<compile_context>
chip_gen: v7x
topology: tpu7x:2x2x1
jax: 0.10.0
libtpu: 0.0.40
codegen_flags: <defaults>
</compile_context>

<pallas_src>
import functools
import math

import jax
import jax.numpy as jnp
from jax import lax
from jax.experimental import pallas as pl
from jax.experimental.pallas import tpu as pltpu


def _round_up(x, m):
    return ((x + m - 1) // m) * m


# ---------------------------------------------------------------------------
# Kernels
# ---------------------------------------------------------------------------

def _tap_conv_kernel(x_ref, w_ref, b_ref, o_ref, *, offsets, n_out):
    """Shifted-tap conv + bias + ReLU for one image.

    x_ref: (1, Nin, Cs)  bf16  flattened zero-padded image (one per grid step)
    w_ref: (K, Cs, Cout) bf16  VMEM-resident across the grid (constant index_map)
    b_ref: (1, Cout)     f32   VMEM-resident
    o_ref: (1, P, Cout)  bf16

    Output flat pixel p is sum_k x[p + offsets[k]] @ W[k]; offsets are static
    Python ints, so every tap is a static 2-D slice of the resident input tile
    (no im2col tensors ever hit HBM).  f32 MXU accumulation, bias + ReLU fused.
    """
    o0 = offsets[0]
    acc = jnp.dot(x_ref[0, o0:o0 + n_out, :], w_ref[0],
                  preferred_element_type=jnp.float32)
    for k in range(1, len(offsets)):          # static unroll, K in {1, 4, 9}
        o = offsets[k]
        acc = acc + jnp.dot(x_ref[0, o:o + n_out, :], w_ref[k],
                            preferred_element_type=jnp.float32)
    o_ref[0] = jnp.maximum(acc + b_ref[...], 0.0).astype(o_ref.dtype)


def _head_kernel(x_ref, w_ref, b_ref, o_ref, *, inv_s):
    """class_conv (1x1) + ReLU + global average pool for one image.

    x_ref: (1, S, C) bf16, w_ref: (C, n_cls) bf16, b_ref: (1, n_cls) f32,
    o_ref: (1, 1, n_cls) f32.  Mean over S done in-kernel (no pooling matrix).
    """
    h = jnp.dot(x_ref[0], w_ref[...], preferred_element_type=jnp.float32)
    h = jnp.maximum(h + b_ref[...], 0.0)
    o_ref[0] = jnp.sum(h, axis=0, keepdims=True) * inv_s


# ---------------------------------------------------------------------------
# Generic layer caller
# ---------------------------------------------------------------------------

def _tap_conv_call(x_flat, w_k, b, offsets, n_out):
    """x_flat: (B, Nin, Cs) bf16, w_k: (K, Cs, Cout) bf16, b: (Cout,) f32."""
    B, Nin, Cs = x_flat.shape
    K, _, Cout = w_k.shape
    kern = functools.partial(_tap_conv_kernel,
                             offsets=tuple(int(o) for o in offsets),
                             n_out=int(n_out))
    return pl.pallas_call(
        kern,
        out_shape=jax.ShapeDtypeStruct((B, n_out, Cout), jnp.bfloat16),
        grid=(B,),
        in_specs=[
            pl.BlockSpec((1, Nin, Cs), lambda i: (i, 0, 0)),
            pl.BlockSpec((K, Cs, Cout), lambda i: (0, 0, 0)),   # weights resident
            pl.BlockSpec((1, Cout), lambda i: (0, 0)),          # bias resident
        ],
        out_specs=pl.BlockSpec((1, n_out, Cout), lambda i: (i, 0, 0)),
        compiler_params=pltpu.CompilerParams(
            dimension_semantics=("parallel",)),
    )(x_flat, w_k, b.reshape(1, Cout).astype(jnp.float32))


# ---------------------------------------------------------------------------
# Layer wrappers (pure layout plumbing only: pad / reshape / slice)
# ---------------------------------------------------------------------------

def conv3x3_s1(x_nhwc, w_hwio, b):
    """3x3, pad=1, stride 1 conv + bias + ReLU (9 in-kernel taps)."""
    B, H, W, Cin = x_nhwc.shape
    Cout = w_hwio.shape[-1]
    Ws = W + 2                                   # padded row length
    P = H * Ws                                   # flat outputs (cols >= W are garbage)
    offsets = [dy * Ws + dx for dy in range(3) for dx in range(3)]
    nin = _round_up(P + offsets[-1], 8)

    xp = jnp.pad(x_nhwc, ((0, 0), (1, 1), (1, 1), (0, 0))).astype(jnp.bfloat16)
    xf = xp.reshape(B, (H + 2) * Ws, Cin)
    xf = jnp.pad(xf, ((0, 0), (0, nin - xf.shape[1]), (0, 0)))
    w_k = w_hwio.reshape(9, Cin, Cout).astype(jnp.bfloat16)

    y = _tap_conv_call(xf, w_k, b, offsets, P)
    return y.reshape(B, H, Ws, Cout)[:, :, :W, :]


def conv3x3_s2(x_nhwc, w_hwio, b):
    """3x3, pad=1, stride 2 conv + bias + ReLU.

    Rewritten as a stride-1 2x2 conv on a space-to-depth input: 4 in-kernel taps
    with contraction 4*Cin (weights zero-padded for the 7/16 unused positions),
    so no strided in-kernel access and deep MXU passes.
    """
    B, H, W, Cin = x_nhwc.shape
    Cout = w_hwio.shape[-1]
    Hp2, Wp2 = _round_up(H + 2, 2), _round_up(W + 2, 2)
    xp = jnp.pad(x_nhwc, ((0, 0), (1, Hp2 - H - 1), (1, Wp2 - W - 1), (0, 0)))
    Hs, Ws = Hp2 // 2, Wp2 // 2
    # space-to-depth, channel order (py, px, ci)
    xs = xp.reshape(B, Hs, 2, Ws, 2, Cin).transpose(0, 1, 3, 2, 4, 5)
    xs = xs.reshape(B, Hs, Ws, 4 * Cin).astype(jnp.bfloat16)

    Ho = (H + 2 - 3) // 2 + 1
    Wo = (W + 2 - 3) // 2 + 1
    P = Ho * Ws
    offsets = [0, 1, Ws, Ws + 1]                 # 2x2 taps in s2d space
    nin = _round_up(P + offsets[-1], 8)
    xf = xs.reshape(B, Hs * Ws, 4 * Cin)
    xf = jnp.pad(xf, ((0, 0), (0, nin - xf.shape[1]), (0, 0)))

    # W2[dY, dX, py, px, ci, co] = W[2*dY+py, 2*dX+px, ci, co] (0 where index > 2)
    w2 = jnp.zeros((2, 2, 2, 2, Cin, Cout), w_hwio.dtype)
    for dy in range(3):
        for dx in range(3):
            dY, py = divmod(dy, 2)
            dX, px = divmod(dx, 2)
            w2 = w2.at[dY, dX, py, px].set(w_hwio[dy, dx])
    w_k = w2.reshape(4, 4 * Cin, Cout).astype(jnp.bfloat16)

    y = _tap_conv_call(xf, w_k, b, offsets, P)
    return y.reshape(B, Ho, Ws, Cout)[:, :, :Wo, :]


def conv3x3_s1_smallcin(x_nhwc, w_hwio, b):
    """conv1: Cin is tiny (3) -> fold the 3x3 taps into channels in the wrapper
    so the kernel runs one (N, 9*Cin) x (9*Cin, Cout) matmul (contraction 27)."""
    B, H, W, Cin = x_nhwc.shape
    Cout = w_hwio.shape[-1]
    xp = jnp.pad(x_nhwc, ((0, 0), (1, 1), (1, 1), (0, 0)))
    patches = jnp.concatenate(
        [xp[:, dy:dy + H, dx:dx + W, :] for dy in range(3) for dx in range(3)],
        axis=-1)                                       # (B, H, W, 9*Cin)
    xf = patches.reshape(B, H * W, 9 * Cin).astype(jnp.bfloat16)
    w_k = w_hwio.reshape(1, 9 * Cin, Cout).astype(jnp.bfloat16)
    y = _tap_conv_call(xf, w_k, b, [0], H * W)
    return y.reshape(B, H, W, Cout)


def conv1x1(x_nhwc, w_hwio, b):
    """1x1 conv + bias + ReLU (single tap, no padding)."""
    B, H, W, Cin = x_nhwc.shape
    Cout = w_hwio.shape[-1]
    xf = x_nhwc.reshape(B, H * W, Cin).astype(jnp.bfloat16)
    w_k = w_hwio.reshape(1, Cin, Cout).astype(jnp.bfloat16)
    y = _tap_conv_call(xf, w_k, b, [0], H * W)
    return y.reshape(B, H, W, Cout)


def head_pallas(x_nhwc, w_hwio, b):
    """class_conv (1x1) + ReLU + adaptive_avg_pool2d(1) + squeeze, per-image grid."""
    B, H, W, C = x_nhwc.shape
    n_cls = w_hwio.shape[-1]
    S = H * W
    xf = x_nhwc.reshape(B, S, C).astype(jnp.bfloat16)
    w2 = w_hwio.reshape(C, n_cls).astype(jnp.bfloat16)
    b2 = b.reshape(1, n_cls).astype(jnp.float32)
    kern = functools.partial(_head_kernel, inv_s=1.0 / float(S))
    out = pl.pallas_call(
        kern,
        out_shape=jax.ShapeDtypeStruct((B, 1, n_cls), jnp.float32),
        grid=(B,),
        in_specs=[
            pl.BlockSpec((1, S, C), lambda i: (i, 0, 0)),
            pl.BlockSpec((C, n_cls), lambda i: (0, 0)),
            pl.BlockSpec((1, n_cls), lambda i: (0, 0)),
        ],
        out_specs=pl.BlockSpec((1, 1, n_cls), lambda i: (i, 0, 0)),
        compiler_params=pltpu.CompilerParams(
            dimension_semantics=("parallel",)),
    )(xf, w2, b2)
    return out.reshape(B, n_cls)


# ---------------------------------------------------------------------------
# Model forward
# ---------------------------------------------------------------------------

def model_c_forward(x_nchw, params):
    """Forward pass of modelC (eval mode: dropout = identity)."""
    x = jnp.transpose(x_nchw, (0, 2, 3, 1))        # NCHW -> NHWC (lane-dense C)
    # TODO(synk): F.dropout(x, 0.2) / F.dropout(., 0.5) implemented as identity.
    (w1, b1), (w2, b2), (w3, b3), (w4, b4), (w5, b5), \
        (w6, b6), (w7, b7), (w8, b8), (wc, bc) = params
    x = conv3x3_s1_smallcin(x, w1, b1)             # conv1 (Cin=3 special case)
    x = conv3x3_s1(x, w2, b2)                      # conv2
    x = conv3x3_s2(x, w3, b3)                      # conv3 (stride 2)
    x = conv3x3_s1(x, w4, b4)                      # conv4
    x = conv3x3_s1(x, w5, b5)                      # conv5
    x = conv3x3_s2(x, w6, b6)                      # conv6 (stride 2)
    x = conv3x3_s1(x, w7, b7)                      # conv7
    x = conv1x1(x, w8, b8)                         # conv8 (1x1)
    return head_pallas(x, wc, bc)                  # class_conv + ReLU + GAP


# ---------------------------------------------------------------------------
# Params (PyTorch Conv2d default init, weights stored HWIO / bf16, bias f32)
# ---------------------------------------------------------------------------

def init_params(key, input_size, n_classes=10):
    cfg = [  # (KH, KW, Cin, Cout): conv1..conv8, class_conv
        (3, 3, input_size, 96), (3, 3, 96, 96), (3, 3, 96, 96),
        (3, 3, 96, 192), (3, 3, 192, 192), (3, 3, 192, 192),
        (3, 3, 192, 192), (1, 1, 192, 192), (1, 1, 192, n_classes),
    ]
    params = []
    for k, (kh, kw, cin, cout) in zip(jax.random.split(key, len(cfg)), cfg):
        kw_key, kb_key = jax.random.split(k)
        bound = 1.0 / math.sqrt(cin * kh * kw)
        w = jax.random.uniform(kw_key, (kh, kw, cin, cout), jnp.float32, -bound, bound)
        b = jax.random.uniform(kb_key, (cout,), jnp.float32, -bound, bound)
        params.append((w.astype(jnp.bfloat16), b))
    return params


# ---------------------------------------------------------------------------
# Pure-JAX reference (same bf16 cast points, f32 accumulation)
# ---------------------------------------------------------------------------

def ref_forward(x_nchw, params):
    dn = ("NHWC", "HWIO", "NHWC")

    def conv(x, w, b, stride):
        pad = (w.shape[0] - 1) // 2
        y = lax.conv_general_dilated(
            x.astype(jnp.bfloat16), w.astype(jnp.bfloat16),
            window_strides=(stride, stride),
            padding=((pad, pad), (pad, pad)),
            dimension_numbers=dn,
            preferred_element_type=jnp.float32)
        return jnp.maximum(y + b.reshape(1, 1, 1, -1), 0.0)

    x = jnp.transpose(x_nchw, (0, 2, 3, 1))
    strides = (1, 1, 2, 1, 1, 2, 1, 1)
    for (w, b), s in zip(params[:8], strides):
        x = conv(x, w, b, s).astype(jnp.bfloat16)
    wc, bc = params[8]
    y = conv(x, wc, bc, 1)                          # class_conv + ReLU (f32)
    return jnp.mean(y, axis=(1, 2))                 # adaptive_avg_pool2d(1) + squeeze


# ---------------------------------------------------------------------------
# Self-test
# ---------------------------------------------------------------------------

if __name__ == "__main__":
    B, C_in, H, W = 2, 3, 16, 16     # small CIFAR-like shapes
    n_classes = 10

    key = jax.random.PRNGKey(0)
    kx, kp = jax.random.split(key)
    x = jax.random.normal(kx, (B, C_in, H, W), jnp.float32)
    params = init_params(kp, C_in, n_classes)

    fwd = jax.jit(model_c_forward)
    out = jax.block_until_ready(fwd(x, params))

    ref = ref_forward(x, params)
    assert out.shape == (B, n_classes)
    assert bool(jnp.all(jnp.isfinite(out)))
    # bf16 operands / f32 accumulation on both sides -> loose-ish tolerance.
    assert jnp.allclose(out, ref, rtol=5e-2, atol=5e-3), (out, ref)

    print("KERNEL_OK")
</pallas_src>

<mosaic_0001>
module attributes {stable_mosaic.version = 11 : i64} {
  func.func @_tap_conv_kernel(%arg0: i32, %arg1: memref<1x256x27xbf16, #tpu.memory_space<vmem>>, %arg2: memref<1x27x96xbf16, #tpu.memory_space<vmem>>, %arg3: memref<1x96xf32, #tpu.memory_space<vmem>>, %arg4: memref<1x256x96xbf16, #tpu.memory_space<vmem>>) attributes {dimension_semantics = [#tpu.dimension_semantics<parallel>], iteration_bounds = array<i64: 2>, scalar_prefetch = 0 : i64, scratch_operands = 0 : i64, tpu.core_type = #tpu.core_type<tc>, window_params = [{transform_indices = @transform_0, window_bounds = array<i64: 1, 256, 27>}, {pipeline_mode = #tpu.pipeline_mode<synchronous>, transform_indices = @transform_1, window_bounds = array<i64: 1, 27, 96>}, {pipeline_mode = #tpu.pipeline_mode<synchronous>, transform_indices = @transform_2, window_bounds = array<i64: 1, 96>}, {transform_indices = @transform_3, window_bounds = array<i64: 1, 256, 96>}]} {
    %c0 = arith.constant 0 : index
    %c0_0 = arith.constant 0 : index
    %c0_1 = arith.constant 0 : index
    %0 = vector.load %arg1[%c0, %c0_0, %c0_1] : memref<1x256x27xbf16, #tpu.memory_space<vmem>>, vector<1x256x27xbf16>
    %1 = vector.shape_cast %0 : vector<1x256x27xbf16> to vector<256x27xbf16>
    %c0_2 = arith.constant 0 : index
    %c0_3 = arith.constant 0 : index
    %c0_4 = arith.constant 0 : index
    %2 = vector.load %arg2[%c0_2, %c0_3, %c0_4] : memref<1x27x96xbf16, #tpu.memory_space<vmem>>, vector<1x27x96xbf16>
    %3 = vector.shape_cast %2 : vector<1x27x96xbf16> to vector<27x96xbf16>
    %cst = arith.constant dense<0.000000e+00> : vector<256x96xf32>
    %4 = tpu.matmul %1, %3, %cst {dimension_numbers = #tpu.dot_dimension_numbers<[1], [0], [0], [1], [0, 0, 1, 1], [], []>} : vector<256x27xbf16>, vector<27x96xbf16>, vector<256x96xf32> -> vector<256x96xf32>
    %c0_5 = arith.constant 0 : index
    %c0_6 = arith.constant 0 : index
    %5 = vector.load %arg3[%c0_5, %c0_6] : memref<1x96xf32, #tpu.memory_space<vmem>>, vector<1x96xf32>
    %6 = vector.broadcast %5 : vector<1x96xf32> to vector<256x96xf32>
    %7 = arith.addf %4, %6 : vector<256x96xf32>
    %cst_7 = arith.constant 0.000000e+00 : f32
    %8 = vector.broadcast %cst_7 : f32 to vector<256x96xf32>
    %9 = arith.maximumf %7, %8 : vector<256x96xf32>
    %10 = arith.truncf %9 : vector<256x96xf32> to vector<256x96xbf16>
    %c0_8 = arith.constant 0 : index
    %c0_9 = arith.constant 0 : index
    %c0_10 = arith.constant 0 : index
    %11 = vector.load %arg4[%c0_8, %c0_9, %c0_10] : memref<1x256x96xbf16, #tpu.memory_space<vmem>>, vector<1x256x96xbf16>
    %12 = vector.shape_cast %11 : vector<1x256x96xbf16> to vector<256x96xbf16>
    %13 = vector.shape_cast %10 : vector<256x96xbf16> to vector<1x256x96xbf16>
    tpu.vector_store %arg4[%c0_8, %c0_9, %c0_10], %13 {strides = array<i32>} : memref<1x256x96xbf16, #tpu.memory_space<vmem>>, vector<1x256x96xbf16>,
    return
  }
  func.func @transform_0(%arg0: i32) -> (i32, i32, i32) {
    %c0_i32 = arith.constant 0 : i32
    %c0_i32_0 = arith.constant 0 : i32
    %c0_i32_1 = arith.constant 0 : i32
    return %arg0, %c0_i32, %c0_i32_0 : i32, i32, i32
  }
  func.func @transform_1(%arg0: i32) -> (i32, i32, i32) {
    %c0_i32 = arith.constant 0 : i32
    %c0_i32_0 = arith.constant 0 : i32
    %c0_i32_1 = arith.constant 0 : i32
    %c0_i32_2 = arith.constant 0 : i32
    return %c0_i32, %c0_i32_0, %c0_i32_1 : i32, i32, i32
  }
  func.func @transform_2(%arg0: i32) -> (i32, i32) {
    %c0_i32 = arith.constant 0 : i32
    %c0_i32_0 = arith.constant 0 : i32
    %c0_i32_1 = arith.constant 0 : i32
    return %c0_i32, %c0_i32_0 : i32, i32
  }
  func.func @transform_3(%arg0: i32) -> (i32, i32, i32) {
    %c0_i32 = arith.constant 0 : i32
    %c0_i32_0 = arith.constant 0 : i32
    %c0_i32_1 = arith.constant 0 : i32
    return %arg0, %c0_i32, %c0_i32_0 : i32, i32, i32
  }
}

module attributes {stable_mosaic.version = 11 : i64} {
  func.func @_tap_conv_kernel(%arg0: i32, %arg1: memref<1x328x96xbf16, #tpu.memory_space<vmem>>, %arg2: memref<9x96x96xbf16, #tpu.memory_space<vmem>>, %arg3: memref<1x96xf32, #tpu.memory_space<vmem>>, %arg4: memref<1x288x96xbf16, #tpu.memory_space<vmem>>) attributes {dimension_semantics = [#tpu.dimension_semantics<parallel>], iteration_bounds = array<i64: 2>, scalar_prefetch = 0 : i64, scratch_operands = 0 : i64, tpu.core_type = #tpu.core_type<tc>, window_params = [{transform_indices = @transform_0, window_bounds = array<i64: 1, 328, 96>}, {pipeline_mode = #tpu.pipeline_mode<synchronous>, transform_indices = @transform_1, window_bounds = array<i64: 9, 96, 96>}, {pipeline_mode = #tpu.pipeline_mode<synchronous>, transform_indices = @transform_2, window_bounds = array<i64: 1, 96>}, {transform_indices = @transform_3, window_bounds = array<i64: 1, 288, 96>}]} {
    %c0 = arith.constant 0 : index
    %c0_0 = arith.constant 0 : index
    %c0_1 = arith.constant 0 : index
    %0 = vector.load %arg1[%c0, %c0_0, %c0_1] : memref<1x328x96xbf16, #tpu.memory_space<vmem>>, vector<1x288x96xbf16>
    %1 = vector.shape_cast %0 : vector<1x288x96xbf16> to vector<288x96xbf16>
    %c0_2 = arith.constant 0 : index
    %c0_3 = arith.constant 0 : index
    %c0_4 = arith.constant 0 : index
    %2 = vector.load %arg2[%c0_2, %c0_3, %c0_4] : memref<9x96x96xbf16, #tpu.memory_space<vmem>>, vector<1x96x96xbf16>
    %3 = vector.shape_cast %2 : vector<1x96x96xbf16> to vector<96x96xbf16>
    %cst = arith.constant dense<0.000000e+00> : vector<288x96xf32>
    %4 = tpu.matmul %1, %3, %cst {dimension_numbers = #tpu.dot_dimension_numbers<[1], [0], [0], [1], [0, 0, 1, 1], [], []>} : vector<288x96xbf16>, vector<96x96xbf16>, vector<288x96xf32> -> vector<288x96xf32>
    %c0_5 = arith.constant 0 : index
    %c1 = arith.constant 1 : index
    %c0_6 = arith.constant 0 : index
    %5 = vector.load %arg1[%c0_5, %c1, %c0_6] : memref<1x328x96xbf16, #tpu.memory_space<vmem>>, vector<1x288x96xbf16>
    %6 = vector.shape_cast %5 : vector<1x288x96xbf16> to vector<288x96xbf16>
    %c1_7 = arith.constant 1 : index
    %c0_8 = arith.constant 0 : index
    %c0_9 = arith.constant 0 : index
    %7 = vector.load %arg2[%c1_7, %c0_8, %c0_9] : memref<9x96x96xbf16, #tpu.memory_space<vmem>>, vector<1x96x96xbf16>
    %8 = vector.shape_cast %7 : vector<1x96x96xbf16> to vector<96x96xbf16>
    %cst_10 = arith.constant dense<0.000000e+00> : vector<288x96xf32>
    %9 = tpu.matmul %6, %8, %cst_10 {dimension_numbers = #tpu.dot_dimension_numbers<[1], [0], [0], [1], [0, 0, 1, 1], [], []>} : vector<288x96xbf16>, vector<96x96xbf16>, vector<288x96xf32> -> vector<288x96xf32>
    %10 = arith.addf %4, %9 : vector<288x96xf32>
    %c0_11 = arith.constant 0 : index
    %c2 = arith.constant 2 : index
    %c0_12 = arith.constant 0 : index
    %11 = vector.load %arg1[%c0_11, %c2, %c0_12] : memref<1x328x96xbf16, #tpu.memory_space<vmem>>, vector<1x288x96xbf16>
    %12 = vector.shape_cast %11 : vector<1x288x96xbf16> to vector<288x96xbf16>
    %c2_13 = arith.constant 2 : index
    %c0_14 = arith.constant 0 : index
    %c0_15 = arith.constant 0 : index
    %13 = vector.load %arg2[%c2_13, %c0_14, %c0_15] : memref<9x96x96xbf16, #tpu.memory_space<vmem>>, vector<1x96x96xbf16>
    %14 = vector.shape_cast %13 : vector<1x96x96xbf16> to vector<96x96xbf16>
    %cst_16 = arith.constant dense<0.000000e+00> : vector<288x96xf32>
    %15 = tpu.matmul %12, %14, %cst_16 {dimension_numbers = #tpu.dot_dimension_numbers<[1], [0], [0], [1], [0, 0, 1, 1], [], []>} : vector<288x96xbf16>, vector<96x96xbf16>, vector<288x96xf32> -> vector<288x96xf32>
    %16 = arith.addf %10, %15 : vector<288x96xf32>
    %c0_17 = arith.constant 0 : index
    %c18 = arith.constant 18 : index
    %c0_18 = arith.constant 0 : index
    %17 = vector.load %arg1[%c0_17, %c18, %c0_18] : memref<1x328x96xbf16, #tpu.memory_space<vmem>>, vector<1x288x96xbf16>
    %18 = vector.shape_cast %17 : vector<1x288x96xbf16> to vector<288x96xbf16>
    %c3 = arith.constant 3 : index
    %c0_19 = arith.constant 0 : index
    %c0_20 = arith.constant 0 : index
    %19 = vector.load %arg2[%c3, %c0_19, %c0_20] : memref<9x96x96xbf16, #tpu.memory_space<vmem>>, vector<1x96x96xbf16>
    %20 = vector.shape_cast %19 : vector<1x96x96xbf16> to vector<96x96xbf16>
    %cst_21 = arith.constant dense<0.000000e+00> : vector<288x96xf32>
    %21 = tpu.matmul %18, %20, %cst_21 {dimension_numbers = #tpu.dot_dimension_numbers<[1], [0], [0], [1], [0, 0, 1, 1], [], []>} : vector<288x96xbf16>, vector<96x96xbf16>, vector<288x96xf32> -> vector<288x96xf32>
    %22 = arith.addf %16, %21 : vector<288x96xf32>
    %c0_22 = arith.constant 0 : index
    %c19 = arith.constant 19 : index
    %c0_23 = arith.constant 0 : index
    %23 = vector.load %arg1[%c0_22, %c19, %c0_23] : memref<1x328x96xbf16, #tpu.memory_space<vmem>>, vector<1x288x96xbf16>
    %24 = vector.shape_cast %23 : vector<1x288x96xbf16> to vector<288x96xbf16>
    %c4 = arith.constant 4 : index
    %c0_24 = arith.constant 0 : index
    %c0_25 = arith.constant 0 : index
    %25 = vector.load %arg2[%c4, %c0_24, %c0_25] : memref<9x96x96xbf16, #tpu.memory_space<vmem>>, vector<1x96x96xbf16>
    %26 = vector.shape_cast %25 : vector<1x96x96xbf16> to vector<96x96xbf16>
    %cst_26 = arith.constant dense<0.000000e+00> : vector<288x96xf32>
    %27 = tpu.matmul %24, %26, %cst_26 {dimension_numbers = #tpu.dot_dimension_numbers<[1], [0], [0], [1], [0, 0, 1, 1], [], []>} : vector<288x96xbf16>, vector<96x96xbf16>, vector<288x96xf32> -> vector<288x96xf32>
    %28 = arith.addf %22, %27 : vector<288x96xf32>
    %c0_27 = arith.constant 0 : index
    %c20 = arith.constant 20 : index
    %c0_28 = arith.constant 0 : index
    %29 = vector.load %arg1[%c0_27, %c20, %c0_28] : memref<1x328x96xbf16, #tpu.memory_space<vmem>>, vector<1x288x96xbf16>
    %30 = vector.shape_cast %29 : vector<1x288x96xbf16> to vector<288x96xbf16>
    %c5 = arith.constant 5 : index
    %c0_29 = arith.constant 0 : index
    %c0_30 = arith.constant 0 : index
    %31 = vector.load %arg2[%c5, %c0_29, %c0_30] : memref<9x96x96xbf16, #tpu.memory_space<vmem>>, vector<1x96x96xbf16>
    %32 = vector.shape_cast %31 : vector<1x96x96xbf16> to vector<96x96xbf16>
    %cst_31 = arith.constant dense<0.000000e+00> : vector<288x96xf32>
    %33 = tpu.matmul %30, %32, %cst_31 {dimension_numbers = #tpu.dot_dimension_numbers<[1], [0], [0], [1], [0, 0, 1, 1], [], []>} : vector<288x96xbf16>, vector<96x96xbf16>, vector<288x96xf32> -> vector<288x96xf32>
    %34 = arith.addf %28, %33 : vector<288x96xf32>
    %c0_32 = arith.constant 0 : index
    %c36 = arith.constant 36 : index
    %c0_33 = arith.constant 0 : index
    %35 = vector.load %arg1[%c0_32, %c36, %c0_33] : memref<1x328x96xbf16, #tpu.memory_space<vmem>>, vector<1x288x96xbf16>
    %36 = vector.shape_cast %35 : vector<1x288x96xbf16> to vector<288x96xbf16>
    %c6 = arith.constant 6 : index
    %c0_34 = arith.constant 0 : index
    %c0_35 = arith.constant 0 : index
    %37 = vector.load %arg2[%c6, %c0_34, %c0_35] : memref<9x96x96xbf16, #tpu.memory_space<vmem>>, vector<1x96x96xbf16>
    %38 = vector.shape_cast %37 : vector<1x96x96xbf16> to vector<96x96xbf16>
    %cst_36 = arith.constant dense<0.000000e+00> : vector<288x96xf32>
    %39 = tpu.matmul %36, %38, %cst_36 {dimension_numbers = #tpu.dot_dimension_numbers<[1], [0], [0], [1], [0, 0, 1, 1], [], []>} : vector<288x96xbf16>, vector<96x96xbf16>, vector<288x96xf32> -> vector<288x96xf32>
    %40 = arith.addf %34, %39 : vector<288x96xf32>
    %c0_37 = arith.constant 0 : index
    %c37 = arith.constant 37 : index
    %c0_38 = arith.constant 0 : index
    %41 = vector.load %arg1[%c0_37, %c37, %c0_38] : memref<1x328x96xbf16, #tpu.memory_space<vmem>>, vector<1x288x96xbf16>
    %42 = vector.shape_cast %41 : vector<1x288x96xbf16> to vector<288x96xbf16>
    %c7 = arith.constant 7 : index
    %c0_39 = arith.constant 0 : index
    %c0_40 = arith.constant 0 : index
    %43 = vector.load %arg2[%c7, %c0_39, %c0_40] : memref<9x96x96xbf16, #tpu.memory_space<vmem>>, vector<1x96x96xbf16>
    %44 = vector.shape_cast %43 : vector<1x96x96xbf16> to vector<96x96xbf16>
    %cst_41 = arith.constant dense<0.000000e+00> : vector<288x96xf32>
    %45 = tpu.matmul %42, %44, %cst_41 {dimension_numbers = #tpu.dot_dimension_numbers<[1], [0], [0], [1], [0, 0, 1, 1], [], []>} : vector<288x96xbf16>, vector<96x96xbf16>, vector<288x96xf32> -> vector<288x96xf32>
    %46 = arith.addf %40, %45 : vector<288x96xf32>
    %c0_42 = arith.constant 0 : index
    %c38 = arith.constant 38 : index
    %c0_43 = arith.constant 0 : index
    %47 = vector.load %arg1[%c0_42, %c38, %c0_43] : memref<1x328x96xbf16, #tpu.memory_space<vmem>>, vector<1x288x96xbf16>
    %48 = vector.shape_cast %47 : vector<1x288x96xbf16> to vector<288x96xbf16>
    %c8 = arith.constant 8 : index
    %c0_44 = arith.constant 0 : index
    %c0_45 = arith.constant 0 : index
    %49 = vector.load %arg2[%c8, %c0_44, %c0_45] : memref<9x96x96xbf16, #tpu.memory_space<vmem>>, vector<1x96x96xbf16>
    %50 = vector.shape_cast %49 : vector<1x96x96xbf16> to vector<96x96xbf16>
    %cst_46 = arith.constant dense<0.000000e+00> : vector<288x96xf32>
    %51 = tpu.matmul %48, %50, %cst_46 {dimension_numbers = #tpu.dot_dimension_numbers<[1], [0], [0], [1], [0, 0, 1, 1], [], []>} : vector<288x96xbf16>, vector<96x96xbf16>, vector<288x96xf32> -> vector<288x96xf32>
    %52 = arith.addf %46, %51 : vector<288x96xf32>
    %c0_47 = arith.constant 0 : index
    %c0_48 = arith.constant 0 : index
    %53 = vector.load %arg3[%c0_47, %c0_48] : memref<1x96xf32, #tpu.memory_space<vmem>>, vector<1x96xf32>
    %54 = vector.broadcast %53 : vector<1x96xf32> to vector<288x96xf32>
    %55 = arith.addf %52, %54 : vector<288x96xf32>
    %cst_49 = arith.constant 0.000000e+00 : f32
    %56 = vector.broadcast %cst_49 : f32 to vector<288x96xf32>
    %57 = arith.maximumf %55, %56 : vector<288x96xf32>
    %58 = arith.truncf %57 : vector<288x96xf32> to vector<288x96xbf16>
    %c0_50 = arith.constant 0 : index
    %c0_51 = arith.constant 0 : index
    %c0_52 = arith.constant 0 : index
    %59 = vector.load %arg4[%c0_50, %c0_51, %c0_52] : memref<1x288x96xbf16, #tpu.memory_space<vmem>>, vector<1x288x96xbf16>
    %60 = vector.shape_cast %59 : vector<1x288x96xbf16> to vector<288x96xbf16>
    %61 = vector.shape_cast %58 : vector<288x96xbf16> to vector<1x288x96xbf16>
    tpu.vector_store %arg4[%c0_50, %c0_51, %c0_52], %61 {strides = array<i32>} : memref<1x288x96xbf16, #tpu.memory_space<vmem>>, vector<1x288x96xbf16>,
    return
  }
  func.func @transform_0(%arg0: i32) -> (i32, i32, i32) {
    %c0_i32 = arith.constant 0 : i32
    %c0_i32_0 = arith.constant 0 : i32
    %c0_i32_1 = arith.constant 0 : i32
    return %arg0, %c0_i32, %c0_i32_0 : i32, i32, i32
  }
  func.func @transform_1(%arg0: i32) -> (i32, i32, i32) {
    %c0_i32 = arith.constant 0 : i32
    %c0_i32_0 = arith.constant 0 : i32
    %c0_i32_1 = arith.constant 0 : i32
    %c0_i32_2 = arith.constant 0 : i32
    return %c0_i32, %c0_i32_0, %c0_i32_1 : i32, i32, i32
  }
  func.func @transform_2(%arg0: i32) -> (i32, i32) {
    %c0_i32 = arith.constant 0 : i32
    %c0_i32_0 = arith.constant 0 : i32
    %c0_i32_1 = arith.constant 0 : i32
    return %c0_i32, %c0_i32_0 : i32, i32
  }
  func.func @transform_3(%arg0: i32) -> (i32, i32, i32) {
    %c0_i32 = arith.constant 0 : i32
    %c0_i32_0 = arith.constant 0 : i32
    %c0_i32_1 = arith.constant 0 : i32
    return %arg0, %c0_i32, %c0_i32_0 : i32, i32, i32
  }
}

module attributes {stable_mosaic.version = 11 : i64} {
  func.func @_tap_conv_kernel(%arg0: i32, %arg1: memref<1x88x384xbf16, #tpu.memory_space<vmem>>, %arg2: memref<4x384x96xbf16, #tpu.memory_space<vmem>>, %arg3: memref<1x96xf32, #tpu.memory_space<vmem>>, %arg4: memref<1x72x96xbf16, #tpu.memory_space<vmem>>) attributes {dimension_semantics = [#tpu.dimension_semantics<parallel>], iteration_bounds = array<i64: 2>, scalar_prefetch = 0 : i64, scratch_operands = 0 : i64, tpu.core_type = #tpu.core_type<tc>, window_params = [{transform_indices = @transform_0, window_bounds = array<i64: 1, 88, 384>}, {pipeline_mode = #tpu.pipeline_mode<synchronous>, transform_indices = @transform_1, window_bounds = array<i64: 4, 384, 96>}, {pipeline_mode = #tpu.pipeline_mode<synchronous>, transform_indices = @transform_2, window_bounds = array<i64: 1, 96>}, {transform_indices = @transform_3, window_bounds = array<i64: 1, 72, 96>}]} {
    %c0 = arith.constant 0 : index
    %c0_0 = arith.constant 0 : index
    %c0_1 = arith.constant 0 : index
    %0 = vector.load %arg1[%c0, %c0_0, %c0_1] : memref<1x88x384xbf16, #tpu.memory_space<vmem>>, vector<1x72x384xbf16>
    %1 = vector.shape_cast %0 : vector<1x72x384xbf16> to vector<72x384xbf16>
    %c0_2 = arith.constant 0 : index
    %c0_3 = arith.constant 0 : index
    %c0_4 = arith.constant 0 : index
    %2 = vector.load %arg2[%c0_2, %c0_3, %c0_4] : memref<4x384x96xbf16, #tpu.memory_space<vmem>>, vector<1x384x96xbf16>
    %3 = vector.shape_cast %2 : vector<1x384x96xbf16> to vector<384x96xbf16>
    %cst = arith.constant dense<0.000000e+00> : vector<72x96xf32>
    %4 = tpu.matmul %1, %3, %cst {dimension_numbers = #tpu.dot_dimension_numbers<[1], [0], [0], [1], [0, 0, 1, 1], [], []>} : vector<72x384xbf16>, vector<384x96xbf16>, vector<72x96xf32> -> vector<72x96xf32>
    %c0_5 = arith.constant 0 : index
    %c1 = arith.constant 1 : index
    %c0_6 = arith.constant 0 : index
    %5 = vector.load %arg1[%c0_5, %c1, %c0_6] : memref<1x88x384xbf16, #tpu.memory_space<vmem>>, vector<1x72x384xbf16>
    %6 = vector.shape_cast %5 : vector<1x72x384xbf16> to vector<72x384xbf16>
    %c1_7 = arith.constant 1 : index
    %c0_8 = arith.constant 0 : index
    %c0_9 = arith.constant 0 : index
    %7 = vector.load %arg2[%c1_7, %c0_8, %c0_9] : memref<4x384x96xbf16, #tpu.memory_space<vmem>>, vector<1x384x96xbf16>
    %8 = vector.shape_cast %7 : vector<1x384x96xbf16> to vector<384x96xbf16>
    %cst_10 = arith.constant dense<0.000000e+00> : vector<72x96xf32>
    %9 = tpu.matmul %6, %8, %cst_10 {dimension_numbers = #tpu.dot_dimension_numbers<[1], [0], [0], [1], [0, 0, 1, 1], [], []>} : vector<72x384xbf16>, vector<384x96xbf16>, vector<72x96xf32> -> vector<72x96xf32>
    %10 = arith.addf %4, %9 : vector<72x96xf32>
    %c0_11 = arith.constant 0 : index
    %c9 = arith.constant 9 : index
    %c0_12 = arith.constant 0 : index
    %11 = vector.load %arg1[%c0_11, %c9, %c0_12] : memref<1x88x384xbf16, #tpu.memory_space<vmem>>, vector<1x72x384xbf16>
    %12 = vector.shape_cast %11 : vector<1x72x384xbf16> to vector<72x384xbf16>
    %c2 = arith.constant 2 : index
    %c0_13 = arith.constant 0 : index
    %c0_14 = arith.constant 0 : index
    %13 = vector.load %arg2[%c2, %c0_13, %c0_14] : memref<4x384x96xbf16, #tpu.memory_space<vmem>>, vector<1x384x96xbf16>
    %14 = vector.shape_cast %13 : vector<1x384x96xbf16> to vector<384x96xbf16>
    %cst_15 = arith.constant dense<0.000000e+00> : vector<72x96xf32>
    %15 = tpu.matmul %12, %14, %cst_15 {dimension_numbers = #tpu.dot_dimension_numbers<[1], [0], [0], [1], [0, 0, 1, 1], [], []>} : vector<72x384xbf16>, vector<384x96xbf16>, vector<72x96xf32> -> vector<72x96xf32>
    %16 = arith.addf %10, %15 : vector<72x96xf32>
    %c0_16 = arith.constant 0 : index
    %c10 = arith.constant 10 : index
    %c0_17 = arith.constant 0 : index
    %17 = vector.load %arg1[%c0_16, %c10, %c0_17] : memref<1x88x384xbf16, #tpu.memory_space<vmem>>, vector<1x72x384xbf16>
    %18 = vector.shape_cast %17 : vector<1x72x384xbf16> to vector<72x384xbf16>
    %c3 = arith.constant 3 : index
    %c0_18 = arith.constant 0 : index
    %c0_19 = arith.constant 0 : index
    %19 = vector.load %arg2[%c3, %c0_18, %c0_19] : memref<4x384x96xbf16, #tpu.memory_space<vmem>>, vector<1x384x96xbf16>
    %20 = vector.shape_cast %19 : vector<1x384x96xbf16> to vector<384x96xbf16>
    %cst_20 = arith.constant dense<0.000000e+00> : vector<72x96xf32>
    %21 = tpu.matmul %18, %20, %cst_20 {dimension_numbers = #tpu.dot_dimension_numbers<[1], [0], [0], [1], [0, 0, 1, 1], [], []>} : vector<72x384xbf16>, vector<384x96xbf16>, vector<72x96xf32> -> vector<72x96xf32>
    %22 = arith.addf %16, %21 : vector<72x96xf32>
    %c0_21 = arith.constant 0 : index
    %c0_22 = arith.constant 0 : index
    %23 = vector.load %arg3[%c0_21, %c0_22] : memref<1x96xf32, #tpu.memory_space<vmem>>, vector<1x96xf32>
    %24 = vector.broadcast %23 : vector<1x96xf32> to vector<72x96xf32>
    %25 = arith.addf %22, %24 : vector<72x96xf32>
    %cst_23 = arith.constant 0.000000e+00 : f32
    %26 = vector.broadcast %cst_23 : f32 to vector<72x96xf32>
    %27 = arith.maximumf %25, %26 : vector<72x96xf32>
    %28 = arith.truncf %27 : vector<72x96xf32> to vector<72x96xbf16>
    %c0_24 = arith.constant 0 : index
    %c0_25 = arith.constant 0 : index
    %c0_26 = arith.constant 0 : index
    %29 = vector.load %arg4[%c0_24, %c0_25, %c0_26] : memref<1x72x96xbf16, #tpu.memory_space<vmem>>, vector<1x72x96xbf16>
    %30 = vector.shape_cast %29 : vector<1x72x96xbf16> to vector<72x96xbf16>
    %31 = vector.shape_cast %28 : vector<72x96xbf16> to vector<1x72x96xbf16>
    tpu.vector_store %arg4[%c0_24, %c0_25, %c0_26], %31 {strides = array<i32>} : memref<1x72x96xbf16, #tpu.memory_space<vmem>>, vector<1x72x96xbf16>,
    return
  }
  func.func @transform_0(%arg0: i32) -> (i32, i32, i32) {
    %c0_i32 = arith.constant 0 : i32
    %c0_i32_0 = arith.constant 0 : i32
    %c0_i32_1 = arith.constant 0 : i32
    return %arg0, %c0_i32, %c0_i32_0 : i32, i32, i32
  }
  func.func @transform_1(%arg0: i32) -> (i32, i32, i32) {
    %c0_i32 = arith.constant 0 : i32
    %c0_i32_0 = arith.constant 0 : i32
    %c0_i32_1 = arith.constant 0 : i32
    %c0_i32_2 = arith.constant 0 : i32
    return %c0_i32, %c0_i32_0, %c0_i32_1 : i32, i32, i32
  }
  func.func @transform_2(%arg0: i32) -> (i32, i32) {
    %c0_i32 = arith.constant 0 : i32
    %c0_i32_0 = arith.constant 0 : i32
    %c0_i32_1 = arith.constant 0 : i32
    return %c0_i32, %c0_i32_0 : i32, i32
  }
  func.func @transform_3(%arg0: i32) -> (i32, i32, i32) {
    %c0_i32 = arith.constant 0 : i32
    %c0_i32_0 = arith.constant 0 : i32
    %c0_i32_1 = arith.constant 0 : i32
    return %arg0, %c0_i32, %c0_i32_0 : i32, i32, i32
  }
}

module attributes {stable_mosaic.version = 11 : i64} {
  func.func @_tap_conv_kernel(%arg0: i32, %arg1: memref<1x104x96xbf16, #tpu.memory_space<vmem>>, %arg2: memref<9x96x192xbf16, #tpu.memory_space<vmem>>, %arg3: memref<1x192xf32, #tpu.memory_space<vmem>>, %arg4: memref<1x80x192xbf16, #tpu.memory_space<vmem>>) attributes {dimension_semantics = [#tpu.dimension_semantics<parallel>], iteration_bounds = array<i64: 2>, scalar_prefetch = 0 : i64, scratch_operands = 0 : i64, tpu.core_type = #tpu.core_type<tc>, window_params = [{transform_indices = @transform_0, window_bounds = array<i64: 1, 104, 96>}, {pipeline_mode = #tpu.pipeline_mode<synchronous>, transform_indices = @transform_1, window_bounds = array<i64: 9, 96, 192>}, {pipeline_mode = #tpu.pipeline_mode<synchronous>, transform_indices = @transform_2, window_bounds = array<i64: 1, 192>}, {transform_indices = @transform_3, window_bounds = array<i64: 1, 80, 192>}]} {
    %c0 = arith.constant 0 : index
    %c0_0 = arith.constant 0 : index
    %c0_1 = arith.constant 0 : index
    %0 = vector.load %arg1[%c0, %c0_0, %c0_1] : memref<1x104x96xbf16, #tpu.memory_space<vmem>>, vector<1x80x96xbf16>
    %1 = vector.shape_cast %0 : vector<1x80x96xbf16> to vector<80x96xbf16>
    %c0_2 = arith.constant 0 : index
    %c0_3 = arith.constant 0 : index
    %c0_4 = arith.constant 0 : index
    %2 = vector.load %arg2[%c0_2, %c0_3, %c0_4] : memref<9x96x192xbf16, #tpu.memory_space<vmem>>, vector<1x96x192xbf16>
    %3 = vector.shape_cast %2 : vector<1x96x192xbf16> to vector<96x192xbf16>
    %cst = arith.constant dense<0.000000e+00> : vector<80x192xf32>
    %4 = tpu.matmul %1, %3, %cst {dimension_numbers = #tpu.dot_dimension_numbers<[1], [0], [0], [1], [0, 0, 1, 1], [], []>} : vector<80x96xbf16>, vector<96x192xbf16>, vector<80x192xf32> -> vector<80x192xf32>
    %c0_5 = arith.constant 0 : index
    %c1 = arith.constant 1 : index
    %c0_6 = arith.constant 0 : index
    %5 = vector.load %arg1[%c0_5, %c1, %c0_6] : memref<1x104x96xbf16, #tpu.memory_space<vmem>>, vector<1x80x96xbf16>
    %6 = vector.shape_cast %5 : vector<1x80x96xbf16> to vector<80x96xbf16>
    %c1_7 = arith.constant 1 : index
    %c0_8 = arith.constant 0 : index
    %c0_9 = arith.constant 0 : index
    %7 = vector.load %arg2[%c1_7, %c0_8, %c0_9] : memref<9x96x192xbf16, #tpu.memory_space<vmem>>, vector<1x96x192xbf16>
    %8 = vector.shape_cast %7 : vector<1x96x192xbf16> to vector<96x192xbf16>
    %cst_10 = arith.constant dense<0.000000e+00> : vector<80x192xf32>
    %9 = tpu.matmul %6, %8, %cst_10 {dimension_numbers = #tpu.dot_dimension_numbers<[1], [0], [0], [1], [0, 0, 1, 1], [], []>} : vector<80x96xbf16>, vector<96x192xbf16>, vector<80x192xf32> -> vector<80x192xf32>
    %10 = arith.addf %4, %9 : vector<80x192xf32>
    %c0_11 = arith.constant 0 : index
    %c2 = arith.constant 2 : index
    %c0_12 = arith.constant 0 : index
    %11 = vector.load %arg1[%c0_11, %c2, %c0_12] : memref<1x104x96xbf16, #tpu.memory_space<vmem>>, vector<1x80x96xbf16>
    %12 = vector.shape_cast %11 : vector<1x80x96xbf16> to vector<80x96xbf16>
    %c2_13 = arith.constant 2 : index
    %c0_14 = arith.constant 0 : index
    %c0_15 = arith.constant 0 : index
    %13 = vector.load %arg2[%c2_13, %c0_14, %c0_15] : memref<9x96x192xbf16, #tpu.memory_space<vmem>>, vector<1x96x192xbf16>
    %14 = vector.shape_cast %13 : vector<1x96x192xbf16> to vector<96x192xbf16>
    %cst_16 = arith.constant dense<0.000000e+00> : vector<80x192xf32>
    %15 = tpu.matmul %12, %14, %cst_16 {dimension_numbers = #tpu.dot_dimension_numbers<[1], [0], [0], [1], [0, 0, 1, 1], [], []>} : vector<80x96xbf16>, vector<96x192xbf16>, vector<80x192xf32> -> vector<80x192xf32>
    %16 = arith.addf %10, %15 : vector<80x192xf32>
    %c0_17 = arith.constant 0 : index
    %c10 = arith.constant 10 : index
    %c0_18 = arith.constant 0 : index
    %17 = vector.load %arg1[%c0_17, %c10, %c0_18] : memref<1x104x96xbf16, #tpu.memory_space<vmem>>, vector<1x80x96xbf16>
    %18 = vector.shape_cast %17 : vector<1x80x96xbf16> to vector<80x96xbf16>
    %c3 = arith.constant 3 : index
    %c0_19 = arith.constant 0 : index
    %c0_20 = arith.constant 0 : index
    %19 = vector.load %arg2[%c3, %c0_19, %c0_20] : memref<9x96x192xbf16, #tpu.memory_space<vmem>>, vector<1x96x192xbf16>
    %20 = vector.shape_cast %19 : vector<1x96x192xbf16> to vector<96x192xbf16>
    %cst_21 = arith.constant dense<0.000000e+00> : vector<80x192xf32>
    %21 = tpu.matmul %18, %20, %cst_21 {dimension_numbers = #tpu.dot_dimension_numbers<[1], [0], [0], [1], [0, 0, 1, 1], [], []>} : vector<80x96xbf16>, vector<96x192xbf16>, vector<80x192xf32> -> vector<80x192xf32>
    %22 = arith.addf %16, %21 : vector<80x192xf32>
    %c0_22 = arith.constant 0 : index
    %c11 = arith.constant 11 : index
    %c0_23 = arith.constant 0 : index
    %23 = vector.load %arg1[%c0_22, %c11, %c0_23] : memref<1x104x96xbf16, #tpu.memory_space<vmem>>, vector<1x80x96xbf16>
    %24 = vector.shape_cast %23 : vector<1x80x96xbf16> to vector<80x96xbf16>
    %c4 = arith.constant 4 : index
    %c0_24 = arith.constant 0 : index
    %c0_25 = arith.constant 0 : index
    %25 = vector.load %arg2[%c4, %c0_24, %c0_25] : memref<9x96x192xbf16, #tpu.memory_space<vmem>>, vector<1x96x192xbf16>
    %26 = vector.shape_cast %25 : vector<1x96x192xbf16> to vector<96x192xbf16>
    %cst_26 = arith.constant dense<0.000000e+00> : vector<80x192xf32>
    %27 = tpu.matmul %24, %26, %cst_26 {dimension_numbers = #tpu.dot_dimension_numbers<[1], [0], [0], [1], [0, 0, 1, 1], [], []>} : vector<80x96xbf16>, vector<96x192xbf16>, vector<80x192xf32> -> vector<80x192xf32>
    %28 = arith.addf %22, %27 : vector<80x192xf32>
    %c0_27 = arith.constant 0 : index
    %c12 = arith.constant 12 : index
    %c0_28 = arith.constant 0 : index
    %29 = vector.load %arg1[%c0_27, %c12, %c0_28] : memref<1x104x96xbf16, #tpu.memory_space<vmem>>, vector<1x80x96xbf16>
    %30 = vector.shape_cast %29 : vector<1x80x96xbf16> to vector<80x96xbf16>
    %c5 = arith.constant 5 : index
    %c0_29 = arith.constant 0 : index
    %c0_30 = arith.constant 0 : index
    %31 = vector.load %arg2[%c5, %c0_29, %c0_30] : memref<9x96x192xbf16, #tpu.memory_space<vmem>>, vector<1x96x192xbf16>
    %32 = vector.shape_cast %31 : vector<1x96x192xbf16> to vector<96x192xbf16>
    %cst_31 = arith.constant dense<0.000000e+00> : vector<80x192xf32>
    %33 = tpu.matmul %30, %32, %cst_31 {dimension_numbers = #tpu.dot_dimension_numbers<[1], [0], [0], [1], [0, 0, 1, 1], [], []>} : vector<80x96xbf16>, vector<96x192xbf16>, vector<80x192xf32> -> vector<80x192xf32>
    %34 = arith.addf %28, %33 : vector<80x192xf32>
    %c0_32 = arith.constant 0 : index
    %c20 = arith.constant 20 : index
    %c0_33 = arith.constant 0 : index
    %35 = vector.load %arg1[%c0_32, %c20, %c0_33] : memref<1x104x96xbf16, #tpu.memory_space<vmem>>, vector<1x80x96xbf16>
    %36 = vector.shape_cast %35 : vector<1x80x96xbf16> to vector<80x96xbf16>
    %c6 = arith.constant 6 : index
    %c0_34 = arith.constant 0 : index
    %c0_35 = arith.constant 0 : index
    %37 = vector.load %arg2[%c6, %c0_34, %c0_35] : memref<9x96x192xbf16, #tpu.memory_space<vmem>>, vector<1x96x192xbf16>
    %38 = vector.shape_cast %37 : vector<1x96x192xbf16> to vector<96x192xbf16>
    %cst_36 = arith.constant dense<0.000000e+00> : vector<80x192xf32>
    %39 = tpu.matmul %36, %38, %cst_36 {dimension_numbers = #tpu.dot_dimension_numbers<[1], [0], [0], [1], [0, 0, 1, 1], [], []>} : vector<80x96xbf16>, vector<96x192xbf16>, vector<80x192xf32> -> vector<80x192xf32>
    %40 = arith.addf %34, %39 : vector<80x192xf32>
    %c0_37 = arith.constant 0 : index
    %c21 = arith.constant 21 : index
    %c0_38 = arith.constant 0 : index
    %41 = vector.load %arg1[%c0_37, %c21, %c0_38] : memref<1x104x96xbf16, #tpu.memory_space<vmem>>, vector<1x80x96xbf16>
    %42 = vector.shape_cast %41 : vector<1x80x96xbf16> to vector<80x96xbf16>
    %c7 = arith.constant 7 : index
    %c0_39 = arith.constant 0 : index
    %c0_40 = arith.constant 0 : index
    %43 = vector.load %arg2[%c7, %c0_39, %c0_40] : memref<9x96x192xbf16, #tpu.memory_space<vmem>>, vector<1x96x192xbf16>
    %44 = vector.shape_cast %43 : vector<1x96x192xbf16> to vector<96x192xbf16>
    %cst_41 = arith.constant dense<0.000000e+00> : vector<80x192xf32>
    %45 = tpu.matmul %42, %44, %cst_41 {dimension_numbers = #tpu.dot_dimension_numbers<[1], [0], [0], [1], [0, 0, 1, 1], [], []>} : vector<80x96xbf16>, vector<96x192xbf16>, vector<80x192xf32> -> vector<80x192xf32>
    %46 = arith.addf %40, %45 : vector<80x192xf32>
    %c0_42 = arith.constant 0 : index
    %c22 = arith.constant 22 : index
    %c0_43 = arith.constant 0 : index
    %47 = vector.load %arg1[%c0_42, %c22, %c0_43] : memref<1x104x96xbf16, #tpu.memory_space<vmem>>, vector<1x80x96xbf16>
    %48 = vector.shape_cast %47 : vector<1x80x96xbf16> to vector<80x96xbf16>
    %c8 = arith.constant 8 : index
    %c0_44 = arith.constant 0 : index
    %c0_45 = arith.constant 0 : index
    %49 = vector.load %arg2[%c8, %c0_44, %c0_45] : memref<9x96x192xbf16, #tpu.memory_space<vmem>>, vector<1x96x192xbf16>
    %50 = vector.shape_cast %49 : vector<1x96x192xbf16> to vector<96x192xbf16>
    %cst_46 = arith.constant dense<0.000000e+00> : vector<80x192xf32>
    %51 = tpu.matmul %48, %50, %cst_46 {dimension_numbers = #tpu.dot_dimension_numbers<[1], [0], [0], [1], [0, 0, 1, 1], [], []>} : vector<80x96xbf16>, vector<96x192xbf16>, vector<80x192xf32> -> vector<80x192xf32>
    %52 = arith.addf %46, %51 : vector<80x192xf32>
    %c0_47 = arith.constant 0 : index
    %c0_48 = arith.constant 0 : index
    %53 = vector.load %arg3[%c0_47, %c0_48] : memref<1x192xf32, #tpu.memory_space<vmem>>, vector<1x192xf32>
    %54 = vector.broadcast %53 : vector<1x192xf32> to vector<80x192xf32>
    %55 = arith.addf %52, %54 : vector<80x192xf32>
    %cst_49 = arith.constant 0.000000e+00 : f32
    %56 = vector.broadcast %cst_49 : f32 to vector<80x192xf32>
    %57 = arith.maximumf %55, %56 : vector<80x192xf32>
    %58 = arith.truncf %57 : vector<80x192xf32> to vector<80x192xbf16>
    %c0_50 = arith.constant 0 : index
    %c0_51 = arith.constant 0 : index
    %c0_52 = arith.constant 0 : index
    %59 = vector.load %arg4[%c0_50, %c0_51, %c0_52] : memref<1x80x192xbf16, #tpu.memory_space<vmem>>, vector<1x80x192xbf16>
    %60 = vector.shape_cast %59 : vector<1x80x192xbf16> to vector<80x192xbf16>
    %61 = vector.shape_cast %58 : vector<80x192xbf16> to vector<1x80x192xbf16>
    tpu.vector_store %arg4[%c0_50, %c0_51, %c0_52], %61 {strides = array<i32>} : memref<1x80x192xbf16, #tpu.memory_space<vmem>>, vector<1x80x192xbf16>,
    return
  }
  func.func @transform_0(%arg0: i32) -> (i32, i32, i32) {
    %c0_i32 = arith.constant 0 : i32
    %c0_i32_0 = arith.constant 0 : i32
    %c0_i32_1 = arith.constant 0 : i32
    return %arg0, %c0_i32, %c0_i32_0 : i32, i32, i32
  }
  func.func @transform_1(%arg0: i32) -> (i32, i32, i32) {
    %c0_i32 = arith.constant 0 : i32
    %c0_i32_0 = arith.constant 0 : i32
    %c0_i32_1 = arith.constant 0 : i32
    %c0_i32_2 = arith.constant 0 : i32
    return %c0_i32, %c0_i32_0, %c0_i32_1 : i32, i32, i32
  }
  func.func @transform_2(%arg0: i32) -> (i32, i32) {
    %c0_i32 = arith.constant 0 : i32
    %c0_i32_0 = arith.constant 0 : i32
    %c0_i32_1 = arith.constant 0 : i32
    return %c0_i32, %c0_i32_0 : i32, i32
  }
  func.func @transform_3(%arg0: i32) -> (i32, i32, i32) {
    %c0_i32 = arith.constant 0 : i32
    %c0_i32_0 = arith.constant 0 : i32
    %c0_i32_1 = arith.constant 0 : i32
    return %arg0, %c0_i32, %c0_i32_0 : i32, i32, i32
  }
}

module attributes {stable_mosaic.version = 11 : i64} {
  func.func @_tap_conv_kernel(%arg0: i32, %arg1: memref<1x104x192xbf16, #tpu.memory_space<vmem>>, %arg2: memref<9x192x192xbf16, #tpu.memory_space<vmem>>, %arg3: memref<1x192xf32, #tpu.memory_space<vmem>>, %arg4: memref<1x80x192xbf16, #tpu.memory_space<vmem>>) attributes {dimension_semantics = [#tpu.dimension_semantics<parallel>], iteration_bounds = array<i64: 2>, scalar_prefetch = 0 : i64, scratch_operands = 0 : i64, tpu.core_type = #tpu.core_type<tc>, window_params = [{transform_indices = @transform_0, window_bounds = array<i64: 1, 104, 192>}, {pipeline_mode = #tpu.pipeline_mode<synchronous>, transform_indices = @transform_1, window_bounds = array<i64: 9, 192, 192>}, {pipeline_mode = #tpu.pipeline_mode<synchronous>, transform_indices = @transform_2, window_bounds = array<i64: 1, 192>}, {transform_indices = @transform_3, window_bounds = array<i64: 1, 80, 192>}]} {
    %c0 = arith.constant 0 : index
    %c0_0 = arith.constant 0 : index
    %c0_1 = arith.constant 0 : index
    %0 = vector.load %arg1[%c0, %c0_0, %c0_1] : memref<1x104x192xbf16, #tpu.memory_space<vmem>>, vector<1x80x192xbf16>
    %1 = vector.shape_cast %0 : vector<1x80x192xbf16> to vector<80x192xbf16>
    %c0_2 = arith.constant 0 : index
    %c0_3 = arith.constant 0 : index
    %c0_4 = arith.constant 0 : index
    %2 = vector.load %arg2[%c0_2, %c0_3, %c0_4] : memref<9x192x192xbf16, #tpu.memory_space<vmem>>, vector<1x192x192xbf16>
    %3 = vector.shape_cast %2 : vector<1x192x192xbf16> to vector<192x192xbf16>
    %cst = arith.constant dense<0.000000e+00> : vector<80x192xf32>
    %4 = tpu.matmul %1, %3, %cst {dimension_numbers = #tpu.dot_dimension_numbers<[1], [0], [0], [1], [0, 0, 1, 1], [], []>} : vector<80x192xbf16>, vector<192x192xbf16>, vector<80x192xf32> -> vector<80x192xf32>
    %c0_5 = arith.constant 0 : index
    %c1 = arith.constant 1 : index
    %c0_6 = arith.constant 0 : index
    %5 = vector.load %arg1[%c0_5, %c1, %c0_6] : memref<1x104x192xbf16, #tpu.memory_space<vmem>>, vector<1x80x192xbf16>
    %6 = vector.shape_cast %5 : vector<1x80x192xbf16> to vector<80x192xbf16>
    %c1_7 = arith.constant 1 : index
    %c0_8 = arith.constant 0 : index
    %c0_9 = arith.constant 0 : index
    %7 = vector.load %arg2[%c1_7, %c0_8, %c0_9] : memref<9x192x192xbf16, #tpu.memory_space<vmem>>, vector<1x192x192xbf16>
    %8 = vector.shape_cast %7 : vector<1x192x192xbf16> to vector<192x192xbf16>
    %cst_10 = arith.constant dense<0.000000e+00> : vector<80x192xf32>
    %9 = tpu.matmul %6, %8, %cst_10 {dimension_numbers = #tpu.dot_dimension_numbers<[1], [0], [0], [1], [0, 0, 1, 1], [], []>} : vector<80x192xbf16>, vector<192x192xbf16>, vector<80x192xf32> -> vector<80x192xf32>
    %10 = arith.addf %4, %9 : vector<80x192xf32>
    %c0_11 = arith.constant 0 : index
    %c2 = arith.constant 2 : index
    %c0_12 = arith.constant 0 : index
    %11 = vector.load %arg1[%c0_11, %c2, %c0_12] : memref<1x104x192xbf16, #tpu.memory_space<vmem>>, vector<1x80x192xbf16>
    %12 = vector.shape_cast %11 : vector<1x80x192xbf16> to vector<80x192xbf16>
    %c2_13 = arith.constant 2 : index
    %c0_14 = arith.constant 0 : index
    %c0_15 = arith.constant 0 : index
    %13 = vector.load %arg2[%c2_13, %c0_14, %c0_15] : memref<9x192x192xbf16, #tpu.memory_space<vmem>>, vector<1x192x192xbf16>
    %14 = vector.shape_cast %13 : vector<1x192x192xbf16> to vector<192x192xbf16>
    %cst_16 = arith.constant dense<0.000000e+00> : vector<80x192xf32>
    %15 = tpu.matmul %12, %14, %cst_16 {dimension_numbers = #tpu.dot_dimension_numbers<[1], [0], [0], [1], [0, 0, 1, 1], [], []>} : vector<80x192xbf16>, vector<192x192xbf16>, vector<80x192xf32> -> vector<80x192xf32>
    %16 = arith.addf %10, %15 : vector<80x192xf32>
    %c0_17 = arith.constant 0 : index
    %c10 = arith.constant 10 : index
    %c0_18 = arith.constant 0 : index
    %17 = vector.load %arg1[%c0_17, %c10, %c0_18] : memref<1x104x192xbf16, #tpu.memory_space<vmem>>, vector<1x80x192xbf16>
    %18 = vector.shape_cast %17 : vector<1x80x192xbf16> to vector<80x192xbf16>
    %c3 = arith.constant 3 : index
    %c0_19 = arith.constant 0 : index
    %c0_20 = arith.constant 0 : index
    %19 = vector.load %arg2[%c3, %c0_19, %c0_20] : memref<9x192x192xbf16, #tpu.memory_space<vmem>>, vector<1x192x192xbf16>
    %20 = vector.shape_cast %19 : vector<1x192x192xbf16> to vector<192x192xbf16>
    %cst_21 = arith.constant dense<0.000000e+00> : vector<80x192xf32>
    %21 = tpu.matmul %18, %20, %cst_21 {dimension_numbers = #tpu.dot_dimension_numbers<[1], [0], [0], [1], [0, 0, 1, 1], [], []>} : vector<80x192xbf16>, vector<192x192xbf16>, vector<80x192xf32> -> vector<80x192xf32>
    %22 = arith.addf %16, %21 : vector<80x192xf32>
    %c0_22 = arith.constant 0 : index
    %c11 = arith.constant 11 : index
    %c0_23 = arith.constant 0 : index
    %23 = vector.load %arg1[%c0_22, %c11, %c0_23] : memref<1x104x192xbf16, #tpu.memory_space<vmem>>, vector<1x80x192xbf16>
    %24 = vector.shape_cast %23 : vector<1x80x192xbf16> to vector<80x192xbf16>
    %c4 = arith.constant 4 : index
    %c0_24 = arith.constant 0 : index
    %c0_25 = arith.constant 0 : index
    %25 = vector.load %arg2[%c4, %c0_24, %c0_25] : memref<9x192x192xbf16, #tpu.memory_space<vmem>>, vector<1x192x192xbf16>
    %26 = vector.shape_cast %25 : vector<1x192x192xbf16> to vector<192x192xbf16>
    %cst_26 = arith.constant dense<0.000000e+00> : vector<80x192xf32>
    %27 = tpu.matmul %24, %26, %cst_26 {dimension_numbers = #tpu.dot_dimension_numbers<[1], [0], [0], [1], [0, 0, 1, 1], [], []>} : vector<80x192xbf16>, vector<192x192xbf16>, vector<80x192xf32> -> vector<80x192xf32>
    %28 = arith.addf %22, %27 : vector<80x192xf32>
    %c0_27 = arith.constant 0 : index
    %c12 = arith.constant 12 : index
    %c0_28 = arith.constant 0 : index
    %29 = vector.load %arg1[%c0_27, %c12, %c0_28] : memref<1x104x192xbf16, #tpu.memory_space<vmem>>, vector<1x80x192xbf16>
    %30 = vector.shape_cast %29 : vector<1x80x192xbf16> to vector<80x192xbf16>
    %c5 = arith.constant 5 : index
    %c0_29 = arith.constant 0 : index
    %c0_30 = arith.constant 0 : index
    %31 = vector.load %arg2[%c5, %c0_29, %c0_30] : memref<9x192x192xbf16, #tpu.memory_space<vmem>>, vector<1x192x192xbf16>
    %32 = vector.shape_cast %31 : vector<1x192x192xbf16> to vector<192x192xbf16>
    %cst_31 = arith.constant dense<0.000000e+00> : vector<80x192xf32>
    %33 = tpu.matmul %30, %32, %cst_31 {dimension_numbers = #tpu.dot_dimension_numbers<[1], [0], [0], [1], [0, 0, 1, 1], [], []>} : vector<80x192xbf16>, vector<192x192xbf16>, vector<80x192xf32> -> vector<80x192xf32>
    %34 = arith.addf %28, %33 : vector<80x192xf32>
    %c0_32 = arith.constant 0 : index
    %c20 = arith.constant 20 : index
    %c0_33 = arith.constant 0 : index
    %35 = vector.load %arg1[%c0_32, %c20, %c0_33] : memref<1x104x192xbf16, #tpu.memory_space<vmem>>, vector<1x80x192xbf16>
    %36 = vector.shape_cast %35 : vector<1x80x192xbf16> to vector<80x192xbf16>
    %c6 = arith.constant 6 : index
    %c0_34 = arith.constant 0 : index
    %c0_35 = arith.constant 0 : index
    %37 = vector.load %arg2[%c6, %c0_34, %c0_35] : memref<9x192x192xbf16, #tpu.memory_space<vmem>>, vector<1x192x192xbf16>
    %38 = vector.shape_cast %37 : vector<1x192x192xbf16> to vector<192x192xbf16>
    %cst_36 = arith.constant dense<0.000000e+00> : vector<80x192xf32>
    %39 = tpu.matmul %36, %38, %cst_36 {dimension_numbers = #tpu.dot_dimension_numbers<[1], [0], [0], [1], [0, 0, 1, 1], [], []>} : vector<80x192xbf16>, vector<192x192xbf16>, vector<80x192xf32> -> vector<80x192xf32>
    %40 = arith.addf %34, %39 : vector<80x192xf32>
    %c0_37 = arith.constant 0 : index
    %c21 = arith.constant 21 : index
    %c0_38 = arith.constant 0 : index
    %41 = vector.load %arg1[%c0_37, %c21, %c0_38] : memref<1x104x192xbf16, #tpu.memory_space<vmem>>, vector<1x80x192xbf16>
    %42 = vector.shape_cast %41 : vector<1x80x192xbf16> to vector<80x192xbf16>
    %c7 = arith.constant 7 : index
    %c0_39 = arith.constant 0 : index
    %c0_40 = arith.constant 0 : index
    %43 = vector.load %arg2[%c7, %c0_39, %c0_40] : memref<9x192x192xbf16, #tpu.memory_space<vmem>>, vector<1x192x192xbf16>
    %44 = vector.shape_cast %43 : vector<1x192x192xbf16> to vector<192x192xbf16>
    %cst_41 = arith.constant dense<0.000000e+00> : vector<80x192xf32>
    %45 = tpu.matmul %42, %44, %cst_41 {dimension_numbers = #tpu.dot_dimension_numbers<[1], [0], [0], [1], [0, 0, 1, 1], [], []>} : vector<80x192xbf16>, vector<192x192xbf16>, vector<80x192xf32> -> vector<80x192xf32>
    %46 = arith.addf %40, %45 : vector<80x192xf32>
    %c0_42 = arith.constant 0 : index
    %c22 = arith.constant 22 : index
    %c0_43 = arith.constant 0 : index
    %47 = vector.load %arg1[%c0_42, %c22, %c0_43] : memref<1x104x192xbf16, #tpu.memory_space<vmem>>, vector<1x80x192xbf16>
    %48 = vector.shape_cast %47 : vector<1x80x192xbf16> to vector<80x192xbf16>
    %c8 = arith.constant 8 : index
    %c0_44 = arith.constant 0 : index
    %c0_45 = arith.constant 0 : index
    %49 = vector.load %arg2[%c8, %c0_44, %c0_45] : memref<9x192x192xbf16, #tpu.memory_space<vmem>>, vector<1x192x192xbf16>
    %50 = vector.shape_cast %49 : vector<1x192x192xbf16> to vector<192x192xbf16>
    %cst_46 = arith.constant dense<0.000000e+00> : vector<80x192xf32>
    %51 = tpu.matmul %48, %50, %cst_46 {dimension_numbers = #tpu.dot_dimension_numbers<[1], [0], [0], [1], [0, 0, 1, 1], [], []>} : vector<80x192xbf16>, vector<192x192xbf16>, vector<80x192xf32> -> vector<80x192xf32>
    %52 = arith.addf %46, %51 : vector<80x192xf32>
    %c0_47 = arith.constant 0 : index
    %c0_48 = arith.constant 0 : index
    %53 = vector.load %arg3[%c0_47, %c0_48] : memref<1x192xf32, #tpu.memory_space<vmem>>, vector<1x192xf32>
    %54 = vector.broadcast %53 : vector<1x192xf32> to vector<80x192xf32>
    %55 = arith.addf %52, %54 : vector<80x192xf32>
    %cst_49 = arith.constant 0.000000e+00 : f32
    %56 = vector.broadcast %cst_49 : f32 to vector<80x192xf32>
    %57 = arith.maximumf %55, %56 : vector<80x192xf32>
    %58 = arith.truncf %57 : vector<80x192xf32> to vector<80x192xbf16>
    %c0_50 = arith.constant 0 : index
    %c0_51 = arith.constant 0 : index
    %c0_52 = arith.constant 0 : index
    %59 = vector.load %arg4[%c0_50, %c0_51, %c0_52] : memref<1x80x192xbf16, #tpu.memory_space<vmem>>, vector<1x80x192xbf16>
    %60 = vector.shape_cast %59 : vector<1x80x192xbf16> to vector<80x192xbf16>
    %61 = vector.shape_cast %58 : vector<80x192xbf16> to vector<1x80x192xbf16>
    tpu.vector_store %arg4[%c0_50, %c0_51, %c0_52], %61 {strides = array<i32>} : memref<1x80x192xbf16, #tpu.memory_space<vmem>>, vector<1x80x192xbf16>,
    return
  }
  func.func @transform_0(%arg0: i32) -> (i32, i32, i32) {
    %c0_i32 = arith.constant 0 : i32
    %c0_i32_0 = arith.constant 0 : i32
    %c0_i32_1 = arith.constant 0 : i32
    return %arg0, %c0_i32, %c0_i32_0 : i32, i32, i32
  }
  func.func @transform_1(%arg0: i32) -> (i32, i32, i32) {
    %c0_i32 = arith.constant 0 : i32
    %c0_i32_0 = arith.constant 0 : i32
    %c0_i32_1 = arith.constant 0 : i32
    %c0_i32_2 = arith.constant 0 : i32
    return %c0_i32, %c0_i32_0, %c0_i32_1 : i32, i32, i32
  }
  func.func @transform_2(%arg0: i32) -> (i32, i32) {
    %c0_i32 = arith.constant 0 : i32
    %c0_i32_0 = arith.constant 0 : i32
    %c0_i32_1 = arith.constant 0 : i32
    return %c0_i32, %c0_i32_0 : i32, i32
  }
  func.func @transform_3(%arg0: i32) -> (i32, i32, i32) {
    %c0_i32 = arith.constant 0 : i32
    %c0_i32_0 = arith.constant 0 : i32
    %c0_i32_1 = arith.constant 0 : i32
    return %arg0, %c0_i32, %c0_i32_0 : i32, i32, i32
  }
}

module attributes {stable_mosaic.version = 11 : i64} {
  func.func @_tap_conv_kernel(%arg0: i32, %arg1: memref<1x32x768xbf16, #tpu.memory_space<vmem>>, %arg2: memref<4x768x192xbf16, #tpu.memory_space<vmem>>, %arg3: memref<1x192xf32, #tpu.memory_space<vmem>>, %arg4: memref<1x20x192xbf16, #tpu.memory_space<vmem>>) attributes {dimension_semantics = [#tpu.dimension_semantics<parallel>], iteration_bounds = array<i64: 2>, scalar_prefetch = 0 : i64, scratch_operands = 0 : i64, tpu.core_type = #tpu.core_type<tc>, window_params = [{transform_indices = @transform_0, window_bounds = array<i64: 1, 32, 768>}, {pipeline_mode = #tpu.pipeline_mode<synchronous>, transform_indices = @transform_1, window_bounds = array<i64: 4, 768, 192>}, {pipeline_mode = #tpu.pipeline_mode<synchronous>, transform_indices = @transform_2, window_bounds = array<i64: 1, 192>}, {transform_indices = @transform_3, window_bounds = array<i64: 1, 20, 192>}]} {
    %c0 = arith.constant 0 : index
    %c0_0 = arith.constant 0 : index
    %c0_1 = arith.constant 0 : index
    %0 = vector.load %arg1[%c0, %c0_0, %c0_1] : memref<1x32x768xbf16, #tpu.memory_space<vmem>>, vector<1x20x768xbf16>
    %1 = vector.shape_cast %0 : vector<1x20x768xbf16> to vector<20x768xbf16>
    %c0_2 = arith.constant 0 : index
    %c0_3 = arith.constant 0 : index
    %c0_4 = arith.constant 0 : index
    %2 = vector.load %arg2[%c0_2, %c0_3, %c0_4] : memref<4x768x192xbf16, #tpu.memory_space<vmem>>, vector<1x768x192xbf16>
    %3 = vector.shape_cast %2 : vector<1x768x192xbf16> to vector<768x192xbf16>
    %cst = arith.constant dense<0.000000e+00> : vector<20x192xf32>
    %4 = tpu.matmul %1, %3, %cst {dimension_numbers = #tpu.dot_dimension_numbers<[1], [0], [0], [1], [0, 0, 1, 1], [], []>} : vector<20x768xbf16>, vector<768x192xbf16>, vector<20x192xf32> -> vector<20x192xf32>
    %c0_5 = arith.constant 0 : index
    %c1 = arith.constant 1 : index
    %c0_6 = arith.constant 0 : index
    %5 = vector.load %arg1[%c0_5, %c1, %c0_6] : memref<1x32x768xbf16, #tpu.memory_space<vmem>>, vector<1x20x768xbf16>
    %6 = vector.shape_cast %5 : vector<1x20x768xbf16> to vector<20x768xbf16>
    %c1_7 = arith.constant 1 : index
    %c0_8 = arith.constant 0 : index
    %c0_9 = arith.constant 0 : index
    %7 = vector.load %arg2[%c1_7, %c0_8, %c0_9] : memref<4x768x192xbf16, #tpu.memory_space<vmem>>, vector<1x768x192xbf16>
    %8 = vector.shape_cast %7 : vector<1x768x192xbf16> to vector<768x192xbf16>
    %cst_10 = arith.constant dense<0.000000e+00> : vector<20x192xf32>
    %9 = tpu.matmul %6, %8, %cst_10 {dimension_numbers = #tpu.dot_dimension_numbers<[1], [0], [0], [1], [0, 0, 1, 1], [], []>} : vector<20x768xbf16>, vector<768x192xbf16>, vector<20x192xf32> -> vector<20x192xf32>
    %10 = arith.addf %4, %9 : vector<20x192xf32>
    %c0_11 = arith.constant 0 : index
    %c5 = arith.constant 5 : index
    %c0_12 = arith.constant 0 : index
    %11 = vector.load %arg1[%c0_11, %c5, %c0_12] : memref<1x32x768xbf16, #tpu.memory_space<vmem>>, vector<1x20x768xbf16>
    %12 = vector.shape_cast %11 : vector<1x20x768xbf16> to vector<20x768xbf16>
    %c2 = arith.constant 2 : index
    %c0_13 = arith.constant 0 : index
    %c0_14 = arith.constant 0 : index
    %13 = vector.load %arg2[%c2, %c0_13, %c0_14] : memref<4x768x192xbf16, #tpu.memory_space<vmem>>, vector<1x768x192xbf16>
    %14 = vector.shape_cast %13 : vector<1x768x192xbf16> to vector<768x192xbf16>
    %cst_15 = arith.constant dense<0.000000e+00> : vector<20x192xf32>
    %15 = tpu.matmul %12, %14, %cst_15 {dimension_numbers = #tpu.dot_dimension_numbers<[1], [0], [0], [1], [0, 0, 1, 1], [], []>} : vector<20x768xbf16>, vector<768x192xbf16>, vector<20x192xf32> -> vector<20x192xf32>
    %16 = arith.addf %10, %15 : vector<20x192xf32>
    %c0_16 = arith.constant 0 : index
    %c6 = arith.constant 6 : index
    %c0_17 = arith.constant 0 : index
    %17 = vector.load %arg1[%c0_16, %c6, %c0_17] : memref<1x32x768xbf16, #tpu.memory_space<vmem>>, vector<1x20x768xbf16>
    %18 = vector.shape_cast %17 : vector<1x20x768xbf16> to vector<20x768xbf16>
    %c3 = arith.constant 3 : index
    %c0_18 = arith.constant 0 : index
    %c0_19 = arith.constant 0 : index
    %19 = vector.load %arg2[%c3, %c0_18, %c0_19] : memref<4x768x192xbf16, #tpu.memory_space<vmem>>, vector<1x768x192xbf16>
    %20 = vector.shape_cast %19 : vector<1x768x192xbf16> to vector<768x192xbf16>
    %cst_20 = arith.constant dense<0.000000e+00> : vector<20x192xf32>
    %21 = tpu.matmul %18, %20, %cst_20 {dimension_numbers = #tpu.dot_dimension_numbers<[1], [0], [0], [1], [0, 0, 1, 1], [], []>} : vector<20x768xbf16>, vector<768x192xbf16>, vector<20x192xf32> -> vector<20x192xf32>
    %22 = arith.addf %16, %21 : vector<20x192xf32>
    %c0_21 = arith.constant 0 : index
    %c0_22 = arith.constant 0 : index
    %23 = vector.load %arg3[%c0_21, %c0_22] : memref<1x192xf32, #tpu.memory_space<vmem>>, vector<1x192xf32>
    %24 = vector.broadcast %23 : vector<1x192xf32> to vector<20x192xf32>
    %25 = arith.addf %22, %24 : vector<20x192xf32>
    %cst_23 = arith.constant 0.000000e+00 : f32
    %26 = vector.broadcast %cst_23 : f32 to vector<20x192xf32>
    %27 = arith.maximumf %25, %26 : vector<20x192xf32>
    %28 = arith.truncf %27 : vector<20x192xf32> to vector<20x192xbf16>
    %c0_24 = arith.constant 0 : index
    %c0_25 = arith.constant 0 : index
    %c0_26 = arith.constant 0 : index
    %29 = vector.load %arg4[%c0_24, %c0_25, %c0_26] : memref<1x20x192xbf16, #tpu.memory_space<vmem>>, vector<1x20x192xbf16>
    %30 = vector.shape_cast %29 : vector<1x20x192xbf16> to vector<20x192xbf16>
    %31 = vector.shape_cast %28 : vector<20x192xbf16> to vector<1x20x192xbf16>
    tpu.vector_store %arg4[%c0_24, %c0_25, %c0_26], %31 {strides = array<i32>} : memref<1x20x192xbf16, #tpu.memory_space<vmem>>, vector<1x20x192xbf16>,
    return
  }
  func.func @transform_0(%arg0: i32) -> (i32, i32, i32) {
    %c0_i32 = arith.constant 0 : i32
    %c0_i32_0 = arith.constant 0 : i32
    %c0_i32_1 = arith.constant 0 : i32
    return %arg0, %c0_i32, %c0_i32_0 : i32, i32, i32
  }
  func.func @transform_1(%arg0: i32) -> (i32, i32, i32) {
    %c0_i32 = arith.constant 0 : i32
    %c0_i32_0 = arith.constant 0 : i32
    %c0_i32_1 = arith.constant 0 : i32
    %c0_i32_2 = arith.constant 0 : i32
    return %c0_i32, %c0_i32_0, %c0_i32_1 : i32, i32, i32
  }
  func.func @transform_2(%arg0: i32) -> (i32, i32) {
    %c0_i32 = arith.constant 0 : i32
    %c0_i32_0 = arith.constant 0 : i32
    %c0_i32_1 = arith.constant 0 : i32
    return %c0_i32, %c0_i32_0 : i32, i32
  }
  func.func @transform_3(%arg0: i32) -> (i32, i32, i32) {
    %c0_i32 = arith.constant 0 : i32
    %c0_i32_0 = arith.constant 0 : i32
    %c0_i32_1 = arith.constant 0 : i32
    return %arg0, %c0_i32, %c0_i32_0 : i32, i32, i32
  }
}

module attributes {stable_mosaic.version = 11 : i64} {
  func.func @_tap_conv_kernel(%arg0: i32, %arg1: memref<1x40x192xbf16, #tpu.memory_space<vmem>>, %arg2: memref<9x192x192xbf16, #tpu.memory_space<vmem>>, %arg3: memref<1x192xf32, #tpu.memory_space<vmem>>, %arg4: memref<1x24x192xbf16, #tpu.memory_space<vmem>>) attributes {dimension_semantics = [#tpu.dimension_semantics<parallel>], iteration_bounds = array<i64: 2>, scalar_prefetch = 0 : i64, scratch_operands = 0 : i64, tpu.core_type = #tpu.core_type<tc>, window_params = [{transform_indices = @transform_0, window_bounds = array<i64: 1, 40, 192>}, {pipeline_mode = #tpu.pipeline_mode<synchronous>, transform_indices = @transform_1, window_bounds = array<i64: 9, 192, 192>}, {pipeline_mode = #tpu.pipeline_mode<synchronous>, transform_indices = @transform_2, window_bounds = array<i64: 1, 192>}, {transform_indices = @transform_3, window_bounds = array<i64: 1, 24, 192>}]} {
    %c0 = arith.constant 0 : index
    %c0_0 = arith.constant 0 : index
    %c0_1 = arith.constant 0 : index
    %0 = vector.load %arg1[%c0, %c0_0, %c0_1] : memref<1x40x192xbf16, #tpu.memory_space<vmem>>, vector<1x24x192xbf16>
    %1 = vector.shape_cast %0 : vector<1x24x192xbf16> to vector<24x192xbf16>
    %c0_2 = arith.constant 0 : index
    %c0_3 = arith.constant 0 : index
    %c0_4 = arith.constant 0 : index
    %2 = vector.load %arg2[%c0_2, %c0_3, %c0_4] : memref<9x192x192xbf16, #tpu.memory_space<vmem>>, vector<1x192x192xbf16>
    %3 = vector.shape_cast %2 : vector<1x192x192xbf16> to vector<192x192xbf16>
    %cst = arith.constant dense<0.000000e+00> : vector<24x192xf32>
    %4 = tpu.matmul %1, %3, %cst {dimension_numbers = #tpu.dot_dimension_numbers<[1], [0], [0], [1], [0, 0, 1, 1], [], []>} : vector<24x192xbf16>, vector<192x192xbf16>, vector<24x192xf32> -> vector<24x192xf32>
    %c0_5 = arith.constant 0 : index
    %c1 = arith.constant 1 : index
    %c0_6 = arith.constant 0 : index
    %5 = vector.load %arg1[%c0_5, %c1, %c0_6] : memref<1x40x192xbf16, #tpu.memory_space<vmem>>, vector<1x24x192xbf16>
    %6 = vector.shape_cast %5 : vector<1x24x192xbf16> to vector<24x192xbf16>
    %c1_7 = arith.constant 1 : index
    %c0_8 = arith.constant 0 : index
    %c0_9 = arith.constant 0 : index
    %7 = vector.load %arg2[%c1_7, %c0_8, %c0_9] : memref<9x192x192xbf16, #tpu.memory_space<vmem>>, vector<1x192x192xbf16>
    %8 = vector.shape_cast %7 : vector<1x192x192xbf16> to vector<192x192xbf16>
    %cst_10 = arith.constant dense<0.000000e+00> : vector<24x192xf32>
    %9 = tpu.matmul %6, %8, %cst_10 {dimension_numbers = #tpu.dot_dimension_numbers<[1], [0], [0], [1], [0, 0, 1, 1], [], []>} : vector<24x192xbf16>, vector<192x192xbf16>, vector<24x192xf32> -> vector<24x192xf32>
    %10 = arith.addf %4, %9 : vector<24x192xf32>
    %c0_11 = arith.constant 0 : index
    %c2 = arith.constant 2 : index
    %c0_12 = arith.constant 0 : index
    %11 = vector.load %arg1[%c0_11, %c2, %c0_12] : memref<1x40x192xbf16, #tpu.memory_space<vmem>>, vector<1x24x192xbf16>
    %12 = vector.shape_cast %11 : vector<1x24x192xbf16> to vector<24x192xbf16>
    %c2_13 = arith.constant 2 : index
    %c0_14 = arith.constant 0 : index
    %c0_15 = arith.constant 0 : index
    %13 = vector.load %arg2[%c2_13, %c0_14, %c0_15] : memref<9x192x192xbf16, #tpu.memory_space<vmem>>, vector<1x192x192xbf16>
    %14 = vector.shape_cast %13 : vector<1x192x192xbf16> to vector<192x192xbf16>
    %cst_16 = arith.constant dense<0.000000e+00> : vector<24x192xf32>
    %15 = tpu.matmul %12, %14, %cst_16 {dimension_numbers = #tpu.dot_dimension_numbers<[1], [0], [0], [1], [0, 0, 1, 1], [], []>} : vector<24x192xbf16>, vector<192x192xbf16>, vector<24x192xf32> -> vector<24x192xf32>
    %16 = arith.addf %10, %15 : vector<24x192xf32>
    %c0_17 = arith.constant 0 : index
    %c6 = arith.constant 6 : index
    %c0_18 = arith.constant 0 : index
    %17 = vector.load %arg1[%c0_17, %c6, %c0_18] : memref<1x40x192xbf16, #tpu.memory_space<vmem>>, vector<1x24x192xbf16>
    %18 = vector.shape_cast %17 : vector<1x24x192xbf16> to vector<24x192xbf16>
    %c3 = arith.constant 3 : index
    %c0_19 = arith.constant 0 : index
    %c0_20 = arith.constant 0 : index
    %19 = vector.load %arg2[%c3, %c0_19, %c0_20] : memref<9x192x192xbf16, #tpu.memory_space<vmem>>, vector<1x192x192xbf16>
    %20 = vector.shape_cast %19 : vector<1x192x192xbf16> to vector<192x192xbf16>
    %cst_21 = arith.constant dense<0.000000e+00> : vector<24x192xf32>
    %21 = tpu.matmul %18, %20, %cst_21 {dimension_numbers = #tpu.dot_dimension_numbers<[1], [0], [0], [1], [0, 0, 1, 1], [], []>} : vector<24x192xbf16>, vector<192x192xbf16>, vector<24x192xf32> -> vector<24x192xf32>
    %22 = arith.addf %16, %21 : vector<24x192xf32>
    %c0_22 = arith.constant 0 : index
    %c7 = arith.constant 7 : index
    %c0_23 = arith.constant 0 : index
    %23 = vector.load %arg1[%c0_22, %c7, %c0_23] : memref<1x40x192xbf16, #tpu.memory_space<vmem>>, vector<1x24x192xbf16>
    %24 = vector.shape_cast %23 : vector<1x24x192xbf16> to vector<24x192xbf16>
    %c4 = arith.constant 4 : index
    %c0_24 = arith.constant 0 : index
    %c0_25 = arith.constant 0 : index
    %25 = vector.load %arg2[%c4, %c0_24, %c0_25] : memref<9x192x192xbf16, #tpu.memory_space<vmem>>, vector<1x192x192xbf16>
    %26 = vector.shape_cast %25 : vector<1x192x192xbf16> to vector<192x192xbf16>
    %cst_26 = arith.constant dense<0.000000e+00> : vector<24x192xf32>
    %27 = tpu.matmul %24, %26, %cst_26 {dimension_numbers = #tpu.dot_dimension_numbers<[1], [0], [0], [1], [0, 0, 1, 1], [], []>} : vector<24x192xbf16>, vector<192x192xbf16>, vector<24x192xf32> -> vector<24x192xf32>
    %28 = arith.addf %22, %27 : vector<24x192xf32>
    %c0_27 = arith.constant 0 : index
    %c8 = arith.constant 8 : index
    %c0_28 = arith.constant 0 : index
    %29 = vector.load %arg1[%c0_27, %c8, %c0_28] : memref<1x40x192xbf16, #tpu.memory_space<vmem>>, vector<1x24x192xbf16>
    %30 = vector.shape_cast %29 : vector<1x24x192xbf16> to vector<24x192xbf16>
    %c5 = arith.constant 5 : index
    %c0_29 = arith.constant 0 : index
    %c0_30 = arith.constant 0 : index
    %31 = vector.load %arg2[%c5, %c0_29, %c0_30] : memref<9x192x192xbf16, #tpu.memory_space<vmem>>, vector<1x192x192xbf16>
    %32 = vector.shape_cast %31 : vector<1x192x192xbf16> to vector<192x192xbf16>
    %cst_31 = arith.constant dense<0.000000e+00> : vector<24x192xf32>
    %33 = tpu.matmul %30, %32, %cst_31 {dimension_numbers = #tpu.dot_dimension_numbers<[1], [0], [0], [1], [0, 0, 1, 1], [], []>} : vector<24x192xbf16>, vector<192x192xbf16>, vector<24x192xf32> -> vector<24x192xf32>
    %34 = arith.addf %28, %33 : vector<24x192xf32>
    %c0_32 = arith.constant 0 : index
    %c12 = arith.constant 12 : index
    %c0_33 = arith.constant 0 : index
    %35 = vector.load %arg1[%c0_32, %c12, %c0_33] : memref<1x40x192xbf16, #tpu.memory_space<vmem>>, vector<1x24x192xbf16>
    %36 = vector.shape_cast %35 : vector<1x24x192xbf16> to vector<24x192xbf16>
    %c6_34 = arith.constant 6 : index
    %c0_35 = arith.constant 0 : index
    %c0_36 = arith.constant 0 : index
    %37 = vector.load %arg2[%c6_34, %c0_35, %c0_36] : memref<9x192x192xbf16, #tpu.memory_space<vmem>>, vector<1x192x192xbf16>
    %38 = vector.shape_cast %37 : vector<1x192x192xbf16> to vector<192x192xbf16>
    %cst_37 = arith.constant dense<0.000000e+00> : vector<24x192xf32>
    %39 = tpu.matmul %36, %38, %cst_37 {dimension_numbers = #tpu.dot_dimension_numbers<[1], [0], [0], [1], [0, 0, 1, 1], [], []>} : vector<24x192xbf16>, vector<192x192xbf16>, vector<24x192xf32> -> vector<24x192xf32>
    %40 = arith.addf %34, %39 : vector<24x192xf32>
    %c0_38 = arith.constant 0 : index
    %c13 = arith.constant 13 : index
    %c0_39 = arith.constant 0 : index
    %41 = vector.load %arg1[%c0_38, %c13, %c0_39] : memref<1x40x192xbf16, #tpu.memory_space<vmem>>, vector<1x24x192xbf16>
    %42 = vector.shape_cast %41 : vector<1x24x192xbf16> to vector<24x192xbf16>
    %c7_40 = arith.constant 7 : index
    %c0_41 = arith.constant 0 : index
    %c0_42 = arith.constant 0 : index
    %43 = vector.load %arg2[%c7_40, %c0_41, %c0_42] : memref<9x192x192xbf16, #tpu.memory_space<vmem>>, vector<1x192x192xbf16>
    %44 = vector.shape_cast %43 : vector<1x192x192xbf16> to vector<192x192xbf16>
    %cst_43 = arith.constant dense<0.000000e+00> : vector<24x192xf32>
    %45 = tpu.matmul %42, %44, %cst_43 {dimension_numbers = #tpu.dot_dimension_numbers<[1], [0], [0], [1], [0, 0, 1, 1], [], []>} : vector<24x192xbf16>, vector<192x192xbf16>, vector<24x192xf32> -> vector<24x192xf32>
    %46 = arith.addf %40, %45 : vector<24x192xf32>
    %c0_44 = arith.constant 0 : index
    %c14 = arith.constant 14 : index
    %c0_45 = arith.constant 0 : index
    %47 = vector.load %arg1[%c0_44, %c14, %c0_45] : memref<1x40x192xbf16, #tpu.memory_space<vmem>>, vector<1x24x192xbf16>
    %48 = vector.shape_cast %47 : vector<1x24x192xbf16> to vector<24x192xbf16>
    %c8_46 = arith.constant 8 : index
    %c0_47 = arith.constant 0 : index
    %c0_48 = arith.constant 0 : index
    %49 = vector.load %arg2[%c8_46, %c0_47, %c0_48] : memref<9x192x192xbf16, #tpu.memory_space<vmem>>, vector<1x192x192xbf16>
    %50 = vector.shape_cast %49 : vector<1x192x192xbf16> to vector<192x192xbf16>
    %cst_49 = arith.constant dense<0.000000e+00> : vector<24x192xf32>
    %51 = tpu.matmul %48, %50, %cst_49 {dimension_numbers = #tpu.dot_dimension_numbers<[1], [0], [0], [1], [0, 0, 1, 1], [], []>} : vector<24x192xbf16>, vector<192x192xbf16>, vector<24x192xf32> -> vector<24x192xf32>
    %52 = arith.addf %46, %51 : vector<24x192xf32>
    %c0_50 = arith.constant 0 : index
    %c0_51 = arith.constant 0 : index
    %53 = vector.load %arg3[%c0_50, %c0_51] : memref<1x192xf32, #tpu.memory_space<vmem>>, vector<1x192xf32>
    %54 = vector.broadcast %53 : vector<1x192xf32> to vector<24x192xf32>
    %55 = arith.addf %52, %54 : vector<24x192xf32>
    %cst_52 = arith.constant 0.000000e+00 : f32
    %56 = vector.broadcast %cst_52 : f32 to vector<24x192xf32>
    %57 = arith.maximumf %55, %56 : vector<24x192xf32>
    %58 = arith.truncf %57 : vector<24x192xf32> to vector<24x192xbf16>
    %c0_53 = arith.constant 0 : index
    %c0_54 = arith.constant 0 : index
    %c0_55 = arith.constant 0 : index
    %59 = vector.load %arg4[%c0_53, %c0_54, %c0_55] : memref<1x24x192xbf16, #tpu.memory_space<vmem>>, vector<1x24x192xbf16>
    %60 = vector.shape_cast %59 : vector<1x24x192xbf16> to vector<24x192xbf16>
    %61 = vector.shape_cast %58 : vector<24x192xbf16> to vector<1x24x192xbf16>
    tpu.vector_store %arg4[%c0_53, %c0_54, %c0_55], %61 {strides = array<i32>} : memref<1x24x192xbf16, #tpu.memory_space<vmem>>, vector<1x24x192xbf16>,
    return
  }
  func.func @transform_0(%arg0: i32) -> (i32, i32, i32) {
    %c0_i32 = arith.constant 0 : i32
    %c0_i32_0 = arith.constant 0 : i32
    %c0_i32_1 = arith.constant 0 : i32
    return %arg0, %c0_i32, %c0_i32_0 : i32, i32, i32
  }
  func.func @transform_1(%arg0: i32) -> (i32, i32, i32) {
    %c0_i32 = arith.constant 0 : i32
    %c0_i32_0 = arith.constant 0 : i32
    %c0_i32_1 = arith.constant 0 : i32
    %c0_i32_2 = arith.constant 0 : i32
    return %c0_i32, %c0_i32_0, %c0_i32_1 : i32, i32, i32
  }
  func.func @transform_2(%arg0: i32) -> (i32, i32) {
    %c0_i32 = arith.constant 0 : i32
    %c0_i32_0 = arith.constant 0 : i32
    %c0_i32_1 = arith.constant 0 : i32
    return %c0_i32, %c0_i32_0 : i32, i32
  }
  func.func @transform_3(%arg0: i32) -> (i32, i32, i32) {
    %c0_i32 = arith.constant 0 : i32
    %c0_i32_0 = arith.constant 0 : i32
    %c0_i32_1 = arith.constant 0 : i32
    return %arg0, %c0_i32, %c0_i32_0 : i32, i32, i32
  }
}

module attributes {stable_mosaic.version = 11 : i64} {
  func.func @_tap_conv_kernel(%arg0: i32, %arg1: memref<1x16x192xbf16, #tpu.memory_space<vmem>>, %arg2: memref<1x192x192xbf16, #tpu.memory_space<vmem>>, %arg3: memref<1x192xf32, #tpu.memory_space<vmem>>, %arg4: memref<1x16x192xbf16, #tpu.memory_space<vmem>>) attributes {dimension_semantics = [#tpu.dimension_semantics<parallel>], iteration_bounds = array<i64: 2>, scalar_prefetch = 0 : i64, scratch_operands = 0 : i64, tpu.core_type = #tpu.core_type<tc>, window_params = [{transform_indices = @transform_0, window_bounds = array<i64: 1, 16, 192>}, {pipeline_mode = #tpu.pipeline_mode<synchronous>, transform_indices = @transform_1, window_bounds = array<i64: 1, 192, 192>}, {pipeline_mode = #tpu.pipeline_mode<synchronous>, transform_indices = @transform_2, window_bounds = array<i64: 1, 192>}, {transform_indices = @transform_3, window_bounds = array<i64: 1, 16, 192>}]} {
    %c0 = arith.constant 0 : index
    %c0_0 = arith.constant 0 : index
    %c0_1 = arith.constant 0 : index
    %0 = vector.load %arg1[%c0, %c0_0, %c0_1] : memref<1x16x192xbf16, #tpu.memory_space<vmem>>, vector<1x16x192xbf16>
    %1 = vector.shape_cast %0 : vector<1x16x192xbf16> to vector<16x192xbf16>
    %c0_2 = arith.constant 0 : index
    %c0_3 = arith.constant 0 : index
    %c0_4 = arith.constant 0 : index
    %2 = vector.load %arg2[%c0_2, %c0_3, %c0_4] : memref<1x192x192xbf16, #tpu.memory_space<vmem>>, vector<1x192x192xbf16>
    %3 = vector.shape_cast %2 : vector<1x192x192xbf16> to vector<192x192xbf16>
    %cst = arith.constant dense<0.000000e+00> : vector<16x192xf32>
    %4 = tpu.matmul %1, %3, %cst {dimension_numbers = #tpu.dot_dimension_numbers<[1], [0], [0], [1], [0, 0, 1, 1], [], []>} : vector<16x192xbf16>, vector<192x192xbf16>, vector<16x192xf32> -> vector<16x192xf32>
    %c0_5 = arith.constant 0 : index
    %c0_6 = arith.constant 0 : index
    %5 = vector.load %arg3[%c0_5, %c0_6] : memref<1x192xf32, #tpu.memory_space<vmem>>, vector<1x192xf32>
    %6 = vector.broadcast %5 : vector<1x192xf32> to vector<16x192xf32>
    %7 = arith.addf %4, %6 : vector<16x192xf32>
    %cst_7 = arith.constant 0.000000e+00 : f32
    %8 = vector.broadcast %cst_7 : f32 to vector<16x192xf32>
    %9 = arith.maximumf %7, %8 : vector<16x192xf32>
    %10 = arith.truncf %9 : vector<16x192xf32> to vector<16x192xbf16>
    %c0_8 = arith.constant 0 : index
    %c0_9 = arith.constant 0 : index
    %c0_10 = arith.constant 0 : index
    %11 = vector.load %arg4[%c0_8, %c0_9, %c0_10] : memref<1x16x192xbf16, #tpu.memory_space<vmem>>, vector<1x16x192xbf16>
    %12 = vector.shape_cast %11 : vector<1x16x192xbf16> to vector<16x192xbf16>
    %13 = vector.shape_cast %10 : vector<16x192xbf16> to vector<1x16x192xbf16>
    tpu.vector_store %arg4[%c0_8, %c0_9, %c0_10], %13 {strides = array<i32>} : memref<1x16x192xbf16, #tpu.memory_space<vmem>>, vector<1x16x192xbf16>,
    return
  }
  func.func @transform_0(%arg0: i32) -> (i32, i32, i32) {
    %c0_i32 = arith.constant 0 : i32
    %c0_i32_0 = arith.constant 0 : i32
    %c0_i32_1 = arith.constant 0 : i32
    return %arg0, %c0_i32, %c0_i32_0 : i32, i32, i32
  }
  func.func @transform_1(%arg0: i32) -> (i32, i32, i32) {
    %c0_i32 = arith.constant 0 : i32
    %c0_i32_0 = arith.constant 0 : i32
    %c0_i32_1 = arith.constant 0 : i32
    %c0_i32_2 = arith.constant 0 : i32
    return %c0_i32, %c0_i32_0, %c0_i32_1 : i32, i32, i32
  }
  func.func @transform_2(%arg0: i32) -> (i32, i32) {
    %c0_i32 = arith.constant 0 : i32
    %c0_i32_0 = arith.constant 0 : i32
    %c0_i32_1 = arith.constant 0 : i32
    return %c0_i32, %c0_i32_0 : i32, i32
  }
  func.func @transform_3(%arg0: i32) -> (i32, i32, i32) {
    %c0_i32 = arith.constant 0 : i32
    %c0_i32_0 = arith.constant 0 : i32
    %c0_i32_1 = arith.constant 0 : i32
    return %arg0, %c0_i32, %c0_i32_0 : i32, i32, i32
  }
}

module attributes {stable_mosaic.version = 11 : i64} {
  func.func @_head_kernel(%arg0: i32, %arg1: memref<1x16x192xbf16, #tpu.memory_space<vmem>>, %arg2: memref<192x10xbf16, #tpu.memory_space<vmem>>, %arg3: memref<1x10xf32, #tpu.memory_space<vmem>>, %arg4: memref<1x1x10xf32, #tpu.memory_space<vmem>>) attributes {dimension_semantics = [#tpu.dimension_semantics<parallel>], iteration_bounds = array<i64: 2>, scalar_prefetch = 0 : i64, scratch_operands = 0 : i64, tpu.core_type = #tpu.core_type<tc>, window_params = [{transform_indices = @transform_0, window_bounds = array<i64: 1, 16, 192>}, {pipeline_mode = #tpu.pipeline_mode<synchronous>, transform_indices = @transform_1, window_bounds = array<i64: 192, 10>}, {pipeline_mode = #tpu.pipeline_mode<synchronous>, transform_indices = @transform_2, window_bounds = array<i64: 1, 10>}, {transform_indices = @transform_3, window_bounds = array<i64: 1, 1, 10>}]} {
    %c0 = arith.constant 0 : index
    %c0_0 = arith.constant 0 : index
    %c0_1 = arith.constant 0 : index
    %0 = vector.load %arg1[%c0, %c0_0, %c0_1] : memref<1x16x192xbf16, #tpu.memory_space<vmem>>, vector<1x16x192xbf16>
    %1 = vector.shape_cast %0 : vector<1x16x192xbf16> to vector<16x192xbf16>
    %c0_2 = arith.constant 0 : index
    %c0_3 = arith.constant 0 : index
    %2 = vector.load %arg2[%c0_2, %c0_3] : memref<192x10xbf16, #tpu.memory_space<vmem>>, vector<192x10xbf16>
    %cst = arith.constant dense<0.000000e+00> : vector<16x10xf32>
    %3 = tpu.matmul %1, %2, %cst {dimension_numbers = #tpu.dot_dimension_numbers<[1], [0], [0], [1], [0, 0, 1, 1], [], []>} : vector<16x192xbf16>, vector<192x10xbf16>, vector<16x10xf32> -> vector<16x10xf32>
    %c0_4 = arith.constant 0 : index
    %c0_5 = arith.constant 0 : index
    %4 = vector.load %arg3[%c0_4, %c0_5] : memref<1x10xf32, #tpu.memory_space<vmem>>, vector<1x10xf32>
    %5 = vector.broadcast %4 : vector<1x10xf32> to vector<16x10xf32>
    %6 = arith.addf %3, %5 : vector<16x10xf32>
    %cst_6 = arith.constant 0.000000e+00 : f32
    %7 = vector.broadcast %cst_6 : f32 to vector<16x10xf32>
    %8 = arith.maximumf %6, %7 : vector<16x10xf32>
    %cst_7 = arith.constant dense<0.000000e+00> : vector<10xf32>
    %9 = vector.multi_reduction <add>, %8, %cst_7 [0] : vector<16x10xf32> to vector<10xf32>
    %10 = vector.shape_cast %9 : vector<10xf32> to vector<1x10xf32>
    %cst_8 = arith.constant 6.250000e-02 : f32
    %11 = vector.broadcast %cst_8 : f32 to vector<1x10xf32>
    %12 = arith.mulf %10, %11 : vector<1x10xf32>
    %c0_9 = arith.constant 0 : index
    %c0_10 = arith.constant 0 : index
    %c0_11 = arith.constant 0 : index
    %13 = vector.load %arg4[%c0_9, %c0_10, %c0_11] : memref<1x1x10xf32, #tpu.memory_space<vmem>>, vector<1x1x10xf32>
    %14 = vector.shape_cast %13 : vector<1x1x10xf32> to vector<1x10xf32>
    %15 = vector.shape_cast %12 : vector<1x10xf32> to vector<1x1x10xf32>
    tpu.vector_store %arg4[%c0_9, %c0_10, %c0_11], %15 {strides = array<i32>} : memref<1x1x10xf32, #tpu.memory_space<vmem>>, vector<1x1x10xf32>,
    return
  }
  func.func @transform_0(%arg0: i32) -> (i32, i32, i32) {
    %c0_i32 = arith.constant 0 : i32
    %c0_i32_0 = arith.constant 0 : i32
    %c0_i32_1 = arith.constant 0 : i32
    return %arg0, %c0_i32, %c0_i32_0 : i32, i32, i32
  }
  func.func @transform_1(%arg0: i32) -> (i32, i32) {
    %c0_i32 = arith.constant 0 : i32
    %c0_i32_0 = arith.constant 0 : i32
    %c0_i32_1 = arith.constant 0 : i32
    return %c0_i32, %c0_i32_0 : i32, i32
  }
  func.func @transform_2(%arg0: i32) -> (i32, i32) {
    %c0_i32 = arith.constant 0 : i32
    %c0_i32_0 = arith.constant 0 : i32
    %c0_i32_1 = arith.constant 0 : i32
    return %c0_i32, %c0_i32_0 : i32, i32
  }
  func.func @transform_3(%arg0: i32) -> (i32, i32, i32) {
    %c0_i32 = arith.constant 0 : i32
    %c0_i32_0 = arith.constant 0 : i32
    %c0_i32_1 = arith.constant 0 : i32
    return %arg0, %c0_i32, %c0_i32_0 : i32, i32, i32
  }
}

</mosaic_0001>

<bundles_post_ra>
// kernel: model_c_forward.9
= control target key start
LH: loop header
LB: loop body
LE: loop exit
PB: predicated region body
PF: predicated region fallthrough
CT: control target
= control target key end

     0   :  { %8 = vsyncpa [#allocation3], 0  ;;  %s1068_s12 = smov 0   ;;  %s1271_s0 = inlined_call_operand.vmem [shape: bf16[2,256,27], index: 0, kind: input, shape index: {}]   ;;  %s1272_s1 = inlined_call_operand.vmem [shape: bf16[1,27,96], index: 1, kind: input, shape index: {}]   ;;  %s1273_s2 = inlined_call_operand.hbm [shape: f32[1,96], index: 2, kind: input, shape index: {}]   ;;  %s1274_s3 = inlined_call_operand.vmem [shape: bf16[2,256,96], index: 3, kind: output, shape index: {}]  }
   0x1 LB: > { %s1074_s13 = sadd.s32 4294967295, %s1044_s12   ;;  %p798_p0 = scmp.ge.s32.totalorder %s1044_s12, 1  ;;  %s1044_s12 = sphi %s1068_s12, %s14_s12  }
   0x2   : > { %p113_p1 = scmp.lt.s32.totalorder %s1044_s12, 3  ;;  %p1275_p3 = scmp.eq.s32.totalorder %s1074_s13, 0 }
   0x3   : > { %s1046_s15 = smov [#allocation2]   ;;  %s1006_s20 = scalar_lea.hbm %s1273_s2, 16 }
   0x4   : > { %p1078_p2 = pnand %p798_p0, %p113_p1  ;;  %s129_s16 = sshll.u32 %s1046_s15, 4  ;;  %s130_s16 = int_to_ptr.vmem [resolvable:$true] %s129_s16 }
   0x5   : > { %p1007_p6 = scmp.ne.s32.totalorder %s1273_s2, %s1006_s20  ;;  %p1013_p10 = scmp.lt.u32.totalorder %s1006_s20, %s1273_s2 }
   0x6   : > { %s1277_s14 = scalar_select %p1078_p2, 1, 0 }
   0x7   : > { %p972_p4 = pneg %p1078_p2 }
   0x9   : > { %p1087_p5 = pnand %p1275_p3, %p972_p4 }
   0xb   : > { %p1008_p7 = pneg %p1087_p5 }
   0xd   : > { %p1009_p8 = pnand %p1008_p7, %p1007_p6 }
   0xf   : > { %p1010_p9 = pneg %p1009_p8 }
  0x11   : > { %p1015_p11 = pnand %p1013_p10, %p1010_p9 }
  0x13   : > { %1018 = shalt.err (!%p1015_p11)
}
  0x14   : > { %s1019_s25 = scalar_lea.vmem %s130_s16, 16  ;;  %s1026_s26 = scalar_lea.vmem %s130_s16, 32 }
  0x15   : > { %p1020_p12 = scmp.ne.s32.totalorder %s130_s16, %s1019_s25  ;;  %p1027_p1 = scmp.lt.s32.totalorder %s130_s16, %s130_s16 }
  0x16   : > { %p1028_p4 = scmp.lt.s32.totalorder %s1026_s26, %s1019_s25 }
  0x17   : > { %p1022_p13 = pnand %p1020_p12, %p1008_p7 }
  0x18   : > { %p1029_p3 = por %p1028_p4, %p1027_p1 }
  0x19   : > { %p1023_p0 = pneg %p1022_p13 }
  0x1b   : > { %p1030_p2 = pnand %p1029_p3, %p1023_p0 }
  0x1d   : > { %1033 = shalt.err (!%p1030_p2)
}
  0x1e   : > { %975 = dma.hbm_to_vmem [thread:$0]  (!%p1087_p5), %s1273_s2, 16, %s130_s16, [#allocation3]  }
  0x1f   : > { %p1279_p6 = scmp.ne.s32.totalorder %s1277_s14, 0 }
  0x20   : > { %p1280_p8 = scmp.eq.s32.totalorder (!%p1279_p6), %s1074_s13, 0 }
  0x21   : > { %150 = sbr.rel (%p1279_p6) target bundleno = 297 (0x129), region = 32 }
  0x28   : > { %1039 = dma.done.wait (%p1280_p8), [#allocation3], 16   ;;  %p1281_p7 = pmov %p1280_p8 }
  0x29   : > { %p174_p9 = scmp.lt.s32.totalorder %s1074_s13, 1  ;;  %vm368_vm0 = vcmask 1044480   ;;  %vm369_vm1 = vcmask 1045504   ;;  %v1047_v0 = vmov 65535   ;;  %vm319_vm2 = vcmask 220160   ;;  %v988_v2 = vld [vmem:[%s1272_s1] sm:$0xff]  }
  0x2a   : > { %1041 = vsyncadd (%p1281_p7), [#allocation3], 4294967280  ;;  %v370_v1 = vsel %vm368_vm0, 4294967295, %v1047_v0  ;;  %v989_v4 = vld [vmem:[%s1272_s1 + $0x8] sm:$0x3f]   ;;  %928 = vmatprep.subr.bf16.mxu0 %v988_v2  ;;  %964 = vmatprep.subr.bf16.mxu1 %v988_v2  ;;  %vm696_vm3 = vcmask 781312  }
  0x2b   : > { %s1283_s13 = smov (!%p174_p9, %s1074_s13), 1  ;;  %v371_v3 = vsel %vm369_vm1, %v370_v1, 0  ;;  %929 = vmatpush3.bf16.msra.mxu0 %v988_v2  ;;  %966 = vmatpush3.bf16.msra.mxu1 %v988_v2  ;;  %v1163_v22 = vld [vmem:[#allocation2] ss:$0 sm:$0xff] }
  0x2c   : > { %s876_s29 = sshll.u32 %s1283_s13, 7  ;;  %v373_v6 = vand.u32 %v989_v4, %v371_v3 }
  0x2d   : > { %s1123_s5 = scalar_lea.vmem %s1271_s0, %s876_s29  ;;  %s1176_s14 = scalar_lea.vmem %s1274_s3, %s876_s29 }
  0x2e   : > { %v990_v5 = vld [vmem:[%s1123_s5] sm:$0xff]   ;;  %v992_v8 = vld [vmem:[%s1123_s5 + $0x8] sm:$0xff]   ;;  %930 = vmatprep.subr.bf16.mxu0 %v373_v6  ;;  %965 = vmatprep.subr.bf16.mxu1 %v373_v6  ;;  %v994_v10 = vld [vmem:[%s1123_s5 + $0x10] sm:$0xff]  }
  0x2f   : > { %v991_v7 = vld [vmem:[%s1123_s5 + $0x40] sm:$0xff]   ;;  %932 = vmatprep.mubr.msk.bf16.mxu0 %vm319_vm2, %v990_v5  ;;  %v993_v9 = vld [vmem:[%s1123_s5 + $0x48] sm:$0xff]   ;;  %931 = vmatpush3.bf16.msra.mxu0 %v373_v6  ;;  %v995_v11 = vld [vmem:[%s1123_s5 + $0x50] sm:$0xff]  }
  0x30   : > { %948 = vmatprep.mubr.msk.bf16.mxu1 %vm319_vm2, %v991_v7  ;;  %967 = vmatpush3.bf16.msra.mxu1 %v373_v6  ;;  %v996_v12 = vld [vmem:[%s1123_s5 + $0x18] sm:$0xff]   ;;  %v998_v14 = vld [vmem:[%s1123_s5 + $0x20] sm:$0xff]   ;;  %v1000_v16 = vld [vmem:[%s1123_s5 + $0x28] sm:$0xff]  }
  0x31   : > { %v997_v13 = vld [vmem:[%s1123_s5 + $0x58] sm:$0xff]   ;;  %v999_v15 = vld [vmem:[%s1123_s5 + $0x60] sm:$0xff]   ;;  %v1001_v17 = vld [vmem:[%s1123_s5 + $0x68] sm:$0xff]  }
  0x32   : > { %933 = vmatmul.mubr.msk.bf16.vlgmr.msra.gmra.mrb[0].mxu0 %vm319_vm2, %v992_v8  ;;  %v1002_v18 = vld [vmem:[%s1123_s5 + $0x30] sm:$0xff]   ;;  %v1004_v20 = vld [vmem:[%s1123_s5 + $0x38] sm:$0xff]  }
  0x33   : > { %949 = vmatmul.mubr.msk.bf16.vlgmr.msra.gmra.mrb[0].mxu1 %vm319_vm2, %v993_v9  ;;  %936 = vmatprep.mubr.msk.bf16.mxu0 %vm319_vm2, %v994_v10  ;;  %v1003_v19 = vld [vmem:[%s1123_s5 + $0x70] sm:$0xff]   ;;  %v1005_v21 = vld [vmem:[%s1123_s5 + $0x78] sm:$0xff]  }
  0x34   : > { %952 = vmatprep.mubr.msk.bf16.mxu1 %vm319_vm2, %v995_v11 }
  0x3a   : > { %937 = vmatmul.mubr.msk.bf16.gmra.mrb[4].mxu0 %vm319_vm2, %v996_v12 }
  0x3b   : > { %953 = vmatmul.mubr.msk.bf16.gmra.mrb[4].mxu1 %vm319_vm2, %v997_v13  ;;  %940 = vmatprep.mubr.msk.bf16.mxu0 %vm319_vm2, %v998_v14 }
  0x3c   : > { %956 = vmatprep.mubr.msk.bf16.mxu1 %vm319_vm2, %v999_v15 }
  0x42   : > { %941 = vmatmul.mubr.msk.bf16.gmra.mrb[8].mxu0 %vm319_vm2, %v1000_v16 }
  0x43   : > { %957 = vmatmul.mubr.msk.bf16.gmra.mrb[8].mxu1 %vm319_vm2, %v1001_v17  ;;  %944 = vmatprep.mubr.msk.bf16.mxu0 %vm319_vm2, %v1002_v18 }
  0x44   : > { %960 = vmatprep.mubr.msk.bf16.mxu1 %vm319_vm2, %v1003_v19 }
  0x4a   : > { %945 = vmatmul.mubr.msk.bf16.gmra.mrb[12].mxu0 %vm319_vm2, %v1004_v20 }
  0x4b   : > { %961 = vmatmul.mubr.msk.bf16.gmra.mrb[12].mxu1 %vm319_vm2, %v1005_v21 }
 0x105   : > { %v934_v23 = vpop.f32.mrb[0].mxu0 }
 0x106   : > { %v950_v24 = vpop.f32.mrb[0].mxu1  ;;  %v418_v25 = vadd.f32 %v934_v23, %v1163_v22  ;;  %v409_v27 = vpop.f32.mrb[1].mxu0 }
 0x107   : > { %v482_v26 = vadd.f32 %v950_v24, %v1163_v22  ;;  %v473_v28 = vpop.f32.mrb[1].mxu1  ;;  %v410_v29 = vadd.f32 %v1163_v22, %v409_v27  ;;  %v935_v31 = vpop.f32.mrb[2].mxu0 }
 0x108   : > { %v474_v30 = vadd.f32 %v1163_v22, %v473_v28  ;;  %v951_v32 = vpop.f32.mrb[2].mxu1  ;;  %v538_v33 = vmax.f32 %v418_v25, 0.0  ;;  %v421_v35 = vadd.f32 %v935_v31, %v1163_v22  ;;  %v412_v37 = vpop.f32.mrb[3].mxu0 }
 0x109   : > { %v554_v34 = vmax.f32 %v482_v26, 0.0  ;;  %v485_v36 = vadd.f32 %v951_v32, %v1163_v22  ;;  %v476_v38 = vpop.f32.mrb[3].mxu1  ;;  %v536_v39 = vmax.f32 %v410_v29, 0.0  ;;  %v413_v41 = vadd.f32 %v1163_v22, %v412_v37 }
 0x10a   : > { %v552_v40 = vmax.f32 %v474_v30, 0.0  ;;  %v477_v42 = vadd.f32 %v1163_v22, %v476_v38  ;;  %v880_v43 = vpack.c.bf16 %v538_v33, %v538_v33  ;;  %v539_v45 = vmax.f32 %v421_v35, 0.0 }
 0x10b   : > { %v896_v44 = vpack.c.bf16 %v554_v34, %v554_v34  ;;  %v555_v46 = vmax.f32 %v485_v36, 0.0  ;;  %v878_v47 = vpack.c.bf16 %v536_v39, %v536_v39  ;;  %v537_v49 = vmax.f32 %v413_v41, 0.0 }
 0x10c   : > { %v894_v48 = vpack.c.bf16 %v552_v40, %v552_v40  ;;  %v553_v50 = vmax.f32 %v477_v42, 0.0  ;;  %699 = vst.msk [vmem:[%s1176_s14 + $0x8] sm:$0xf] %vm696_vm3, %v880_v43  ;;  %v881_v51 = vpack.c.bf16 %v539_v45, %v539_v45 }
 0x10d   : > { %715 = vst.msk [vmem:[%s1176_s14 + $0x48] sm:$0xf] %vm696_vm3, %v896_v44  ;;  %v897_v52 = vpack.c.bf16 %v555_v46, %v555_v46  ;;  %697 = vst.msk [vmem:[%s1176_s14] sm:$0xf] %vm696_vm3, %v878_v47  ;;  %v879_v53 = vpack.c.bf16 %v537_v49, %v537_v49  ;;  %v938_v55 = vpop.f32.mrb[4].mxu0 }
 0x10e   : > { %713 = vst.msk [vmem:[%s1176_s14 + $0x40] sm:$0xf] %vm696_vm3, %v894_v48  ;;  %v895_v54 = vpack.c.bf16 %v553_v50, %v553_v50  ;;  %v954_v56 = vpop.f32.mrb[4].mxu1  ;;  %700 = vst.msk [vmem:[%s1176_s14 + $0xc] sm:$0xf] %vm696_vm3, %v881_v51  ;;  %v434_v57 = vadd.f32 %v938_v55, %v1163_v22  ;;  %v425_v59 = vpop.f32.mrb[5].mxu0 }
 0x10f   : > { %716 = vst.msk [vmem:[%s1176_s14 + $0x4c] sm:$0xf] %vm696_vm3, %v897_v52  ;;  %v498_v58 = vadd.f32 %v954_v56, %v1163_v22  ;;  %v489_v60 = vpop.f32.mrb[5].mxu1  ;;  %698 = vst.msk [vmem:[%s1176_s14 + $0x4] sm:$0xf] %vm696_vm3, %v879_v53  ;;  %v426_v61 = vadd.f32 %v1163_v22, %v425_v59  ;;  %v939_v63 = vpop.f32.mrb[6].mxu0 }
 0x110   : > { %714 = vst.msk [vmem:[%s1176_s14 + $0x44] sm:$0xf] %vm696_vm3, %v895_v54  ;;  %v490_v62 = vadd.f32 %v1163_v22, %v489_v60  ;;  %v955_v0 = vpop.f32.mrb[6].mxu1  ;;  %v542_v1 = vmax.f32 %v434_v57, 0.0  ;;  %v437_v3 = vadd.f32 %v939_v63, %v1163_v22  ;;  %v428_v5 = vpop.f32.mrb[7].mxu0 }
 0x111   : > { %v558_v2 = vmax.f32 %v498_v58, 0.0  ;;  %v501_v4 = vadd.f32 %v955_v0, %v1163_v22  ;;  %v492_v6 = vpop.f32.mrb[7].mxu1  ;;  %v540_v7 = vmax.f32 %v426_v61, 0.0  ;;  %v429_v9 = vadd.f32 %v1163_v22, %v428_v5 }
 0x112   : > { %v556_v8 = vmax.f32 %v490_v62, 0.0  ;;  %v493_v10 = vadd.f32 %v1163_v22, %v492_v6  ;;  %v884_v11 = vpack.c.bf16 %v542_v1, %v542_v1  ;;  %v543_v13 = vmax.f32 %v437_v3, 0.0 }
 0x113   : > { %v900_v12 = vpack.c.bf16 %v558_v2, %v558_v2  ;;  %v559_v14 = vmax.f32 %v501_v4, 0.0  ;;  %v882_v15 = vpack.c.bf16 %v540_v7, %v540_v7  ;;  %v541_v17 = vmax.f32 %v429_v9, 0.0 }
 0x114   : > { %v898_v16 = vpack.c.bf16 %v556_v8, %v556_v8  ;;  %v557_v18 = vmax.f32 %v493_v10, 0.0  ;;  %703 = vst.msk [vmem:[%s1176_s14 + $0x18] sm:$0xf] %vm696_vm3, %v884_v11  ;;  %v885_v19 = vpack.c.bf16 %v543_v13, %v543_v13 }
 0x115   : > { %719 = vst.msk [vmem:[%s1176_s14 + $0x58] sm:$0xf] %vm696_vm3, %v900_v12  ;;  %v901_v20 = vpack.c.bf16 %v559_v14, %v559_v14  ;;  %701 = vst.msk [vmem:[%s1176_s14 + $0x10] sm:$0xf] %vm696_vm3, %v882_v15  ;;  %v883_v21 = vpack.c.bf16 %v541_v17, %v541_v17  ;;  %v942_v24 = vpop.f32.mrb[8].mxu0 }
 0x116   : > { %717 = vst.msk [vmem:[%s1176_s14 + $0x50] sm:$0xf] %vm696_vm3, %v898_v16  ;;  %v899_v23 = vpack.c.bf16 %v557_v18, %v557_v18  ;;  %v958_v25 = vpop.f32.mrb[8].mxu1  ;;  %704 = vst.msk [vmem:[%s1176_s14 + $0x1c] sm:$0xf] %vm696_vm3, %v885_v19  ;;  %v450_v26 = vadd.f32 %v942_v24, %v1163_v22  ;;  %v441_v28 = vpop.f32.mrb[9].mxu0 }
 0x117   : > { %720 = vst.msk [vmem:[%s1176_s14 + $0x5c] sm:$0xf] %vm696_vm3, %v901_v20  ;;  %v514_v27 = vadd.f32 %v958_v25, %v1163_v22  ;;  %v505_v29 = vpop.f32.mrb[9].mxu1  ;;  %702 = vst.msk [vmem:[%s1176_s14 + $0x14] sm:$0xf] %vm696_vm3, %v883_v21  ;;  %v442_v30 = vadd.f32 %v1163_v22, %v441_v28  ;;  %v943_v32 = vpop.f32.mrb[10].mxu0 }
 0x118   : > { %718 = vst.msk [vmem:[%s1176_s14 + $0x54] sm:$0xf] %vm696_vm3, %v899_v23  ;;  %v506_v31 = vadd.f32 %v1163_v22, %v505_v29  ;;  %v959_v33 = vpop.f32.mrb[10].mxu1  ;;  %v546_v34 = vmax.f32 %v450_v26, 0.0  ;;  %v453_v36 = vadd.f32 %v943_v32, %v1163_v22  ;;  %v444_v38 = vpop.f32.mrb[11].mxu0 }
 0x119   : > { %v562_v35 = vmax.f32 %v514_v27, 0.0  ;;  %v517_v37 = vadd.f32 %v959_v33, %v1163_v22  ;;  %v508_v39 = vpop.f32.mrb[11].mxu1  ;;  %v544_v40 = vmax.f32 %v442_v30, 0.0  ;;  %v445_v42 = vadd.f32 %v1163_v22, %v444_v38 }
 0x11a   : > { %v560_v41 = vmax.f32 %v506_v31, 0.0  ;;  %v509_v43 = vadd.f32 %v1163_v22, %v508_v39  ;;  %v888_v44 = vpack.c.bf16 %v546_v34, %v546_v34  ;;  %v547_v46 = vmax.f32 %v453_v36, 0.0 }
 0x11b   : > { %v904_v45 = vpack.c.bf16 %v562_v35, %v562_v35  ;;  %v563_v47 = vmax.f32 %v517_v37, 0.0  ;;  %v886_v48 = vpack.c.bf16 %v544_v40, %v544_v40  ;;  %v545_v50 = vmax.f32 %v445_v42, 0.0 }
 0x11c   : > { %v902_v49 = vpack.c.bf16 %v560_v41, %v560_v41  ;;  %v561_v51 = vmax.f32 %v509_v43, 0.0  ;;  %707 = vst.msk [vmem:[%s1176_s14 + $0x28] sm:$0xf] %vm696_vm3, %v888_v44  ;;  %v889_v52 = vpack.c.bf16 %v547_v46, %v547_v46 }
 0x11d   : > { %723 = vst.msk [vmem:[%s1176_s14 + $0x68] sm:$0xf] %vm696_vm3, %v904_v45  ;;  %v905_v53 = vpack.c.bf16 %v563_v47, %v563_v47  ;;  %705 = vst.msk [vmem:[%s1176_s14 + $0x20] sm:$0xf] %vm696_vm3, %v886_v48  ;;  %v887_v54 = vpack.c.bf16 %v545_v50, %v545_v50  ;;  %v946_v56 = vpop.f32.mrb[12].mxu0 }
 0x11e   : > { %721 = vst.msk [vmem:[%s1176_s14 + $0x60] sm:$0xf] %vm696_vm3, %v902_v49  ;;  %v903_v55 = vpack.c.bf16 %v561_v51, %v561_v51  ;;  %v962_v57 = vpop.f32.mrb[12].mxu1  ;;  %708 = vst.msk [vmem:[%s1176_s14 + $0x2c] sm:$0xf] %vm696_vm3, %v889_v52  ;;  %v466_v58 = vadd.f32 %v946_v56, %v1163_v22  ;;  %v457_v60 = vpop.f32.mrb[13].mxu0 }
 0x11f   : > { %724 = vst.msk [vmem:[%s1176_s14 + $0x6c] sm:$0xf] %vm696_vm3, %v905_v53  ;;  %v530_v59 = vadd.f32 %v962_v57, %v1163_v22  ;;  %v521_v61 = vpop.f32.mrb[13].mxu1  ;;  %706 = vst.msk [vmem:[%s1176_s14 + $0x24] sm:$0xf] %vm696_vm3, %v887_v54  ;;  %v458_v62 = vadd.f32 %v1163_v22, %v457_v60  ;;  %v947_v0 = vpop.f32.mrb[14].mxu0 }
 0x120   : > { %722 = vst.msk [vmem:[%s1176_s14 + $0x64] sm:$0xf] %vm696_vm3, %v903_v55  ;;  %v522_v63 = vadd.f32 %v1163_v22, %v521_v61  ;;  %v963_v1 = vpop.f32.mrb[14].mxu1  ;;  %v550_v2 = vmax.f32 %v466_v58, 0.0  ;;  %v469_v4 = vadd.f32 %v947_v0, %v1163_v22  ;;  %v460_v6 = vpop.f32.mrb[15].mxu0 }
 0x121   : > { %v566_v3 = vmax.f32 %v530_v59, 0.0  ;;  %v533_v5 = vadd.f32 %v963_v1, %v1163_v22  ;;  %v524_v7 = vpop.f32.mrb[15].mxu1  ;;  %v548_v8 = vmax.f32 %v458_v62, 0.0  ;;  %v461_v10 = vadd.f32 %v1163_v22, %v460_v6 }
 0x122   : > { %v564_v9 = vmax.f32 %v522_v63, 0.0  ;;  %v525_v11 = vadd.f32 %v1163_v22, %v524_v7  ;;  %v892_v12 = vpack.c.bf16 %v550_v2, %v550_v2  ;;  %v551_v14 = vmax.f32 %v469_v4, 0.0 }
 0x123   : > { %v908_v13 = vpack.c.bf16 %v566_v3, %v566_v3  ;;  %v567_v15 = vmax.f32 %v533_v5, 0.0  ;;  %v890_v16 = vpack.c.bf16 %v548_v8, %v548_v8  ;;  %v549_v18 = vmax.f32 %v461_v10, 0.0 }
 0x124   : > { %v906_v17 = vpack.c.bf16 %v564_v9, %v564_v9  ;;  %v565_v19 = vmax.f32 %v525_v11, 0.0  ;;  %711 = vst.msk [vmem:[%s1176_s14 + $0x38] sm:$0xf] %vm696_vm3, %v892_v12  ;;  %v893_v20 = vpack.c.bf16 %v551_v14, %v551_v14 }
 0x125   : > { %727 = vst.msk [vmem:[%s1176_s14 + $0x78] sm:$0xf] %vm696_vm3, %v908_v13  ;;  %v909_v21 = vpack.c.bf16 %v567_v15, %v567_v15  ;;  %709 = vst.msk [vmem:[%s1176_s14 + $0x30] sm:$0xf] %vm696_vm3, %v890_v16  ;;  %v891_v22 = vpack.c.bf16 %v549_v18, %v549_v18 }
 0x126   : > { %725 = vst.msk [vmem:[%s1176_s14 + $0x70] sm:$0xf] %vm696_vm3, %v906_v17  ;;  %v907_v23 = vpack.c.bf16 %v565_v19, %v565_v19  ;;  %712 = vst.msk [vmem:[%s1176_s14 + $0x3c] sm:$0xf] %vm696_vm3, %v893_v20 }
 0x127   : > { %728 = vst.msk [vmem:[%s1176_s14 + $0x7c] sm:$0xf] %vm696_vm3, %v909_v21  ;;  %710 = vst.msk [vmem:[%s1176_s14 + $0x34] sm:$0xf] %vm696_vm3, %v891_v22 }
 0x128   : > { %726 = vst.msk [vmem:[%s1176_s14 + $0x74] sm:$0xf] %vm696_vm3, %v907_v23 }
 0x129 PF: > { %s14_s12 = sadd.s32 1, %s1044_s12  }
 0x12a   : > { %p11_p2 = scmp.ge.s32.totalorder %s14_s12, 4  }
 0x12c   :  { %13 = sbr.rel (!%p11_p2) target bundleno = 1 (0x1), region = 67 }
 0x133   :  { %750 = vsyncpa [#allocation3], 1 }
 0x134   :  { %752 = vsyncpa [#allocation3 + $0x1], 1 }

// kernel: model_c_forward.10
= control target key start
LH: loop header
LB: loop body
LE: loop exit
PB: predicated region body
PF: predicated region fallthrough
CT: control target
= control target key end

     0   :  { %s5919_s12 = smov 0   ;;  %s7004_s0 = inlined_call_operand.vmem [shape: bf16[2,328,96], index: 0, kind: input, shape index: {}]   ;;  %s7005_s1 = inlined_call_operand.vmem [shape: bf16[9,96,96], index: 1, kind: input, shape index: {}]   ;;  %s7006_s2 = inlined_call_operand.vmem [shape: f32[1,96], index: 2, kind: input, shape index: {}]   ;;  %s7007_s3 = inlined_call_operand.vmem [shape: bf16[2,288,96], index: 3, kind: output, shape index: {}]  }
   0x1 LB: > { %s4330_s13 = sadd.s32 4294967295, %s5897_s12   ;;  %p4334_p0 = scmp.ge.s32.totalorder %s5897_s12, 1  ;;  %s5897_s12 = sphi %s5919_s12, %s13_s12  }
   0x2   : > { %p137_p1 = scmp.lt.s32.totalorder %s5897_s12, 3 }
   0x4   : > { %p138_p2 = pnand %p4334_p0, %p137_p1 }
   0x5   : > { %v5744_v0 = vld [vmem:[%s7005_s1 + $0x30] sm:$0xff] (!%p138_p2)   ;;  %p161_p3 = scmp.lt.s32.totalorder (!%p138_p2), %s4330_s13, 1  ;;  %v5745_v1 = vld [vmem:[%s7005_s1 + $0xc0] sm:$0xff] (!%p138_p2)   ;;  %v5746_v2 = vld [vmem:[%s7005_s1 + $0x38] sm:$0xff] (!%p138_p2)   ;;  %vm512_vm0 = vcmask (!%p138_p2), 785408   ;;  %vm2342_vm3 = vcmask (!%p138_p2), 1045504  }
   0x6   : > { %141 = sbr.rel (%p138_p2) target bundleno = 576 (0x240), region = 32  ;;  %5002 = vmatprep.subr.bf16.mxu1 (!%p138_p2), %v5744_v0  ;;  %5194 = vmatprep.subr.bf16.mxu0 (!%p138_p2), %v5745_v1  ;;  %v5747_v3 = vld [vmem:[%s7005_s1 + $0xc8] sm:$0xff] (!%p138_p2)   ;;  %v5748_v4 = vld [vmem:[%s7005_s1 + $0x40] sm:$0xff] (!%p138_p2)   ;;  %v5749_v5 = vld [vmem:[%s7005_s1 + $0xd0] sm:$0xff] (!%p138_p2)   ;;  %vm327_vm1 = vsmask.f32 (!%p138_p2), 7424 }
   0x7   : > { %5003 = vmatpush3.bf16.msra.mxu1 (!%p138_p2), %v5744_v0  ;;  %5195 = vmatpush3.bf16.msra.mxu0 (!%p138_p2), %v5745_v1  ;;  %v5750_v6 = vld [vmem:[%s7005_s1 + $0x48] sm:$0xff] (!%p138_p2)   ;;  %v5751_v7 = vld [vmem:[%s7005_s1 + $0xd8] sm:$0xff] (!%p138_p2)   ;;  %v5752_v8 = vld [vmem:[%s7005_s1 + $0x50] sm:$0xff] (!%p138_p2)   ;;  %vm1851_vm2 = vsmask.f32 (!%p138_p2), 6400  ;;  %vm1010_vm4 = vcmask (!%p138_p2), 1046528  }
   0x8   : > { %5004 = vmatprep.subr.bf16.mxu1 (!%p138_p2), %v5746_v2  ;;  %5196 = vmatprep.subr.bf16.mxu0 (!%p138_p2), %v5747_v3  ;;  %v5753_v9 = vld [vmem:[%s7005_s1 + $0xe0] sm:$0xff] (!%p138_p2)   ;;  %v5754_v15 = vld [vmem:[%s7005_s1 + $0x58] sm:$0xff] (!%p138_p2)   ;;  %v5755_v18 = vld [vmem:[%s7005_s1 + $0xe8] sm:$0xff] (!%p138_p2)   ;;  %vm3183_vm5 = vsmask.f32 (!%p138_p2), 5376  ;;  %vm3674_vm6 = vcmask (!%p138_p2), 1044480  }
   0x9   : > { %v5762_v42 = vld [vmem:[%s7005_s1 + $0xf0] sm:$0xff] (!%p138_p2)   ;;  %v5765_v56 = vld [vmem:[%s7005_s1 + $0xf8] sm:$0xff] (!%p138_p2)   ;;  %v5767_v63 = vld [vmem:[%s7005_s1] sm:$0xff] (!%p138_p2)   ;;  %vm4238_vm7 = vcmask (!%p138_p2), 781312  }
   0xb   : > { %5005 = vmatpush3.bf16.msra.mxu1 (!%p138_p2), %v5746_v2  ;;  %5197 = vmatpush3.bf16.msra.mxu0 (!%p138_p2), %v5747_v3 }
   0xc   : > { %5006 = vmatprep.subr.bf16.mxu1 (!%p138_p2), %v5748_v4  ;;  %5198 = vmatprep.subr.bf16.mxu0 (!%p138_p2), %v5749_v5 }
   0xd   : > { %s7009_s13 = smov (!%p161_p3, %s4330_s13), 1 }
   0xe   : > { %s5734_s26 = smul.u32 164, %s7009_s13 }
   0xf   : > { %5007 = vmatpush3.bf16.msra.mxu1 %v5748_v4  ;;  %5199 = vmatpush3.bf16.msra.mxu0 %v5749_v5  ;;  %s5735_s18 = smul.u32 144, %s7009_s13 }
  0x10   : > { %s5957_s6 = scalar_lea.vmem %s7004_s0, %s5734_s26  ;;  %5008 = vmatprep.subr.bf16.mxu1 %v5750_v6  ;;  %5200 = vmatprep.subr.bf16.mxu0 %v5751_v7 }
  0x11   : > { %v172_v10 = vld [vmem:[%s5957_s6] sm:$0xf]  ;;  %v173_v11 = vld [vmem:[%s5957_s6 + $0x4] sm:$0xf]  ;;  %v5970_v13 = vld [vmem:[%s5957_s6 + $0x8] sm:$0xff]   ;;  %s6883_s21 = scalar_lea.vmem %s7007_s3, %s5735_s18 }
  0x12   : > { %v5967_v12 = vcombine.low %v172_v10, %v173_v11  ;;  %v5973_v14 = vld [vmem:[%s5957_s6 + $0x10] sm:$0xff]   ;;  %v1351_v16 = vld [vmem:[%s5957_s6 + $0x8] sm:$0xe]  ;;  %v5980_v17 = vld [vmem:[%s5957_s6 + $0xc] sm:$0xf]  ;;  %v336_v21 = vshll.u32 %v5970_v13, 16 }
  0x13   : > { %5009 = vmatpush3.bf16.msra.mxu1 %v5750_v6  ;;  %v340_v22 = vshrl.u32 %v5970_v13, 16  ;;  %5201 = vmatpush3.bf16.msra.mxu0 %v5751_v7  ;;  %v5990_v23 = vcombine.low %v1351_v16, %v5980_v17  ;;  %v1861_v24 = vshrl.u32 %v5973_v14, 16  ;;  %v1864_v25 = vshll.u32 %v5973_v14, 16  ;;  %v5995_v28 = vld [vmem:[%s5957_s6 + $0x10] sm:$0xff]   ;;  %v5998_v29 = vld [vmem:[%s5957_s6 + $0x18] sm:$0xff]   ;;  %v6015_v50 = vld [vmem:[%s5957_s6 + $0x20] sm:$0xff]  }
  0x14   : > { %v329_v19 = vshrl.u32 %v5967_v12, 16  ;;  %v331_v20 = vshll.u32 %v5967_v12, 16  ;;  %5010 = vmatprep.subr.bf16.mxu1 %v5752_v8  ;;  %5202 = vmatprep.subr.bf16.mxu0 %v5753_v9  ;;  %v338_v27 = vrot.slane %v336_v21, 1  ;;  %v344_v36 = vshll.u32 %v5995_v28, 16  ;;  %v6011_v48 = vld [vmem:[%s5957_s6 + $0x18] sm:$0xff]   ;;  %v6027_v59 = vld [vmem:[%s5957_s6 + $0x20] sm:$0xff]  }
  0x15   : > { %v1853_v30 = vshrl.u32 %v5990_v23, 16  ;;  %v1856_v31 = vshll.u32 %v5990_v23, 16  ;;  %v1863_v32 = vrot.slane %v1861_v24, 1  ;;  %v1866_v33 = vrot.slane %v1864_v25, 2  ;;  %v6038_v3 = vld [vmem:[%s5957_s6 + $0x28] sm:$0xff]   ;;  %v5769_v6 = vld [vmem:[%s7005_s1 + $0x100] sm:$0xff]  }
  0x16   : > { %v333_v26 = vrot.slane %v331_v20, 1  ;;  %v342_v35 = vor.u32 %v340_v22, %v338_v27  ;;  %v1870_v37 = vshrl.u32 %v5998_v29, 16  ;;  %v1873_v41 = vshll.u32 %v5998_v29, 16  ;;  %v6054_v21 = vld [vmem:[%s5957_s6 + $0x30] sm:$0xff]  }
  0x17   : > { %5011 = vmatpush3.bf16.msra.mxu1 %v5752_v8  ;;  %5203 = vmatpush3.bf16.msra.mxu0 %v5753_v9  ;;  %v1855_v38 = vrot.slane %v1853_v30, 1  ;;  %v1858_v39 = vrot.slane %v1856_v31, 2  ;;  %v1867_v40 = vor.u32 %v1866_v33, %v1863_v32  ;;  %v346_v44 = vrot.slane %v344_v36, 1  ;;  %v6057_v22 = vld [vmem:[%s5957_s6 + $0x30] sm:$0xff]   ;;  %v6066_v33 = vld [vmem:[%s5957_s6 + $0x38] sm:$0xff]  }
  0x18   : > { %v334_v34 = vor.u32 %v333_v26, %v329_v19  ;;  %5012 = vmatprep.subr.bf16.mxu1 %v5754_v15  ;;  %5204 = vmatprep.subr.bf16.mxu0 %v5755_v18  ;;  %v1872_v45 = vrot.slane %v1870_v37, 1  ;;  %v1875_v47 = vrot.slane %v1873_v41, 2  ;;  %v348_v49 = vshrl.u32 %v5995_v28, 16 }
  0x19   : > { %v1859_v46 = vor.u32 %v1858_v39, %v1855_v38  ;;  %v347_v51 = vsel %vm327_vm1, %v342_v35, %v346_v44  ;;  %v352_v55 = vshll.u32 %v6011_v48, 16  ;;  %v1879_v57 = vshrl.u32 %v6015_v50, 16  ;;  %v5774_v35 = vld [vmem:[%s7005_s1 + $0x8] sm:$0xff]  }
  0x1a   : > { %v339_v43 = vsel %vm327_vm1, %v334_v34, %v338_v27  ;;  %v1876_v53 = vor.u32 %v1875_v47, %v1872_v45  ;;  %v350_v54 = vor.u32 %v348_v49, %v346_v44  ;;  %v1882_v58 = vshll.u32 %v6015_v50, 16 }
  0x1b   : > { %5014 = vmatprep.mubr.msk.bf16.mxu1 %vm512_vm0, %v339_v43  ;;  %5013 = vmatpush3.bf16.msra.mxu1 %v5754_v15  ;;  %v1868_v52 = vsel %vm1851_vm2, %v1859_v46, %v1867_v40  ;;  %v356_v60 = vshrl.u32 %v6011_v48, 16  ;;  %v354_v62 = vrot.slane %v352_v55, 1  ;;  %v1881_v0 = vrot.slane %v1879_v57, 1  ;;  %v6049_v15 = vld [vmem:[%s5957_s6 + $0x28] sm:$0xff]   ;;  %v6082_v46 = vld [vmem:[%s5957_s6 + $0x38] sm:$0xff]  }
  0x1c   : > { %5205 = vmatpush3.bf16.msra.mxu0 %v5755_v18  ;;  %5206 = vmatprep.mubr.msk.bf16.mxu0 %vm512_vm0, %v1868_v52  ;;  %v1877_v61 = vsel %vm1851_vm2, %v1867_v40, %v1876_v53  ;;  %v1884_v1 = vrot.slane %v1882_v58, 2  ;;  %v360_v2 = vshll.u32 %v6027_v59, 16  ;;  %v364_v7 = vshrl.u32 %v6027_v59, 16  ;;  %v5775_v40 = vld [vmem:[%s7005_s1 + $0x108] sm:$0xff]  }
  0x1d   : > { %5242 = vmatprep.subr.bf16.mxu0 %v5762_v42  ;;  %v355_v4 = vsel %vm327_vm1, %v350_v54, %v354_v62  ;;  %v358_v5 = vor.u32 %v356_v60, %v354_v62  ;;  %5050 = vmatprep.subr.bf16.mxu1 %v5767_v63  ;;  %v1888_v10 = vshrl.u32 %v6038_v3, 16  ;;  %v1891_v11 = vshll.u32 %v6038_v3, 16  ;;  %v6090_v54 = vld [vmem:[%s5957_s6 + $0x40] sm:$0xff]  }
  0x1e   : > { %5015 = vmatmul.mubr.msk.bf16.vlgmr.msra.gmra.mrb[0].mxu1 %vm512_vm0, %v347_v51  ;;  %v1885_v8 = vor.u32 %v1884_v1, %v1881_v0  ;;  %v362_v9 = vrot.slane %v360_v2, 1  ;;  %v368_v25 = vshll.u32 %v6049_v15, 16  ;;  %v372_v26 = vshrl.u32 %v6049_v15, 16  ;;  %v6100_v0 = vld [vmem:[%s5957_s6 + $0x48] sm:$0xff]   ;;  %v5780_v2 = vld [vmem:[%s7005_s1 + $0x110] sm:$0xff]  }
  0x1f   : > { %5207 = vmatmul.mubr.msk.bf16.vlgmr.msra.gmra.mrb[0].mxu0 %vm512_vm0, %v1877_v61  ;;  %5018 = vmatprep.mubr.msk.bf16.mxu1 %vm512_vm0, %v355_v4  ;;  %v1890_v19 = vrot.slane %v1888_v10, 1  ;;  %v1893_v20 = vrot.slane %v1891_v11, 2  ;;  %v1897_v30 = vshrl.u32 %v6054_v21, 16  ;;  %v1900_v31 = vshll.u32 %v6054_v21, 16 }
  0x20   : > { %5243 = vmatpush3.bf16.msra.mxu0 %v5762_v42  ;;  %5051 = vmatpush3.bf16.msra.mxu1 %v5767_v63  ;;  %v1886_v16 = vsel %vm1851_vm2, %v1876_v53, %v1885_v8  ;;  %v363_v18 = vsel %vm327_vm1, %v358_v5, %v362_v9  ;;  %v366_v24 = vor.u32 %v364_v7, %v362_v9  ;;  %v376_v32 = vshll.u32 %v6057_v22, 16  ;;  %v6087_v53 = vld [vmem:[%s5957_s6 + $0x40] sm:$0xff]  }
  0x21   : > { %5244 = vmatprep.subr.bf16.mxu0 %v5765_v56  ;;  %5210 = vmatprep.mubr.msk.bf16.mxu0 %vm512_vm0, %v1886_v16  ;;  %v1894_v27 = vor.u32 %v1893_v20, %v1890_v19  ;;  %v370_v34 = vrot.slane %v368_v25, 1  ;;  %v1899_v37 = vrot.slane %v1897_v30, 1  ;;  %v1902_v38 = vrot.slane %v1900_v31, 2  ;;  %v6122_v30 = vld [vmem:[%s5957_s6 + $0x50] sm:$0xff]  }
  0x22   : > { %v378_v39 = vrot.slane %v376_v32, 1  ;;  %v1906_v43 = vshrl.u32 %v6066_v33, 16  ;;  %v1909_v44 = vshll.u32 %v6066_v33, 16  ;;  %5052 = vmatprep.subr.bf16.mxu1 %v5774_v35  ;;  %v380_v47 = vshrl.u32 %v6057_v22, 16 }
  0x23   : > { %v1895_v36 = vsel %vm1851_vm2, %v1885_v8, %v1894_v27  ;;  %v371_v41 = vsel %vm327_vm1, %v366_v24, %v370_v34  ;;  %v374_v42 = vor.u32 %v372_v26, %v370_v34  ;;  %v1903_v45 = vor.u32 %v1902_v38, %v1899_v37  ;;  %v6108_v8 = vld [vmem:[%s5957_s6 + $0x48] sm:$0xff]  }
  0x24   : > { %5245 = vmatpush3.bf16.msra.mxu0 %v5765_v56  ;;  %v1908_v51 = vrot.slane %v1906_v43, 1  ;;  %v1911_v52 = vrot.slane %v1909_v44, 2  ;;  %5053 = vmatpush3.bf16.msra.mxu1 %v5774_v35  ;;  %v382_v56 = vor.u32 %v380_v47, %v378_v39  ;;  %v384_v57 = vshll.u32 %v6082_v46, 16 }
  0x25   : > { %5246 = vmatprep.subr.bf16.mxu0 %v5769_v6  ;;  %v379_v49 = vsel %vm327_vm1, %v374_v42, %v378_v39  ;;  %v1904_v55 = vsel %vm1851_vm2, %v1894_v27, %v1903_v45  ;;  %v388_v58 = vshrl.u32 %v6082_v46, 16  ;;  %v1915_v61 = vshrl.u32 %v6087_v53, 16  ;;  %v6119_v27 = vld [vmem:[%s5957_s6 + $0x50] sm:$0xff]   ;;  %v6135_v42 = vld [vmem:[%s5957_s6 + $0x58] sm:$0xff]  }
  0x26   : > { %5019 = vmatmul.mubr.msk.bf16.gmra.mrb[4].mxu1 %vm512_vm0, %v363_v18  ;;  %v1912_v60 = vor.u32 %v1911_v52, %v1908_v51  ;;  %v1918_v62 = vshll.u32 %v6087_v53, 16  ;;  %v392_v63 = vshll.u32 %v6090_v54, 16  ;;  %v386_v1 = vrot.slane %v384_v57, 1  ;;  %v5786_v51 = vld [vmem:[%s7005_s1 + $0x118] sm:$0xff]  }
  0x27   : > { %5211 = vmatmul.mubr.msk.bf16.gmra.mrb[4].mxu0 %vm512_vm0, %v1895_v36  ;;  %5022 = vmatprep.mubr.msk.bf16.mxu1 %vm512_vm0, %v371_v41  ;;  %v1917_v5 = vrot.slane %v1915_v61, 1  ;;  %v1924_v11 = vshrl.u32 %v6100_v0, 16  ;;  %v1927_v16 = vshll.u32 %v6100_v0, 16  ;;  %v396_v19 = vshrl.u32 %v6090_v54, 16 }
  0x28   : > { %5247 = vmatpush3.bf16.msra.mxu0 %v5769_v6  ;;  %5214 = vmatprep.mubr.msk.bf16.mxu0 %vm512_vm0, %v1904_v55  ;;  %v1913_v4 = vsel %vm1851_vm2, %v1903_v45, %v1912_v60  ;;  %v1920_v6 = vrot.slane %v1918_v62, 2  ;;  %v394_v7 = vrot.slane %v392_v63, 1  ;;  %v387_v9 = vsel %vm327_vm1, %v382_v56, %v386_v1 }
  0x29   : > { %5248 = vmatprep.subr.bf16.mxu0 %v5775_v40  ;;  %v390_v10 = vor.u32 %v388_v58, %v386_v1  ;;  %v400_v20 = vshll.u32 %v6108_v8, 16  ;;  %v1926_v25 = vrot.slane %v1924_v11, 1  ;;  %v1929_v26 = vrot.slane %v1927_v16, 2  ;;  %v6147_v58 = vld [vmem:[%s5957_s6 + $0x58] sm:$0xff]  }
  0x2a   : > { %v1921_v18 = vor.u32 %v1920_v6, %v1917_v5  ;;  %v398_v32 = vor.u32 %v396_v19, %v394_v7  ;;  %v404_v35 = vshrl.u32 %v6108_v8, 16  ;;  %v1933_v37 = vshrl.u32 %v6119_v27, 16  ;;  %v6156_v6 = vld [vmem:[%s5957_s6 + $0x60] sm:$0xff]   ;;  %v6171_v19 = vld [vmem:[%s5957_s6 + $0x68] sm:$0xff]  }
  0x2b   : > { %v395_v24 = vsel %vm327_vm1, %v390_v10, %v394_v7  ;;  %v402_v34 = vrot.slane %v400_v20, 1  ;;  %v1930_v36 = vor.u32 %v1929_v26, %v1926_v25  ;;  %v1936_v38 = vshll.u32 %v6119_v27, 16 }
  0x2c   : > { %5249 = vmatpush3.bf16.msra.mxu0 %v5775_v40  ;;  %v1922_v31 = vsel %vm1851_vm2, %v1912_v60, %v1921_v18  ;;  %v408_v39 = vshll.u32 %v6122_v30, 16  ;;  %v5784_v40 = vld [vmem:[%s7005_s1 + $0x10] sm:$0xff]   ;;  %v412_v43 = vshrl.u32 %v6122_v30, 16  ;;  %v1935_v45 = vrot.slane %v1933_v37, 1  ;;  %v2325_v60 = vld [vmem:[%s5957_s6 + $0x8] sm:$0xc] }
  0x2d   : > { %5250 = vmatprep.subr.bf16.mxu0 %v5780_v2  ;;  %v403_v41 = vsel %vm327_vm1, %v398_v32, %v402_v34  ;;  %v1931_v44 = vsel %vm1851_vm2, %v1921_v18, %v1930_v36  ;;  %v1938_v47 = vrot.slane %v1936_v38, 2  ;;  %5054 = vmatprep.subr.bf16.mxu1 %v5784_v40  ;;  %v1942_v52 = vshrl.u32 %v6135_v42, 16  ;;  %v6186_v38 = vld [vmem:[%s5957_s6 + $0x78] sm:$0xff]  }
  0x2e   : > { %5023 = vmatmul.mubr.msk.bf16.gmra.mrb[8].mxu1 %vm512_vm0, %v379_v49  ;;  %v410_v49 = vrot.slane %v408_v39, 1  ;;  %v1945_v55 = vshll.u32 %v6135_v42, 16  ;;  %v406_v57 = vor.u32 %v404_v35, %v402_v34  ;;  %v4557_v1 = vcombine.low %v2325_v60, %v5980_v17  ;;  %v5790_v17 = vld [vmem:[%s7005_s1 + $0x120] sm:$0xff]   ;;  %v6181_v34 = vld [vmem:[%s5957_s6 + $0x70] sm:$0xff]  }
  0x2f   : > { %5215 = vmatmul.mubr.msk.bf16.gmra.mrb[8].mxu0 %vm512_vm0, %v1913_v4  ;;  %5026 = vmatprep.mubr.msk.bf16.mxu1 %vm512_vm0, %v387_v9  ;;  %v1939_v56 = vor.u32 %v1938_v47, %v1935_v45  ;;  %v1944_v61 = vrot.slane %v1942_v52, 1  ;;  %v416_v4 = vshll.u32 %v6147_v58, 16  ;;  %v2344_v5 = vrot.slane %v5973_v14, 2  ;;  %v5791_v14 = vld [vmem:[%s7005_s1 + $0x18] sm:$0xff]   ;;  %v5797_v45 = vld [vmem:[%s7005_s1 + $0x20] sm:$0xff]  }
  0x30   : > { %5251 = vmatpush3.bf16.msra.mxu0 %v5780_v2  ;;  %5218 = vmatprep.mubr.msk.bf16.mxu0 %vm512_vm0, %v1922_v31  ;;  %v1947_v62 = vrot.slane %v1945_v55, 2  ;;  %v414_v63 = vor.u32 %v412_v43, %v410_v49  ;;  %v420_v7 = vshrl.u32 %v6147_v58, 16  ;;  %v2343_v10 = vrot.slane %v4557_v1, 2  ;;  %v6214_v1 = vld [vmem:[%s5957_s6 + $0x88] sm:$0xff]  }
  0x31   : > { %5055 = vmatpush3.bf16.msra.mxu1 %v5784_v40  ;;  %5252 = vmatprep.subr.bf16.mxu0 %v5786_v51  ;;  %v1940_v2 = vsel %vm1851_vm2, %v1930_v36, %v1939_v56  ;;  %v411_v11 = vsel %vm327_vm1, %v406_v57, %v410_v49  ;;  %v418_v16 = vrot.slane %v416_v4, 1  ;;  %v424_v18 = vshll.u32 %v6156_v6, 16 }
  0x32   : > { %v6160_v9 = vor.u32 %v1947_v62, %v1944_v61  ;;  %v428_v20 = vshrl.u32 %v6156_v6, 16  ;;  %5056 = vmatprep.subr.bf16.mxu1 %v5791_v14  ;;  %v432_v26 = vshll.u32 %v6171_v19, 16  ;;  %v2345_v31 = vsel %vm2342_vm3, %v2343_v10, %v2344_v5 }
  0x33   : > { %v419_v25 = vsel %vm327_vm1, %v414_v63, %v418_v16  ;;  %v426_v32 = vrot.slane %v424_v18, 1  ;;  %v422_v35 = vor.u32 %v420_v7, %v418_v16  ;;  %v2346_v39 = vrot.slane %v5998_v29, 2  ;;  %v6229_v7 = vld [vmem:[%s7005_s1 + $0x60] sm:$0xff]   ;;  %v6236_v18 = vld [vmem:[%s5957_s6 + $0x90] ss:$0 sps:$4 sm:$0x11]  }
  0x34   : > { %5253 = vmatpush3.bf16.msra.mxu0 %v5786_v51  ;;  %v434_v37 = vrot.slane %v432_v26, 1  ;;  %v2348_v40 = vrot.slane %v6015_v50, 2  ;;  %v444_v49 = vshrl.u32 %v6181_v34, 16  ;;  %v448_v51 = vshll.u32 %v6186_v38, 16  ;;  %v6202_v50 = vld [vmem:[%s5957_s6 + $0x80] sm:$0xff]  }
  0x35   : > { %5290 = vmatprep.subr.bf16.mxu0 %v5790_v17  ;;  %5057 = vmatpush3.bf16.msra.mxu1 %v5791_v14  ;;  %v430_v36 = vor.u32 %v428_v20, %v426_v32  ;;  %v427_v43 = vsel %vm327_vm1, %v422_v35, %v426_v32  ;;  %v2347_v29 = vsel %vm2342_vm3, %v2344_v5, %v2346_v39  ;;  %v2350_v60 = vrot.slane %v6038_v3, 2  ;;  %v5800_v3 = vld [vmem:[%s7005_s1 + $0x130] sm:$0xff]  }
  0x36   : > { %5027 = vmatmul.mubr.msk.bf16.gmra.mrb[12].mxu1 %vm512_vm0, %v395_v24  ;;  %v1949_v24 = vsel %vm1851_vm2, %v1939_v56, %v6160_v9  ;;  %5058 = vmatprep.subr.bf16.mxu1 %v5797_v45  ;;  %v2349_v52 = vsel %vm2342_vm3, %v2346_v39, %v2348_v40  ;;  %v5794_v56 = vld [vmem:[%s7005_s1 + $0x128] sm:$0xff]   ;;  %v450_v62 = vrot.slane %v448_v51, 1  ;;  %v2352_v63 = vrot.slane %v6054_v21, 2  ;;  %v6270_v51 = vld [vmem:[%s7005_s1 + $0x150] sm:$0xff]  }
  0x37   : > { %5030 = vmatprep.mubr.msk.bf16.mxu1 %vm512_vm0, %v403_v41  ;;  %5219 = vmatmul.mubr.msk.bf16.gmra.mrb[12].mxu0 %vm512_vm0, %v1931_v44  ;;  %v440_v41 = vshll.u32 %v6181_v34, 16  ;;  %v436_v44 = vshrl.u32 %v6171_v19, 16  ;;  %v435_v47 = vsel %vm327_vm1, %v430_v36, %v434_v37  ;;  %v456_v4 = vshll.u32 %v6202_v50, 16  ;;  %v5808_v36 = vld [vmem:[%s7005_s1 + $0x140] sm:$0xff]  }
  0x38   : > { %5222 = vmatprep.mubr.msk.bf16.mxu0 %vm512_vm0, %v1940_v2  ;;  %v5801_v2 = vld [vmem:[%s7005_s1 + $0x28] sm:$0xff]   ;;  %v452_v5 = vshrl.u32 %v6186_v38, 16  ;;  %v2351_v16 = vsel %vm2342_vm3, %v2348_v40, %v2350_v60  ;;  %v2353_v14 = vsel %vm2342_vm3, %v2350_v60, %v2352_v63  ;;  %v2354_v32 = vrot.slane %v6066_v33, 2 }
  0x39   : > { %v442_v55 = vrot.slane %v440_v41, 1  ;;  %v438_v57 = vor.u32 %v436_v44, %v434_v37  ;;  %5059 = vmatpush3.bf16.msra.mxu1 %v5797_v45  ;;  %v458_v20 = vrot.slane %v456_v4, 1  ;;  %v2356_v35 = vrot.slane %v6087_v53, 2  ;;  %v5812_v53 = vld [vmem:[%s7005_s1 + $0x148] sm:$0xff]   ;;  %v6314_v4 = vld [vmem:[%s5957_s6 + $0x78] sm:$0xff]  }
  0x3a   : > { %5060 = vmatprep.subr.bf16.mxu1 %v5801_v2  ;;  %v468_v39 = vshrl.u32 %v6214_v1, 16  ;;  %v472_v40 = vshll.u32 %v6236_v18, 16 }
  0x3b   : > { %v446_v61 = vor.u32 %v444_v49, %v442_v55  ;;  %v443_v21 = vsel %vm327_vm1, %v438_v57, %v442_v55  ;;  %v2357_v33 = vsel %vm2342_vm3, %v2354_v32, %v2356_v35  ;;  %v2360_v49 = vrot.slane %v6119_v27, 2  ;;  %v6277_v55 = vld [vmem:[%s5957_s6 + $0x60] sm:$0xff]   ;;  %v5809_v57 = vld [vmem:[%s7005_s1 + $0x68] sm:$0xff]  }
  0x3c   : > { %v474_v45 = vrot.slane %v472_v40, 1  ;;  %v2362_v27 = vrot.slane %v6135_v42, 2  ;;  %v5814_v42 = vld [vmem:[%s7005_s1 + $0x70] sm:$0xff]   ;;  %v6382_v40 = vld [vmem:[%s5957_s6 + $0x20] sm:$0xff]  }
  0x3d   : > { %5061 = vmatpush3.bf16.msra.mxu1 %v5801_v2  ;;  %v451_v10 = vsel %vm327_vm1, %v446_v61, %v450_v62  ;;  %v6291_v61 = vld [vmem:[%s5957_s6 + $0x68] sm:$0xff]  }
  0x3e   : > { %5031 = vmatmul.mubr.msk.bf16.gmra.mrb[16].mxu1 %vm512_vm0, %v411_v11  ;;  %v464_v11 = vshll.u32 %v6214_v1, 16  ;;  %5098 = vmatprep.subr.bf16.mxu1 %v6229_v7  ;;  %v2363_v60 = vsel %vm2342_vm3, %v2360_v49, %v2362_v27 }
  0x3f   : > { %5034 = vmatprep.mubr.msk.bf16.mxu1 %vm512_vm0, %v419_v25  ;;  %5223 = vmatmul.mubr.msk.bf16.gmra.mrb[16].mxu0 %vm512_vm0, %v1949_v24  ;;  %v5802_v24 = vld [vmem:[%s7005_s1 + $0x138] sm:$0xff]   ;;  %v454_v25 = vor.u32 %v452_v5, %v450_v62  ;;  %v6297_v62 = vld [vmem:[%s5957_s6 + $0x70] sm:$0xff]   ;;  %v5825_v5 = vld [vmem:[%s7005_s1 + $0x80] sm:$0xff]  }
  0x40   : > { %5254 = vmatprep.mubr.msk.bf16.mxu0 %vm512_vm0, %v2345_v31  ;;  %v466_v31 = vrot.slane %v464_v11, 1 }
  0x41   : > { %v459_v37 = vsel %vm327_vm1, %v454_v25, %v458_v20  ;;  %v6357_v25 = vld [vmem:[%s5957_s6 + $0x14] sm:$0xf] }
  0x42   : > { %v470_v44 = vor.u32 %v468_v39, %v466_v31 }
  0x46   : > { %5035 = vmatmul.mubr.msk.bf16.gmra.mrb[20].mxu1 %vm512_vm0, %v427_v43  ;;  %v2355_v43 = vsel %vm2342_vm3, %v2352_v63, %v2354_v32  ;;  %v2368_v63 = vrot.slane %v6297_v62, 2 }
  0x47   : > { %5038 = vmatprep.mubr.msk.bf16.mxu1 %vm512_vm0, %v435_v47  ;;  %5255 = vmatmul.mubr.msk.bf16.vlgmr.msra.gmra.mrb[0].mxu0 %vm512_vm0, %v2347_v29  ;;  %v2358_v47 = vrot.slane %v6100_v0, 2  ;;  %v475_v29 = vsel %vm327_vm1, %v470_v44, %v474_v45  ;;  %v6398_v44 = vld [vmem:[%s5957_s6 + $0x30] sm:$0xff]  }
  0x48   : > { %5291 = vmatpush3.bf16.msra.mxu0 %v5790_v17  ;;  %5258 = vmatprep.mubr.msk.bf16.mxu0 %vm512_vm0, %v2349_v52  ;;  %v460_v17 = vshrl.u32 %v6202_v50, 16 }
  0x49   : > { %5292 = vmatprep.subr.bf16.mxu0 %v5794_v56  ;;  %v2359_v52 = vsel %vm2342_vm3, %v2356_v35, %v2358_v47  ;;  %v2361_v0 = vsel %vm2342_vm3, %v2358_v47, %v2360_v49  ;;  %v6371_v35 = vld [vmem:[%s5957_s6 + $0x18] sm:$0xff]   ;;  %v2833_v49 = vrot.slane %v6398_v44, 2 }
  0x4a   : > { %v462_v26 = vor.u32 %v460_v17, %v458_v20  ;;  %v6336_v17 = vld [vmem:[%s5957_s6 + $0x88] sm:$0xff]   ;;  %v6407_v47 = vld [vmem:[%s5957_s6 + $0x38] sm:$0xff]  }
  0x4c   : > { %5293 = vmatpush3.bf16.msra.mxu0 %v5794_v56  ;;  %v467_v41 = vsel %vm327_vm1, %v462_v26, %v466_v31  ;;  %v2364_v56 = vrot.slane %v6277_v55, 2  ;;  %v6362_v26 = vld [vmem:[%s5957_s6 + $0x98] ss:$0 sps:$4 sm:$0x33]  }
  0x4d   : > { %5294 = vmatprep.subr.bf16.mxu0 %v5800_v3 }
  0x4e   : > { %5039 = vmatmul.mubr.msk.bf16.gmra.mrb[24].mxu1 %vm512_vm0, %v443_v21  ;;  %v6320_v21 = vld [vmem:[%s5957_s6 + $0x80] sm:$0xff]  }
  0x4f   : > { %5042 = vmatprep.mubr.msk.bf16.mxu1 %vm512_vm0, %v451_v10  ;;  %5259 = vmatmul.mubr.msk.bf16.gmra.mrb[4].mxu0 %vm512_vm0, %v2351_v16  ;;  %v6342_v16 = vld [vmem:[%s5957_s6 + $0x90] sm:$0xff]  }
  0x50   : > { %5262 = vmatprep.mubr.msk.bf16.mxu0 %vm512_vm0, %v2353_v14  ;;  %5295 = vmatpush3.bf16.msra.mxu0 %v5800_v3  ;;  %v6350_v14 = vld [vmem:[%s7005_s1 + $0x90] sm:$0xff]   ;;  %v2376_v20 = vrot.slane %v6342_v16, 2 }
  0x51   : > { %5296 = vmatprep.subr.bf16.mxu0 %v5802_v24 }
  0x54   : > { %5297 = vmatpush3.bf16.msra.mxu0 %v5802_v24  ;;  %v2683_v24 = vld [vmem:[%s5957_s6 + $0x10] sm:$0xc] }
  0x55   : > { %5298 = vmatprep.subr.bf16.mxu0 %v5808_v36  ;;  %v6368_v32 = vcombine.low %v2683_v24, %v6357_v25  ;;  %v6466_v24 = vld [vmem:[%s7005_s1 + $0x180] sm:$0xff]  }
  0x56   : > { %5043 = vmatmul.mubr.msk.bf16.gmra.mrb[28].mxu1 %vm512_vm0, %v459_v37 }
  0x57   : > { %5046 = vmatprep.mubr.msk.bf16.mxu1 %vm512_vm0, %v467_v41  ;;  %5263 = vmatmul.mubr.msk.bf16.gmra.mrb[8].mxu0 %vm512_vm0, %v2355_v43  ;;  %v2826_v37 = vrot.slane %v6368_v32, 2  ;;  %v6388_v41 = vld [vmem:[%s5957_s6 + $0x28] sm:$0xff]   ;;  %v2829_v43 = vrot.slane %v6382_v40, 2 }
  0x58   : > { %5266 = vmatprep.mubr.msk.bf16.mxu0 %vm512_vm0, %v2357_v33  ;;  %5299 = vmatpush3.bf16.msra.mxu0 %v5808_v36  ;;  %v2378_v36 = vrot.slane %v6362_v26, 2  ;;  %v2831_v33 = vrot.slane %v6388_v41, 2 }
  0x59   : > { %5300 = vmatprep.subr.bf16.mxu0 %v5812_v53 }
  0x5a   : > { %v2379_v39 = vsel %vm2342_vm3, %v2376_v20, %v2378_v36  ;;  %v2832_v45 = vsel %vm2342_vm3, %v2829_v43, %v2831_v33  ;;  %v6471_v36 = vld [vmem:[%s5957_s6 + $0x60] sm:$0xff]  }
  0x5c   : > { %5301 = vmatpush3.bf16.msra.mxu0 %v5812_v53 }
  0x5d   : > { %5338 = vmatprep.subr.bf16.mxu0 %v6270_v51 }
  0x5e   : > { %5047 = vmatmul.mubr.msk.bf16.gmra.mrb[32].mxu1 %vm512_vm0, %v475_v29  ;;  %v2835_v29 = vrot.slane %v6407_v47, 2 }
  0x5f   : > { %5062 = vmatprep.mubr.msk.bf16.mxu1 %vm512_vm0, %v5967_v12  ;;  %5267 = vmatmul.mubr.msk.bf16.gmra.mrb[12].mxu0 %vm512_vm0, %v2359_v52  ;;  %v2365_v12 = vsel %vm2342_vm3, %v2362_v27, %v2364_v56  ;;  %v5829_v52 = vld [vmem:[%s7005_s1 + $0x160] sm:$0xff]  }
  0x60   : > { %5270 = vmatprep.mubr.msk.bf16.mxu0 %vm512_vm0, %v2361_v0  ;;  %v2834_v0 = vsel %vm2342_vm3, %v2831_v33, %v2833_v49  ;;  %v6421_v27 = vld [vmem:[%s5957_s6 + $0x40] sm:$0xff]  }
  0x66   : > { %5063 = vmatmul.mubr.msk.bf16.vlgmr.msra.gmra.mrb[0].mxu1 %vm512_vm0, %v5970_v13  ;;  %v2366_v13 = vrot.slane %v6291_v61, 2 }
  0x67   : > { %5066 = vmatprep.mubr.msk.bf16.mxu1 %vm512_vm0, %v5995_v28  ;;  %5099 = vmatpush3.bf16.msra.mxu1 %v6229_v7  ;;  %v5820_v28 = vld [vmem:[%s7005_s1 + $0x78] sm:$0xff]   ;;  %v2372_v7 = vrot.slane %v6320_v21, 2 }
  0x68   : > { %5271 = vmatmul.mubr.msk.bf16.gmra.mrb[16].mxu0 %vm512_vm0, %v2363_v60  ;;  %5100 = vmatprep.subr.bf16.mxu1 %v5809_v57  ;;  %v2367_v2 = vsel %vm2342_vm3, %v2364_v56, %v2366_v13  ;;  %v2369_v3 = vsel %vm2342_vm3, %v2366_v13, %v2368_v63  ;;  %v6427_v56 = vld [vmem:[%s5957_s6 + $0x48] sm:$0xff]   ;;  %v2837_v60 = vrot.slane %v6421_v27, 2  ;;  %v5840_v13 = vld [vmem:[%s7005_s1 + $0x170] sm:$0xff]  }
  0x69   : > { %5274 = vmatprep.mubr.msk.bf16.mxu0 %vm512_vm0, %v2365_v12  ;;  %v993_v12 = vld [vmem:[%s5957_s6] sm:$0xe] }
  0x6b   : > { %5101 = vmatpush3.bf16.msra.mxu1 %v5809_v57  ;;  %v5834_v57 = vld [vmem:[%s7005_s1 + $0x168] sm:$0xff]  }
  0x6c   : > { %5102 = vmatprep.subr.bf16.mxu1 %v5814_v42 }
  0x6e   : > { %5067 = vmatmul.mubr.msk.bf16.gmra.mrb[4].mxu1 %vm512_vm0, %v6011_v48  ;;  %v2370_v48 = vrot.slane %v6314_v4, 2 }
  0x6f   : > { %5070 = vmatprep.mubr.msk.bf16.mxu1 %vm512_vm0, %v6027_v59  ;;  %5103 = vmatpush3.bf16.msra.mxu1 %v5814_v42  ;;  %v5830_v59 = vld [vmem:[%s7005_s1 + $0x88] sm:$0xff]   ;;  %v2839_v42 = vrot.slane %v6427_v56, 2 }
  0x70   : > { %5275 = vmatmul.mubr.msk.bf16.gmra.mrb[20].mxu0 %vm512_vm0, %v2367_v2  ;;  %5104 = vmatprep.subr.bf16.mxu1 %v5820_v28  ;;  %v2371_v10 = vsel %vm2342_vm3, %v2368_v63, %v2370_v48  ;;  %v2373_v11 = vsel %vm2342_vm3, %v2370_v48, %v2372_v7  ;;  %v5860_v63 = vld [vmem:[%s5957_s6 + $0x4] sm:$0xf]  ;;  %v2838_v2 = vsel %vm2342_vm3, %v2835_v29, %v2837_v60  ;;  %v6451_v48 = vld [vmem:[%s5957_s6 + $0x58] sm:$0xff]  }
  0x71   : > { %5278 = vmatprep.mubr.msk.bf16.mxu0 %vm512_vm0, %v2369_v3  ;;  %v6445_v3 = vld [vmem:[%s5957_s6 + $0x50] sm:$0xff]  }
  0x73   : > { %5105 = vmatpush3.bf16.msra.mxu1 %v5820_v28  ;;  %v4428_v28 = vcombine.low %v993_v12, %v5860_v63  ;;  %v5846_v63 = vld [vmem:[%s7005_s1 + $0xa0] sm:$0xff]  }
  0x74   : > { %5106 = vmatprep.subr.bf16.mxu1 %v5825_v5 }
  0x76   : > { %5071 = vmatmul.mubr.msk.bf16.gmra.mrb[8].mxu1 %vm512_vm0, %v6049_v15  ;;  %v2374_v15 = vrot.slane %v6336_v17, 2 }
  0x77   : > { %5074 = vmatprep.mubr.msk.bf16.mxu1 %vm512_vm0, %v6057_v22  ;;  %5107 = vmatpush3.bf16.msra.mxu1 %v5825_v5  ;;  %v2840_v5 = vsel %vm2342_vm3, %v2837_v60, %v2839_v42  ;;  %v5864_v60 = vld [vmem:[%s5957_s6 + $0x20] sm:$0xff]  }
  0x78   : > { %5279 = vmatmul.mubr.msk.bf16.gmra.mrb[24].mxu0 %vm512_vm0, %v2371_v10  ;;  %5108 = vmatprep.subr.bf16.mxu1 %v5830_v59  ;;  %v2375_v22 = vsel %vm2342_vm3, %v2372_v7, %v2374_v15  ;;  %v2377_v31 = vsel %vm2342_vm3, %v2374_v15, %v2376_v20  ;;  %v5844_v7 = vld [vmem:[%s7005_s1 + $0x178] sm:$0xff]   ;;  %v5861_v10 = vld [vmem:[%s5957_s6 + $0x8] sm:$0xff]   ;;  %v2841_v15 = vrot.slane %v6445_v3, 2  ;;  %v2843_v20 = vrot.slane %v6451_v48, 2 }
  0x79   : > { %5282 = vmatprep.mubr.msk.bf16.mxu0 %vm512_vm0, %v2373_v11  ;;  %v1012_v11 = vrot.slane %v5861_v10, 1  ;;  %v1018_v12 = vrot.slane %v5864_v60, 1  ;;  %v6519_v10 = vld [vmem:[%s5957_s6 + $0x80] sm:$0xff]  }
  0x7b   : > { %5109 = vmatpush3.bf16.msra.mxu1 %v5830_v59  ;;  %v1011_v59 = vrot.slane %v4428_v28, 1 }
  0x7c   : > { %5146 = vmatprep.subr.bf16.mxu1 %v6350_v14 }
  0x7e   : > { %5075 = vmatmul.mubr.msk.bf16.gmra.mrb[12].mxu1 %vm512_vm0, %v6082_v46  ;;  %v2827_v46 = vrot.slane %v6371_v35, 2 }
  0x7f   : > { %5078 = vmatprep.mubr.msk.bf16.mxu1 %vm512_vm0, %v6090_v54 }
  0x80   : > { %5283 = vmatmul.mubr.msk.bf16.gmra.mrb[28].mxu0 %vm512_vm0, %v2375_v22  ;;  %v2828_v54 = vsel %vm2342_vm3, %v2826_v37, %v2827_v46  ;;  %v2830_v53 = vsel %vm2342_vm3, %v2827_v46, %v2829_v43  ;;  %v1013_v22 = vsel %vm1010_vm4, %v1011_v59, %v1012_v11  ;;  %v2844_v37 = vsel %vm2342_vm3, %v2841_v15, %v2843_v20  ;;  %v6477_v46 = vld [vmem:[%s5957_s6 + $0x68] sm:$0xff]   ;;  %v5863_v43 = vld [vmem:[%s5957_s6 + $0x18] sm:$0xff]  }
  0x81   : > { %5286 = vmatprep.mubr.msk.bf16.mxu0 %vm512_vm0, %v2377_v31  ;;  %v2842_v31 = vsel %vm2342_vm3, %v2839_v42, %v2841_v15  ;;  %v1016_v33 = vrot.slane %v5863_v43, 1  ;;  %v5865_v42 = vld [vmem:[%s5957_s6 + $0x28] sm:$0xff]  }
  0x82   : > { %v6524_v15 = vld [vmem:[%s5957_s6 + $0x88] sm:$0xff]  }
  0x83   : > { %v2855_v43 = vrot.slane %v6524_v15, 2 }
  0x86   : > { %5079 = vmatmul.mubr.msk.bf16.gmra.mrb[16].mxu1 %vm512_vm0, %v6108_v8 }
  0x87   : > { %5082 = vmatprep.mubr.msk.bf16.mxu1 %vm512_vm0, %v6122_v30  ;;  %v5823_v30 = vld [vmem:[%s7005_s1 + $0x158] sm:$0xff]  }
  0x88   : > { %5287 = vmatmul.mubr.msk.bf16.gmra.mrb[32].mxu0 %vm512_vm0, %v2379_v39  ;;  %v5862_v39 = vld [vmem:[%s5957_s6 + $0x10] sm:$0xff]  }
  0x89   : > { %5302 = vmatprep.mubr.msk.bf16.mxu0 %vm512_vm0, %v2828_v54  ;;  %v1014_v54 = vrot.slane %v5862_v39, 1  ;;  %v5851_v39 = vld [vmem:[%s7005_s1 + $0xb0] sm:$0xff]  }
  0x8e   : > { %5083 = vmatmul.mubr.msk.bf16.gmra.mrb[20].mxu1 %vm512_vm0, %v6147_v58 }
  0x8f   : > { %5086 = vmatprep.mubr.msk.bf16.mxu1 %vm512_vm0, %v6156_v6 }
  0x90   : > { %5303 = vmatmul.mubr.msk.bf16.vlgmr.msra.gmra.mrb[0].mxu0 %vm512_vm0, %v2830_v53  ;;  %v2845_v53 = vrot.slane %v6471_v36, 2 }
  0x91   : > { %5339 = vmatpush3.bf16.msra.mxu0 %v6270_v51  ;;  %5306 = vmatprep.mubr.msk.bf16.mxu0 %vm512_vm0, %v2832_v45  ;;  %v2836_v51 = vsel %vm2342_vm3, %v2833_v49, %v2835_v29  ;;  %v2847_v45 = vrot.slane %v6477_v46, 2  ;;  %v1017_v49 = vsel %vm1010_vm4, %v1014_v54, %v1016_v33  ;;  %v5841_v29 = vld [vmem:[%s7005_s1 + $0x98] sm:$0xff]  }
  0x92   : > { %5340 = vmatprep.subr.bf16.mxu0 %v5823_v30 }
  0x95   : > { %5341 = vmatpush3.bf16.msra.mxu0 %v5823_v30  ;;  %v1015_v30 = vsel %vm1010_vm4, %v1012_v11, %v1014_v54  ;;  %v2853_v54 = vrot.slane %v6519_v10, 2 }
  0x96   : > { %5087 = vmatmul.mubr.msk.bf16.gmra.mrb[24].mxu1 %vm512_vm0, %v6171_v19  ;;  %5342 = vmatprep.subr.bf16.mxu0 %v5829_v52 }
  0x97   : > { %5090 = vmatprep.mubr.msk.bf16.mxu1 %vm512_vm0, %v6181_v34 }
  0x98   : > { %5307 = vmatmul.mubr.msk.bf16.gmra.mrb[4].mxu0 %vm512_vm0, %v2834_v0  ;;  %v6494_v0 = vld [vmem:[%s5957_s6 + $0x70] sm:$0xff]  }
  0x99   : > { %5310 = vmatprep.mubr.msk.bf16.mxu0 %vm512_vm0, %v2836_v51  ;;  %5343 = vmatpush3.bf16.msra.mxu0 %v5829_v52  ;;  %v2846_v52 = vsel %vm2342_vm3, %v2843_v20, %v2845_v53  ;;  %v2848_v51 = vsel %vm2342_vm3, %v2845_v53, %v2847_v45  ;;  %v2849_v28 = vrot.slane %v6494_v0, 2  ;;  %v5866_v20 = vld [vmem:[%s5957_s6 + $0x30] sm:$0xff]  }
  0x9a   : > { %5344 = vmatprep.subr.bf16.mxu0 %v5834_v57 }
  0x9b   : > { %v2850_v59 = vsel %vm2342_vm3, %v2847_v45, %v2849_v28  ;;  %v5853_v45 = vld [vmem:[%s7005_s1 + $0xb8] sm:$0xff]  }
  0x9d   : > { %5345 = vmatpush3.bf16.msra.mxu0 %v5834_v57  ;;  %v6499_v57 = vld [vmem:[%s5957_s6 + $0x78] sm:$0xff]  }
  0x9e   : > { %5091 = vmatmul.mubr.msk.bf16.gmra.mrb[28].mxu1 %vm512_vm0, %v6186_v38  ;;  %5346 = vmatprep.subr.bf16.mxu0 %v5840_v13 }
  0x9f   : > { %5094 = vmatprep.mubr.msk.bf16.mxu1 %vm512_vm0, %v6202_v50 }
  0xa0   : > { %5311 = vmatmul.mubr.msk.bf16.gmra.mrb[8].mxu0 %vm512_vm0, %v2838_v2  ;;  %v2851_v2 = vrot.slane %v6499_v57, 2 }
  0xa1   : > { %5314 = vmatprep.mubr.msk.bf16.mxu0 %vm512_vm0, %v2840_v5  ;;  %5347 = vmatpush3.bf16.msra.mxu0 %v5840_v13  ;;  %v1020_v13 = vrot.slane %v5865_v42, 1 }
  0xa2   : > { %5348 = vmatprep.subr.bf16.mxu0 %v5844_v7  ;;  %v2852_v11 = vsel %vm2342_vm3, %v2849_v28, %v2851_v2  ;;  %v3188_v28 = vshll.u32 %v6368_v32, 16 }
  0xa3   : > { %v1021_v5 = vsel %vm1010_vm4, %v1018_v12, %v1020_v13 }
  0xa5   : > { %5349 = vmatpush3.bf16.msra.mxu0 %v5844_v7  ;;  %v5849_v7 = vld [vmem:[%s7005_s1 + $0xa8] sm:$0xff]  }
  0xa6   : > { %5095 = vmatmul.mubr.msk.bf16.gmra.mrb[32].mxu1 %vm512_vm0, %v6214_v1  ;;  %5386 = vmatprep.subr.bf16.mxu0 %v6466_v24 }
  0xa7   : > { %5110 = vmatprep.mubr.msk.bf16.mxu1 %vm512_vm0, %v1013_v22  ;;  %v1022_v22 = vrot.slane %v5866_v20, 1 }
  0xa8   : > { %5315 = vmatmul.mubr.msk.bf16.gmra.mrb[12].mxu0 %vm512_vm0, %v2842_v31  ;;  %v5867_v31 = vld [vmem:[%s5957_s6 + $0x38] sm:$0xff]  }
  0xa9   : > { %5318 = vmatprep.mubr.msk.bf16.mxu0 %vm512_vm0, %v2844_v37  ;;  %v1024_v37 = vrot.slane %v5867_v31, 1 }
  0xab   : > { %v1025_v53 = vsel %vm1010_vm4, %v1022_v22, %v1024_v37 }
  0xae   : > { %5111 = vmatmul.mubr.msk.bf16.vlgmr.msra.gmra.mrb[0].mxu1 %vm512_vm0, %v1015_v30  ;;  %v2854_v30 = vsel %vm2342_vm3, %v2851_v2, %v2853_v54  ;;  %v3193_v2 = vshrl.u32 %v6371_v35, 16 }
  0xaf   : > { %5114 = vmatprep.mubr.msk.bf16.mxu1 %vm512_vm0, %v1017_v49  ;;  %5147 = vmatpush3.bf16.msra.mxu1 %v6350_v14  ;;  %v1019_v14 = vsel %vm1010_vm4, %v1016_v33, %v1018_v12  ;;  %v1023_v33 = vsel %vm1010_vm4, %v1020_v13, %v1022_v22  ;;  %v6543_v49 = vld [vmem:[%s5957_s6 + $0x90] sm:$0xff]   ;;  %v1028_v12 = vrot.slane %v6108_v8, 1  ;;  %v3185_v13 = vshrl.u32 %v6368_v32, 16  ;;  %v5847_v32 = vld [vmem:[%s5957_s6 + $0xa0] ss:$0 sps:$4 sm:$0x33]  }
  0xb0   : > { %5319 = vmatmul.mubr.msk.bf16.gmra.mrb[16].mxu0 %vm512_vm0, %v2846_v52  ;;  %5148 = vmatprep.subr.bf16.mxu1 %v5841_v29  ;;  %v6548_v52 = vld [vmem:[%s5957_s6 + $0x98] sm:$0xff]   ;;  %v2857_v42 = vrot.slane %v6543_v49, 2  ;;  %v3190_v22 = vrot.slane %v3188_v28, 3  ;;  %v3195_v31 = vrot.slane %v3193_v2, 2 }
  0xb1   : > { %5322 = vmatprep.mubr.msk.bf16.mxu0 %vm512_vm0, %v2848_v51  ;;  %v5868_v51 = vld [vmem:[%s5957_s6 + $0x40] sm:$0xff]  }
  0xb2   : > { %v1026_v60 = vrot.slane %v5868_v51, 1  ;;  %v3211_v51 = vshrl.u32 %v6388_v41, 16 }
  0xb3   : > { %5149 = vmatpush3.bf16.msra.mxu1 %v5841_v29  ;;  %v2856_v29 = vsel %vm2342_vm3, %v2853_v54, %v2855_v43 }
  0xb4   : > { %5150 = vmatprep.subr.bf16.mxu1 %v5846_v63  ;;  %v1029_v8 = vsel %vm1010_vm4, %v1026_v60, %v1028_v12 }
  0xb6   : > { %5115 = vmatmul.mubr.msk.bf16.gmra.mrb[4].mxu1 %vm512_vm0, %v1019_v14  ;;  %v3196_v14 = vshll.u32 %v6371_v35, 16 }
  0xb7   : > { %5118 = vmatprep.mubr.msk.bf16.mxu1 %vm512_vm0, %v1021_v5  ;;  %5151 = vmatpush3.bf16.msra.mxu1 %v5846_v63  ;;  %v2859_v63 = vrot.slane %v6548_v52, 2  ;;  %v1027_v5 = vsel %vm1010_vm4, %v1024_v37, %v1026_v60  ;;  %v3214_v60 = vshll.u32 %v6388_v41, 16 }
  0xb8   : > { %5323 = vmatmul.mubr.msk.bf16.gmra.mrb[20].mxu0 %vm512_vm0, %v2850_v59  ;;  %5152 = vmatprep.subr.bf16.mxu1 %v5849_v7  ;;  %v2858_v59 = vsel %vm2342_vm3, %v2855_v43, %v2857_v42  ;;  %v3198_v37 = vrot.slane %v3196_v14, 3  ;;  %v2861_v43 = vrot.slane %v5847_v32, 2 }
  0xb9   : > { %5326 = vmatprep.mubr.msk.bf16.mxu0 %vm512_vm0, %v2852_v11  ;;  %v3187_v11 = vrot.slane %v3185_v13, 2  ;;  %v2860_v20 = vsel %vm2342_vm3, %v2857_v42, %v2859_v63 }
  0xbb   : > { %5153 = vmatpush3.bf16.msra.mxu1 %v5849_v7  ;;  %v6566_v7 = vld [vmem:[%s7005_s1 + $0xc0] sm:$0xff]  }
  0xbc   : > { %5154 = vmatprep.subr.bf16.mxu1 %v5851_v39 }
  0xbe   : > { %5119 = vmatmul.mubr.msk.bf16.gmra.mrb[8].mxu1 %vm512_vm0, %v1023_v33  ;;  %v1032_v33 = vrot.slane %v6147_v58, 1  ;;  %v2862_v58 = vsel %vm2342_vm3, %v2859_v63, %v2861_v43  ;;  %v3220_v63 = vshrl.u32 %v6398_v44, 16 }
  0xbf   : > { %5122 = vmatprep.mubr.msk.bf16.mxu1 %vm512_vm0, %v1025_v53  ;;  %5155 = vmatpush3.bf16.msra.mxu1 %v5851_v39  ;;  %v5870_v39 = vld [vmem:[%s5957_s6 + $0x50] sm:$0xff]   ;;  %v3202_v53 = vshrl.u32 %v6382_v40, 16 }
  0xc0   : > { %5327 = vmatmul.mubr.msk.bf16.gmra.mrb[24].mxu0 %vm512_vm0, %v2854_v30  ;;  %5156 = vmatprep.subr.bf16.mxu1 %v5853_v45  ;;  %v1030_v54 = vrot.slane %v5870_v39, 1  ;;  %v3191_v30 = vor.u32 %v3190_v22, %v3187_v11  ;;  %v3223_v11 = vshll.u32 %v6398_v44, 16  ;;  %v3229_v22 = vshrl.u32 %v6407_v47, 16 }
  0xc1   : > { %5330 = vmatprep.mubr.msk.bf16.mxu0 %vm512_vm0, %v2856_v29  ;;  %v3199_v29 = vor.u32 %v3198_v37, %v3195_v31  ;;  %v3204_v28 = vrot.slane %v3202_v53, 2  ;;  %v3232_v31 = vshll.u32 %v6407_v47, 16  ;;  %v5850_v53 = vld [vmem:[%s7005_s1 + $0x188] sm:$0xff]  }
  0xc2   : > { %v1031_v42 = vsel %vm1010_vm4, %v1028_v12, %v1030_v54  ;;  %v1033_v13 = vsel %vm1010_vm4, %v1030_v54, %v1032_v33  ;;  %v1036_v12 = vrot.slane %v6171_v19, 1  ;;  %v3222_v54 = vrot.slane %v3220_v63, 2  ;;  %v5854_v63 = vld [vmem:[%s7005_s1 + $0x198] sm:$0xff]  }
  0xc3   : > { %5157 = vmatpush3.bf16.msra.mxu1 %v5853_v45  ;;  %v3205_v45 = vshll.u32 %v6382_v40, 16  ;;  %v3200_v14 = vsel %vm3183_vm5, %v3191_v30, %v3199_v29  ;;  %v3225_v19 = vrot.slane %v3223_v11, 3  ;;  %v3234_v30 = vrot.slane %v3232_v31, 3 }
  0xc4   : > { %5434 = vmatprep.subr.bf16.mxu1 %v6566_v7  ;;  %v1044_v11 = vrot.slane %v6214_v1, 1  ;;  %v3259_v31 = vshll.u32 %v6445_v3, 16 }
  0xc5   : > { %v3207_v2 = vrot.slane %v3205_v45, 3  ;;  %v3231_v45 = vrot.slane %v3229_v22, 2  ;;  %v3256_v22 = vshrl.u32 %v6445_v3, 16 }
  0xc6   : > { %5123 = vmatmul.mubr.msk.bf16.gmra.mrb[12].mxu1 %vm512_vm0, %v1027_v5  ;;  %v3213_v5 = vrot.slane %v3211_v51, 2  ;;  %v3226_v51 = vor.u32 %v3225_v19, %v3222_v54 }
  0xc7   : > { %5126 = vmatprep.mubr.msk.bf16.mxu1 %vm512_vm0, %v1029_v8  ;;  %v3216_v8 = vrot.slane %v3214_v60, 3  ;;  %v3208_v32 = vor.u32 %v3207_v2, %v3204_v28  ;;  %v3238_v60 = vshrl.u32 %v6421_v27, 16  ;;  %v3250_v28 = vshll.u32 %v6427_v56, 16 }
  0xc8   : > { %5331 = vmatmul.mubr.msk.bf16.gmra.mrb[28].mxu0 %vm512_vm0, %v2858_v59  ;;  %v1034_v59 = vrot.slane %v6156_v6, 1 }
  0xc9   : > { %5334 = vmatprep.mubr.msk.bf16.mxu0 %vm512_vm0, %v2860_v20  ;;  %v3217_v20 = vor.u32 %v3216_v8, %v3213_v5  ;;  %v3209_v39 = vsel %vm3183_vm5, %v3199_v29, %v3208_v32  ;;  %v1040_v29 = vrot.slane %v6186_v38, 1 }
  0xca   : > { %v1035_v37 = vsel %vm1010_vm4, %v1032_v33, %v1034_v59  ;;  %v1037_v6 = vsel %vm1010_vm4, %v1034_v59, %v1036_v12  ;;  %v1038_v33 = vrot.slane %v6181_v34, 1  ;;  %v5852_v34 = vld [vmem:[%s7005_s1 + $0x190] sm:$0xff]  }
  0xcb   : > { %v3218_v43 = vsel %vm3183_vm5, %v3208_v32, %v3217_v20  ;;  %v3227_v2 = vsel %vm3183_vm5, %v3217_v20, %v3226_v51  ;;  %v3252_v32 = vrot.slane %v3250_v28, 3  ;;  %v3274_v28 = vshrl.u32 %v6471_v36, 16 }
  0xcc   : > { %v1039_v38 = vsel %vm1010_vm4, %v1036_v12, %v1038_v33  ;;  %v1042_v12 = vrot.slane %v6202_v50, 1  ;;  %v5855_v50 = vld [vmem:[%s7005_s1 + $0x1a0] sm:$0xff]  }
  0xce   : > { %5127 = vmatmul.mubr.msk.bf16.gmra.mrb[16].mxu1 %vm512_vm0, %v1031_v42  ;;  %v3241_v42 = vshll.u32 %v6421_v27, 16  ;;  %v1043_v1 = vsel %vm1010_vm4, %v1040_v29, %v1042_v12  ;;  %v1045_v54 = vsel %vm1010_vm4, %v1042_v12, %v1044_v11  ;;  %v5872_v12 = vld [vmem:[%s5957_s6 + $0x18] sm:$0xff]  }
  0xcf   : > { %5130 = vmatprep.mubr.msk.bf16.mxu1 %vm512_vm0, %v1033_v13  ;;  %v3235_v13 = vor.u32 %v3234_v30, %v3231_v45 }
  0xd0   : > { %5335 = vmatmul.mubr.msk.bf16.gmra.mrb[32].mxu0 %vm512_vm0, %v2862_v58  ;;  %v3247_v58 = vshrl.u32 %v6427_v56, 16  ;;  %v3243_v5 = vrot.slane %v3241_v42, 3  ;;  %v5871_v42 = vld [vmem:[%s5957_s6 + $0x10] sm:$0xff]  }
  0xd1   : > { %5350 = vmatprep.mubr.msk.bf16.mxu0 %vm512_vm0, %v3200_v14  ;;  %v3240_v14 = vrot.slane %v3238_v60, 2  ;;  %v3236_v8 = vsel %vm3183_vm5, %v3226_v51, %v3235_v13  ;;  %v5856_v51 = vld [vmem:[%s7005_s1 + $0x1a8] sm:$0xff]   ;;  %v1494_v60 = vrot.slane %v5990_v23, 1 }
  0xd2   : > { %v3249_v59 = vrot.slane %v3247_v58, 2 }
  0xd3   : > { %v3244_v20 = vor.u32 %v3243_v5, %v3240_v14  ;;  %v3276_v5 = vrot.slane %v3274_v28, 2 }
  0xd5   : > { %v3245_v19 = vsel %vm3183_vm5, %v3235_v13, %v3244_v20  ;;  %v1495_v13 = vrot.slane %v5871_v42, 1  ;;  %v5875_v42 = vld [vmem:[%s5957_s6 + $0x30] sm:$0xff]  }
  0xd6   : > { %5131 = vmatmul.mubr.msk.bf16.gmra.mrb[20].mxu1 %vm512_vm0, %v1035_v37  ;;  %v3253_v37 = vor.u32 %v3252_v32, %v3249_v59 }
  0xd7   : > { %5134 = vmatprep.mubr.msk.bf16.mxu1 %vm512_vm0, %v1037_v6  ;;  %v3265_v6 = vshrl.u32 %v6451_v48, 16 }
  0xd8   : > { %5351 = vmatmul.mubr.msk.bf16.vlgmr.msra.gmra.mrb[0].mxu0 %vm512_vm0, %v3209_v39  ;;  %v3268_v39 = vshll.u32 %v6451_v48, 16  ;;  %v3254_v45 = vsel %vm3183_vm5, %v3244_v20, %v3253_v37  ;;  %v1497_v20 = vrot.slane %v5872_v12, 1 }
  0xd9   : > { %5387 = vmatpush3.bf16.msra.mxu0 %v6466_v24  ;;  %5354 = vmatprep.mubr.msk.bf16.mxu0 %vm512_vm0, %v3218_v43  ;;  %v1041_v24 = vsel %vm1010_vm4, %v1038_v33, %v1040_v29  ;;  %v3258_v43 = vrot.slane %v3256_v22, 2  ;;  %v3267_v30 = vrot.slane %v3265_v6, 2  ;;  %v1046_v29 = vrot.slane %v6236_v18, 1 }
  0xda   : > { %5388 = vmatprep.subr.bf16.mxu0 %v5850_v53  ;;  %v3270_v33 = vrot.slane %v3268_v39, 3  ;;  %v3286_v18 = vshll.u32 %v6477_v46, 16  ;;  %v3295_v6 = vshll.u32 %v6494_v0, 16 }
  0xdb   : > { %v1047_v23 = vsel %vm1010_vm4, %v1044_v11, %v1046_v29  ;;  %v5873_v11 = vld [vmem:[%s5957_s6 + $0x20] sm:$0xff]   ;;  %v5874_v29 = vld [vmem:[%s5957_s6 + $0x28] sm:$0xff]  }
  0xdc   : > { %v1499_v22 = vrot.slane %v5873_v11, 1 }
  0xdd   : > { %5389 = vmatpush3.bf16.msra.mxu0 %v5850_v53  ;;  %v3261_v53 = vrot.slane %v3259_v31, 3 }
  0xde   : > { %5135 = vmatmul.mubr.msk.bf16.gmra.mrb[24].mxu1 %vm512_vm0, %v1039_v38  ;;  %5390 = vmatprep.subr.bf16.mxu0 %v5852_v34  ;;  %v3271_v38 = vor.u32 %v3270_v33, %v3267_v30 }
  0xdf   : > { %5138 = vmatprep.mubr.msk.bf16.mxu1 %vm512_vm0, %v1041_v24  ;;  %v3262_v58 = vor.u32 %v3261_v53, %v3258_v43  ;;  %v3283_v24 = vshrl.u32 %v6477_v46, 16 }
  0xe0   : > { %5355 = vmatmul.mubr.msk.bf16.gmra.mrb[4].mxu0 %vm512_vm0, %v3227_v2  ;;  %v1496_v2 = vsel %vm1010_vm4, %v1494_v60, %v1495_v13  ;;  %v1501_v60 = vrot.slane %v5874_v29, 1  ;;  %v6714_v29 = vld [vmem:[%s5957_s6 + $0xa0] ss:$0 sps:$4 sm:$0x77]  }
  0xe1   : > { %5358 = vmatprep.mubr.msk.bf16.mxu0 %vm512_vm0, %v3236_v8  ;;  %5391 = vmatpush3.bf16.msra.mxu0 %v5852_v34  ;;  %v3277_v34 = vshll.u32 %v6471_v36, 16  ;;  %v3263_v14 = vsel %vm3183_vm5, %v3253_v37, %v3262_v58  ;;  %v3272_v59 = vsel %vm3183_vm5, %v3262_v58, %v3271_v38  ;;  %v3285_v32 = vrot.slane %v3283_v24, 2  ;;  %v5876_v58 = vld [vmem:[%s7005_s1 + $0xc8] sm:$0xff]  }
  0xe2   : > { %5392 = vmatprep.subr.bf16.mxu0 %v5854_v63  ;;  %v3292_v37 = vshrl.u32 %v6494_v0, 16 }
  0xe3   : > { %v3279_v8 = vrot.slane %v3277_v34, 3  ;;  %v3310_v34 = vshrl.u32 %v6519_v10, 16 }
  0xe4   : > { %v3294_v53 = vrot.slane %v3292_v37, 2  ;;  %v5880_v37 = vld [vmem:[%s7005_s1 + $0xd8] sm:$0xff]  }
  0xe5   : > { %5393 = vmatpush3.bf16.msra.mxu0 %v5854_v63  ;;  %v3288_v63 = vrot.slane %v3286_v18, 3  ;;  %v3280_v31 = vor.u32 %v3279_v8, %v3276_v5  ;;  %v3322_v18 = vshll.u32 %v6524_v15, 16  ;;  %v3312_v8 = vrot.slane %v3310_v34, 2  ;;  %v5883_v34 = vld [vmem:[%s5957_s6 + $0x50] sm:$0xff]  }
  0xe6   : > { %5139 = vmatmul.mubr.msk.bf16.gmra.mrb[28].mxu1 %vm512_vm0, %v1043_v1  ;;  %5394 = vmatprep.subr.bf16.mxu0 %v5855_v50  ;;  %v3304_v1 = vshll.u32 %v6499_v57, 16 }
  0xe7   : > { %5142 = vmatprep.mubr.msk.bf16.mxu1 %vm512_vm0, %v1045_v54  ;;  %v3289_v39 = vor.u32 %v3288_v63, %v3285_v32  ;;  %v1498_v54 = vsel %vm1010_vm4, %v1495_v13, %v1497_v20  ;;  %v3281_v43 = vsel %vm3183_vm5, %v3271_v38, %v3280_v31  ;;  %v1503_v13 = vrot.slane %v5875_v42, 1 }
  0xe8   : > { %5359 = vmatmul.mubr.msk.bf16.gmra.mrb[8].mxu0 %vm512_vm0, %v3245_v19  ;;  %v1500_v19 = vsel %vm1010_vm4, %v1497_v20, %v1499_v22  ;;  %v3313_v38 = vshll.u32 %v6519_v10, 16  ;;  %v3324_v12 = vrot.slane %v3322_v18, 3  ;;  %v5878_v20 = vld [vmem:[%s5957_s6 + $0x38] sm:$0xff]   ;;  %v3346_v18 = vshrl.u32 %v6714_v29, 16 }
  0xe9   : > { %5362 = vmatprep.mubr.msk.bf16.mxu0 %vm512_vm0, %v3254_v45  ;;  %5395 = vmatpush3.bf16.msra.mxu0 %v5855_v50  ;;  %v3301_v50 = vshrl.u32 %v6499_v57, 16  ;;  %v3297_v45 = vrot.slane %v3295_v6, 3  ;;  %v3290_v30 = vsel %vm3183_vm5, %v3280_v31, %v3289_v39  ;;  %v1505_v11 = vrot.slane %v5878_v20, 1 }
  0xea   : > { %5396 = vmatprep.subr.bf16.mxu0 %v5856_v51 }
  0xeb   : > { %v3303_v33 = vrot.slane %v3301_v50, 2  ;;  %v3298_v28 = vor.u32 %v3297_v45, %v3294_v53  ;;  %v3331_v50 = vshll.u32 %v6543_v49, 16  ;;  %v5881_v45 = vld [vmem:[%s7005_s1 + $0xe0] sm:$0xff]  }
  0xed   : > { %5397 = vmatpush3.bf16.msra.mxu0 %v5856_v51  ;;  %v3306_v51 = vrot.slane %v3304_v1, 3  ;;  %v3299_v5 = vsel %vm3183_vm5, %v3289_v39, %v3298_v28  ;;  %v3328_v39 = vshrl.u32 %v6543_v49, 16 }
  0xee   : > { %5143 = vmatmul.mubr.msk.bf16.gmra.mrb[32].mxu1 %vm512_vm0, %v1047_v23  ;;  %v1502_v23 = vsel %vm1010_vm4, %v1499_v22, %v1501_v60  ;;  %v5879_v22 = vld [vmem:[%s5957_s6 + $0x40] sm:$0xff]  }
  0xef   : > { %5158 = vmatprep.mubr.msk.bf16.mxu1 %vm512_vm0, %v1496_v2  ;;  %v3307_v24 = vor.u32 %v3306_v51, %v3303_v33  ;;  %v1504_v2 = vsel %vm1010_vm4, %v1501_v60, %v1503_v13  ;;  %v1507_v31 = vrot.slane %v5879_v22, 1  ;;  %v3330_v33 = vrot.slane %v3328_v39, 2 }
  0xf0   : > { %5363 = vmatmul.mubr.msk.bf16.gmra.mrb[12].mxu0 %vm512_vm0, %v3263_v14  ;;  %v5877_v14 = vld [vmem:[%s7005_s1 + $0xd0] sm:$0xff]   ;;  %v3333_v51 = vrot.slane %v3331_v50, 3  ;;  %v3676_v39 = vrot.slane %v6371_v35, 3  ;;  %v3678_v35 = vrot.slane %v6382_v40, 3  ;;  %v1523_v40 = vrot.slane %v6320_v21, 1 }
  0xf1   : > { %5366 = vmatprep.mubr.msk.bf16.mxu0 %vm512_vm0, %v3272_v59  ;;  %v3315_v59 = vrot.slane %v3313_v38, 3  ;;  %v3308_v32 = vsel %vm3183_vm5, %v3298_v28, %v3307_v24  ;;  %v1508_v53 = vsel %vm1010_vm4, %v1505_v11, %v1507_v31  ;;  %v1511_v38 = vrot.slane %v5883_v34, 1 }
  0xf2   : > { %v1525_v21 = vrot.slane %v6336_v17, 1  ;;  %v3688_v34 = vrot.slane %v6427_v56, 3 }
  0xf3   : > { %v3316_v6 = vor.u32 %v3315_v59, %v3312_v8 }
  0xf6   : > { %5159 = vmatmul.mubr.msk.bf16.vlgmr.msra.gmra.mrb[0].mxu1 %vm512_vm0, %v1498_v54  ;;  %v3337_v54 = vshrl.u32 %v6548_v52, 16 }
  0xf7   : > { %5162 = vmatprep.mubr.msk.bf16.mxu1 %vm512_vm0, %v1500_v19  ;;  %5440 = vmatpush3.bf16.msra.mxu1 %v6566_v7  ;;  %v3319_v7 = vshrl.u32 %v6524_v15, 16  ;;  %v3340_v19 = vshll.u32 %v6548_v52, 16 }
  0xf8   : > { %5367 = vmatmul.mubr.msk.bf16.gmra.mrb[16].mxu0 %vm512_vm0, %v3281_v43  ;;  %5435 = vmatprep.subr.bf16.mxu1 %v5876_v58  ;;  %v1506_v43 = vsel %vm1010_vm4, %v1503_v13, %v1505_v11  ;;  %v3339_v42 = vrot.slane %v3337_v54, 2  ;;  %v5885_v11 = vld [vmem:[%s5957_s6 + $0x58] sm:$0xff]  }
  0xf9   : > { %5370 = vmatprep.mubr.msk.bf16.mxu0 %vm512_vm0, %v3290_v30  ;;  %v3321_v63 = vrot.slane %v3319_v7, 2  ;;  %v3317_v30 = vsel %vm3183_vm5, %v3307_v24, %v3316_v6  ;;  %v3342_v13 = vrot.slane %v3340_v19, 3  ;;  %v5884_v24 = vld [vmem:[%s7005_s1 + $0xe8] sm:$0xff]   ;;  %v3334_v7 = vor.u32 %v3333_v51, %v3330_v33 }
  0xfa   : > { %v1513_v22 = vrot.slane %v5885_v11, 1  ;;  %v1519_v19 = vrot.slane %v6297_v62, 1  ;;  %v1521_v62 = vrot.slane %v6314_v4, 1  ;;  %v3684_v33 = vrot.slane %v6407_v47, 3  ;;  %v5886_v47 = vld [vmem:[%s5957_s6 + $0x60] sm:$0xff]  }
  0xfb   : > { %5441 = vmatpush3.bf16.msra.mxu1 %v5876_v58  ;;  %v3325_v1 = vor.u32 %v3324_v12, %v3321_v63  ;;  %v5882_v58 = vld [vmem:[%s5957_s6 + $0x48] sm:$0xff]   ;;  %v3692_v11 = vrot.slane %v6451_v48, 3  ;;  %v5889_v48 = vld [vmem:[%s5957_s6 + $0x78] sm:$0xff]  }
  0xfc   : > { %5436 = vmatprep.subr.bf16.mxu1 %v5877_v14  ;;  %v1509_v28 = vrot.slane %v5882_v58, 1  ;;  %v1514_v50 = vsel %vm1010_vm4, %v1511_v38, %v1513_v22  ;;  %v1522_v51 = vsel %vm1010_vm4, %v1519_v19, %v1521_v62  ;;  %v1954_v58 = vshll.u32 %v5886_v47, 16 }
  0xfd   : > { %v3326_v60 = vsel %vm3183_vm5, %v3316_v6, %v3325_v1  ;;  %v3335_v59 = vsel %vm3183_vm5, %v3325_v1, %v3334_v7 }
  0xfe   : > { %5163 = vmatmul.mubr.msk.bf16.gmra.mrb[4].mxu1 %vm512_vm0, %v1502_v23  ;;  %v3349_v23 = vshll.u32 %v6714_v29, 16  ;;  %v1512_v8 = vsel %vm1010_vm4, %v1509_v28, %v1511_v38  ;;  %v1526_v38 = vsel %vm1010_vm4, %v1523_v40, %v1525_v21 }
  0xff   : > { %5166 = vmatprep.mubr.msk.bf16.mxu1 %vm512_vm0, %v1504_v2  ;;  %5442 = vmatpush3.bf16.msra.mxu1 %v5877_v14  ;;  %v3343_v2 = vor.u32 %v3342_v13, %v3339_v42  ;;  %v1510_v14 = vsel %vm1010_vm4, %v1507_v31, %v1509_v28  ;;  %v1515_v31 = vrot.slane %v6277_v55, 1  ;;  %v1517_v55 = vrot.slane %v6291_v61, 1 }
 0x100   : > { %5371 = vmatmul.mubr.msk.bf16.gmra.mrb[20].mxu0 %vm512_vm0, %v3299_v5  ;;  %5437 = vmatprep.subr.bf16.mxu1 %v5880_v37  ;;  %v3657_v5 = vld [vmem:[%s5957_s6 + $0x10] sm:$0x8]  ;;  %v3351_v63 = vrot.slane %v3349_v23, 3  ;;  %v1951_v13 = vshrl.u32 %v5886_v47, 16  ;;  %v3686_v28 = vrot.slane %v6421_v27, 3  ;;  %v1956_v23 = vrot.slane %v1954_v58, 2 }
 0x101   : > { %5374 = vmatprep.mubr.msk.bf16.mxu0 %vm512_vm0, %v3308_v32  ;;  %v3348_v32 = vrot.slane %v3346_v18, 2  ;;  %v3344_v12 = vsel %vm3183_vm5, %v3334_v7, %v3343_v2  ;;  %v4686_v20 = vcombine.low %v3657_v5, %v6357_v25  ;;  %v1516_v1 = vsel %vm1010_vm4, %v1513_v22, %v1515_v31  ;;  %v5887_v27 = vld [vmem:[%s5957_s6 + $0x68] sm:$0xff]  }
 0x102   : > { %v1953_v18 = vrot.slane %v1951_v13, 1  ;;  %v1963_v56 = vshll.u32 %v5887_v27, 16  ;;  %v3698_v47 = vrot.slane %v6494_v0, 3  ;;  %v3700_v13 = vrot.slane %v6499_v57, 3 }
 0x103   : > { %5443 = vmatpush3.bf16.msra.mxu1 %v5880_v37  ;;  %v3352_v37 = vor.u32 %v3351_v63, %v3348_v32  ;;  %v3675_v6 = vrot.slane %v4686_v20, 3  ;;  %v5888_v32 = vld [vmem:[%s5957_s6 + $0x70] sm:$0xff]   ;;  %v3690_v20 = vrot.slane %v6445_v3, 3  ;;  %v2014_v0 = vshrl.u32 %v6362_v26, 16 }
 0x104   : > { %5438 = vmatprep.subr.bf16.mxu1 %v5881_v45  ;;  %v1969_v63 = vshrl.u32 %v5888_v32, 16  ;;  %v2017_v57 = vshll.u32 %v6362_v26, 16 }
 0x105   : > { %v3353_v25 = vsel %vm3183_vm5, %v3343_v2, %v3352_v37  ;;  %v3677_v54 = vsel %vm3674_vm6, %v3675_v6, %v3676_v39  ;;  %v3687_v2 = vsel %vm3674_vm6, %v3684_v33, %v3686_v28  ;;  %v1965_v37 = vrot.slane %v1963_v56, 2 }
 0x106   : > { %5167 = vmatmul.mubr.msk.bf16.gmra.mrb[8].mxu1 %vm512_vm0, %v1506_v43  ;;  %v3680_v43 = vrot.slane %v6388_v41, 3  ;;  %v3682_v41 = vrot.slane %v6398_v44, 3  ;;  %v1527_v44 = vrot.slane %v6342_v16, 1 }
 0x107   : > { %5170 = vmatprep.mubr.msk.bf16.mxu1 %vm512_vm0, %v1508_v53  ;;  %5444 = vmatpush3.bf16.msra.mxu1 %v5881_v45  ;;  %v1518_v53 = vsel %vm1010_vm4, %v1515_v31, %v1517_v55  ;;  %v1520_v45 = vsel %vm1010_vm4, %v1517_v55, %v1519_v19  ;;  %v1981_v55 = vshll.u32 %v5889_v48, 16 }
 0x108   : > { %5375 = vmatmul.mubr.msk.bf16.gmra.mrb[24].mxu0 %vm512_vm0, %v3317_v30  ;;  %5439 = vmatprep.subr.bf16.mxu1 %v5884_v24  ;;  %v3679_v30 = vsel %vm3674_vm6, %v3676_v39, %v3678_v35  ;;  %v3681_v61 = vsel %vm3674_vm6, %v3678_v35, %v3680_v43  ;;  %v3683_v42 = vsel %vm3674_vm6, %v3680_v43, %v3682_v41  ;;  %v1971_v39 = vrot.slane %v1969_v63, 1  ;;  %v5890_v35 = vld [vmem:[%s5957_s6 + $0x80] sm:$0xff]  }
 0x109   : > { %5378 = vmatprep.mubr.msk.bf16.mxu0 %vm512_vm0, %v3326_v60  ;;  %v1524_v60 = vsel %vm1010_vm4, %v1521_v62, %v1523_v40  ;;  %v3685_v4 = vsel %vm3674_vm6, %v3682_v41, %v3684_v33  ;;  %v1528_v7 = vsel %vm1010_vm4, %v1525_v21, %v1527_v44  ;;  %v1987_v43 = vshrl.u32 %v5890_v35, 16 }
 0x10a   : > { %v1983_v62 = vrot.slane %v1981_v55, 2  ;;  %v2005_v21 = vshrl.u32 %v6342_v16, 16 }
 0x10b   : > { %5445 = vmatpush3.bf16.msra.mxu1 %v5884_v24  ;;  %v5859_v24 = vld [vmem:[%s5957_s6 + $0x98] ss:$0 sps:$4 sm:$0x11]   ;;  %v1989_v41 = vrot.slane %v1987_v43, 1 }
 0x10c   : > { %v1529_v5 = vrot.slane %v5859_v24, 1 }
 0x10e   : > { %5171 = vmatmul.mubr.msk.bf16.gmra.mrb[12].mxu1 %vm512_vm0, %v1510_v14  ;;  %v3689_v14 = vsel %vm3674_vm6, %v3686_v28, %v3688_v34  ;;  %v1530_v22 = vsel %vm1010_vm4, %v1527_v44, %v1529_v5  ;;  %v2008_v44 = vshll.u32 %v6342_v16, 16  ;;  %v3701_v16 = vsel %vm3674_vm6, %v3698_v47, %v3700_v13 }
 0x10f   : > { %5174 = vmatprep.mubr.msk.bf16.mxu1 %vm512_vm0, %v1512_v8  ;;  %v1960_v8 = vshrl.u32 %v5887_v27, 16  ;;  %v2016_v27 = vrot.slane %v2014_v0, 1 }
 0x110   : > { %5379 = vmatmul.mubr.msk.bf16.gmra.mrb[28].mxu0 %vm512_vm0, %v3335_v59  ;;  %v1957_v59 = vor.u32 %v1956_v23, %v1953_v18  ;;  %v2010_v24 = vrot.slane %v2008_v44, 2 }
 0x111   : > { %5382 = vmatprep.mubr.msk.bf16.mxu0 %vm512_vm0, %v3344_v12  ;;  %v1972_v12 = vshll.u32 %v5888_v32, 16  ;;  %v1962_v31 = vrot.slane %v1960_v8, 1  ;;  %v2019_v8 = vrot.slane %v2017_v57, 2 }
 0x112   : > { %v1958_v6 = vsel %vm1851_vm2, %v6160_v9, %v1957_v59  ;;  %v1990_v9 = vshll.u32 %v5890_v35, 16 }
 0x113   : > { %v1966_v3 = vor.u32 %v1965_v37, %v1962_v31  ;;  %v2020_v32 = vor.u32 %v2019_v8, %v2016_v27 }
 0x114   : > { %v1992_v33 = vrot.slane %v1990_v9, 2 }
 0x116   : > { %5175 = vmatmul.mubr.msk.bf16.gmra.mrb[16].mxu1 %vm512_vm0, %v1514_v50  ;;  %v1974_v50 = vrot.slane %v1972_v12, 2 }
 0x117   : > { %5178 = vmatprep.mubr.msk.bf16.mxu1 %vm512_vm0, %v1516_v1  ;;  %v3691_v1 = vsel %vm3674_vm6, %v3688_v34, %v3690_v20 }
 0x118   : > { %5383 = vmatmul.mubr.msk.bf16.gmra.mrb[32].mxu0 %vm512_vm0, %v3353_v25  ;;  %v3693_v25 = vsel %vm3674_vm6, %v3690_v20, %v3692_v11  ;;  %v1975_v19 = vor.u32 %v1974_v50, %v1971_v39 }
 0x119   : > { %5398 = vmatprep.mubr.msk.bf16.mxu0 %vm512_vm0, %v3677_v54  ;;  %v1978_v54 = vshrl.u32 %v5889_v48, 16 }
 0x11a   : > { %v1976_v40 = vsel %vm1851_vm2, %v1966_v3, %v1975_v19 }
 0x11e   : > { %5179 = vmatmul.mubr.msk.bf16.gmra.mrb[20].mxu1 %vm512_vm0, %v1518_v53  ;;  %v3694_v53 = vrot.slane %v6471_v36, 3  ;;  %v1996_v36 = vshrl.u32 %v6336_v17, 16 }
 0x11f   : > { %5182 = vmatprep.mubr.msk.bf16.mxu1 %vm512_vm0, %v1520_v45  ;;  %v3696_v45 = vrot.slane %v6477_v46, 3  ;;  %v1999_v46 = vshll.u32 %v6336_v17, 16  ;;  %v2007_v17 = vrot.slane %v2005_v21, 1 }
 0x120   : > { %5399 = vmatmul.mubr.msk.bf16.vlgmr.msra.gmra.mrb[0].mxu0 %vm512_vm0, %v3679_v30  ;;  %v1967_v30 = vsel %vm1851_vm2, %v1957_v59, %v1966_v3  ;;  %v1998_v28 = vrot.slane %v1996_v36, 1 }
 0x121   : > { %5402 = vmatprep.mubr.msk.bf16.mxu0 %vm512_vm0, %v3681_v61  ;;  %v1980_v61 = vrot.slane %v1978_v54, 1  ;;  %v2001_v34 = vrot.slane %v1999_v46, 2  ;;  %v2011_v23 = vor.u32 %v2010_v24, %v2007_v17 }
 0x123   : > { %v2002_v18 = vor.u32 %v2001_v34, %v1998_v28  ;;  %v2021_v63 = vsel %vm1851_vm2, %v2011_v23, %v2020_v32 }
 0x125   : > { %v2012_v56 = vsel %vm1851_vm2, %v2002_v18, %v2011_v23 }
 0x126   : > { %5183 = vmatmul.mubr.msk.bf16.gmra.mrb[24].mxu1 %vm512_vm0, %v1522_v51  ;;  %v3695_v51 = vsel %vm3674_vm6, %v3692_v11, %v3694_v53  ;;  %v3710_v11 = vrot.slane %v6714_v29, 3 }
 0x127   : > { %5186 = vmatprep.mubr.msk.bf16.mxu1 %vm512_vm0, %v1524_v60  ;;  %v3697_v60 = vsel %vm3674_vm6, %v3694_v53, %v3696_v45 }
 0x128   : > { %5403 = vmatmul.mubr.msk.bf16.gmra.mrb[4].mxu0 %vm512_vm0, %v3683_v42  ;;  %v1984_v42 = vor.u32 %v1983_v62, %v1980_v61  ;;  %v6874_v61 = vld [vmem:[%s7006_s2] ss:$0 sm:$0xff] }
 0x129   : > { %5406 = vmatprep.mubr.msk.bf16.mxu0 %vm512_vm0, %v3685_v4  ;;  %v1993_v4 = vor.u32 %v1992_v33, %v1989_v41 }
 0x12a   : > { %v1985_v58 = vsel %vm1851_vm2, %v1975_v19, %v1984_v42 }
 0x12b   : > { %v2003_v5 = vsel %vm1851_vm2, %v1993_v4, %v2002_v18 }
 0x12e   : > { %5187 = vmatmul.mubr.msk.bf16.gmra.mrb[28].mxu1 %vm512_vm0, %v1526_v38  ;;  %v1994_v38 = vsel %vm1851_vm2, %v1984_v42, %v1993_v4 }
 0x12f   : > { %5190 = vmatprep.mubr.msk.bf16.mxu1 %vm512_vm0, %v1528_v7  ;;  %v3699_v7 = vsel %vm3674_vm6, %v3696_v45, %v3698_v47 }
 0x130   : > { %5407 = vmatmul.mubr.msk.bf16.gmra.mrb[8].mxu0 %vm512_vm0, %v3687_v2  ;;  %v3702_v2 = vrot.slane %v6519_v10, 3  ;;  %v3706_v10 = vrot.slane %v6543_v49, 3 }
 0x131   : > { %5410 = vmatprep.mubr.msk.bf16.mxu0 %vm512_vm0, %v3689_v14  ;;  %v3704_v14 = vrot.slane %v6524_v15, 3  ;;  %v3708_v15 = vrot.slane %v6548_v52, 3 }
 0x132   : > { %v3703_v59 = vsel %vm3674_vm6, %v3700_v13, %v3702_v2 }
 0x133   : > { %v3705_v26 = vsel %vm3674_vm6, %v3702_v2, %v3704_v14  ;;  %v3707_v12 = vsel %vm3674_vm6, %v3704_v14, %v3706_v10  ;;  %v3709_v20 = vsel %vm3674_vm6, %v3706_v10, %v3708_v15 }
 0x136   : > { %5191 = vmatmul.mubr.msk.bf16.gmra.mrb[32].mxu1 %vm512_vm0, %v1530_v22  ;;  %v3711_v22 = vsel %vm3674_vm6, %v3708_v15, %v3710_v11 }
 0x137   : > { %5226 = vmatprep.mubr.msk.bf16.mxu1 %vm512_vm0, %v1958_v6 }
 0x138   : > { %5411 = vmatmul.mubr.msk.bf16.gmra.mrb[12].mxu0 %vm512_vm0, %v3691_v1 }
 0x139   : > { %5414 = vmatprep.mubr.msk.bf16.mxu0 %vm512_vm0, %v3693_v25 }
 0x13e   : > { %5227 = vmatmul.mubr.msk.bf16.vlgmr.msra.gmra.mrb[20].mxu1 %vm512_vm0, %v1967_v30 }
 0x13f   : > { %5230 = vmatprep.mubr.msk.bf16.mxu1 %vm512_vm0, %v1976_v40 }
 0x140   : > { %5415 = vmatmul.mubr.msk.bf16.gmra.mrb[16].mxu0 %vm512_vm0, %v3695_v51 }
 0x141   : > { %5418 = vmatprep.mubr.msk.bf16.mxu0 %vm512_vm0, %v3697_v60 }
 0x146   : > { %5231 = vmatmul.mubr.msk.bf16.gmra.mrb[24].mxu1 %vm512_vm0, %v1985_v58 }
 0x147   : > { %5234 = vmatprep.mubr.msk.bf16.mxu1 %vm512_vm0, %v1994_v38 }
 0x148   : > { %5419 = vmatmul.mubr.msk.bf16.gmra.mrb[20].mxu0 %vm512_vm0, %v3699_v7 }
 0x149   : > { %5422 = vmatprep.mubr.msk.bf16.mxu0 %vm512_vm0, %v3701_v16 }
 0x14e   : > { %5235 = vmatmul.mubr.msk.bf16.gmra.mrb[28].mxu1 %vm512_vm0, %v2003_v5 }
 0x14f   : > { %5238 = vmatprep.mubr.msk.bf16.mxu1 %vm512_vm0, %v2012_v56 }
 0x150   : > { %5423 = vmatmul.mubr.msk.bf16.gmra.mrb[24].mxu0 %vm512_vm0, %v3703_v59 }
 0x151   : > { %5426 = vmatprep.mubr.msk.bf16.mxu0 %vm512_vm0, %v3705_v26 }
 0x156   : > { %5239 = vmatmul.mubr.msk.bf16.gmra.mrb[32].mxu1 %vm512_vm0, %v2021_v63 }
 0x158   : > { %5427 = vmatmul.mubr.msk.bf16.gmra.mrb[28].mxu0 %vm512_vm0, %v3707_v12 }
 0x159   : > { %5430 = vmatprep.mubr.msk.bf16.mxu0 %vm512_vm0, %v3709_v20 }
 0x160   : > { %5431 = vmatmul.mubr.msk.bf16.gmra.mrb[32].mxu0 %vm512_vm0, %v3711_v22 }
 0x1c9   : > { %v5160_v49 = vpop.f32.mrb[0].mxu1 }
 0x1ca   : > { %v1655_v52 = vpop.f32.mrb[1].mxu1 }
 0x1cb   : > { %v5161_v31 = vpop.f32.mrb[2].mxu1 }
 0x1cc   : > { %v1658_v37 = vpop.f32.mrb[3].mxu1 }
 0x1d1   : > { %v5164_v6 = vpop.f32.mrb[4].mxu1 }
 0x1d2   : > { %v1671_v39 = vpop.f32.mrb[5].mxu1 }
 0x1d3   : > { %v5165_v50 = vpop.f32.mrb[6].mxu1 }
 0x1d4   : > { %v1674_v1 = vpop.f32.mrb[7].mxu1 }
 0x1d9   : > { %v5168_v25 = vpop.f32.mrb[8].mxu1 }
 0x1da   : > { %v6849_v3 = vpop.f32.mrb[9].mxu1 }
 0x1db   : > { %v6851_v48 = vpop.f32.mrb[10].mxu1 }
 0x1dc   : > { %v6853_v54 = vpop.f32.mrb[11].mxu1 }
 0x1e1   : > { %v6855_v29 = vpop.f32.mrb[12].mxu1 }
 0x1e2   : > { %v6857_v55 = vpop.f32.mrb[13].mxu1 }
 0x1e3   : > { %v6859_v19 = vpop.f32.mrb[14].mxu1 }
 0x1e4   : > { %v6861_v35 = vpop.f32.mrb[15].mxu1 }
 0x1e9   : > { %v6863_v43 = vpop.f32.mrb[16].mxu1 }
 0x1ea   : > { %v6865_v9 = vpop.f32.mrb[17].mxu1 }
 0x1eb   : > { %v6867_v53 = vpop.f32.mrb[18].mxu1 }
 0x1ec   : > { %v6869_v45 = vpop.f32.mrb[19].mxu1 }
 0x1f3   : > { %v5400_v30 = vpop.f32.mrb[0].mxu0 }
 0x1f4   : > { %v5446_v62 = vadd.f32 %v5400_v30, %v5160_v49  ;;  %v3836_v40 = vpop.f32.mrb[1].mxu0 }
 0x1f5   : > { %v5447_v41 = vadd.f32 %v3836_v40, %v1655_v52  ;;  %v5401_v33 = vpop.f32.mrb[2].mxu0 }
 0x1f6   : > { %v4024_v51 = vadd.f32 %v5446_v62, %v6874_v61  ;;  %v5448_v60 = vadd.f32 %v5401_v33, %v5161_v31  ;;  %v3839_v42 = vpop.f32.mrb[3].mxu0 }
 0x1f7   : > { %v4022_v36 = vadd.f32 %v5447_v41, %v6874_v61  ;;  %v5449_v46 = vadd.f32 %v3839_v42, %v1658_v37 }
 0x1f8   : > { %v4060_v4 = vmax.f32 %v4024_v51, 0.0  ;;  %v4025_v21 = vadd.f32 %v5448_v60, %v6874_v61 }
 0x1f9   : > { %v4058_v44 = vmax.f32 %v4022_v36, 0.0  ;;  %v4023_v47 = vadd.f32 %v5449_v46, %v6874_v61 }
 0x1fa   : > { %v4752_v13 = vpack.c.bf16 %v4060_v4, %v4060_v4  ;;  %v4061_v58 = vmax.f32 %v4025_v21, 0.0 }
 0x1fb   : > { %v4750_v28 = vpack.c.bf16 %v4058_v44, %v4058_v44  ;;  %v4059_v34 = vmax.f32 %v4023_v47, 0.0  ;;  %v5404_v38 = vpop.f32.mrb[4].mxu0 }
 0x1fc   : > { %4241 = vst.msk [vmem:[%s6883_s21 + $0x8] sm:$0xf] %vm4238_vm7, %v4752_v13  ;;  %v4753_v17 = vpack.c.bf16 %v4061_v58, %v4061_v58  ;;  %v5450_v24 = vadd.f32 %v5404_v38, %v5164_v6  ;;  %v3852_v7 = vpop.f32.mrb[5].mxu0 }
 0x1fd   : > { %4239 = vst.msk [vmem:[%s6883_s21] sm:$0xf] %vm4238_vm7, %v4750_v28  ;;  %v4751_v16 = vpack.c.bf16 %v4059_v34, %v4059_v34  ;;  %v5451_v18 = vadd.f32 %v3852_v7, %v1671_v39  ;;  %v5405_v0 = vpop.f32.mrb[6].mxu0 }
 0x1fe   : > { %4242 = vst.msk [vmem:[%s6883_s21 + $0xc] sm:$0xf] %vm4238_vm7, %v4753_v17  ;;  %v4028_v57 = vadd.f32 %v5450_v24, %v6874_v61  ;;  %v5452_v23 = vadd.f32 %v5405_v0, %v5165_v50  ;;  %v3855_v2 = vpop.f32.mrb[7].mxu0 }
 0x1ff   : > { %4240 = vst.msk [vmem:[%s6883_s21 + $0x4] sm:$0xf] %vm4238_vm7, %v4751_v16  ;;  %v4026_v14 = vadd.f32 %v5451_v18, %v6874_v61  ;;  %v5453_v5 = vadd.f32 %v3855_v2, %v1674_v1 }
 0x200   : > { %v4064_v27 = vmax.f32 %v4028_v57, 0.0  ;;  %v4029_v8 = vadd.f32 %v5452_v23, %v6874_v61 }
 0x201   : > { %v4062_v56 = vmax.f32 %v4026_v14, 0.0  ;;  %v4027_v59 = vadd.f32 %v5453_v5, %v6874_v61 }
 0x202   : > { %v4756_v26 = vpack.c.bf16 %v4064_v27, %v4064_v27  ;;  %v4065_v32 = vmax.f32 %v4029_v8, 0.0 }
 0x203   : > { %v4754_v10 = vpack.c.bf16 %v4062_v56, %v4062_v56  ;;  %v4063_v15 = vmax.f32 %v4027_v59, 0.0  ;;  %v5408_v63 = vpop.f32.mrb[8].mxu0 }
 0x204   : > { %4245 = vst.msk [vmem:[%s6883_s21 + $0x18] sm:$0xf] %vm4238_vm7, %v4756_v26  ;;  %v4757_v12 = vpack.c.bf16 %v4065_v32, %v4065_v32  ;;  %v5454_v20 = vadd.f32 %v5408_v63, %v5168_v25  ;;  %v3868_v11 = vpop.f32.mrb[9].mxu0 }
 0x205   : > { %4243 = vst.msk [vmem:[%s6883_s21 + $0x10] sm:$0xf] %vm4238_vm7, %v4754_v10  ;;  %v4755_v22 = vpack.c.bf16 %v4063_v15, %v4063_v15  ;;  %v5455_v49 = vadd.f32 %v3868_v11, %v6849_v3  ;;  %v5409_v52 = vpop.f32.mrb[10].mxu0 }
 0x206   : > { %4246 = vst.msk [vmem:[%s6883_s21 + $0x1c] sm:$0xf] %vm4238_vm7, %v4757_v12  ;;  %v4032_v31 = vadd.f32 %v5454_v20, %v6874_v61  ;;  %v5456_v37 = vadd.f32 %v5409_v52, %v6851_v48  ;;  %v3871_v6 = vpop.f32.mrb[11].mxu0 }
 0x207   : > { %4244 = vst.msk [vmem:[%s6883_s21 + $0x14] sm:$0xf] %vm4238_vm7, %v4755_v22  ;;  %v4030_v39 = vadd.f32 %v5455_v49, %v6874_v61  ;;  %v5457_v50 = vadd.f32 %v3871_v6, %v6853_v54 }
 0x208   : > { %v4068_v1 = vmax.f32 %v4032_v31, 0.0  ;;  %v4033_v25 = vadd.f32 %v5456_v37, %v6874_v61 }
 0x209   : > { %v4066_v3 = vmax.f32 %v4030_v39, 0.0  ;;  %v4031_v30 = vadd.f32 %v5457_v50, %v6874_v61 }
 0x20a   : > { %v4760_v62 = vpack.c.bf16 %v4068_v1, %v4068_v1  ;;  %v4069_v40 = vmax.f32 %v4033_v25, 0.0 }
 0x20b   : > { %v4758_v41 = vpack.c.bf16 %v4066_v3, %v4066_v3  ;;  %v4067_v48 = vmax.f32 %v4031_v30, 0.0  ;;  %v5412_v33 = vpop.f32.mrb[12].mxu0 }
 0x20c   : > { %4249 = vst.msk [vmem:[%s6883_s21 + $0x28] sm:$0xf] %vm4238_vm7, %v4760_v62  ;;  %v4761_v51 = vpack.c.bf16 %v4069_v40, %v4069_v40  ;;  %v5458_v60 = vadd.f32 %v5412_v33, %v6855_v29  ;;  %v3884_v42 = vpop.f32.mrb[13].mxu0 }
 0x20d   : > { %4247 = vst.msk [vmem:[%s6883_s21 + $0x20] sm:$0xf] %vm4238_vm7, %v4758_v41  ;;  %v4759_v54 = vpack.c.bf16 %v4067_v48, %v4067_v48  ;;  %v5459_v36 = vadd.f32 %v3884_v42, %v6857_v55  ;;  %v5413_v46 = vpop.f32.mrb[14].mxu0 }
 0x20e   : > { %4250 = vst.msk [vmem:[%s6883_s21 + $0x2c] sm:$0xf] %vm4238_vm7, %v4761_v51  ;;  %v4036_v4 = vadd.f32 %v5458_v60, %v6874_v61  ;;  %v5460_v21 = vadd.f32 %v5413_v46, %v6859_v19  ;;  %v3887_v44 = vpop.f32.mrb[15].mxu0 }
 0x20f   : > { %4248 = vst.msk [vmem:[%s6883_s21 + $0x24] sm:$0xf] %vm4238_vm7, %v4759_v54  ;;  %v4034_v47 = vadd.f32 %v5459_v36, %v6874_v61  ;;  %v5461_v29 = vadd.f32 %v3887_v44, %v6861_v35 }
 0x210   : > { %v4072_v13 = vmax.f32 %v4036_v4, 0.0  ;;  %v4037_v58 = vadd.f32 %v5460_v21, %v6874_v61 }
 0x211   : > { %v4070_v55 = vmax.f32 %v4034_v47, 0.0  ;;  %v4035_v28 = vadd.f32 %v5461_v29, %v6874_v61  ;;  %v5228_v34 = vpop.f32.mrb[20].mxu1 }
 0x212   : > { %v4764_v38 = vpack.c.bf16 %v4072_v13, %v4072_v13  ;;  %v4073_v17 = vmax.f32 %v4037_v58, 0.0  ;;  %v2226_v19 = vpop.f32.mrb[21].mxu1 }
 0x213   : > { %v4762_v24 = vpack.c.bf16 %v4070_v55, %v4070_v55  ;;  %v4071_v7 = vmax.f32 %v4035_v28, 0.0  ;;  %v5416_v16 = vpop.f32.mrb[16].mxu0  ;;  %v5229_v18 = vpop.f32.mrb[22].mxu1 }
 0x214   : > { %4253 = vst.msk [vmem:[%s6883_s21 + $0x38] sm:$0xf] %vm4238_vm7, %v4764_v38  ;;  %v4765_v35 = vpack.c.bf16 %v4073_v17, %v4073_v17  ;;  %v5462_v0 = vadd.f32 %v5416_v16, %v6863_v43  ;;  %v3900_v57 = vpop.f32.mrb[17].mxu0  ;;  %v2229_v23 = vpop.f32.mrb[23].mxu1 }
 0x215   : > { %4251 = vst.msk [vmem:[%s6883_s21 + $0x30] sm:$0xf] %vm4238_vm7, %v4762_v24  ;;  %v4763_v2 = vpack.c.bf16 %v4071_v7, %v4071_v7  ;;  %v5463_v14 = vadd.f32 %v3900_v57, %v6865_v9  ;;  %v5417_v5 = vpop.f32.mrb[18].mxu0 }
 0x216   : > { %4254 = vst.msk [vmem:[%s6883_s21 + $0x3c] sm:$0xf] %vm4238_vm7, %v4765_v35  ;;  %v4040_v27 = vadd.f32 %v5462_v0, %v6874_v61  ;;  %v5464_v8 = vadd.f32 %v5417_v5, %v6867_v53  ;;  %v3903_v56 = vpop.f32.mrb[19].mxu0 }
 0x217   : > { %4252 = vst.msk [vmem:[%s6883_s21 + $0x34] sm:$0xf] %vm4238_vm7, %v4763_v2  ;;  %v4038_v43 = vadd.f32 %v5463_v14, %v6874_v61  ;;  %v5465_v59 = vadd.f32 %v3903_v56, %v6869_v45 }
 0x218   : > { %v4076_v26 = vmax.f32 %v4040_v27, 0.0  ;;  %v4041_v32 = vadd.f32 %v5464_v8, %v6874_v61 }
 0x219   : > { %v4074_v9 = vmax.f32 %v4038_v43, 0.0  ;;  %v4039_v10 = vadd.f32 %v5465_v59, %v6874_v61  ;;  %v5232_v15 = vpop.f32.mrb[24].mxu1 }
 0x21a   : > { %v4768_v63 = vpack.c.bf16 %v4076_v26, %v4076_v26  ;;  %v4077_v12 = vmax.f32 %v4041_v32, 0.0  ;;  %v2242_v53 = vpop.f32.mrb[25].mxu1 }
 0x21b   : > { %v4766_v20 = vpack.c.bf16 %v4074_v9, %v4074_v9  ;;  %v4075_v11 = vmax.f32 %v4039_v10, 0.0  ;;  %v5420_v22 = vpop.f32.mrb[20].mxu0  ;;  %v5233_v49 = vpop.f32.mrb[26].mxu1 }
 0x21c   : > { %4257 = vst.msk [vmem:[%s6883_s21 + $0x48] sm:$0xf] %vm4238_vm7, %v4768_v63  ;;  %v4769_v45 = vpack.c.bf16 %v4077_v12, %v4077_v12  ;;  %v5466_v52 = vadd.f32 %v5420_v22, %v5228_v34  ;;  %v3916_v31 = vpop.f32.mrb[21].mxu0  ;;  %v2245_v37 = vpop.f32.mrb[27].mxu1 }
 0x21d   : > { %4255 = vst.msk [vmem:[%s6883_s21 + $0x40] sm:$0xf] %vm4238_vm7, %v4766_v20  ;;  %v4767_v6 = vpack.c.bf16 %v4075_v11, %v4075_v11  ;;  %v5467_v39 = vadd.f32 %v3916_v31, %v2226_v19  ;;  %v5421_v50 = vpop.f32.mrb[22].mxu0 }
 0x21e   : > { %4258 = vst.msk [vmem:[%s6883_s21 + $0x4c] sm:$0xf] %vm4238_vm7, %v4769_v45  ;;  %v4044_v1 = vadd.f32 %v5466_v52, %v6874_v61  ;;  %v5468_v25 = vadd.f32 %v5421_v50, %v5229_v18  ;;  %v3919_v3 = vpop.f32.mrb[23].mxu0 }
 0x21f   : > { %4256 = vst.msk [vmem:[%s6883_s21 + $0x44] sm:$0xf] %vm4238_vm7, %v4767_v6  ;;  %v4042_v30 = vadd.f32 %v5467_v39, %v6874_v61  ;;  %v5469_v62 = vadd.f32 %v3919_v3, %v2229_v23 }
 0x220   : > { %v4080_v40 = vmax.f32 %v4044_v1, 0.0  ;;  %v4045_v41 = vadd.f32 %v5468_v25, %v6874_v61 }
 0x221   : > { %v4078_v48 = vmax.f32 %v4042_v30, 0.0  ;;  %v4043_v33 = vadd.f32 %v5469_v62, %v6874_v61  ;;  %v5236_v51 = vpop.f32.mrb[28].mxu1 }
 0x222   : > { %v4772_v60 = vpack.c.bf16 %v4080_v40, %v4080_v40  ;;  %v4081_v42 = vmax.f32 %v4045_v41, 0.0  ;;  %v2258_v54 = vpop.f32.mrb[29].mxu1 }
 0x223   : > { %v4770_v36 = vpack.c.bf16 %v4078_v48, %v4078_v48  ;;  %v4079_v46 = vmax.f32 %v4043_v33, 0.0  ;;  %v5424_v4 = vpop.f32.mrb[24].mxu0  ;;  %v5237_v21 = vpop.f32.mrb[30].mxu1 }
 0x224   : > { %4261 = vst.msk [vmem:[%s6883_s21 + $0x58] sm:$0xf] %vm4238_vm7, %v4772_v60  ;;  %v4773_v44 = vpack.c.bf16 %v4081_v42, %v4081_v42  ;;  %v5470_v47 = vadd.f32 %v5424_v4, %v5232_v15  ;;  %v3932_v29 = vpop.f32.mrb[25].mxu0  ;;  %v2261_v13 = vpop.f32.mrb[31].mxu1 }
 0x225   : > { %4259 = vst.msk [vmem:[%s6883_s21 + $0x50] sm:$0xf] %vm4238_vm7, %v4770_v36  ;;  %v4771_v58 = vpack.c.bf16 %v4079_v46, %v4079_v46  ;;  %v5471_v55 = vadd.f32 %v3932_v29, %v2242_v53  ;;  %v5425_v28 = vpop.f32.mrb[26].mxu0 }
 0x226   : > { %4262 = vst.msk [vmem:[%s6883_s21 + $0x5c] sm:$0xf] %vm4238_vm7, %v4773_v44  ;;  %v4048_v34 = vadd.f32 %v5470_v47, %v6874_v61  ;;  %v5472_v38 = vadd.f32 %v5425_v28, %v5233_v49  ;;  %v3935_v17 = vpop.f32.mrb[27].mxu0 }
 0x227   : > { %4260 = vst.msk [vmem:[%s6883_s21 + $0x54] sm:$0xf] %vm4238_vm7, %v4771_v58  ;;  %v4046_v19 = vadd.f32 %v5471_v55, %v6874_v61  ;;  %v5473_v24 = vadd.f32 %v3935_v17, %v2245_v37 }
 0x228   : > { %v4084_v7 = vmax.f32 %v4048_v34, 0.0  ;;  %v4049_v16 = vadd.f32 %v5472_v38, %v6874_v61 }
 0x229   : > { %v4082_v18 = vmax.f32 %v4046_v19, 0.0  ;;  %v4047_v35 = vadd.f32 %v5473_v24, %v6874_v61  ;;  %v5240_v0 = vpop.f32.mrb[32].mxu1 }
 0x22a   : > { %v4776_v57 = vpack.c.bf16 %v4084_v7, %v4084_v7  ;;  %v4085_v23 = vmax.f32 %v4049_v16, 0.0  ;;  %v2274_v2 = vpop.f32.mrb[33].mxu1 }
 0x22b   : > { %v4774_v14 = vpack.c.bf16 %v4082_v18, %v4082_v18  ;;  %v4083_v5 = vmax.f32 %v4047_v35, 0.0  ;;  %v5428_v27 = vpop.f32.mrb[28].mxu0  ;;  %v5241_v8 = vpop.f32.mrb[34].mxu1 }
 0x22c   : > { %4265 = vst.msk [vmem:[%s6883_s21 + $0x68] sm:$0xf] %vm4238_vm7, %v4776_v57  ;;  %v4777_v56 = vpack.c.bf16 %v4085_v23, %v4085_v23  ;;  %v5474_v43 = vadd.f32 %v5428_v27, %v5236_v51  ;;  %v3948_v59 = vpop.f32.mrb[29].mxu0  ;;  %v2277_v26 = vpop.f32.mrb[35].mxu1 }
 0x22d   : > { %4263 = vst.msk [vmem:[%s6883_s21 + $0x60] sm:$0xf] %vm4238_vm7, %v4774_v14  ;;  %v4775_v32 = vpack.c.bf16 %v4083_v5, %v4083_v5  ;;  %v5475_v9 = vadd.f32 %v3948_v59, %v2258_v54  ;;  %v5429_v10 = vpop.f32.mrb[30].mxu0 }
 0x22e   : > { %4266 = vst.msk [vmem:[%s6883_s21 + $0x6c] sm:$0xf] %vm4238_vm7, %v4777_v56  ;;  %v4052_v15 = vadd.f32 %v5474_v43, %v6874_v61  ;;  %v5476_v63 = vadd.f32 %v5429_v10, %v5237_v21  ;;  %v3951_v12 = vpop.f32.mrb[31].mxu0 }
 0x22f   : > { %4264 = vst.msk [vmem:[%s6883_s21 + $0x64] sm:$0xf] %vm4238_vm7, %v4775_v32  ;;  %v4050_v53 = vadd.f32 %v5475_v9, %v6874_v61  ;;  %v5477_v20 = vadd.f32 %v3951_v12, %v2261_v13 }
 0x230   : > { %v4088_v11 = vmax.f32 %v4052_v15, 0.0  ;;  %v4053_v22 = vadd.f32 %v5476_v63, %v6874_v61 }
 0x231   : > { %v4086_v49 = vmax.f32 %v4050_v53, 0.0  ;;  %v4051_v45 = vadd.f32 %v5477_v20, %v6874_v61 }
 0x232   : > { %v4780_v52 = vpack.c.bf16 %v4088_v11, %v4088_v11  ;;  %v4089_v31 = vmax.f32 %v4053_v22, 0.0 }
 0x233   : > { %v4778_v37 = vpack.c.bf16 %v4086_v49, %v4086_v49  ;;  %v4087_v6 = vmax.f32 %v4051_v45, 0.0  ;;  %v5432_v39 = vpop.f32.mrb[32].mxu0 }
 0x234   : > { %4269 = vst.msk [vmem:[%s6883_s21 + $0x78] sm:$0xf] %vm4238_vm7, %v4780_v52  ;;  %v4781_v50 = vpack.c.bf16 %v4089_v31, %v4089_v31  ;;  %v5478_v1 = vadd.f32 %v5432_v39, %v5240_v0  ;;  %v3964_v25 = vpop.f32.mrb[33].mxu0 }
 0x235   : > { %4267 = vst.msk [vmem:[%s6883_s21 + $0x70] sm:$0xf] %vm4238_vm7, %v4778_v37  ;;  %v4779_v3 = vpack.c.bf16 %v4087_v6, %v4087_v6  ;;  %v5479_v30 = vadd.f32 %v3964_v25, %v2274_v2  ;;  %v5433_v62 = vpop.f32.mrb[34].mxu0 }
 0x236   : > { %4270 = vst.msk [vmem:[%s6883_s21 + $0x7c] sm:$0xf] %vm4238_vm7, %v4781_v50  ;;  %v4056_v40 = vadd.f32 %v5478_v1, %v6874_v61  ;;  %v5480_v41 = vadd.f32 %v5433_v62, %v5241_v8  ;;  %v3967_v48 = vpop.f32.mrb[35].mxu0 }
 0x237   : > { %4268 = vst.msk [vmem:[%s6883_s21 + $0x74] sm:$0xf] %vm4238_vm7, %v4779_v3  ;;  %v4054_v33 = vadd.f32 %v5479_v30, %v6874_v61  ;;  %v5481_v51 = vadd.f32 %v3967_v48, %v2277_v26 }
 0x238   : > { %v4092_v60 = vmax.f32 %v4056_v40, 0.0  ;;  %v4057_v42 = vadd.f32 %v5480_v41, %v6874_v61 }
 0x239   : > { %v4090_v54 = vmax.f32 %v4054_v33, 0.0  ;;  %v4055_v36 = vadd.f32 %v5481_v51, %v6874_v61 }
 0x23a   : > { %v4784_v46 = vpack.c.bf16 %v4092_v60, %v4092_v60  ;;  %v4093_v4 = vmax.f32 %v4057_v42, 0.0 }
 0x23b   : > { %v4782_v21 = vpack.c.bf16 %v4090_v54, %v4090_v54  ;;  %v4091_v44 = vmax.f32 %v4055_v36, 0.0 }
 0x23c   : > { %4273 = vst.msk [vmem:[%s6883_s21 + $0x88] sm:$0xf] %vm4238_vm7, %v4784_v46  ;;  %v4785_v47 = vpack.c.bf16 %v4093_v4, %v4093_v4 }
 0x23d   : > { %4271 = vst.msk [vmem:[%s6883_s21 + $0x80] sm:$0xf] %vm4238_vm7, %v4782_v21  ;;  %v4783_v29 = vpack.c.bf16 %v4091_v44, %v4091_v44 }
 0x23e   : > { %4274 = vst.msk [vmem:[%s6883_s21 + $0x8c] sm:$0xf] %vm4238_vm7, %v4785_v47 }
 0x23f   : > { %4272 = vst.msk [vmem:[%s6883_s21 + $0x84] sm:$0xf] %vm4238_vm7, %v4783_v29 }
 0x240 PF: > { %s13_s12 = sadd.s32 1, %s5897_s12  }
 0x241   : > { %p10_p4 = scmp.ge.s32.totalorder %s13_s12, 4  }
 0x243   :  { %12 = sbr.rel (!%p10_p4) target bundleno = 1 (0x1), region = 70 }

// kernel: model_c_forward.11
= control target key start
LH: loop header
LB: loop body
LE: loop exit
PB: predicated region body
PF: predicated region fallthrough
CT: control target
= control target key end

     0   :  { %s3030_s12 = smov 0   ;;  %s3795_s0 = inlined_call_operand.vmem [shape: bf16[2,88,384], index: 0, kind: input, shape index: {}]   ;;  %s3796_s1 = inlined_call_operand.vmem [shape: bf16[4,384,96], index: 1, kind: input, shape index: {}]   ;;  %s3797_s2 = inlined_call_operand.vmem [shape: f32[1,96], index: 2, kind: input, shape index: {}]   ;;  %s3798_s3 = inlined_call_operand.vmem [shape: bf16[2,72,96], index: 3, kind: output, shape index: {}]  }
   0x1 LB: > { %s2170_s13 = sadd.s32 4294967295, %s3006_s12   ;;  %p2174_p0 = scmp.ge.s32.totalorder %s3006_s12, 1  ;;  %s3006_s12 = sphi %s3030_s12, %s13_s12  }
   0x2   : > { %p137_p1 = scmp.lt.s32.totalorder %s3006_s12, 3 }
   0x4   : > { %p138_p2 = pnand %p2174_p0, %p137_p1 }
   0x5   : > { %v2866_v0 = vld [vmem:[%s3796_s1 + $0x100] sm:$0xff] (!%p138_p2)   ;;  %v3008_v2 = vmov (!%p138_p2), 0.0   ;;  %v2869_v4 = vld [vmem:[%s3796_s1 + $0x108] sm:$0xff] (!%p138_p2)   ;;  %vm3009_vm0 = vmmov (!%p138_p2), 0   ;;  %v2872_v7 = vld [vmem:[%s3796_s1 + $0x110] sm:$0xff] (!%p138_p2)   ;;  %p161_p3 = scmp.lt.s32.totalorder (!%p138_p2), %s2170_s13, 1 }
   0x6   : > { %141 = sbr.rel (%p138_p2) target bundleno = 416 (0x1a0), region = 32  ;;  %v2867_v1 = vld [vmem:[%s3796_s1 + $0xc0] sm:$0xff] (!%p138_p2)   ;;  %2710 = vmatprep.subr.bf16.mxu1 (!%p138_p2), %v3008_v2  ;;  %2474 = vmatprep.subr.bf16.mxu0 (!%p138_p2), %v2866_v0  ;;  %v2870_v5 = vld [vmem:[%s3796_s1 + $0xc8] sm:$0xff] (!%p138_p2)   ;;  %v2873_v8 = vld [vmem:[%s3796_s1 + $0xd0] sm:$0xff] (!%p138_p2)   ;;  %vm354_vm1 = vsmask.f32 (!%p138_p2), 7424 }
   0x7   : > { %v2868_v3 = vld [vmem:[%s3796_s1 + $0x140] sm:$0xff] (!%p138_p2)   ;;  %2475 = vmatpush3.bf16.msra.mxu0 (!%p138_p2), %v2867_v1  ;;  %2726 = vmatprep.mubr.msk.bf16.mxu1 (!%p138_p2), %vm3009_vm0, %v3008_v2  ;;  %v2871_v6 = vld [vmem:[%s3796_s1 + $0x148] sm:$0xff] (!%p138_p2)   ;;  %v2874_v9 = vld [vmem:[%s3796_s1 + $0x150] sm:$0xff] (!%p138_p2)   ;;  %vm1703_vm2 = vcmask (!%p138_p2), 1046528   ;;  %vm2105_vm3 = vcmask (!%p138_p2), 781312  }
   0x8   : > { %2711 = vmatpush3.bf16.msra.mxu1 (!%p138_p2), %v2868_v3  ;;  %2476 = vmatprep.subr.bf16.mxu0 (!%p138_p2), %v2869_v4  ;;  %v2875_v10 = vld [vmem:[%s3796_s1 + $0x118] sm:$0xff] (!%p138_p2)   ;;  %v2878_v13 = vld [vmem:[%s3796_s1 + $0x120] sm:$0xff] (!%p138_p2)   ;;  %v2881_v16 = vld [vmem:[%s3796_s1 + $0x128] sm:$0xff] (!%p138_p2)  }
   0x9   : > { %2712 = vmatprep.subr.bf16.mxu1 (!%p138_p2), %v3008_v2  ;;  %v2876_v11 = vld [vmem:[%s3796_s1 + $0xd8] sm:$0xff] (!%p138_p2)   ;;  %v2879_v14 = vld [vmem:[%s3796_s1 + $0xe0] sm:$0xff] (!%p138_p2)   ;;  %v2882_v17 = vld [vmem:[%s3796_s1 + $0xe8] sm:$0xff] (!%p138_p2)  }
   0xa   : > { %v2877_v12 = vld [vmem:[%s3796_s1 + $0x158] sm:$0xff] (!%p138_p2)   ;;  %v2880_v15 = vld [vmem:[%s3796_s1 + $0x160] sm:$0xff] (!%p138_p2)   ;;  %v2883_v18 = vld [vmem:[%s3796_s1 + $0x168] sm:$0xff] (!%p138_p2)  }
   0xb   : > { %2477 = vmatpush3.bf16.msra.mxu0 (!%p138_p2), %v2870_v5  ;;  %v2884_v19 = vld [vmem:[%s3796_s1 + $0x130] sm:$0xff] (!%p138_p2)   ;;  %v2887_v22 = vld [vmem:[%s3796_s1 + $0x138] sm:$0xff] (!%p138_p2)   ;;  %v2894_v33 = vld [vmem:[%s3796_s1 + $0x40] sm:$0xff] (!%p138_p2)  }
   0xc   : > { %2713 = vmatpush3.bf16.msra.mxu1 (!%p138_p2), %v2871_v6  ;;  %2478 = vmatprep.subr.bf16.mxu0 (!%p138_p2), %v2872_v7  ;;  %v2885_v20 = vld [vmem:[%s3796_s1 + $0xf0] sm:$0xff] (!%p138_p2)   ;;  %v2888_v26 = vld [vmem:[%s3796_s1 + $0xf8] sm:$0xff] (!%p138_p2)   ;;  %v2897_v51 = vld [vmem:[%s3796_s1] sm:$0xff] (!%p138_p2)  }
   0xd   : > { %2714 = vmatprep.subr.bf16.mxu1 %v3008_v2  ;;  %s3800_s13 = smov (!%p161_p3, %s2170_s13), 1  ;;  %v2886_v21 = vld [vmem:[%s3796_s1 + $0x170] sm:$0xff]   ;;  %v2889_v30 = vld [vmem:[%s3796_s1 + $0x178] sm:$0xff]   ;;  %v2898_v53 = vld [vmem:[%s3796_s1 + $0x80] sm:$0xff]  }
   0xe   : > { %s2854_s21 = smul.u32 132, %s3800_s13  ;;  %v2899_v57 = vld [vmem:[%s3796_s1 + $0x48] sm:$0xff]  }
   0xf   : > { %2479 = vmatpush3.bf16.msra.mxu0 %v2873_v8  ;;  %v2900_v59 = vld [vmem:[%s3796_s1 + $0x8] sm:$0xff]   ;;  %s2855_s17 = smul.u32 36, %s3800_s13 }
  0x10   : > { %2715 = vmatpush3.bf16.msra.mxu1 %v2874_v9  ;;  %2480 = vmatprep.subr.bf16.mxu0 %v2875_v10  ;;  %s3116_s5 = scalar_lea.vmem %s3795_s0, %s2854_s21  ;;  %v2904_v9 = vld [vmem:[%s3796_s1 + $0x88] sm:$0xff]  }
  0x11   : > { %2716 = vmatprep.subr.bf16.mxu1 %v3008_v2  ;;  %v172_v23 = vld [vmem:[%s3116_s5] sm:$0xff]  ;;  %v3126_v24 = vld [vmem:[%s3116_s5 + $0xc] sm:$0xff]  ;;  %v3129_v25 = vld [vmem:[%s3116_s5 + $0x18] sm:$0xff]  ;;  %s3758_s20 = scalar_lea.vmem %s3798_s3, %s2855_s17 }
  0x12   : > { %v178_v27 = vld [vmem:[%s3116_s5 + $0x24] sm:$0xff]  ;;  %v3137_v28 = vcombine.high %v172_v23, %v3126_v24  ;;  %v3140_v29 = vcombine.low %v172_v23, %v3126_v24  ;;  %v3165_v43 = vld [vmem:[%s3116_s5 + $0x20] ss:$12 sps:$4 sm:$0xff]   ;;  %v180_v60 = vld [vmem:[%s3116_s5 + $0x30] sm:$0xff] }
  0x13   : > { %2481 = vmatpush3.bf16.msra.mxu0 %v2876_v11  ;;  %v3146_v31 = vcombine.high %v3129_v25, %v178_v27  ;;  %v3149_v32 = vcombine.low %v3129_v25, %v178_v27  ;;  %v3161_v40 = vld [vmem:[%s3116_s5 + $0x8] ss:$12 sps:$4 sm:$0xff]   ;;  %v387_v50 = vshll.u32 %v3165_v43, 16  ;;  %v182_v61 = vld [vmem:[%s3116_s5 + $0x3c] sm:$0xff]  ;;  %v407_v0 = vshrl.u32 %v3165_v43, 16 }
  0x14   : > { %2717 = vmatpush3.bf16.msra.mxu1 %v2877_v12  ;;  %2482 = vmatprep.subr.bf16.mxu0 %v2878_v13  ;;  %v368_v34 = vshrl.u32 %v3137_v28, 16  ;;  %v370_v35 = vshll.u32 %v3137_v28, 16  ;;  %v356_v36 = vshrl.u32 %v3140_v29, 16  ;;  %v358_v37 = vshll.u32 %v3140_v29, 16  ;;  %v3195_v4 = vld [vmem:[%s3116_s5 + $0x38] ss:$12 sps:$4 sm:$0xff]  }
  0x15   : > { %2718 = vmatprep.subr.bf16.mxu1 %v3008_v2  ;;  %v375_v38 = vshll.u32 %v3146_v31, 16  ;;  %v363_v39 = vshll.u32 %v3149_v32, 16  ;;  %v380_v46 = vshrl.u32 %v3161_v40, 16  ;;  %v382_v47 = vshll.u32 %v3161_v40, 16 }
  0x16   : > { %v372_v41 = vrot.slane %v370_v35, 1  ;;  %v360_v42 = vrot.slane %v358_v37, 1  ;;  %v389_v56 = vrot.slane %v387_v50, 1  ;;  %v399_v62 = vshrl.u32 %v3146_v31, 16  ;;  %v2913_v50 = vld [vmem:[%s3796_s1 + $0x98] sm:$0xff]  }
  0x17   : > { %2483 = vmatpush3.bf16.msra.mxu0 %v2879_v14  ;;  %v377_v44 = vrot.slane %v375_v38, 1  ;;  %v365_v45 = vrot.slane %v363_v39, 1  ;;  %v384_v52 = vrot.slane %v382_v47, 1  ;;  %v391_v63 = vshrl.u32 %v3149_v32, 16  ;;  %v2905_v14 = vld [vmem:[%s3796_s1 + $0x50] sm:$0xff]  }
  0x18   : > { %2719 = vmatpush3.bf16.msra.mxu1 %v2880_v15  ;;  %2484 = vmatprep.subr.bf16.mxu0 %v2881_v16  ;;  %v373_v48 = vor.u32 %v372_v41, %v368_v34  ;;  %v361_v49 = vor.u32 %v360_v42, %v356_v36  ;;  %v3190_v1 = vcombine.high %v180_v60, %v182_v61  ;;  %v411_v13 = vshll.u32 %v3195_v4, 16  ;;  %v2909_v36 = vld [vmem:[%s3796_s1 + $0x58] sm:$0xff]  }
  0x19   : > { %2720 = vmatprep.subr.bf16.mxu1 %v3008_v2  ;;  %v385_v58 = vor.u32 %v384_v52, %v380_v46  ;;  %v3192_v3 = vcombine.low %v180_v60, %v182_v61  ;;  %v3197_v5 = vcombine.low %v178_v27, %v180_v60  ;;  %v3199_v6 = vcombine.high %v178_v27, %v180_v60  ;;  %v2911_v41 = vld [vmem:[%s3796_s1 + $0x18] sm:$0xff]  }
  0x1a   : > { %v378_v54 = vsel %vm354_vm1, %v373_v48, %v377_v44  ;;  %v366_v55 = vsel %vm354_vm1, %v361_v49, %v365_v45  ;;  %v401_v8 = vor.u32 %v399_v62, %v377_v44  ;;  %v403_v10 = vshll.u32 %v3190_v1, 16  ;;  %v3249_v48 = vld [vmem:[%s3116_s5 + $0x50] ss:$12 sps:$4 sm:$0xff]   ;;  %v3271_v62 = vld [vmem:[%s3116_s5 + $0x60] sm:$0xff] }
  0x1b   : > { %2485 = vmatpush3.bf16.msra.mxu0 %v2882_v17  ;;  %663 = vmatprep.mubr.bf16.mxu0 %v378_v54  ;;  %v390_v7 = vsel %vm354_vm1, %v385_v58, %v389_v56  ;;  %v393_v11 = vor.u32 %v391_v63, %v365_v45  ;;  %v395_v12 = vshll.u32 %v3192_v3, 16  ;;  %v409_v15 = vor.u32 %v407_v0, %v389_v56  ;;  %v2914_v56 = vld [vmem:[%s3796_s1 + $0x60] sm:$0xff]   ;;  %v238_v63 = vld [vmem:[%s3116_s5 + $0x6c] sm:$0x11] }
  0x1c   : > { %2721 = vmatpush3.bf16.msra.mxu1 %v2883_v18  ;;  %2486 = vmatprep.subr.bf16.mxu0 %v2884_v19  ;;  %v405_v16 = vrot.slane %v403_v10, 1  ;;  %v413_v18 = vrot.slane %v411_v13, 1  ;;  %v2906_v19 = vld [vmem:[%s3796_s1 + $0x10] sm:$0xff]   ;;  %v423_v23 = vshrl.u32 %v3190_v1, 16  ;;  %v431_v38 = vshrl.u32 %v3195_v4, 16 }
  0x1d   : > { %2722 = vmatprep.subr.bf16.mxu1 %v3008_v2  ;;  %v397_v17 = vrot.slane %v395_v12, 1  ;;  %v2238_v0 = vcombine.high %v3271_v62, %v238_v63  ;;  %v455_v10 = vshrl.u32 %v3249_v48, 16  ;;  %v239_v12 = vld [vmem:[%s3116_s5 + $0x74] sm:$0x1] }
  0x1e   : > { %v406_v27 = vsel %vm354_vm1, %v401_v8, %v405_v16  ;;  %v414_v34 = vsel %vm354_vm1, %v409_v15, %v413_v18  ;;  %v425_v39 = vor.u32 %v423_v23, %v405_v16  ;;  %v433_v54 = vor.u32 %v431_v38, %v413_v18  ;;  %v2918_v8 = vld [vmem:[%s3796_s1 + $0xa0] sm:$0xff]   ;;  %v2921_v18 = vld [vmem:[%s3796_s1 + $0x28] sm:$0xff]  }
  0x1f   : > { %2487 = vmatpush3.bf16.msra.mxu0 %v2885_v20  ;;  %v3219_v20 = vcombine.high %v3126_v24, %v3129_v25 }
  0x20   : > { %2723 = vmatpush3.bf16.msra.mxu1 %v2886_v21  ;;  %2488 = vmatprep.subr.bf16.mxu0 %v2887_v22  ;;  %v2907_v21 = vld [vmem:[%s3796_s1 + $0x90] sm:$0xff]   ;;  %v184_v22 = vld [vmem:[%s3116_s5 + $0x48] sm:$0xff] }
  0x21   : > { %2724 = vmatprep.subr.bf16.mxu1 %v3008_v2  ;;  %v1230_v42 = vshll.u32 %v3219_v20, 16  ;;  %v3244_v44 = vcombine.high %v182_v61, %v184_v22  ;;  %v3251_v49 = vcombine.low %v182_v61, %v184_v22 }
  0x23   : > { %2489 = vmatpush3.bf16.msra.mxu0 %v2888_v26  ;;  %v415_v26 = vshrl.u32 %v3192_v3, 16 }
  0x24   : > { %2725 = vmatpush3.bf16.msra.mxu1 %v2889_v30  ;;  %2533 = vmatprep.subr.bf16.mxu0 %v2894_v33  ;;  %v398_v30 = vsel %vm354_vm1, %v393_v11, %v397_v17  ;;  %v186_v33 = vld [vmem:[%s3116_s5 + $0x54] sm:$0xff] }
  0x25   : > { %2746 = vmatprep.subr.bf16.mxu1 %v3008_v2  ;;  %v3231_v35 = vcombine.high %v184_v22, %v186_v33  ;;  %v3236_v37 = vcombine.low %v184_v22, %v186_v33  ;;  %v417_v46 = vor.u32 %v415_v26, %v397_v17  ;;  %v2920_v17 = vld [vmem:[%s3796_s1 + $0x68] sm:$0xff]   ;;  %v3300_v22 = vcombine.low %v186_v33, %v3271_v62 }
  0x26   : > { %664 = vmatmul.mubr.bf16.vlgmr.msra.gmra.mrb[0].mxu0 %v366_v55  ;;  %v435_v55 = vshll.u32 %v3249_v48, 16 }
  0x27   : > { %2534 = vmatpush3.bf16.msra.mxu0 %v2897_v51  ;;  %2727 = vmatmul.mubr.bf16.vlgmr.msra.gmra.mrb[0].mxu1 %v390_v7  ;;  %v427_v45 = vshll.u32 %v3231_v35, 16  ;;  %v419_v47 = vshll.u32 %v3236_v37, 16  ;;  %v447_v51 = vshrl.u32 %v3231_v35, 16  ;;  %v439_v58 = vshrl.u32 %v3236_v37, 16 }
  0x28   : > { %2535 = vmatprep.subr.bf16.mxu0 %v2899_v57  ;;  %2747 = vmatpush3.bf16.msra.mxu1 %v2898_v53  ;;  %v2915_v57 = vld [vmem:[%s3796_s1 + $0x20] sm:$0xff]   ;;  %v437_v61 = vrot.slane %v435_v55, 1  ;;  %v3276_v7 = vcombine.low %v3271_v62, %v238_v63  ;;  %v1232_v55 = vrot.slane %v1230_v42, 1 }
  0x29   : > { %2730 = vmatprep.mubr.msk.bf16.mxu1 %vm3009_vm0, %v3008_v2  ;;  %2748 = vmatprep.subr.bf16.mxu1 %v3008_v2  ;;  %v429_v52 = vrot.slane %v427_v45, 1  ;;  %v421_v53 = vrot.slane %v419_v47, 1  ;;  %v1228_v45 = vshrl.u32 %v3219_v20, 16 }
  0x2a   : > { %671 = vmatprep.mubr.bf16.mxu0 %v406_v27  ;;  %v438_v11 = vsel %vm354_vm1, %v433_v54, %v437_v61  ;;  %v443_v15 = vshll.u32 %v3276_v7, 16  ;;  %v2339_v54 = vcombine.low %v3126_v24, %v3129_v25  ;;  %v2929_v25 = vld [vmem:[%s3796_s1 + $0x1c0] sm:$0xff]  }
  0x2b   : > { %2536 = vmatpush3.bf16.msra.mxu0 %v2900_v59  ;;  %v430_v59 = vsel %vm354_vm1, %v425_v39, %v429_v52  ;;  %v422_v60 = vsel %vm354_vm1, %v417_v46, %v421_v53  ;;  %v449_v13 = vor.u32 %v447_v51, %v429_v52  ;;  %v2926_v51 = vld [vmem:[%s3796_s1 + $0x78] sm:$0xff]   ;;  %v1233_v24 = vor.u32 %v1232_v55, %v1228_v45  ;;  %v2933_v45 = vld [vmem:[%s3796_s1 + $0x188] sm:$0xff]  }
  0x2c   : > { %2537 = vmatprep.subr.bf16.mxu0 %v2905_v14  ;;  %2749 = vmatpush3.bf16.msra.mxu1 %v2904_v9  ;;  %v3282_v9 = vld [vmem:[%s3116_s5 + $0x68] sm:$0xf]  ;;  %v451_v14 = vshll.u32 %v2238_v0, 16  ;;  %v445_v26 = vrot.slane %v443_v15, 1  ;;  %v1216_v42 = vshrl.u32 %v2339_v54, 16  ;;  %v1708_v55 = vrot.slane %v3199_v6, 1 }
  0x2d   : > { %2750 = vmatprep.subr.bf16.mxu1 %v3008_v2  ;;  %v2239_v16 = vcombine.low %v3282_v9, %v239_v12  ;;  %v1259_v12 = vshrl.u32 %v3199_v6, 16 }
  0x2e   : > { %672 = vmatmul.mubr.bf16.gmra.mrb[4].mxu0 %v398_v30  ;;  %v453_v23 = vrot.slane %v451_v14, 1  ;;  %v2922_v30 = vld [vmem:[%s3796_s1 + $0xa8] sm:$0xff]  }
  0x2f   : > { %2538 = vmatpush3.bf16.msra.mxu0 %v2906_v19  ;;  %2731 = vmatmul.mubr.bf16.gmra.mrb[4].mxu1 %v414_v34  ;;  %v441_v19 = vor.u32 %v439_v58, %v421_v53  ;;  %v459_v27 = vshll.u32 %v2239_v16, 16  ;;  %v457_v34 = vor.u32 %v455_v10, %v437_v61  ;;  %v2925_v53 = vld [vmem:[%s3796_s1 + $0xb0] sm:$0xff]   ;;  %v469_v58 = vshrl.u32 %v2239_v16, 16 }
  0x30   : > { %2539 = vmatprep.subr.bf16.mxu0 %v2909_v36  ;;  %2751 = vmatpush3.bf16.msra.mxu1 %v2907_v21  ;;  %v3297_v21 = vcombine.high %v186_v33, %v3271_v62  ;;  %v2923_v36 = vld [vmem:[%s3796_s1 + $0x70] sm:$0xff]   ;;  %v466_v33 = vshrl.u32 %v2238_v0, 16  ;;  %v454_v38 = vsel %vm354_vm1, %v449_v13, %v453_v23  ;;  %v1223_v0 = vshll.u32 %v3197_v5, 16 }
  0x31   : > { %2734 = vmatprep.mubr.msk.bf16.mxu1 %vm3009_vm0, %v3008_v2  ;;  %2752 = vmatprep.subr.bf16.mxu1 %v3008_v2  ;;  %v461_v39 = vrot.slane %v459_v27, 1  ;;  %v446_v46 = vsel %vm354_vm1, %v441_v19, %v445_v26  ;;  %v1263_v13 = vshll.u32 %v3244_v44, 16  ;;  %v1251_v16 = vshrl.u32 %v3197_v5, 16 }
  0x32   : > { %679 = vmatprep.mubr.bf16.mxu0 %v430_v59  ;;  %v468_v47 = vor.u32 %v466_v33, %v453_v23  ;;  %v2928_v59 = vld [vmem:[%s3796_s1 + $0xb8] sm:$0xff]   ;;  %v1225_v10 = vrot.slane %v1223_v0, 1  ;;  %v1255_v19 = vshll.u32 %v3251_v49, 16  ;;  %v2931_v33 = vld [vmem:[%s3796_s1 + $0x200] sm:$0xff]   ;;  %v2945_v0 = vld [vmem:[%s3796_s1 + $0x1a8] sm:$0xff]  }
  0x33   : > { %2540 = vmatpush3.bf16.msra.mxu0 %v2911_v41  ;;  %v2924_v41 = vld [vmem:[%s3796_s1 + $0x30] sm:$0xff]   ;;  %v462_v52 = vsel %vm354_vm1, %v457_v34, %v461_v39 }
  0x34   : > { %2541 = vmatprep.subr.bf16.mxu0 %v2914_v56  ;;  %2753 = vmatpush3.bf16.msra.mxu1 %v2913_v50  ;;  %v463_v50 = vshrl.u32 %v3276_v7, 16  ;;  %v2927_v56 = vld [vmem:[%s3796_s1 + $0x38] sm:$0xff]   ;;  %v1257_v27 = vrot.slane %v1255_v19, 1  ;;  %v2264_v19 = vcombine.low %v3271_v62, %v3271_v62 }
  0x35   : > { %2754 = vmatprep.subr.bf16.mxu1 %v3008_v2 }
  0x36   : > { %680 = vmatmul.mubr.bf16.gmra.mrb[8].mxu0 %v422_v60  ;;  %v1218_v60 = vshll.u32 %v2339_v54, 16  ;;  %v465_v61 = vor.u32 %v463_v50, %v445_v26  ;;  %v1283_v26 = vshrl.u32 %v3244_v44, 16  ;;  %v2935_v50 = vld [vmem:[%s3796_s1 + $0x1d0] sm:$0xff]   ;;  %v2938_v54 = vld [vmem:[%s3796_s1 + $0x1d8] sm:$0xff]  }
  0x37   : > { %2542 = vmatpush3.bf16.msra.mxu0 %v2915_v57  ;;  %2735 = vmatmul.mubr.bf16.gmra.mrb[8].mxu1 %v438_v11  ;;  %v1235_v57 = vshll.u32 %v3199_v6, 16 }
  0x38   : > { %2543 = vmatprep.subr.bf16.mxu0 %v2920_v17  ;;  %2738 = vmatprep.mubr.msk.bf16.mxu1 %vm3009_vm0, %v3008_v2  ;;  %v1220_v7 = vrot.slane %v1218_v60, 1  ;;  %v1265_v17 = vrot.slane %v1263_v13, 1 }
  0x39   : > { %2755 = vmatpush3.bf16.msra.mxu1 %v2918_v8  ;;  %687 = vmatprep.mubr.bf16.mxu0 %v454_v38  ;;  %v1237_v20 = vrot.slane %v1235_v57, 1  ;;  %v471_v8 = vor.u32 %v469_v58, %v461_v39  ;;  %v1275_v39 = vshrl.u32 %v3251_v49, 16  ;;  %v1705_v57 = vrot.slane %v3197_v5, 1 }
  0x3a   : > { %2756 = vmatprep.subr.bf16.mxu1 %v3008_v2  ;;  %v1221_v11 = vor.u32 %v1220_v7, %v1216_v42  ;;  %v1285_v34 = vor.u32 %v1283_v26, %v1265_v17  ;;  %v1713_v58 = vrot.slane %v3251_v49, 1  ;;  %v2940_v49 = vld [vmem:[%s3796_s1 + $0x218] sm:$0xff]   ;;  %v2944_v42 = vld [vmem:[%s3796_s1 + $0x1e8] sm:$0xff]  }
  0x3b   : > { %2544 = vmatpush3.bf16.msra.mxu0 %v2921_v18  ;;  %v3344_v63 = vsel %vm354_vm1, %v1233_v24, %v1237_v20  ;;  %v1261_v15 = vor.u32 %v1259_v12, %v1237_v20  ;;  %v1253_v18 = vor.u32 %v1251_v16, %v1225_v10  ;;  %v2942_v20 = vld [vmem:[%s3796_s1 + $0x1a0] sm:$0xff]   ;;  %v2946_v7 = vld [vmem:[%s3796_s1 + $0x228] sm:$0xff]   ;;  %v2952_v12 = vld [vmem:[%s3796_s1 + $0x230] sm:$0xff]  }
  0x3c   : > { %2545 = vmatprep.subr.bf16.mxu0 %v2923_v36  ;;  %v3352_v14 = vsel %vm354_vm1, %v1221_v11, %v1225_v10  ;;  %v1287_v36 = vshll.u32 %v3297_v21, 16  ;;  %v3482_v10 = vld [vmem:[%s3116_s5 + $0x20] sm:$0xf]  ;;  %v2953_v11 = vld [vmem:[%s3796_s1 + $0x1f8] sm:$0xff]  }
  0x3d   : > { %2757 = vmatpush3.bf16.msra.mxu1 %v2922_v30  ;;  %v3359_v23 = vsel %vm354_vm1, %v1261_v15, %v1265_v17  ;;  %v2932_v30 = vld [vmem:[%s3796_s1 + $0x1c8] sm:$0xff]   ;;  %v3373_v38 = vsel %vm354_vm1, %v1253_v18, %v1257_v27  ;;  %v2954_v15 = vld [vmem:[%s3796_s1 + $0x1b8] sm:$0xff]   ;;  %v2960_v16 = vld [vmem:[%s3796_s1 + $0x280] sm:$0xff]  }
  0x3e   : > { %688 = vmatmul.mubr.bf16.gmra.mrb[12].mxu0 %v446_v46  ;;  %2758 = vmatprep.subr.bf16.mxu1 %v3008_v2  ;;  %v1277_v46 = vor.u32 %v1275_v39, %v1257_v27  ;;  %v3506_v17 = vld [vmem:[%s3116_s5 + $0x2c] ss:$12 sps:$4 sm:$0xff]  }
  0x3f   : > { %695 = vmatprep.mubr.bf16.mxu0 %v468_v47  ;;  %2546 = vmatpush3.bf16.msra.mxu0 %v2924_v41  ;;  %v3377_v41 = vrot.slane %v1287_v36, 1  ;;  %v1279_v47 = vshll.u32 %v3300_v22, 16  ;;  %v1247_v26 = vshll.u32 %v3506_v17, 16  ;;  %v2964_v36 = vld [vmem:[%s3796_s1 + $0x2c0] sm:$0xff]   ;;  %v1267_v39 = vshrl.u32 %v3506_v17, 16 }
  0x40   : > { %2739 = vmatmul.mubr.bf16.gmra.mrb[12].mxu1 %v462_v52  ;;  %2547 = vmatprep.subr.bf16.mxu0 %v2926_v51  ;;  %v2937_v52 = vld [vmem:[%s3796_s1 + $0x210] sm:$0xff]  }
  0x41   : > { %2742 = vmatprep.mubr.msk.bf16.mxu1 %vm3009_vm0, %v3008_v2  ;;  %2759 = vmatpush3.bf16.msra.mxu1 %v2925_v53  ;;  %v3397_v51 = vrot.slane %v1279_v47, 1  ;;  %v2971_v47 = vld [vmem:[%s3796_s1 + $0x290] sm:$0xff]  }
  0x42   : > { %2760 = vmatprep.subr.bf16.mxu1 %v3008_v2 }
  0x43   : > { %2548 = vmatpush3.bf16.msra.mxu0 %v2927_v56  ;;  %v3408_v53 = vsel %vm354_vm1, %v1277_v46, %v3397_v51  ;;  %v1715_v56 = vrot.slane %v3244_v44, 1  ;;  %v2941_v44 = vld [vmem:[%s3796_s1 + $0x1e0] sm:$0xff]   ;;  %v2966_v46 = vld [vmem:[%s3796_s1 + $0x248] sm:$0xff]  }
  0x44   : > { %2592 = vmatprep.subr.bf16.mxu0 %v2929_v25  ;;  %v1719_v25 = vrot.slane %v3300_v22, 1 }
  0x45   : > { %2761 = vmatpush3.bf16.msra.mxu1 %v2928_v59  ;;  %v2939_v59 = vld [vmem:[%s3796_s1 + $0x198] sm:$0xff]   ;;  %v3426_v24 = vsel %vm1703_vm2, %v1708_v55, %v1715_v56 }
  0x46   : > { %696 = vmatmul.mubr.bf16.gmra.mrb[16].mxu0 %v465_v61  ;;  %2782 = vmatprep.subr.bf16.mxu1 %v3008_v2  ;;  %v3459_v60 = vsel %vm1703_vm2, %v1713_v58, %v1719_v25  ;;  %v2943_v61 = vld [vmem:[%s3796_s1 + $0x220] sm:$0xff]  }
  0x47   : > { %969 = vmatprep.mubr.bf16.mxu0 %v3137_v28  ;;  %v2930_v28 = vld [vmem:[%s3796_s1 + $0x180] sm:$0xff]  }
  0x48   : > { %2743 = vmatmul.mubr.bf16.gmra.mrb[16].mxu1 %v471_v8  ;;  %v1082_v8 = vld [vmem:[%s3116_s5 + $0x14] sm:$0xf] }
  0x49   : > { %2762 = vmatprep.mubr.msk.bf16.mxu1 %vm3009_vm0, %v3008_v2  ;;  %v2341_v13 = vcombine.low %v1082_v8, %v3482_v10  ;;  %v2979_v8 = vld [vmem:[%s3796_s1 + $0x2d8] sm:$0xff]  }
  0x4b   : > { %v1242_v18 = vshll.u32 %v2341_v13, 16 }
  0x4d   : > { %v1244_v27 = vrot.slane %v1242_v18, 1 }
  0x4e   : > { %970 = vmatmul.mubr.bf16.vlgmr.msra.gmra.mrb[20].mxu0 %v3140_v29  ;;  %v3390_v29 = vsel %vm354_vm1, %v1285_v34, %v3377_v41  ;;  %v3524_v34 = vld [vmem:[%s3116_s5 + $0x44] ss:$12 sps:$4 sm:$0xff]  }
  0x4f   : > { %2593 = vmatpush3.bf16.msra.mxu0 %v2930_v28  ;;  %977 = vmatprep.mubr.bf16.mxu0 %v3146_v31  ;;  %v2934_v31 = vld [vmem:[%s3796_s1 + $0x208] sm:$0xff]   ;;  %v1240_v28 = vshrl.u32 %v2341_v13, 16 }
  0x50   : > { %2763 = vmatmul.mubr.bf16.vlgmr.msra.gmra.mrb[20].mxu1 %v3161_v40  ;;  %2594 = vmatprep.subr.bf16.mxu0 %v2932_v30  ;;  %v2936_v40 = vld [vmem:[%s3796_s1 + $0x190] sm:$0xff]   ;;  %v2987_v13 = vld [vmem:[%s3796_s1 + $0x2a8] sm:$0xff]  }
  0x51   : > { %2783 = vmatpush3.bf16.msra.mxu1 %v2931_v33  ;;  %2766 = vmatprep.mubr.msk.bf16.mxu1 %vm3009_vm0, %v3008_v2  ;;  %v1245_v30 = vor.u32 %v1244_v27, %v1240_v28 }
  0x52   : > { %2784 = vmatprep.subr.bf16.mxu1 %v3008_v2 }
  0x53   : > { %2595 = vmatpush3.bf16.msra.mxu0 %v2933_v45  ;;  %v1271_v45 = vshll.u32 %v3524_v34, 16 }
  0x54   : > { %2596 = vmatprep.subr.bf16.mxu0 %v2935_v50  ;;  %v3547_v50 = vld [vmem:[%s3116_s5 + $0x70] ss:$12 sps:$4 sm:$0x1f]  }
  0x55   : > { %2785 = vmatpush3.bf16.msra.mxu1 %v2934_v31  ;;  %v1273_v31 = vrot.slane %v1271_v45, 1  ;;  %v1326_v28 = vshrl.u32 %v3547_v50, 16  ;;  %v1727_v5 = vrot.slane %v3547_v50, 1 }
  0x56   : > { %978 = vmatmul.mubr.bf16.gmra.mrb[24].mxu0 %v3149_v32  ;;  %2786 = vmatprep.subr.bf16.mxu1 %v3008_v2  ;;  %v1721_v32 = vrot.slane %v3297_v21, 1 }
  0x57   : > { %2597 = vmatpush3.bf16.msra.mxu0 %v2936_v40  ;;  %985 = vmatprep.mubr.bf16.mxu0 %v3190_v1  ;;  %v3436_v1 = vsel %vm1703_vm2, %v1705_v57, %v1713_v58  ;;  %v2970_v40 = vld [vmem:[%s3796_s1 + $0x2c8] sm:$0xff]   ;;  %v1311_v58 = vshll.u32 %v3547_v50, 16 }
  0x58   : > { %2767 = vmatmul.mubr.bf16.gmra.mrb[24].mxu1 %v3165_v43  ;;  %2598 = vmatprep.subr.bf16.mxu0 %v2938_v54  ;;  %v3446_v43 = vsel %vm1703_vm2, %v1715_v56, %v1721_v32  ;;  %v2975_v54 = vld [vmem:[%s3796_s1 + $0x298] sm:$0xff]   ;;  %v1307_v56 = vshrl.u32 %v3297_v21, 16 }
  0x59   : > { %2787 = vmatpush3.bf16.msra.mxu1 %v2937_v52  ;;  %2770 = vmatprep.mubr.msk.bf16.mxu1 %vm3009_vm0, %v3008_v2  ;;  %v3555_v52 = vld [vmem:[%s3116_s5 + $0x5c] ss:$12 sps:$4 sm:$0xff]  }
  0x5a   : > { %2788 = vmatprep.subr.bf16.mxu1 %v3008_v2 }
  0x5b   : > { %2599 = vmatpush3.bf16.msra.mxu0 %v2939_v59 }
  0x5c   : > { %2600 = vmatprep.subr.bf16.mxu0 %v2941_v44  ;;  %v2973_v44 = vld [vmem:[%s3796_s1 + $0x2d0] sm:$0xff]  }
  0x5d   : > { %2789 = vmatpush3.bf16.msra.mxu1 %v2940_v49  ;;  %v1291_v49 = vshrl.u32 %v3524_v34, 16 }
  0x5e   : > { %986 = vmatmul.mubr.bf16.gmra.mrb[28].mxu0 %v3192_v3  ;;  %2790 = vmatprep.subr.bf16.mxu1 %v3008_v2  ;;  %v2947_v3 = vld [vmem:[%s3796_s1 + $0x1f0] sm:$0xff]  }
  0x5f   : > { %2601 = vmatpush3.bf16.msra.mxu0 %v2942_v20  ;;  %993 = vmatprep.mubr.bf16.mxu0 %v3231_v35  ;;  %v2265_v35 = vcombine.high %v3271_v62, %v3271_v62  ;;  %v1249_v62 = vrot.slane %v1247_v26, 1  ;;  %v1295_v20 = vshll.u32 %v3555_v52, 16  ;;  %v2988_v26 = vld [vmem:[%s3796_s1 + $0x268] sm:$0xff]  }
  0x60   : > { %2771 = vmatmul.mubr.bf16.gmra.mrb[28].mxu1 %v3195_v4  ;;  %2602 = vmatprep.subr.bf16.mxu0 %v2944_v42  ;;  %v2949_v4 = vld [vmem:[%s3796_s1 + $0x1b0] sm:$0xff]   ;;  %v2977_v42 = vld [vmem:[%s3796_s1 + $0x258] sm:$0xff]  }
  0x61   : > { %2774 = vmatprep.mubr.msk.bf16.mxu1 %vm3009_vm0, %v3008_v2  ;;  %2791 = vmatpush3.bf16.msra.mxu1 %v2943_v61  ;;  %v1250_v33 = vsel %vm354_vm1, %v1245_v30, %v1249_v62  ;;  %v3579_v61 = vld [vmem:[%s3116_s5 + $0x6c] ss:$12 sps:$4 sm:$0x1f]  }
  0x62   : > { %2792 = vmatprep.subr.bf16.mxu1 %v3008_v2  ;;  %v1644_v30 = vld [vmem:[%s3116_s5 + $0xc] sm:$0xee] }
  0x63   : > { %2603 = vmatpush3.bf16.msra.mxu0 %v2945_v0  ;;  %v2980_v0 = vld [vmem:[%s3796_s1 + $0x2a0] sm:$0xff]  }
  0x64   : > { %2604 = vmatprep.subr.bf16.mxu0 %v2947_v3  ;;  %v1297_v3 = vrot.slane %v1295_v20, 1 }
  0x65   : > { %2793 = vmatpush3.bf16.msra.mxu1 %v2946_v7  ;;  %v1313_v7 = vrot.slane %v1311_v58, 1  ;;  %v1645_v58 = vld [vmem:[%s3116_s5 + $0x14] sm:$0xe] }
  0x66   : > { %994 = vmatmul.mubr.bf16.gmra.mrb[32].mxu0 %v3236_v37  ;;  %2794 = vmatprep.subr.bf16.mxu1 %v3008_v2  ;;  %v2955_v37 = vld [vmem:[%s3796_s1 + $0x238] sm:$0xff]   ;;  %v2428_v20 = vcombine.low %v1645_v58, %v3482_v10 }
  0x67   : > { %1001 = vmatprep.mubr.bf16.mxu0 %v2265_v35  ;;  %2605 = vmatpush3.bf16.msra.mxu0 %v2949_v4  ;;  %v3591_v35 = vld [vmem:[%s3116_s5 + $0x74] ss:$12 sps:$4 sm:$0x1f]   ;;  %v1299_v4 = vshrl.u32 %v3300_v22, 16 }
  0x68   : > { %2775 = vmatmul.mubr.bf16.gmra.mrb[32].mxu1 %v3249_v48  ;;  %2606 = vmatprep.subr.bf16.mxu0 %v2953_v11  ;;  %v2266_v48 = vcombine.low %v3282_v9, %v3282_v9  ;;  %v2963_v9 = vld [vmem:[%s3796_s1 + $0x240] sm:$0xff]   ;;  %v1303_v11 = vshll.u32 %v3579_v61, 16  ;;  %v1319_v18 = vshll.u32 %v3591_v35, 16 }
  0x69   : > { %2778 = vmatprep.mubr.msk.bf16.mxu1 %vm3009_vm0, %v3008_v2  ;;  %2795 = vmatpush3.bf16.msra.mxu1 %v2952_v12 }
  0x6a   : > { %2796 = vmatprep.subr.bf16.mxu1 %v3008_v2 }
  0x6b   : > { %2607 = vmatpush3.bf16.msra.mxu0 %v2954_v15 }
  0x6c   : > { %2651 = vmatprep.subr.bf16.mxu0 %v2960_v16  ;;  %v2985_v16 = vld [vmem:[%s3796_s1 + $0x2e0] sm:$0xff]  }
  0x6d   : > { %2797 = vmatpush3.bf16.msra.mxu1 %v2955_v37  ;;  %v1315_v37 = vshrl.u32 %v3555_v52, 16 }
  0x6e   : > { %1002 = vmatmul.mubr.bf16.gmra.mrb[36].mxu0 %v2264_v19  ;;  %2818 = vmatprep.subr.bf16.mxu1 %v3008_v2  ;;  %v1301_v19 = vor.u32 %v1299_v4, %v3397_v51  ;;  %v1321_v51 = vrot.slane %v1319_v18, 1 }
  0x6f   : > { %1523 = vmatprep.mubr.bf16.mxu0 %v3344_v63  ;;  %v2965_v63 = vld [vmem:[%s3796_s1 + $0x288] sm:$0xff]   ;;  %v1317_v27 = vor.u32 %v1315_v37, %v1297_v3 }
  0x70   : > { %2779 = vmatmul.mubr.bf16.gmra.mrb[36].mxu1 %v2266_v48  ;;  %v1305_v48 = vrot.slane %v1303_v11, 1 }
  0x71   : > { %2798 = vmatprep.mubr.msk.bf16.mxu1 %vm3009_vm0, %v3008_v2 }
  0x76   : > { %1524 = vmatmul.mubr.bf16.vlgmr.msra.gmra.mrb[40].mxu0 %v3352_v14  ;;  %v1269_v14 = vor.u32 %v1267_v39, %v1249_v62  ;;  %v2989_v62 = vld [vmem:[%s3796_s1 + $0x2e8] sm:$0xff]   ;;  %v2999_v39 = vld [vmem:[%s3116_s5 + $0x18] sm:$0xff] }
  0x77   : > { %2652 = vmatpush3.bf16.msra.mxu0 %v2963_v9  ;;  %1531 = vmatprep.mubr.bf16.mxu0 %v3359_v23  ;;  %v2972_v23 = vld [vmem:[%s3796_s1 + $0x250] sm:$0xff]   ;;  %v1306_v9 = vsel %vm354_vm1, %v1301_v19, %v1305_v48  ;;  %v2427_v45 = vcombine.high %v1644_v30, %v2999_v39 }
  0x78   : > { %2799 = vmatmul.mubr.bf16.vlgmr.msra.gmra.mrb[40].mxu1 %v1250_v33  ;;  %2653 = vmatprep.subr.bf16.mxu0 %v2965_v63  ;;  %v1274_v59 = vsel %vm354_vm1, %v1269_v14, %v1273_v31  ;;  %v2991_v63 = vld [vmem:[%s3796_s1 + $0x270] sm:$0xff]   ;;  %v2993_v33 = vld [vmem:[%s3796_s1 + $0x2b8] sm:$0xff]   ;;  %v1323_v14 = vshrl.u32 %v3579_v61, 16 }
  0x79   : > { %2819 = vmatpush3.bf16.msra.mxu1 %v2964_v36  ;;  %2802 = vmatprep.mubr.msk.bf16.mxu1 %vm3009_vm0, %v3008_v2  ;;  %v1328_v36 = vor.u32 %v1326_v28, %v1313_v7 }
  0x7a   : > { %2820 = vmatprep.subr.bf16.mxu1 %v3008_v2 }
  0x7b   : > { %2654 = vmatpush3.bf16.msra.mxu0 %v2966_v46  ;;  %v1322_v46 = vsel %vm354_vm1, %v1317_v27, %v1321_v51 }
  0x7c   : > { %2655 = vmatprep.subr.bf16.mxu0 %v2971_v47  ;;  %v2992_v47 = vld [vmem:[%s3796_s1 + $0x2f0] sm:$0xff]  }
  0x7d   : > { %2821 = vmatpush3.bf16.msra.mxu1 %v2970_v40  ;;  %v1329_v40 = vshrl.u32 %v3591_v35, 16 }
  0x7e   : > { %1532 = vmatmul.mubr.bf16.gmra.mrb[44].mxu0 %v3373_v38  ;;  %2822 = vmatprep.subr.bf16.mxu1 %v3008_v2  ;;  %v1309_v38 = vor.u32 %v1307_v56, %v3377_v41  ;;  %v2981_v41 = vld [vmem:[%s3796_s1 + $0x260] sm:$0xff]   ;;  %v1325_v56 = vor.u32 %v1323_v14, %v1305_v48 }
  0x7f   : > { %2656 = vmatpush3.bf16.msra.mxu0 %v2972_v23  ;;  %1539 = vmatprep.mubr.bf16.mxu0 %v3390_v29  ;;  %v1293_v29 = vor.u32 %v1291_v49, %v1273_v31  ;;  %v2994_v31 = vld [vmem:[%s3796_s1 + $0x278] sm:$0xff]   ;;  %v1707_v23 = vrot.slane %v2427_v45, 1 }
  0x80   : > { %2803 = vmatmul.mubr.bf16.gmra.mrb[44].mxu1 %v1274_v59  ;;  %2657 = vmatprep.subr.bf16.mxu0 %v2975_v54  ;;  %v1314_v12 = vsel %vm354_vm1, %v1309_v38, %v1313_v7  ;;  %v2995_v54 = vld [vmem:[%s3796_s1 + $0x2f8] sm:$0xff]   ;;  %v2426_v59 = vcombine.low %v1644_v30, %v2999_v39  ;;  %v1711_v38 = vrot.slane %v3506_v17, 1 }
  0x81   : > { %2823 = vmatpush3.bf16.msra.mxu1 %v2973_v44  ;;  %2806 = vmatprep.mubr.msk.bf16.mxu1 %vm3009_vm0, %v3008_v2  ;;  %v1298_v15 = vsel %vm354_vm1, %v1293_v29, %v1297_v3  ;;  %v1331_v44 = vor.u32 %v1329_v40, %v1321_v51  ;;  %v1709_v49 = vsel %vm1703_vm2, %v1707_v23, %v1708_v55  ;;  %v1717_v55 = vrot.slane %v3524_v34, 1 }
  0x82   : > { %2824 = vmatprep.subr.bf16.mxu1 %v3008_v2 }
  0x83   : > { %2658 = vmatpush3.bf16.msra.mxu0 %v2977_v42  ;;  %v1704_v42 = vrot.slane %v2426_v59, 1  ;;  %v1718_v10 = vsel %vm1703_vm2, %v1711_v38, %v1717_v55 }
  0x84   : > { %2659 = vmatprep.subr.bf16.mxu0 %v2980_v0  ;;  %v1710_v0 = vrot.slane %v2428_v20, 1 }
  0x85   : > { %2825 = vmatpush3.bf16.msra.mxu1 %v2979_v8  ;;  %v1706_v7 = vsel %vm1703_vm2, %v1704_v42, %v1705_v57  ;;  %v1723_v57 = vrot.slane %v3555_v52, 1 }
  0x86   : > { %1540 = vmatmul.mubr.bf16.gmra.mrb[48].mxu0 %v3408_v53  ;;  %2826 = vmatprep.subr.bf16.mxu1 %v3008_v2  ;;  %v2990_v53 = vld [vmem:[%s3796_s1 + $0x2b0] sm:$0xff]   ;;  %v1712_v6 = vsel %vm1703_vm2, %v1710_v0, %v1711_v38 }
  0x87   : > { %2660 = vmatpush3.bf16.msra.mxu0 %v2981_v41  ;;  %1547 = vmatprep.mubr.bf16.mxu0 %v1314_v12  ;;  %v1724_v17 = vsel %vm1703_vm2, %v1717_v55, %v1723_v57 }
  0x88   : > { %2807 = vmatmul.mubr.bf16.gmra.mrb[48].mxu1 %v1298_v15  ;;  %2661 = vmatprep.subr.bf16.mxu0 %v2987_v13 }
  0x89   : > { %2810 = vmatprep.mubr.msk.bf16.mxu1 %vm3009_vm0, %v3008_v2  ;;  %2827 = vmatpush3.bf16.msra.mxu1 %v2985_v16 }
  0x8a   : > { %2828 = vmatprep.subr.bf16.mxu1 %v3008_v2 }
  0x8b   : > { %2662 = vmatpush3.bf16.msra.mxu0 %v2988_v26 }
  0x8c   : > { %2663 = vmatprep.subr.bf16.mxu0 %v2990_v53 }
  0x8d   : > { %2829 = vmatpush3.bf16.msra.mxu1 %v2989_v62 }
  0x8e   : > { %1548 = vmatmul.mubr.bf16.gmra.mrb[52].mxu0 %v1306_v9  ;;  %2830 = vmatprep.subr.bf16.mxu1 %v3008_v2 }
  0x8f   : > { %1555 = vmatprep.mubr.bf16.mxu0 %v1328_v36  ;;  %2664 = vmatpush3.bf16.msra.mxu0 %v2991_v63 }
  0x90   : > { %2811 = vmatmul.mubr.bf16.gmra.mrb[52].mxu1 %v1322_v46  ;;  %2665 = vmatprep.subr.bf16.mxu0 %v2993_v33 }
  0x91   : > { %2814 = vmatprep.mubr.msk.bf16.mxu1 %vm3009_vm0, %v3008_v2  ;;  %2831 = vmatpush3.bf16.msra.mxu1 %v2992_v47 }
  0x92   : > { %2832 = vmatprep.subr.bf16.mxu1 %v3008_v2 }
  0x93   : > { %2666 = vmatpush3.bf16.msra.mxu0 %v2994_v31 }
  0x95   : > { %2833 = vmatpush3.bf16.msra.mxu1 %v2995_v54 }
  0x96   : > { %1556 = vmatmul.mubr.bf16.gmra.mrb[56].mxu0 %v1325_v56 }
  0x97   : > { %1922 = vmatprep.mubr.bf16.mxu0 %v1709_v49 }
  0x98   : > { %2815 = vmatmul.mubr.bf16.gmra.mrb[56].mxu1 %v1331_v44 }
  0x99   : > { %2834 = vmatprep.mubr.msk.bf16.mxu1 %vm3009_vm0, %v3008_v2 }
  0x9e   : > { %1923 = vmatmul.mubr.bf16.vlgmr.msra.gmra.mrb[60].mxu0 %v1706_v7 }
  0x9f   : > { %1930 = vmatprep.mubr.bf16.mxu0 %v3426_v24  ;;  %v1728_v24 = vsel %vm1703_vm2, %v1721_v32, %v1727_v5 }
  0xa0   : > { %2835 = vmatmul.mubr.bf16.vlgmr.msra.gmra.mrb[60].mxu1 %v1712_v6 }
  0xa1   : > { %2838 = vmatprep.mubr.msk.bf16.mxu1 %vm3009_vm0, %v3008_v2 }
  0xa6   : > { %1931 = vmatmul.mubr.bf16.gmra.mrb[64].mxu0 %v3436_v1  ;;  %v1725_v1 = vrot.slane %v3579_v61, 1 }
  0xa7   : > { %1938 = vmatprep.mubr.bf16.mxu0 %v3446_v43  ;;  %v1729_v43 = vrot.slane %v3591_v35, 1 }
  0xa8   : > { %2839 = vmatmul.mubr.bf16.gmra.mrb[64].mxu1 %v1718_v10  ;;  %v1726_v34 = vsel %vm1703_vm2, %v1719_v25, %v1725_v1 }
  0xa9   : > { %2842 = vmatprep.mubr.msk.bf16.mxu1 %vm3009_vm0, %v3008_v2  ;;  %v1730_v21 = vsel %vm1703_vm2, %v1723_v57, %v1729_v43 }
  0xae   : > { %1939 = vmatmul.mubr.bf16.gmra.mrb[68].mxu0 %v3459_v60 }
  0xaf   : > { %1946 = vmatprep.mubr.bf16.mxu0 %v1728_v24 }
  0xb0   : > { %2843 = vmatmul.mubr.bf16.gmra.mrb[68].mxu1 %v1724_v17 }
  0xb1   : > { %2846 = vmatprep.mubr.msk.bf16.mxu1 %vm3009_vm0, %v3008_v2 }
  0xb6   : > { %1947 = vmatmul.mubr.bf16.gmra.mrb[72].mxu0 %v1726_v34 }
  0xb7   : > { %1954 = vmatprep.mubr.bf16.mxu0 %v1727_v5 }
  0xb8   : > { %2847 = vmatmul.mubr.bf16.gmra.mrb[72].mxu1 %v1730_v21 }
  0xb9   : > { %2850 = vmatprep.mubr.msk.bf16.mxu1 %vm3009_vm0, %v3008_v2 }
  0xbe   : > { %1955 = vmatmul.mubr.bf16.gmra.mrb[76].mxu0 %v1725_v1 }
  0xc0   : > { %2851 = vmatmul.mubr.bf16.gmra.mrb[76].mxu1 %v1729_v43 }
  0xf9   : > { %v2490_v32 = vpop.f32.mrb[0].mxu0 }
  0xfa   : > { %v2491_v60 = vpop.f32.mrb[1].mxu0  ;;  %v737_v52 = vpop.f32.mrb[0].mxu1 }
  0xfb   : > { %v2492_v50 = vadd.f32 %v2491_v60, %v2490_v32  ;;  %v2493_v61 = vpop.f32.mrb[2].mxu0  ;;  %v2728_v29 = vpop.f32.mrb[1].mxu1 }
  0xfc   : > { %v2494_v3 = vpop.f32.mrb[3].mxu0  ;;  %v740_v25 = vpop.f32.mrb[2].mxu1 }
  0xfd   : > { %v738_v22 = vadd.f32 %v2492_v50, %v737_v52  ;;  %v2495_v8 = vadd.f32 %v2494_v3, %v2493_v61  ;;  %v2729_v35 = vpop.f32.mrb[3].mxu1 }
  0xff   : > { %v741_v41 = vadd.f32 %v2495_v8, %v740_v25 }
 0x101   : > { %v2496_v4 = vpop.f32.mrb[4].mxu0 }
 0x102   : > { %v2497_v11 = vpop.f32.mrb[5].mxu0  ;;  %v745_v13 = vpop.f32.mrb[4].mxu1 }
 0x103   : > { %v2498_v12 = vadd.f32 %v2497_v11, %v2496_v4  ;;  %v2499_v15 = vpop.f32.mrb[6].mxu0  ;;  %v2732_v2 = vpop.f32.mrb[5].mxu1 }
 0x104   : > { %v2500_v16 = vpop.f32.mrb[7].mxu0  ;;  %v748_v19 = vpop.f32.mrb[6].mxu1 }
 0x105   : > { %v746_v37 = vadd.f32 %v2498_v12, %v745_v13  ;;  %v2501_v18 = vadd.f32 %v2500_v16, %v2499_v15  ;;  %v2733_v48 = vpop.f32.mrb[7].mxu1 }
 0x107   : > { %v749_v26 = vadd.f32 %v2501_v18, %v748_v19 }
 0x109   : > { %v2502_v28 = vpop.f32.mrb[8].mxu0 }
 0x10a   : > { %v2503_v53 = vpop.f32.mrb[9].mxu0  ;;  %v753_v51 = vpop.f32.mrb[8].mxu1 }
 0x10b   : > { %v2504_v27 = vadd.f32 %v2503_v53, %v2502_v28  ;;  %v2505_v62 = vpop.f32.mrb[10].mxu0  ;;  %v2736_v30 = vpop.f32.mrb[9].mxu1 }
 0x10c   : > { %v2506_v9 = vpop.f32.mrb[11].mxu0  ;;  %v756_v33 = vpop.f32.mrb[10].mxu1 }
 0x10d   : > { %v754_v36 = vadd.f32 %v2504_v27, %v753_v51  ;;  %v2507_v63 = vadd.f32 %v2506_v9, %v2505_v62  ;;  %v2737_v39 = vpop.f32.mrb[11].mxu1 }
 0x10f   : > { %v3688_v45 = vadd.f32 %v2507_v63, %v756_v33 }
 0x111   : > { %v2508_v46 = vpop.f32.mrb[12].mxu0 }
 0x112   : > { %v2509_v47 = vpop.f32.mrb[13].mxu0 }
 0x113   : > { %v2510_v14 = vadd.f32 %v2509_v47, %v2508_v46  ;;  %v761_v31 = vpop.f32.mrb[12].mxu1  ;;  %v2511_v40 = vpop.f32.mrb[14].mxu0 }
 0x114   : > { %v2740_v23 = vpop.f32.mrb[13].mxu1  ;;  %v2512_v54 = vpop.f32.mrb[15].mxu0 }
 0x115   : > { %v3690_v56 = vadd.f32 %v2510_v14, %v761_v31  ;;  %v2513_v58 = vadd.f32 %v2512_v54, %v2511_v40  ;;  %v764_v59 = vpop.f32.mrb[14].mxu1 }
 0x116   : > { %v2741_v44 = vpop.f32.mrb[15].mxu1 }
 0x117   : > { %v3692_v49 = vadd.f32 %v2513_v58, %v764_v59 }
 0x119   : > { %v2514_v20 = vpop.f32.mrb[16].mxu0 }
 0x11a   : > { %v2515_v42 = vpop.f32.mrb[17].mxu0 }
 0x11b   : > { %v2516_v0 = vadd.f32 %v2515_v42, %v2514_v20  ;;  %v769_v38 = vpop.f32.mrb[16].mxu1  ;;  %v2517_v7 = vpop.f32.mrb[18].mxu0 }
 0x11c   : > { %v2744_v6 = vpop.f32.mrb[17].mxu1  ;;  %v2518_v55 = vpop.f32.mrb[19].mxu0 }
 0x11d   : > { %v3694_v10 = vadd.f32 %v2516_v0, %v769_v38  ;;  %v772_v5 = vpop.f32.mrb[18].mxu1 }
 0x11e   : > { %v2745_v57 = vpop.f32.mrb[19].mxu1 }
 0x121   : > { %v2549_v24 = vpop.f32.mrb[20].mxu0 }
 0x122   : > { %v2550_v17 = vpop.f32.mrb[21].mxu0 }
 0x123   : > { %v2551_v1 = vadd.f32 %v2550_v17, %v2549_v24  ;;  %v1043_v43 = vpop.f32.mrb[20].mxu1  ;;  %v2552_v34 = vpop.f32.mrb[22].mxu0 }
 0x124   : > { %v2764_v21 = vpop.f32.mrb[21].mxu1  ;;  %v2553_v32 = vpop.f32.mrb[23].mxu0 }
 0x125   : > { %v972_v60 = vadd.f32 %v2551_v1, %v738_v22  ;;  %v2554_v50 = vadd.f32 %v2553_v32, %v2552_v34  ;;  %v1046_v52 = vpop.f32.mrb[22].mxu1 }
 0x126   : > { %v2765_v61 = vpop.f32.mrb[23].mxu1 }
 0x127   : > { %v3696_v29 = vadd.f32 %v1043_v43, %v972_v60  ;;  %v975_v3 = vadd.f32 %v2554_v50, %v741_v41 }
 0x129   : > { %v3698_v8 = vadd.f32 %v1046_v52, %v975_v3  ;;  %v2555_v25 = vpop.f32.mrb[24].mxu0 }
 0x12a   : > { %v2556_v35 = vpop.f32.mrb[25].mxu0 }
 0x12b   : > { %v2557_v4 = vadd.f32 %v2556_v35, %v2555_v25  ;;  %v1051_v11 = vpop.f32.mrb[24].mxu1  ;;  %v2558_v12 = vpop.f32.mrb[26].mxu0 }
 0x12c   : > { %v2768_v13 = vpop.f32.mrb[25].mxu1  ;;  %v2559_v15 = vpop.f32.mrb[27].mxu0 }
 0x12d   : > { %v980_v2 = vadd.f32 %v2557_v4, %v746_v37  ;;  %v2560_v16 = vadd.f32 %v2559_v15, %v2558_v12  ;;  %v1054_v18 = vpop.f32.mrb[26].mxu1 }
 0x12e   : > { %v2769_v19 = vpop.f32.mrb[27].mxu1 }
 0x12f   : > { %v3700_v22 = vadd.f32 %v1051_v11, %v980_v2  ;;  %v983_v48 = vadd.f32 %v2560_v16, %v749_v26 }
 0x131   : > { %v3702_v28 = vadd.f32 %v1054_v18, %v983_v48  ;;  %v2561_v53 = vpop.f32.mrb[28].mxu0 }
 0x132   : > { %v2562_v41 = vpop.f32.mrb[29].mxu0 }
 0x133   : > { %v2563_v27 = vadd.f32 %v2562_v41, %v2561_v53  ;;  %v1059_v51 = vpop.f32.mrb[28].mxu1  ;;  %v2564_v62 = vpop.f32.mrb[30].mxu0 }
 0x134   : > { %v2772_v30 = vpop.f32.mrb[29].mxu1  ;;  %v2565_v9 = vpop.f32.mrb[31].mxu0 }
 0x135   : > { %v988_v63 = vadd.f32 %v2563_v27, %v754_v36  ;;  %v2566_v33 = vadd.f32 %v2565_v9, %v2564_v62  ;;  %v1062_v39 = vpop.f32.mrb[30].mxu1 }
 0x136   : > { %v2773_v46 = vpop.f32.mrb[31].mxu1 }
 0x137   : > { %v3704_v37 = vadd.f32 %v1059_v51, %v988_v63  ;;  %v991_v47 = vadd.f32 %v2566_v33, %v3688_v45 }
 0x139   : > { %v3707_v14 = vadd.f32 %v1062_v39, %v991_v47  ;;  %v2567_v26 = vpop.f32.mrb[32].mxu0 }
 0x13a   : > { %v2568_v31 = vpop.f32.mrb[33].mxu0 }
 0x13b   : > { %v2569_v40 = vadd.f32 %v2568_v31, %v2567_v26  ;;  %v1067_v23 = vpop.f32.mrb[32].mxu1  ;;  %v2570_v54 = vpop.f32.mrb[34].mxu0 }
 0x13c   : > { %v2776_v58 = vpop.f32.mrb[33].mxu1  ;;  %v2571_v59 = vpop.f32.mrb[35].mxu0 }
 0x13d   : > { %v996_v44 = vadd.f32 %v2569_v40, %v3690_v56  ;;  %v2572_v20 = vadd.f32 %v2571_v59, %v2570_v54  ;;  %v1070_v36 = vpop.f32.mrb[34].mxu1 }
 0x13e   : > { %v2777_v42 = vpop.f32.mrb[35].mxu1 }
 0x13f   : > { %v3710_v0 = vadd.f32 %v1067_v23, %v996_v44  ;;  %v999_v38 = vadd.f32 %v2572_v20, %v3692_v49 }
 0x141   : > { %v3713_v7 = vadd.f32 %v1070_v36, %v999_v38  ;;  %v2573_v45 = vpop.f32.mrb[36].mxu0 }
 0x142   : > { %v2574_v6 = vpop.f32.mrb[37].mxu0 }
 0x143   : > { %v2575_v55 = vadd.f32 %v2574_v6, %v2573_v45  ;;  %v1075_v5 = vpop.f32.mrb[36].mxu1  ;;  %v2576_v57 = vpop.f32.mrb[38].mxu0 }
 0x144   : > { %v2780_v24 = vpop.f32.mrb[37].mxu1  ;;  %v2577_v17 = vpop.f32.mrb[39].mxu0 }
 0x145   : > { %v1004_v1 = vadd.f32 %v2575_v55, %v3694_v10  ;;  %v1078_v43 = vpop.f32.mrb[38].mxu1 }
 0x146   : > { %v2781_v56 = vpop.f32.mrb[39].mxu1 }
 0x147   : > { %v3716_v34 = vadd.f32 %v1075_v5, %v1004_v1 }
 0x149   : > { %v2608_v21 = vpop.f32.mrb[40].mxu0 }
 0x14a   : > { %v2609_v32 = vpop.f32.mrb[41].mxu0 }
 0x14b   : > { %v2610_v60 = vadd.f32 %v2609_v32, %v2608_v21  ;;  %v1597_v50 = vpop.f32.mrb[40].mxu1  ;;  %v2611_v49 = vpop.f32.mrb[42].mxu0 }
 0x14c   : > { %v2800_v52 = vpop.f32.mrb[41].mxu1  ;;  %v2612_v61 = vpop.f32.mrb[43].mxu0 }
 0x14d   : > { %v1598_v3 = vadd.f32 %v2610_v60, %v1597_v50  ;;  %v2613_v25 = vadd.f32 %v2612_v61, %v2611_v49  ;;  %v1600_v35 = vpop.f32.mrb[42].mxu1 }
 0x14e   : > { %v2801_v4 = vpop.f32.mrb[43].mxu1 }
 0x14f   : > { %v3719_v11 = vadd.f32 %v1598_v3, %v3696_v29  ;;  %v1601_v12 = vadd.f32 %v2613_v25, %v1600_v35 }
 0x151   : > { %v3722_v10 = vadd.f32 %v1601_v12, %v3698_v8  ;;  %v2614_v13 = vpop.f32.mrb[44].mxu0 }
 0x152   : > { %v2615_v15 = vpop.f32.mrb[45].mxu0 }
 0x153   : > { %v2616_v2 = vadd.f32 %v2615_v15, %v2614_v13  ;;  %v1605_v16 = vpop.f32.mrb[44].mxu1  ;;  %v2617_v18 = vpop.f32.mrb[46].mxu0 }
 0x154   : > { %v2804_v19 = vpop.f32.mrb[45].mxu1  ;;  %v2618_v48 = vpop.f32.mrb[47].mxu0 }
 0x155   : > { %v1606_v53 = vadd.f32 %v2616_v2, %v1605_v16  ;;  %v2619_v41 = vadd.f32 %v2618_v48, %v2617_v18  ;;  %v1608_v27 = vpop.f32.mrb[46].mxu1  ;;  %v3748_v2 = vld [vmem:[%s3797_s2] ss:$0 sm:$0xff] }
 0x156   : > { %v2805_v51 = vpop.f32.mrb[47].mxu1 }
 0x157   : > { %v3725_v62 = vadd.f32 %v1606_v53, %v3700_v22  ;;  %v1609_v29 = vadd.f32 %v2619_v41, %v1608_v27 }
 0x159   : > { %v3728_v30 = vadd.f32 %v1609_v29, %v3702_v28  ;;  %v2620_v8 = vpop.f32.mrb[48].mxu0 }
 0x15a   : > { %v2621_v9 = vpop.f32.mrb[49].mxu0 }
 0x15b   : > { %v2622_v63 = vadd.f32 %v2621_v9, %v2620_v8  ;;  %v1613_v33 = vpop.f32.mrb[48].mxu1  ;;  %v2623_v39 = vpop.f32.mrb[50].mxu0 }
 0x15c   : > { %v2808_v46 = vpop.f32.mrb[49].mxu1  ;;  %v2624_v47 = vpop.f32.mrb[51].mxu0 }
 0x15d   : > { %v1614_v26 = vadd.f32 %v2622_v63, %v1613_v33  ;;  %v2625_v31 = vadd.f32 %v2624_v47, %v2623_v39  ;;  %v1616_v40 = vpop.f32.mrb[50].mxu1 }
 0x15e   : > { %v2809_v23 = vpop.f32.mrb[51].mxu1 }
 0x15f   : > { %v3731_v54 = vadd.f32 %v1614_v26, %v3704_v37  ;;  %v1617_v22 = vadd.f32 %v2625_v31, %v1616_v40 }
 0x161   : > { %v3734_v58 = vadd.f32 %v1617_v22, %v3707_v14  ;;  %v2626_v28 = vpop.f32.mrb[52].mxu0 }
 0x162   : > { %v2627_v59 = vpop.f32.mrb[53].mxu0 }
 0x163   : > { %v2628_v44 = vadd.f32 %v2627_v59, %v2626_v28  ;;  %v1621_v20 = vpop.f32.mrb[52].mxu1  ;;  %v2629_v36 = vpop.f32.mrb[54].mxu0 }
 0x164   : > { %v2812_v42 = vpop.f32.mrb[53].mxu1  ;;  %v2630_v38 = vpop.f32.mrb[55].mxu0 }
 0x165   : > { %v1622_v45 = vadd.f32 %v2628_v44, %v1621_v20  ;;  %v2631_v6 = vadd.f32 %v2630_v38, %v2629_v36  ;;  %v1624_v55 = vpop.f32.mrb[54].mxu1 }
 0x166   : > { %v2813_v5 = vpop.f32.mrb[55].mxu1 }
 0x167   : > { %v3737_v57 = vadd.f32 %v1622_v45, %v3710_v0  ;;  %v1625_v37 = vadd.f32 %v2631_v6, %v1624_v55 }
 0x169   : > { %v3740_v24 = vadd.f32 %v1625_v37, %v3713_v7  ;;  %v2632_v14 = vpop.f32.mrb[56].mxu0 }
 0x16a   : > { %v2633_v17 = vpop.f32.mrb[57].mxu0 }
 0x16b   : > { %v2634_v1 = vadd.f32 %v2633_v17, %v2632_v14  ;;  %v1629_v43 = vpop.f32.mrb[56].mxu1  ;;  %v2635_v56 = vpop.f32.mrb[58].mxu0 }
 0x16c   : > { %v2816_v21 = vpop.f32.mrb[57].mxu1  ;;  %v2636_v32 = vpop.f32.mrb[59].mxu0 }
 0x16d   : > { %v1630_v60 = vadd.f32 %v2634_v1, %v1629_v43  ;;  %v1632_v50 = vpop.f32.mrb[58].mxu1 }
 0x16e   : > { %v2817_v49 = vpop.f32.mrb[59].mxu1 }
 0x16f   : > { %v3743_v52 = vadd.f32 %v1630_v60, %v3716_v34 }
 0x171   : > { %v2667_v0 = vpop.f32.mrb[60].mxu0 }
 0x172   : > { %v2668_v61 = vpop.f32.mrb[61].mxu0 }
 0x173   : > { %v2669_v3 = vadd.f32 %v2668_v61, %v2667_v0  ;;  %v1996_v25 = vpop.f32.mrb[60].mxu1  ;;  %v2670_v7 = vpop.f32.mrb[62].mxu0 }
 0x174   : > { %v2836_v35 = vpop.f32.mrb[61].mxu1  ;;  %v2671_v4 = vpop.f32.mrb[63].mxu0 }
 0x175   : > { %v1997_v12 = vadd.f32 %v2669_v3, %v1996_v25  ;;  %v2672_v13 = vadd.f32 %v2671_v4, %v2670_v7  ;;  %v1999_v15 = vpop.f32.mrb[62].mxu1 }
 0x176   : > { %v2837_v16 = vpop.f32.mrb[63].mxu1 }
 0x177   : > { %v2034_v18 = vadd.f32 %v1997_v12, %v3719_v11  ;;  %v2000_v34 = vadd.f32 %v2672_v13, %v1999_v15 }
 0x179   : > { %v2050_v19 = vadd.f32 %v3748_v2, %v2034_v18  ;;  %v2035_v48 = vadd.f32 %v2000_v34, %v3722_v10  ;;  %v2673_v53 = vpop.f32.mrb[64].mxu0 }
 0x17a   : > { %v2674_v41 = vpop.f32.mrb[65].mxu0 }
 0x17b   : > { %v2059_v27 = vmax.f32 %v2050_v19, 0.0  ;;  %v2051_v51 = vadd.f32 %v3748_v2, %v2035_v48  ;;  %v2675_v29 = vadd.f32 %v2674_v41, %v2673_v53  ;;  %v2004_v8 = vpop.f32.mrb[64].mxu1  ;;  %v2676_v9 = vpop.f32.mrb[66].mxu0 }
 0x17c   : > { %v2840_v11 = vpop.f32.mrb[65].mxu1  ;;  %v2677_v63 = vpop.f32.mrb[67].mxu0 }
 0x17d   : > { %v2465_v33 = vpack.c.bf16 %v2059_v27, %v2059_v27  ;;  %v2060_v10 = vmax.f32 %v2051_v51, 0.0  ;;  %v2005_v39 = vadd.f32 %v2675_v29, %v2004_v8  ;;  %v2678_v46 = vadd.f32 %v2677_v63, %v2676_v9  ;;  %v2007_v47 = vpop.f32.mrb[66].mxu1 }
 0x17e   : > { %v2841_v26 = vpop.f32.mrb[67].mxu1 }
 0x17f   : > { %2106 = vst.msk [vmem:[%s3758_s20] sm:$0xf] %vm2105_vm3, %v2465_v33  ;;  %v2466_v31 = vpack.c.bf16 %v2060_v10, %v2060_v10  ;;  %v2036_v40 = vadd.f32 %v2005_v39, %v3725_v62  ;;  %v2008_v23 = vadd.f32 %v2678_v46, %v2007_v47 }
 0x181   : > { %2107 = vst.msk [vmem:[%s3758_s20 + $0x4] sm:$0xf] %vm2105_vm3, %v2466_v31  ;;  %v2052_v22 = vadd.f32 %v3748_v2, %v2036_v40  ;;  %v2037_v28 = vadd.f32 %v2008_v23, %v3728_v30  ;;  %v2679_v59 = vpop.f32.mrb[68].mxu0 }
 0x182   : > { %v2680_v44 = vpop.f32.mrb[69].mxu0 }
 0x183   : > { %v2061_v20 = vmax.f32 %v2052_v22, 0.0  ;;  %v2053_v36 = vadd.f32 %v3748_v2, %v2037_v28  ;;  %v2681_v42 = vadd.f32 %v2680_v44, %v2679_v59  ;;  %v2012_v38 = vpop.f32.mrb[68].mxu1  ;;  %v2682_v45 = vpop.f32.mrb[70].mxu0 }
 0x184   : > { %v2844_v6 = vpop.f32.mrb[69].mxu1  ;;  %v2683_v55 = vpop.f32.mrb[71].mxu0 }
 0x185   : > { %v2467_v62 = vpack.c.bf16 %v2061_v20, %v2061_v20  ;;  %v2062_v5 = vmax.f32 %v2053_v36, 0.0  ;;  %v2013_v37 = vadd.f32 %v2681_v42, %v2012_v38  ;;  %v2684_v14 = vadd.f32 %v2683_v55, %v2682_v45  ;;  %v2015_v17 = vpop.f32.mrb[70].mxu1 }
 0x186   : > { %v2845_v1 = vpop.f32.mrb[71].mxu1 }
 0x187   : > { %2108 = vst.msk [vmem:[%s3758_s20 + $0x8] sm:$0xf] %vm2105_vm3, %v2467_v62  ;;  %v2468_v30 = vpack.c.bf16 %v2062_v5, %v2062_v5  ;;  %v2038_v43 = vadd.f32 %v2013_v37, %v3731_v54  ;;  %v2016_v56 = vadd.f32 %v2684_v14, %v2015_v17 }
 0x189   : > { %2109 = vst.msk [vmem:[%s3758_s20 + $0xc] sm:$0xf] %vm2105_vm3, %v2468_v30  ;;  %v2054_v21 = vadd.f32 %v3748_v2, %v2038_v43  ;;  %v2039_v32 = vadd.f32 %v2016_v56, %v3734_v58  ;;  %v2685_v60 = vpop.f32.mrb[72].mxu0 }
 0x18a   : > { %v2686_v50 = vpop.f32.mrb[73].mxu0 }
 0x18b   : > { %v2063_v49 = vmax.f32 %v2054_v21, 0.0  ;;  %v2055_v0 = vadd.f32 %v3748_v2, %v2039_v32  ;;  %v2687_v61 = vadd.f32 %v2686_v50, %v2685_v60  ;;  %v2020_v3 = vpop.f32.mrb[72].mxu1  ;;  %v2688_v25 = vpop.f32.mrb[74].mxu0 }
 0x18c   : > { %v2848_v7 = vpop.f32.mrb[73].mxu1  ;;  %v2689_v35 = vpop.f32.mrb[75].mxu0 }
 0x18d   : > { %v2469_v54 = vpack.c.bf16 %v2063_v49, %v2063_v49  ;;  %v2064_v4 = vmax.f32 %v2055_v0, 0.0  ;;  %v2021_v12 = vadd.f32 %v2687_v61, %v2020_v3  ;;  %v2690_v13 = vadd.f32 %v2689_v35, %v2688_v25  ;;  %v2023_v15 = vpop.f32.mrb[74].mxu1 }
 0x18e   : > { %v2849_v16 = vpop.f32.mrb[75].mxu1 }
 0x18f   : > { %2110 = vst.msk [vmem:[%s3758_s20 + $0x10] sm:$0xf] %vm2105_vm3, %v2469_v54  ;;  %v2470_v58 = vpack.c.bf16 %v2064_v4, %v2064_v4  ;;  %v2040_v18 = vadd.f32 %v2021_v12, %v3737_v57  ;;  %v2024_v34 = vadd.f32 %v2690_v13, %v2023_v15 }
 0x191   : > { %2111 = vst.msk [vmem:[%s3758_s20 + $0x14] sm:$0xf] %vm2105_vm3, %v2470_v58  ;;  %v2056_v19 = vadd.f32 %v3748_v2, %v2040_v18  ;;  %v2041_v48 = vadd.f32 %v2024_v34, %v3740_v24  ;;  %v2691_v53 = vpop.f32.mrb[76].mxu0 }
 0x192   : > { %v2692_v41 = vpop.f32.mrb[77].mxu0 }
 0x193   : > { %v2065_v27 = vmax.f32 %v2056_v19, 0.0  ;;  %v2057_v51 = vadd.f32 %v3748_v2, %v2041_v48  ;;  %v2693_v29 = vadd.f32 %v2692_v41, %v2691_v53  ;;  %v2028_v8 = vpop.f32.mrb[76].mxu1  ;;  %v2694_v9 = vpop.f32.mrb[78].mxu0 }
 0x194   : > { %v2852_v11 = vpop.f32.mrb[77].mxu1  ;;  %v2695_v57 = vpop.f32.mrb[79].mxu0 }
 0x195   : > { %v2471_v63 = vpack.c.bf16 %v2065_v27, %v2065_v27  ;;  %v2066_v33 = vmax.f32 %v2057_v51, 0.0  ;;  %v2029_v10 = vadd.f32 %v2693_v29, %v2028_v8  ;;  %v2031_v39 = vpop.f32.mrb[78].mxu1 }
 0x196   : > { %v2853_v46 = vpop.f32.mrb[79].mxu1 }
 0x197   : > { %2112 = vst.msk [vmem:[%s3758_s20 + $0x18] sm:$0xf] %vm2105_vm3, %v2471_v63  ;;  %v2472_v24 = vpack.c.bf16 %v2066_v33, %v2066_v33  ;;  %v2042_v47 = vadd.f32 %v2029_v10, %v3743_v52 }
 0x199   : > { %2113 = vst.msk [vmem:[%s3758_s20 + $0x1c] sm:$0xf] %vm2105_vm3, %v2472_v24  ;;  %v2058_v26 = vadd.f32 %v3748_v2, %v2042_v47 }
 0x19b   : > { %v2067_v31 = vmax.f32 %v2058_v26, 0.0 }
 0x19d   : > { %v2473_v40 = vpack.c.bf16 %v2067_v31, %v2067_v31 }
 0x19f   : > { %2114 = vst.msk [vmem:[%s3758_s20 + $0x20] sm:$0xf] %vm2105_vm3, %v2473_v40 }
 0x1a0 PF: > { %s13_s12 = sadd.s32 1, %s3006_s12  }
 0x1a1   : > { %p10_p4 = scmp.ge.s32.totalorder %s13_s12, 4  }
 0x1a3   :  { %12 = sbr.rel (!%p10_p4) target bundleno = 1 (0x1), region = 65 }

// kernel: model_c_forward.12
= control target key start
LH: loop header
LB: loop body
LE: loop exit
PB: predicated region body
PF: predicated region fallthrough
CT: control target
= control target key end

     0   :  { %s3084_s12 = smov 0   ;;  %s3853_s0 = inlined_call_operand.vmem [shape: bf16[2,104,96], index: 0, kind: input, shape index: {}]   ;;  %s3854_s1 = inlined_call_operand.vmem [shape: bf16[9,96,192], index: 1, kind: input, shape index: {}]   ;;  %s3855_s2 = inlined_call_operand.vmem [shape: f32[1,192], index: 2, kind: input, shape index: {}]   ;;  %s3856_s3 = inlined_call_operand.vmem [shape: bf16[2,80,192], index: 3, kind: output, shape index: {}]  }
   0x1 LB: > { %s2374_s13 = sadd.s32 4294967295, %s3061_s12   ;;  %p2378_p0 = scmp.ge.s32.totalorder %s3061_s12, 1  ;;  %s3061_s12 = sphi %s3084_s12, %s13_s12  }
   0x2   : > { %p137_p1 = scmp.lt.s32.totalorder %s3061_s12, 3 }
   0x4   : > { %p138_p2 = pnand %p2378_p0, %p137_p1 }
   0x5   : > { %v2858_v0 = vld [vmem:[%s3854_s1 + $0x64] ss:$8 sps:$4 sm:$0xff] (!%p138_p2)   ;;  %v3063_v2 = vmov (!%p138_p2), 0   ;;  %p161_p3 = scmp.lt.s32.totalorder (!%p138_p2), %s2374_s13, 1  ;;  %v2862_v3 = vld [vmem:[%s3854_s1 + $0x60] ss:$8 sps:$4 sm:$0xff] (!%p138_p2)  }
   0x6   : > { %141 = sbr.rel (%p138_p2) target bundleno = 433 (0x1b1), region = 32  ;;  %v2860_v1 = vld [vmem:[%s3854_s1 + $0x184] ss:$8 sps:$4 sm:$0xff] (!%p138_p2)   ;;  %389 = vmatprep.mubr.bf16.mxu1 (!%p138_p2), %v3063_v2  ;;  %1219 = vmatprep.mubr.bf16.mxu0 (!%p138_p2), %v3063_v2  ;;  %v2863_v4 = vld [vmem:[%s3854_s1 + $0x180] ss:$8 sps:$4 sm:$0xff] (!%p138_p2)   ;;  %vm341_vm1 = vcmask (!%p138_p2), 785408  }
   0x7   : > { %357 = vmatprep.subr.bf16.mxu1 (!%p138_p2), %v2858_v0  ;;  %1187 = vmatprep.subr.bf16.mxu0 (!%p138_p2), %v2860_v1  ;;  %v2864_v5 = vld [vmem:[%s3854_s1 + $0x74] ss:$8 sps:$4 sm:$0xff] (!%p138_p2)   ;;  %v2868_v7 = vld [vmem:[%s3854_s1 + $0x70] ss:$8 sps:$4 sm:$0xff] (!%p138_p2)   ;;  %v2870_v9 = vld [vmem:[%s3854_s1 + $0x84] ss:$8 sps:$4 sm:$0xff] (!%p138_p2)  }
   0x8   : > { %358 = vmatpush1.bf16.msra.mxu1 (!%p138_p2), %v2862_v3  ;;  %1188 = vmatpush1.bf16.msra.mxu0 (!%p138_p2), %v2863_v4  ;;  %v2866_v6 = vld [vmem:[%s3854_s1 + $0x194] ss:$8 sps:$4 sm:$0xff] (!%p138_p2)   ;;  %v2869_v8 = vld [vmem:[%s3854_s1 + $0x190] ss:$8 sps:$4 sm:$0xff] (!%p138_p2)   ;;  %v2872_v10 = vld [vmem:[%s3854_s1 + $0x1a4] ss:$8 sps:$4 sm:$0xff] (!%p138_p2)  }
   0x9   : > { %359 = vmatprep.subr.bf16.mxu1 (!%p138_p2), %v2864_v5  ;;  %1189 = vmatprep.subr.bf16.mxu0 (!%p138_p2), %v2866_v6  ;;  %v2874_v11 = vld [vmem:[%s3854_s1 + $0x80] ss:$8 sps:$4 sm:$0xff] (!%p138_p2)   ;;  %v2876_v13 = vld [vmem:[%s3854_s1 + $0x94] ss:$8 sps:$4 sm:$0xff] (!%p138_p2)   ;;  %v2880_v15 = vld [vmem:[%s3854_s1 + $0x90] ss:$8 sps:$4 sm:$0xff] (!%p138_p2)  }
   0xa   : > { %v2875_v12 = vld [vmem:[%s3854_s1 + $0x1a0] ss:$8 sps:$4 sm:$0xff] (!%p138_p2)   ;;  %v2878_v14 = vld [vmem:[%s3854_s1 + $0x1b4] ss:$8 sps:$4 sm:$0xff] (!%p138_p2)   ;;  %v2881_v16 = vld [vmem:[%s3854_s1 + $0x1b0] ss:$8 sps:$4 sm:$0xff] (!%p138_p2)  }
   0xb   : > { %v2882_v17 = vld [vmem:[%s3854_s1 + $0xa4] ss:$8 sps:$4 sm:$0xff] (!%p138_p2)   ;;  %v2886_v19 = vld [vmem:[%s3854_s1 + $0xa0] ss:$8 sps:$4 sm:$0xff] (!%p138_p2)   ;;  %vm236_vm0 = vsmask.f32 (!%p138_p2), 7424 }
   0xc   : > { %360 = vmatpush1.bf16.msra.mxu1 (!%p138_p2), %v2868_v7  ;;  %1190 = vmatpush1.bf16.msra.mxu0 (!%p138_p2), %v2869_v8  ;;  %v2884_v18 = vld [vmem:[%s3854_s1 + $0x1c4] ss:$8 sps:$4 sm:$0xff] (!%p138_p2)   ;;  %v2887_v20 = vld [vmem:[%s3854_s1 + $0x1c0] ss:$8 sps:$4 sm:$0xff] (!%p138_p2)   ;;  %v2888_v21 = vld [vmem:[%s3854_s1 + $0xb4] ss:$8 sps:$4 sm:$0xff] (!%p138_p2)  }
   0xd   : > { %s3860_s13 = smov (!%p161_p3, %s2374_s13), 1  ;;  %361 = vmatprep.subr.bf16.mxu1 %v2870_v9  ;;  %1191 = vmatprep.subr.bf16.mxu0 %v2872_v10  ;;  %v2890_v22 = vld [vmem:[%s3854_s1 + $0x1d4] ss:$8 sps:$4 sm:$0xff]   ;;  %v2892_v28 = vld [vmem:[%s3854_s1 + $0xb0] ss:$8 sps:$4 sm:$0xff]   ;;  %vm610_vm3 = vcmask 1046528  }
   0xe   : > { %s2847_s17 = smul.u32 52, %s3860_s13  ;;  %v2893_v35 = vld [vmem:[%s3854_s1 + $0x1d0] ss:$8 sps:$4 sm:$0xff]   ;;  %v2900_v36 = vld [vmem:[%s3854_s1 + $0x1e4] ss:$8 sps:$4 sm:$0xff]   ;;  %vm1307_vm4 = vcmask 1045504  }
   0xf   : > { %vm1058_vm2 = vsmask.f32 6400  ;;  %v2898_v50 = vld [vmem:[%s3854_s1 + $0x1e0] ss:$8 sps:$4 sm:$0xff]   ;;  %v2907_v56 = vld [vmem:[%s3854_s1 + $0x4] ss:$8 sps:$4 sm:$0xff]  }
  0x10   : > { %362 = vmatpush1.bf16.msra.mxu1 %v2874_v11  ;;  %1192 = vmatpush1.bf16.msra.mxu0 %v2875_v12  ;;  %s3154_s28 = scalar_lea.vmem %s3853_s0, %s2847_s17  ;;  %v2905_v55 = vld [vmem:[%s3854_s1] ss:$8 sps:$4 sm:$0xff]   ;;  %v2903_v60 = vld [vmem:[%s3854_s1 + $0x1f4] ss:$8 sps:$4 sm:$0xff]   ;;  %v2901_v63 = vld [vmem:[%s3854_s1 + $0x1f0] ss:$8 sps:$4 sm:$0xff]  }
  0x11   : > { %363 = vmatprep.subr.bf16.mxu1 %v2876_v13  ;;  %1193 = vmatprep.subr.bf16.mxu0 %v2878_v14  ;;  %v172_v23 = vld [vmem:[%s3154_s28] sm:$0xf]  ;;  %v3170_v24 = vld [vmem:[%s3154_s28 + $0x4] sm:$0xf]  ;;  %v3176_v26 = vld [vmem:[%s3154_s28 + $0x8] sm:$0xff]   ;;  %vm2004_vm5 = vcmask 1044480  }
  0x12   : > { %v3173_v25 = vcombine.low %v172_v23, %v3170_v24  ;;  %v800_v27 = vld [vmem:[%s3154_s28 + $0x4] sm:$0xe]  ;;  %v3183_v29 = vld [vmem:[%s3154_s28 + $0x8] sm:$0xf]  ;;  %v245_v32 = vshll.u32 %v3176_v26, 16  ;;  %v3192_v34 = vld [vmem:[%s3154_s28 + $0xc] sm:$0xff]  }
  0x13   : > { %v3189_v33 = vcombine.low %v800_v27, %v3183_v29  ;;  %v3203_v41 = vld [vmem:[%s3154_s28 + $0x10] sm:$0xff]   ;;  %v1068_v42 = vshrl.u32 %v3192_v34, 16  ;;  %v1071_v43 = vshll.u32 %v3192_v34, 16  ;;  %v249_v44 = vshrl.u32 %v3176_v26, 16  ;;  %v2911_v4 = vld [vmem:[%s3854_s1 + $0x204] ss:$8 sps:$4 sm:$0xff]  }
  0x14   : > { %364 = vmatpush1.bf16.msra.mxu1 %v2880_v15  ;;  %1194 = vmatpush1.bf16.msra.mxu0 %v2881_v16  ;;  %v238_v30 = vshrl.u32 %v3173_v25, 16  ;;  %v240_v31 = vshll.u32 %v3173_v25, 16  ;;  %v247_v38 = vrot.slane %v245_v32, 1  ;;  %v253_v51 = vshll.u32 %v3203_v41, 16  ;;  %v3213_v52 = vld [vmem:[%s3154_s28 + $0x14] sm:$0xff]   ;;  %v3250_v11 = vld [vmem:[%s3154_s28 + $0x1c] sm:$0xff]  }
  0x15   : > { %365 = vmatprep.subr.bf16.mxu1 %v2882_v17  ;;  %1195 = vmatprep.subr.bf16.mxu0 %v2884_v18  ;;  %v1060_v39 = vshrl.u32 %v3189_v33, 16  ;;  %v1063_v40 = vshll.u32 %v3189_v33, 16  ;;  %v1070_v48 = vrot.slane %v1068_v42, 1  ;;  %v1073_v49 = vrot.slane %v1071_v43, 2  ;;  %v2915_v6 = vld [vmem:[%s3854_s1 + $0x10] ss:$8 sps:$4 sm:$0xff]  }
  0x16   : > { %v242_v37 = vrot.slane %v240_v31, 1  ;;  %v1077_v58 = vshrl.u32 %v3213_v52, 16  ;;  %v1080_v59 = vshll.u32 %v3213_v52, 16  ;;  %v251_v61 = vor.u32 %v249_v44, %v247_v38  ;;  %v2917_v7 = vld [vmem:[%s3854_s1 + $0x14] ss:$8 sps:$4 sm:$0xff]   ;;  %v3280_v32 = vld [vmem:[%s3154_s28 + $0x20] sm:$0xff]  }
  0x17   : > { %v1062_v46 = vrot.slane %v1060_v39, 1  ;;  %v1065_v47 = vrot.slane %v1063_v40, 2  ;;  %v1074_v57 = vor.u32 %v1073_v49, %v1070_v48  ;;  %v255_v0 = vrot.slane %v253_v51, 1  ;;  %v3245_v8 = vld [vmem:[%s3154_s28 + $0x18] sm:$0xff]   ;;  %v2909_v16 = vld [vmem:[%s3854_s1 + $0x200] ss:$8 sps:$4 sm:$0xff]  }
  0x18   : > { %366 = vmatpush1.bf16.msra.mxu1 %v2886_v19  ;;  %1196 = vmatpush1.bf16.msra.mxu0 %v2887_v20  ;;  %v243_v45 = vor.u32 %v242_v37, %v238_v30  ;;  %v1079_v1 = vrot.slane %v1077_v58, 1  ;;  %v1082_v3 = vrot.slane %v1080_v59, 2  ;;  %v257_v9 = vshrl.u32 %v3203_v41, 16  ;;  %v2914_v20 = vld [vmem:[%s3854_s1 + $0x214] ss:$8 sps:$4 sm:$0xff]   ;;  %s2848_s17 = smul.u32 80, %s3860_s13 }
  0x19   : > { %367 = vmatprep.subr.bf16.mxu1 %v2888_v21  ;;  %1197 = vmatprep.subr.bf16.mxu0 %v2890_v22  ;;  %v1066_v54 = vor.u32 %v1065_v47, %v1062_v46  ;;  %v256_v10 = vsel %vm236_vm0, %v251_v61, %v255_v0  ;;  %v612_v12 = vrot.slane %v3176_v26, 1  ;;  %v614_v13 = vrot.slane %v3203_v41, 1  ;;  %v2926_v30 = vld [vmem:[%s3854_s1 + $0x20] ss:$8 sps:$4 sm:$0xff]   ;;  %v2928_v31 = vld [vmem:[%s3854_s1 + $0x24] ss:$8 sps:$4 sm:$0xff]  }
  0x1a   : > { %v248_v53 = vsel %vm236_vm0, %v243_v45, %v247_v38  ;;  %v1083_v5 = vor.u32 %v1082_v3, %v1079_v1  ;;  %v261_v14 = vshll.u32 %v3245_v8, 16  ;;  %v1086_v17 = vshrl.u32 %v3250_v11, 16  ;;  %v2922_v38 = vld [vmem:[%s3854_s1 + $0x224] ss:$8 sps:$4 sm:$0xff]   ;;  %v2920_v43 = vld [vmem:[%s3854_s1 + $0x220] ss:$8 sps:$4 sm:$0xff]   ;;  %s3797_s19 = scalar_lea.vmem %s3856_s3, %s2848_s17 }
  0x1b   : > { %v1075_v62 = vsel %vm1058_vm2, %v1066_v54, %v1074_v57  ;;  %v1089_v18 = vshll.u32 %v3250_v11, 16  ;;  %v3264_v19 = vsel %vm610_vm3, %v612_v12, %v614_v13  ;;  %v852_v22 = vrot.slane %v3189_v33, 1  ;;  %v2912_v33 = vld [vmem:[%s3854_s1 + $0x210] ss:$8 sps:$4 sm:$0xff]   ;;  %v1290_v40 = vld [vmem:[%s3154_s28 + $0x4] sm:$0xc] }
  0x1c   : > { %368 = vmatpush1.bf16.msra.mxu1 %v2892_v28  ;;  %1198 = vmatpush1.bf16.msra.mxu0 %v2893_v35  ;;  %v1084_v15 = vsel %vm1058_vm2, %v1074_v57, %v1083_v5  ;;  %v263_v21 = vrot.slane %v261_v14, 1  ;;  %v259_v23 = vor.u32 %v257_v9, %v255_v0  ;;  %v1088_v27 = vrot.slane %v1086_v17, 1  ;;  %v2934_v45 = vld [vmem:[%s3854_s1 + $0x30] ss:$8 sps:$4 sm:$0xff]   ;;  %v2936_v46 = vld [vmem:[%s3854_s1 + $0x34] ss:$8 sps:$4 sm:$0xff]  }
  0x1d   : > { %1394 = vmatprep.subr.bf16.mxu0 %v2900_v36  ;;  %510 = vmatprep.subr.bf16.mxu1 %v2907_v56  ;;  %v1091_v28 = vrot.slane %v1089_v18, 2  ;;  %v616_v36 = vrot.slane %v3245_v8, 1  ;;  %v853_v37 = vrot.slane %v3192_v34, 1  ;;  %v269_v39 = vshll.u32 %v3280_v32, 16  ;;  %v2925_v49 = vld [vmem:[%s3854_s1 + $0x234] ss:$8 sps:$4 sm:$0xff]  }
  0x1e   : > { %v264_v42 = vsel %vm236_vm0, %v259_v23, %v263_v21  ;;  %v265_v44 = vshrl.u32 %v3245_v8, 16  ;;  %v618_v54 = vrot.slane %v3280_v32, 1  ;;  %v2941_v56 = vld [vmem:[%s3854_s1 + $0x40] ss:$8 sps:$4 sm:$0xff]   ;;  %v2943_v58 = vld [vmem:[%s3854_s1 + $0x44] ss:$8 sps:$4 sm:$0xff]  }
  0x1f   : > { %2411 = vmatmul.mubr.msk.bf16.vlgmr.msra.gmra.mrb[0].mxu1 %vm341_vm1, %v248_v53  ;;  %2523 = vmatmul.mubr.msk.bf16.vlgmr.msra.gmra.mrb[0].mxu0 %vm341_vm1, %v1075_v62  ;;  %v3286_v35 = vor.u32 %v1091_v28, %v1088_v27  ;;  %v3307_v47 = vsel %vm610_vm3, %v614_v13, %v616_v36  ;;  %v3310_v48 = vsel %vm610_vm3, %v852_v22, %v853_v37  ;;  %v271_v51 = vrot.slane %v269_v39, 1  ;;  %v2946_v62 = vld [vmem:[%s3854_s1 + $0x54] ss:$8 sps:$4 sm:$0xff]   ;;  %v2944_v9 = vld [vmem:[%s3854_s1 + $0x50] ss:$8 sps:$4 sm:$0xff]  }
  0x20   : > { %399 = vmatprep.mubr.bf16.mxu1 %v3063_v2  ;;  %511 = vmatpush1.bf16.msra.mxu1 %v2905_v55  ;;  %v2540_v53 = vcombine.low %v1290_v40, %v3183_v29  ;;  %v2940_v55 = vld [vmem:[%s3154_s28 + $0x28] ss:$0 sps:$4 sm:$0x11]   ;;  %v267_v57 = vor.u32 %v265_v44, %v263_v21  ;;  %v3329_v29 = vsel %vm610_vm3, %v616_v36, %v618_v54  ;;  %v855_v59 = vrot.slane %v3213_v52, 1  ;;  %v2955_v14 = vld [vmem:[%s3854_s1 + $0xc4] ss:$8 sps:$4 sm:$0xff]  }
  0x21   : > { %1395 = vmatpush1.bf16.msra.mxu0 %v2898_v50  ;;  %1229 = vmatprep.mubr.bf16.mxu0 %v3063_v2  ;;  %v1093_v50 = vsel %vm1058_vm2, %v1083_v5, %v3286_v35  ;;  %v1309_v61 = vrot.slane %v3192_v34, 2  ;;  %v620_v1 = vrot.slane %v2940_v55, 1  ;;  %v2933_v34 = vld [vmem:[%s3854_s1 + $0x244] ss:$8 sps:$4 sm:$0xff]   ;;  %v2931_v13 = vld [vmem:[%s3854_s1 + $0x240] ss:$8 sps:$4 sm:$0xff]  }
  0x22   : > { %1396 = vmatprep.subr.bf16.mxu0 %v2903_v60  ;;  %512 = vmatprep.subr.bf16.mxu1 %v2917_v7  ;;  %v857_v60 = vrot.slane %v3250_v11, 1  ;;  %v1308_v0 = vrot.slane %v2540_v53, 2  ;;  %v3343_v3 = vsel %vm610_vm3, %v853_v37, %v855_v59  ;;  %v272_v5 = vsel %vm236_vm0, %v267_v57, %v271_v51  ;;  %v2939_v17 = vld [vmem:[%s3854_s1 + $0x254] ss:$8 sps:$4 sm:$0xff]   ;;  %v2937_v22 = vld [vmem:[%s3854_s1 + $0x250] ss:$8 sps:$4 sm:$0xff]  }
  0x23   : > { %v277_v7 = vshll.u32 %v2940_v55, 16  ;;  %v1311_v23 = vrot.slane %v3213_v52, 2  ;;  %v2949_v28 = vld [vmem:[%s3854_s1 + $0x264] ss:$8 sps:$4 sm:$0xff]   ;;  %v2952_v52 = vld [vmem:[%s3854_s1 + $0x274] ss:$8 sps:$4 sm:$0xff]  }
  0x24   : > { %513 = vmatpush1.bf16.msra.mxu1 %v2915_v6  ;;  %v273_v6 = vshrl.u32 %v3280_v32, 16  ;;  %v1313_v36 = vrot.slane %v3250_v11, 2  ;;  %v2950_v37 = vld [vmem:[%s3854_s1 + $0x270] ss:$8 sps:$4 sm:$0xff]   ;;  %v2953_v39 = vld [vmem:[%s3854_s1 + $0xc0] ss:$8 sps:$4 sm:$0xff]  }
  0x25   : > { %1397 = vmatpush1.bf16.msra.mxu0 %v2901_v63  ;;  %514 = vmatprep.subr.bf16.mxu1 %v2928_v31  ;;  %v2923_v63 = vld [vmem:[%s3854_s1 + $0x230] ss:$8 sps:$4 sm:$0xff]   ;;  %v2947_v31 = vld [vmem:[%s3854_s1 + $0x260] ss:$8 sps:$4 sm:$0xff]   ;;  %v2962_v40 = vld [vmem:[%s3854_s1 + $0xd4] ss:$8 sps:$4 sm:$0xff]  }
  0x26   : > { %1398 = vmatprep.subr.bf16.mxu0 %v2911_v4  ;;  %v3346_v4 = vsel %vm610_vm3, %v855_v59, %v857_v60  ;;  %v275_v18 = vor.u32 %v273_v6, %v271_v51  ;;  %v2957_v11 = vld [vmem:[%s3854_s1 + $0x280] ss:$8 sps:$4 sm:$0xff]   ;;  %v2977_v55 = vld [vmem:[%s3854_s1 + $0xf4] ss:$8 sps:$4 sm:$0xff]   ;;  %v2983_v59 = vld [vmem:[%s3854_s1 + $0x104] ss:$8 sps:$4 sm:$0xff]  }
  0x27   : > { %2412 = vmatmul.mubr.msk.bf16.gmra.mrb[4].mxu1 %vm341_vm1, %v256_v10  ;;  %2524 = vmatmul.mubr.msk.bf16.gmra.mrb[4].mxu0 %vm341_vm1, %v1084_v15  ;;  %v3357_v10 = vsel %vm610_vm3, %v618_v54, %v620_v1  ;;  %v1310_v15 = vsel %vm1307_vm4, %v1308_v0, %v1309_v61  ;;  %v593_v44 = vld [vmem:[%s3154_s28] sm:$0xe]  ;;  %v2963_v57 = vld [vmem:[%s3154_s28 + $0x2c] ss:$0 sps:$4 sm:$0x33]   ;;  %vm2306_vm7 = vcmask 1043456  }
  0x28   : > { %409 = vmatprep.mubr.bf16.mxu1 %v3063_v2  ;;  %1239 = vmatprep.mubr.bf16.mxu0 %v3063_v2  ;;  %v2967_v53 = vld [vmem:[%s3854_s1 + $0xe0] ss:$8 sps:$4 sm:$0xff]   ;;  %v1498_v0 = vld [vmem:[%s3154_s28 + $0xc] sm:$0xf]  ;;  %vm1755_vm6 = vsmask.f32 5376 }
  0x29   : > { %1399 = vmatpush1.bf16.msra.mxu0 %v2909_v16  ;;  %515 = vmatpush1.bf16.msra.mxu1 %v2926_v30  ;;  %v3367_v16 = vld [vmem:[%s3154_s28 + $0x24] sm:$0xff]   ;;  %vm2307_vm8 = vcmask 523268  }
  0x2a   : > { %1400 = vmatprep.subr.bf16.mxu0 %v2914_v20  ;;  %516 = vmatprep.subr.bf16.mxu1 %v2936_v46  ;;  %v279_v20 = vrot.slane %v277_v7, 1  ;;  %v859_v21 = vrot.slane %v3367_v16, 1  ;;  %v2445_v46 = vcombine.low %v593_v44, %v3170_v24  ;;  %v2974_v24 = vld [vmem:[%s3854_s1 + $0x2a4] ss:$8 sps:$4 sm:$0xff]   ;;  %v2987_v7 = vld [vmem:[%s3854_s1 + $0x114] ss:$8 sps:$4 sm:$0xff]   ;;  %vm3799_vm9 = vmor %vm2307_vm8, %vm2306_vm7 }
  0x2b   : > { %v3481_v6 = vld [vmem:[%s3154_s28 + $0x20] sm:$0xff]  }
  0x2c   : > { %v3384_v27 = vsel %vm610_vm3, %v857_v60, %v859_v21  ;;  %v280_v30 = vsel %vm236_vm0, %v275_v18, %v279_v20  ;;  %v611_v51 = vrot.slane %v2445_v46, 1  ;;  %v3468_v60 = vld [vmem:[%s3154_s28 + $0x18] sm:$0xff]   ;;  %v2010_v18 = vrot.slane %v3481_v6, 3  ;;  %v3496_v20 = vld [vmem:[%s3154_s28 + $0x28] sm:$0xff]  }
  0x2d   : > { %1401 = vmatpush1.bf16.msra.mxu0 %v2912_v33  ;;  %517 = vmatpush1.bf16.msra.mxu1 %v2934_v45  ;;  %v1312_v33 = vsel %vm1307_vm4, %v1309_v61, %v1311_v23  ;;  %v2960_v45 = vld [vmem:[%s3854_s1 + $0xd0] ss:$8 sps:$4 sm:$0xff]   ;;  %v1317_v61 = vrot.slane %v2963_v57, 2 }
  0x2e   : > { %1402 = vmatprep.subr.bf16.mxu0 %v2922_v38  ;;  %518 = vmatprep.subr.bf16.mxu1 %v2943_v58  ;;  %v2959_v38 = vld [vmem:[%s3854_s1 + $0x284] ss:$8 sps:$4 sm:$0xff]   ;;  %v3447_v54 = vsel %vm610_vm3, %v611_v51, %v612_v12  ;;  %v3457_v58 = vld [vmem:[%s3154_s28 + $0x10] sm:$0xff]  }
  0x2f   : > { %2413 = vmatmul.mubr.msk.bf16.gmra.mrb[8].mxu1 %vm341_vm1, %v264_v42  ;;  %2525 = vmatmul.mubr.msk.bf16.gmra.mrb[8].mxu0 %vm341_vm1, %v1093_v50  ;;  %v1314_v42 = vsel %vm1307_vm4, %v1311_v23, %v1313_v36  ;;  %v2964_v50 = vld [vmem:[%s3854_s1 + $0x290] ss:$8 sps:$4 sm:$0xff]   ;;  %v2006_v1 = vrot.slane %v3457_v58, 3 }
  0x30   : > { %419 = vmatprep.mubr.bf16.mxu1 %v3063_v2  ;;  %1426 = vmatprep.mubr.bf16.mxu0 %v3063_v2  ;;  %v2975_v12 = vld [vmem:[%s3854_s1 + $0xf0] ss:$8 sps:$4 sm:$0xff]  }
  0x31   : > { %1403 = vmatpush1.bf16.msra.mxu0 %v2920_v43  ;;  %519 = vmatpush1.bf16.msra.mxu1 %v2941_v56  ;;  %v2966_v43 = vld [vmem:[%s3854_s1 + $0x294] ss:$8 sps:$4 sm:$0xff]   ;;  %v2985_v23 = vld [vmem:[%s3854_s1 + $0x110] ss:$8 sps:$4 sm:$0xff]  }
  0x32   : > { %1404 = vmatprep.subr.bf16.mxu0 %v2925_v49  ;;  %520 = vmatprep.subr.bf16.mxu1 %v2946_v62  ;;  %v1315_v49 = vrot.slane %v3367_v16, 2  ;;  %v1497_v62 = vld [vmem:[%s3154_s28 + $0x8] sm:$0xc] }
  0x34   : > { %v1316_v56 = vsel %vm1307_vm4, %v1313_v36, %v1315_v49 }
  0x35   : > { %1405 = vmatpush1.bf16.msra.mxu0 %v2923_v63  ;;  %521 = vmatpush1.bf16.msra.mxu1 %v2944_v9  ;;  %v1098_v63 = vshll.u32 %v3367_v16, 16 }
  0x36   : > { %1635 = vmatprep.subr.bf16.mxu0 %v2933_v34  ;;  %697 = vmatprep.subr.bf16.mxu1 %v2955_v14  ;;  %v2008_v34 = vrot.slane %v3468_v60, 3  ;;  %v1318_v14 = vsel %vm1307_vm4, %v1315_v49, %v1317_v61  ;;  %v2978_v49 = vld [vmem:[%s3854_s1 + $0x2b0] ss:$8 sps:$4 sm:$0xff]  }
  0x37   : > { %2414 = vmatmul.mubr.msk.bf16.gmra.mrb[12].mxu1 %vm341_vm1, %v272_v5  ;;  %v2981_v5 = vld [vmem:[%s3854_s1 + $0x100] ss:$8 sps:$4 sm:$0xff]  }
  0x38   : > { %429 = vmatprep.mubr.bf16.mxu1 %v3063_v2  ;;  %2553 = vmatmul.mubr.msk.bf16.vlgmr.msra.gmra.mrb[0].mxu0 %vm341_vm1, %v1310_v15  ;;  %v3487_v9 = vsel %vm2004_vm5, %v2006_v1, %v2008_v34  ;;  %v3490_v15 = vcombine.low %v1497_v62, %v1498_v0  ;;  %v3000_v62 = vld [vmem:[%s3854_s1 + $0x2e0] ss:$8 sps:$4 sm:$0xff]  }
  0x39   : > { %1636 = vmatpush1.bf16.msra.mxu0 %v2931_v13  ;;  %1436 = vmatprep.mubr.bf16.mxu0 %v3063_v2 }
  0x3a   : > { %1637 = vmatprep.subr.bf16.mxu0 %v2939_v17  ;;  %v1100_v17 = vrot.slane %v1098_v63, 2  ;;  %v1549_v36 = vrot.slane %v3490_v15, 2  ;;  %v3009_v63 = vld [vmem:[%s3854_s1 + $0x2f4] ss:$8 sps:$4 sm:$0xff]  }
  0x3d   : > { %1638 = vmatpush1.bf16.msra.mxu0 %v2937_v22  ;;  %v1104_v22 = vshrl.u32 %v2963_v57, 16 }
  0x3e   : > { %1639 = vmatprep.subr.bf16.mxu0 %v2949_v28 }
  0x3f   : > { %2415 = vmatmul.mubr.msk.bf16.gmra.mrb[16].mxu1 %vm341_vm1, %v280_v30  ;;  %v3503_v30 = vsel %vm2004_vm5, %v2008_v34, %v2010_v18  ;;  %v3007_v34 = vld [vmem:[%s3854_s1 + $0x2f0] ss:$8 sps:$4 sm:$0xff]  }
  0x40   : > { %542 = vmatprep.mubr.bf16.mxu1 %v3063_v2  ;;  %2554 = vmatmul.mubr.msk.bf16.gmra.mrb[4].mxu0 %vm341_vm1, %v1312_v33  ;;  %v1106_v33 = vrot.slane %v1104_v22, 1  ;;  %v1765_v22 = vshrl.u32 %v3457_v58, 16 }
  0x41   : > { %1446 = vmatprep.mubr.bf16.mxu0 %v3063_v2  ;;  %1640 = vmatpush1.bf16.msra.mxu0 %v2947_v31  ;;  %v1107_v31 = vshll.u32 %v2963_v57, 16  ;;  %v2988_v57 = vld [vmem:[%s3854_s1 + $0x2c0] ss:$8 sps:$4 sm:$0xff]  }
  0x42   : > { %1641 = vmatprep.subr.bf16.mxu0 %v2952_v52  ;;  %v2012_v52 = vrot.slane %v3496_v20, 3 }
  0x45   : > { %1642 = vmatpush1.bf16.msra.mxu0 %v2950_v37  ;;  %v1550_v37 = vrot.slane %v3457_v58, 2 }
  0x46   : > { %1643 = vmatprep.subr.bf16.mxu0 %v2959_v38 }
  0x47   : > { %2428 = vmatmul.mubr.msk.bf16.vlgmr.msra.gmra.mrb[0].mxu1 %vm341_vm1, %v3173_v25  ;;  %v2969_v25 = vld [vmem:[%s3854_s1 + $0xe4] ss:$8 sps:$4 sm:$0xff]  }
  0x48   : > { %552 = vmatprep.mubr.bf16.mxu1 %v3063_v2  ;;  %698 = vmatpush1.bf16.msra.mxu1 %v2953_v39  ;;  %v1109_v39 = vrot.slane %v1107_v31, 2  ;;  %v1760_v31 = vshll.u32 %v3490_v15, 16 }
  0x49   : > { %2555 = vmatmul.mubr.msk.bf16.gmra.mrb[8].mxu0 %vm341_vm1, %v1314_v42  ;;  %699 = vmatprep.subr.bf16.mxu1 %v2962_v40  ;;  %v3520_v40 = vsel %vm2004_vm5, %v2010_v18, %v2012_v52  ;;  %v3016_v18 = vld [vmem:[%s3854_s1 + $0x150] ss:$8 sps:$4 sm:$0xff]  }
  0x4a   : > { %1456 = vmatprep.mubr.bf16.mxu0 %v3063_v2  ;;  %1644 = vmatpush1.bf16.msra.mxu0 %v2957_v11  ;;  %v1110_v42 = vor.u32 %v1109_v39, %v1106_v33  ;;  %v1551_v11 = vsel %vm1307_vm4, %v1549_v36, %v1550_v37  ;;  %v3022_v33 = vld [vmem:[%s3854_s1 + $0x160] ss:$8 sps:$4 sm:$0xff]   ;;  %v1767_v36 = vrot.slane %v1765_v22, 2  ;;  %v3046_v22 = vld [vmem:[%s3854_s1 + $0x190] ss:$8 sps:$4 sm:$0xff]  }
  0x4b   : > { %1645 = vmatprep.subr.bf16.mxu0 %v2966_v43  ;;  %v2972_v43 = vld [vmem:[%s3854_s1 + $0x2a0] ss:$8 sps:$4 sm:$0xff]  }
  0x4c   : > { %700 = vmatpush1.bf16.msra.mxu1 %v2960_v45  ;;  %v1987_v45 = vld [vmem:[%s3154_s28 + $0x8] sm:$0x8] }
  0x4d   : > { %701 = vmatprep.subr.bf16.mxu1 %v2969_v25  ;;  %v2635_v46 = vcombine.low %v1987_v45, %v1498_v0  ;;  %v3042_v25 = vld [vmem:[%s3154_s28 + $0x2c] ss:$0 sps:$4 sm:$0x11]   ;;  %v3003_v0 = vld [vmem:[%s3854_s1 + $0x130] ss:$8 sps:$4 sm:$0xff]   ;;  %v1774_v45 = vshrl.u32 %v3468_v60, 16 }
  0x4e   : > { %1646 = vmatpush1.bf16.msra.mxu0 %v2964_v50  ;;  %v861_v51 = vrot.slane %v3042_v25, 1 }
  0x4f   : > { %2429 = vmatmul.mubr.msk.bf16.gmra.mrb[4].mxu1 %vm341_vm1, %v3176_v26  ;;  %1884 = vmatprep.subr.bf16.mxu0 %v2974_v24  ;;  %v1095_v26 = vshrl.u32 %v3367_v16, 16  ;;  %v2005_v50 = vrot.slane %v2635_v46, 3  ;;  %v2990_v24 = vld [vmem:[%s3854_s1 + $0x2c4] ss:$8 sps:$4 sm:$0xff]   ;;  %v1554_v16 = vrot.slane %v3481_v6, 2  ;;  %v1777_v46 = vshll.u32 %v3468_v60, 16 }
  0x50   : > { %562 = vmatprep.mubr.bf16.mxu1 %v3063_v2  ;;  %702 = vmatpush1.bf16.msra.mxu1 %v2967_v53 }
  0x51   : > { %2556 = vmatmul.mubr.msk.bf16.gmra.mrb[12].mxu0 %vm341_vm1, %v1316_v56  ;;  %703 = vmatprep.subr.bf16.mxu1 %v2977_v55  ;;  %v1097_v13 = vrot.slane %v1095_v26, 1  ;;  %v3547_v53 = vsel %vm2004_vm5, %v2005_v50, %v2006_v1  ;;  %v3552_v55 = vsel %vm610_vm3, %v859_v21, %v861_v51  ;;  %v2993_v21 = vld [vmem:[%s3854_s1 + $0x2d0] ss:$8 sps:$4 sm:$0xff]   ;;  %v3005_v26 = vld [vmem:[%s3854_s1 + $0x134] ss:$8 sps:$4 sm:$0xff]   ;;  %v1556_v1 = vrot.slane %v3496_v20, 2 }
  0x52   : > { %1466 = vmatprep.mubr.bf16.mxu0 %v3063_v2  ;;  %v1779_v50 = vrot.slane %v1777_v46, 3  ;;  %v3019_v51 = vld [vmem:[%s3854_s1 + $0x310] ss:$8 sps:$4 sm:$0xff]  }
  0x53   : > { %v1101_v28 = vor.u32 %v1100_v17, %v1097_v13  ;;  %v3018_v13 = vld [vmem:[%s3854_s1 + $0x154] ss:$8 sps:$4 sm:$0xff]   ;;  %v3006_v17 = vld [vmem:[%s3154_s28 + $0x30] ss:$0 sps:$4 sm:$0x33]  }
  0x54   : > { %704 = vmatpush1.bf16.msra.mxu1 %v2975_v12  ;;  %v2995_v12 = vld [vmem:[%s3854_s1 + $0x2d4] ss:$8 sps:$4 sm:$0xff]  }
  0x55   : > { %705 = vmatprep.subr.bf16.mxu1 %v2983_v59  ;;  %v3515_v38 = vsel %vm1058_vm2, %v3286_v35, %v1101_v28  ;;  %v3527_v44 = vsel %vm1058_vm2, %v1101_v28, %v1110_v42  ;;  %v2980_v35 = vld [vmem:[%s3854_s1 + $0x2b4] ss:$8 sps:$4 sm:$0xff]   ;;  %v2996_v59 = vld [vmem:[%s3854_s1 + $0x120] ss:$8 sps:$4 sm:$0xff]   ;;  %v1757_v28 = vshrl.u32 %v3490_v15, 16 }
  0x57   : > { %2430 = vmatmul.mubr.msk.bf16.gmra.mrb[8].mxu1 %vm341_vm1, %v3203_v41  ;;  %v2998_v41 = vld [vmem:[%s3854_s1 + $0x124] ss:$8 sps:$4 sm:$0xff]   ;;  %v1759_v42 = vrot.slane %v1757_v28, 2 }
  0x58   : > { %572 = vmatprep.mubr.bf16.mxu1 %v3063_v2  ;;  %706 = vmatpush1.bf16.msra.mxu1 %v2981_v5  ;;  %v3015_v5 = vld [vmem:[%s3854_s1 + $0x304] ss:$8 sps:$4 sm:$0xff]  }
  0x59   : > { %2557 = vmatmul.mubr.msk.bf16.gmra.mrb[16].mxu0 %vm341_vm1, %v1318_v14  ;;  %707 = vmatprep.subr.bf16.mxu1 %v2987_v7  ;;  %v3010_v7 = vld [vmem:[%s3854_s1 + $0x140] ss:$8 sps:$4 sm:$0xff]   ;;  %v1557_v14 = vsel %vm1307_vm4, %v1554_v16, %v1556_v1 }
  0x5a   : > { %1667 = vmatprep.mubr.bf16.mxu0 %v3063_v2 }
  0x5c   : > { %708 = vmatpush1.bf16.msra.mxu1 %v2985_v23  ;;  %v3024_v23 = vld [vmem:[%s3854_s1 + $0x164] ss:$8 sps:$4 sm:$0xff]  }
  0x5d   : > { %938 = vmatprep.subr.bf16.mxu1 %v2998_v41  ;;  %v1768_v41 = vshll.u32 %v3457_v58, 16  ;;  %v3025_v58 = vld [vmem:[%s3854_s1 + $0x170] ss:$8 sps:$4 sm:$0xff]  }
  0x5f   : > { %2431 = vmatmul.mubr.msk.bf16.gmra.mrb[12].mxu1 %vm341_vm1, %v3245_v8  ;;  %v1552_v8 = vrot.slane %v3468_v60, 2  ;;  %v3021_v60 = vld [vmem:[%s3854_s1 + $0x314] ss:$8 sps:$4 sm:$0xff]  }
  0x60   : > { %582 = vmatprep.mubr.bf16.mxu1 %v3063_v2 }
  0x61   : > { %2588 = vmatmul.mubr.msk.bf16.vlgmr.msra.gmra.mrb[0].mxu0 %vm341_vm1, %v1551_v11  ;;  %v1553_v56 = vsel %vm1307_vm4, %v1550_v37, %v1552_v8  ;;  %v1555_v61 = vsel %vm1307_vm4, %v1552_v8, %v1554_v16  ;;  %v3027_v37 = vld [vmem:[%s3854_s1 + $0x174] ss:$8 sps:$4 sm:$0xff]   ;;  %v1762_v11 = vrot.slane %v1760_v31, 3  ;;  %v1776_v8 = vrot.slane %v1774_v45, 2  ;;  %v3028_v16 = vld [vmem:[%s3854_s1 + $0x320] ss:$8 sps:$4 sm:$0xff]  }
  0x62   : > { %1885 = vmatpush1.bf16.msra.mxu0 %v2972_v43  ;;  %1677 = vmatprep.mubr.bf16.mxu0 %v3063_v2  ;;  %v1770_v43 = vrot.slane %v1768_v41, 3  ;;  %v3048_v41 = vld [vmem:[%s3854_s1 + $0x1a0] ss:$8 sps:$4 sm:$0xff]  }
  0x63   : > { %1886 = vmatprep.subr.bf16.mxu0 %v2980_v35  ;;  %v1763_v15 = vor.u32 %v1762_v11, %v1759_v42  ;;  %v3052_v42 = vld [vmem:[%s3854_s1 + $0x1c0] ss:$8 sps:$4 sm:$0xff]   ;;  %v3053_v11 = vld [vmem:[%s3854_s1 + $0x1d4] ss:$8 sps:$4 sm:$0xff]  }
  0x64   : > { %v1771_v35 = vor.u32 %v1770_v43, %v1767_v36 }
  0x66   : > { %1887 = vmatpush1.bf16.msra.mxu0 %v2978_v49  ;;  %v1772_v25 = vsel %vm1755_vm6, %v1763_v15, %v1771_v35  ;;  %v3013_v49 = vld [vmem:[%s3854_s1 + $0x300] ss:$8 sps:$4 sm:$0xff]  }
  0x67   : > { %2432 = vmatmul.mubr.msk.bf16.gmra.mrb[16].mxu1 %vm341_vm1, %v3280_v32  ;;  %1888 = vmatprep.subr.bf16.mxu0 %v2990_v24  ;;  %v3002_v32 = vld [vmem:[%s3854_s1 + $0x2e4] ss:$8 sps:$4 sm:$0xff]   ;;  %v1780_v24 = vor.u32 %v1779_v50, %v1776_v8 }
  0x68   : > { %729 = vmatprep.mubr.bf16.mxu1 %v3063_v2 }
  0x69   : > { %2589 = vmatmul.mubr.msk.bf16.gmra.mrb[4].mxu0 %vm341_vm1, %v1553_v56  ;;  %v1783_v56 = vshrl.u32 %v3481_v6, 16 }
  0x6a   : > { %1687 = vmatprep.mubr.bf16.mxu0 %v3063_v2  ;;  %1889 = vmatpush1.bf16.msra.mxu0 %v2988_v57  ;;  %v3030_v57 = vld [vmem:[%s3854_s1 + $0x324] ss:$8 sps:$4 sm:$0xff]  }
  0x6b   : > { %1890 = vmatprep.subr.bf16.mxu0 %v2995_v12  ;;  %v1781_v12 = vsel %vm1755_vm6, %v1771_v35, %v1780_v24  ;;  %v2196_v35 = vlaneseq }
  0x6d   : > { %v2197_v45 = vshrl.u32 %v2196_v35, 7 }
  0x6e   : > { %1891 = vmatpush1.bf16.msra.mxu0 %v2993_v21  ;;  %v1785_v21 = vrot.slane %v1783_v56, 2 }
  0x6f   : > { %2458 = vmatmul.mubr.msk.bf16.vlgmr.msra.gmra.mrb[0].mxu1 %vm341_vm1, %v3447_v54  ;;  %1892 = vmatprep.subr.bf16.mxu0 %v3002_v32  ;;  %v3012_v54 = vld [vmem:[%s3854_s1 + $0x144] ss:$8 sps:$4 sm:$0xff]  }
  0x70   : > { %739 = vmatprep.mubr.bf16.mxu1 %v3063_v2  ;;  %939 = vmatpush1.bf16.msra.mxu1 %v2996_v59  ;;  %v1792_v59 = vshrl.u32 %v3496_v20, 16 }
  0x71   : > { %2590 = vmatmul.mubr.msk.bf16.gmra.mrb[8].mxu0 %vm341_vm1, %v1555_v61  ;;  %940 = vmatprep.subr.bf16.mxu1 %v3005_v26  ;;  %v1795_v61 = vshll.u32 %v3496_v20, 16  ;;  %v2198_v20 = vsub.s32 0, %v2197_v45 }
  0x72   : > { %1697 = vmatprep.mubr.bf16.mxu0 %v3063_v2  ;;  %1893 = vmatpush1.bf16.msra.mxu0 %v3000_v62  ;;  %v3036_v62 = vld [vmem:[%s3854_s1 + $0x344] ss:$8 sps:$4 sm:$0xff]  }
  0x73   : > { %1894 = vmatprep.subr.bf16.mxu0 %v3009_v63  ;;  %v1794_v63 = vrot.slane %v1792_v59, 2 }
  0x74   : > { %941 = vmatpush1.bf16.msra.mxu1 %v3003_v0 }
  0x75   : > { %942 = vmatprep.subr.bf16.mxu1 %v3012_v54  ;;  %v1797_v54 = vrot.slane %v1795_v61, 3 }
  0x76   : > { %1895 = vmatpush1.bf16.msra.mxu0 %v3007_v34  ;;  %v3692_v34 = vld [vmem:[%s3154_s28 + $0x30] ss:$0 sps:$4 sm:$0x77]  }
  0x77   : > { %2459 = vmatmul.mubr.msk.bf16.gmra.mrb[4].mxu1 %vm341_vm1, %v3264_v19  ;;  %2091 = vmatprep.subr.bf16.mxu0 %v3015_v5  ;;  %v1558_v19 = vrot.slane %v3006_v17, 2  ;;  %v3040_v5 = vld [vmem:[%s3854_s1 + $0x354] ss:$8 sps:$4 sm:$0xff]   ;;  %v1804_v17 = vshll.u32 %v3692_v34, 16 }
  0x78   : > { %749 = vmatprep.mubr.bf16.mxu1 %v3063_v2  ;;  %943 = vmatpush1.bf16.msra.mxu1 %v3010_v7  ;;  %v3044_v7 = vld [vmem:[%s3854_s1 + $0x180] ss:$8 sps:$4 sm:$0xff]  }
  0x79   : > { %2591 = vmatmul.mubr.msk.bf16.gmra.mrb[12].mxu0 %vm341_vm1, %v1557_v14  ;;  %944 = vmatprep.subr.bf16.mxu1 %v3018_v13  ;;  %v1559_v39 = vsel %vm1307_vm4, %v1556_v1, %v1558_v19  ;;  %v3034_v1 = vld [vmem:[%s3854_s1 + $0x340] ss:$8 sps:$4 sm:$0xff]   ;;  %v3045_v13 = vld [vmem:[%s3854_s1 + $0x194] ss:$8 sps:$4 sm:$0xff]   ;;  %v1801_v14 = vshrl.u32 %v3692_v34, 16  ;;  %v1806_v31 = vrot.slane %v1804_v17, 3 }
  0x7a   : > { %1707 = vmatprep.mubr.bf16.mxu0 %v3063_v2 }
  0x7b   : > { %v1803_v28 = vrot.slane %v1801_v14, 2 }
  0x7c   : > { %945 = vmatpush1.bf16.msra.mxu1 %v3016_v18  ;;  %v3038_v18 = vld [vmem:[%s3854_s1 + $0x350] ss:$8 sps:$4 sm:$0xff]  }
  0x7d   : > { %946 = vmatprep.subr.bf16.mxu1 %v3024_v23  ;;  %v3047_v23 = vld [vmem:[%s3854_s1 + $0x1a4] ss:$8 sps:$4 sm:$0xff]   ;;  %v1807_v36 = vor.u32 %v1806_v31, %v1803_v28 }
  0x7f   : > { %2460 = vmatmul.mubr.msk.bf16.gmra.mrb[8].mxu1 %vm341_vm1, %v3307_v47  ;;  %v3043_v47 = vld [vmem:[%s3854_s1 + $0x184] ss:$8 sps:$4 sm:$0xff]  }
  0x80   : > { %759 = vmatprep.mubr.bf16.mxu1 %v3063_v2  ;;  %947 = vmatpush1.bf16.msra.mxu1 %v3022_v33  ;;  %v3049_v33 = vld [vmem:[%s3854_s1 + $0x1b4] ss:$8 sps:$4 sm:$0xff]  }
  0x81   : > { %2592 = vmatmul.mubr.msk.bf16.gmra.mrb[16].mxu0 %vm341_vm1, %v1559_v39  ;;  %948 = vmatprep.subr.bf16.mxu1 %v3027_v37  ;;  %v3051_v37 = vld [vmem:[%s3854_s1 + $0x1c4] ss:$8 sps:$4 sm:$0xff]  }
  0x82   : > { %1916 = vmatprep.mubr.bf16.mxu0 %v3063_v2 }
  0x84   : > { %949 = vmatpush1.bf16.msra.mxu1 %v3025_v58 }
  0x85   : > { %2675 = vmatprep.subr.bf16.mxu1 %v3043_v47 }
  0x87   : > { %2461 = vmatmul.mubr.msk.bf16.gmra.mrb[12].mxu1 %vm341_vm1, %v3329_v29  ;;  %v1786_v29 = vshll.u32 %v3481_v6, 16  ;;  %v3033_v6 = vld [vmem:[%s3854_s1 + $0x334] ss:$8 sps:$4 sm:$0xff]  }
  0x88   : > { %769 = vmatprep.mubr.bf16.mxu1 %v3063_v2 }
  0x89   : > { %2618 = vmatmul.mubr.msk.bf16.vlgmr.msra.gmra.mrb[0].mxu0 %vm341_vm1, %v1772_v25  ;;  %v1788_v32 = vrot.slane %v1786_v29, 3  ;;  %v2202_v25 = vsub.s32 1, %v2197_v45 }
  0x8a   : > { %2092 = vmatpush1.bf16.msra.mxu0 %v3013_v49  ;;  %1926 = vmatprep.mubr.bf16.mxu0 %v3063_v2 }
  0x8b   : > { %2093 = vmatprep.subr.bf16.mxu0 %v3021_v60  ;;  %v1789_v26 = vor.u32 %v1788_v32, %v1785_v21 }
  0x8d   : > { %v1790_v0 = vsel %vm1755_vm6, %v1780_v24, %v1789_v26 }
  0x8e   : > { %2094 = vmatpush1.bf16.msra.mxu0 %v3019_v51 }
  0x8f   : > { %2462 = vmatmul.mubr.msk.bf16.gmra.mrb[16].mxu1 %vm341_vm1, %v3357_v10  ;;  %2095 = vmatprep.subr.bf16.mxu0 %v3030_v57  ;;  %v3031_v10 = vld [vmem:[%s3854_s1 + $0x330] ss:$8 sps:$4 sm:$0xff]  }
  0x90   : > { %970 = vmatprep.mubr.bf16.mxu1 %v3063_v2 }
  0x91   : > { %2619 = vmatmul.mubr.msk.bf16.gmra.mrb[4].mxu0 %vm341_vm1, %v1781_v12 }
  0x92   : > { %1936 = vmatprep.mubr.bf16.mxu0 %v3063_v2  ;;  %2096 = vmatpush1.bf16.msra.mxu0 %v3028_v16 }
  0x93   : > { %2097 = vmatprep.subr.bf16.mxu0 %v3033_v6 }
  0x96   : > { %2098 = vmatpush1.bf16.msra.mxu0 %v3031_v10 }
  0x97   : > { %2493 = vmatmul.mubr.msk.bf16.vlgmr.msra.gmra.mrb[0].mxu1 %vm341_vm1, %v3310_v48  ;;  %2099 = vmatprep.subr.bf16.mxu0 %v3036_v62  ;;  %v1798_v48 = vor.u32 %v1797_v54, %v1794_v63 }
  0x98   : > { %980 = vmatprep.mubr.bf16.mxu1 %v3063_v2  ;;  %2681 = vmatpush1.bf16.msra.mxu1 %v3044_v7 }
  0x99   : > { %2620 = vmatmul.mubr.msk.bf16.gmra.mrb[8].mxu0 %vm341_vm1, %v1790_v0  ;;  %2676 = vmatprep.subr.bf16.mxu1 %v3045_v13  ;;  %v1799_v19 = vsel %vm1755_vm6, %v1789_v26, %v1798_v48  ;;  %v1808_v39 = vsel %vm1755_vm6, %v1798_v48, %v1807_v36 }
  0x9a   : > { %1946 = vmatprep.mubr.bf16.mxu0 %v3063_v2  ;;  %2100 = vmatpush1.bf16.msra.mxu0 %v3034_v1 }
  0x9b   : > { %2101 = vmatprep.subr.bf16.mxu0 %v3040_v5 }
  0x9c   : > { %2682 = vmatpush1.bf16.msra.mxu1 %v3046_v22 }
  0x9d   : > { %2677 = vmatprep.subr.bf16.mxu1 %v3047_v23 }
  0x9e   : > { %2102 = vmatpush1.bf16.msra.mxu0 %v3038_v18 }
  0x9f   : > { %2494 = vmatmul.mubr.msk.bf16.gmra.mrb[4].mxu1 %vm341_vm1, %v3343_v3  ;;  %v3050_v3 = vld [vmem:[%s3854_s1 + $0x1b0] ss:$8 sps:$4 sm:$0xff]  }
  0xa0   : > { %990 = vmatprep.mubr.bf16.mxu1 %v3063_v2  ;;  %2683 = vmatpush1.bf16.msra.mxu1 %v3048_v41 }
  0xa1   : > { %2621 = vmatmul.mubr.msk.bf16.gmra.mrb[12].mxu0 %vm341_vm1, %v1799_v19  ;;  %2678 = vmatprep.subr.bf16.mxu1 %v3049_v33 }
  0xa2   : > { %1956 = vmatprep.mubr.bf16.mxu0 %v3063_v2 }
  0xa4   : > { %2684 = vmatpush1.bf16.msra.mxu1 %v3050_v3 }
  0xa5   : > { %2679 = vmatprep.subr.bf16.mxu1 %v3051_v37 }
  0xa7   : > { %2495 = vmatmul.mubr.msk.bf16.gmra.mrb[8].mxu1 %vm341_vm1, %v3346_v4  ;;  %v3054_v4 = vld [vmem:[%s3854_s1 + $0x1d0] ss:$8 sps:$4 sm:$0xff]  }
  0xa8   : > { %1000 = vmatprep.mubr.bf16.mxu1 %v3063_v2  ;;  %2685 = vmatpush1.bf16.msra.mxu1 %v3052_v42 }
  0xa9   : > { %2622 = vmatmul.mubr.msk.bf16.gmra.mrb[16].mxu0 %vm341_vm1, %v1808_v39  ;;  %2680 = vmatprep.subr.bf16.mxu1 %v3053_v11 }
  0xaa   : > { %2123 = vmatprep.mubr.bf16.mxu0 %v3063_v2 }
  0xac   : > { %2686 = vmatpush1.bf16.msra.mxu1 %v3054_v4 }
  0xaf   : > { %2496 = vmatmul.mubr.msk.bf16.gmra.mrb[12].mxu1 %vm341_vm1, %v3384_v27  ;;  %v2014_v27 = vrot.slane %v3692_v34, 3 }
  0xb0   : > { %1010 = vmatprep.mubr.bf16.mxu1 %v3063_v2 }
  0xb1   : > { %2648 = vmatmul.mubr.msk.bf16.vlgmr.msra.gmra.mrb[0].mxu0 %vm341_vm1, %v3547_v53 }
  0xb2   : > { %2133 = vmatprep.mubr.bf16.mxu0 %v3063_v2 }
  0xb7   : > { %2497 = vmatmul.mubr.msk.bf16.gmra.mrb[16].mxu1 %vm341_vm1, %v3552_v55 }
  0xb8   : > { %1249 = vmatprep.mubr.bf16.mxu1 %v3063_v2 }
  0xb9   : > { %2649 = vmatmul.mubr.msk.bf16.gmra.mrb[4].mxu0 %vm341_vm1, %v3487_v9  ;;  %v2015_v9 = vsel %vm2004_vm5, %v2012_v52, %v2014_v27  ;;  %v2194_v52 = vld [vmem:[%s3855_s2] sm:$0x3] }
  0xba   : > { %2143 = vmatprep.mubr.bf16.mxu0 %v3063_v2  ;;  %v3785_v49 = vrot.slane %v2194_v52, %v2198_v20  ;;  %v3787_v50 = vrot.slane %v2194_v52, %v2202_v25 }
  0xbf   : > { %2526 = vmatmul.mubr.msk.bf16.vlgmr.msra.gmra.mrb[12].mxu1 %vm341_vm1, %v3515_v38 }
  0xc0   : > { %1259 = vmatprep.mubr.bf16.mxu1 %v3063_v2 }
  0xc1   : > { %2650 = vmatmul.mubr.msk.bf16.gmra.mrb[8].mxu0 %vm341_vm1, %v3503_v30 }
  0xc2   : > { %2153 = vmatprep.mubr.bf16.mxu0 %v3063_v2 }
  0xc7   : > { %2527 = vmatmul.mubr.msk.bf16.gmra.mrb[16].mxu1 %vm341_vm1, %v3527_v44 }
  0xc9   : > { %2651 = vmatmul.mubr.msk.bf16.gmra.mrb[12].mxu0 %vm341_vm1, %v3520_v40 }
  0xca   : > { %2163 = vmatprep.mubr.bf16.mxu0 %v3063_v2 }
  0xd1   : > { %2652 = vmatmul.mubr.msk.bf16.gmra.mrb[16].mxu0 %vm341_vm1, %v2015_v9 }
 0x16a   : > { %v972_v38 = vpop.f32.mrb[0].mxu1 }
 0x16b   : > { %v974_v30 = vpop.f32.mrb[1].mxu1 }
 0x16c   : > { %v976_v53 = vpop.f32.mrb[2].mxu1 }
 0x16d   : > { %v978_v55 = vpop.f32.mrb[3].mxu1 }
 0x172   : > { %v982_v43 = vpop.f32.mrb[4].mxu1 }
 0x173   : > { %v984_v58 = vpop.f32.mrb[5].mxu1 }
 0x174   : > { %v986_v44 = vpop.f32.mrb[6].mxu1 }
 0x175   : > { %v988_v15 = vpop.f32.mrb[7].mxu1 }
 0x17a   : > { %v992_v40 = vpop.f32.mrb[8].mxu1 }
 0x17b   : > { %v994_v2 = vpop.f32.mrb[9].mxu1 }
 0x17c   : > { %v996_v46 = vpop.f32.mrb[10].mxu1 }
 0x17d   : > { %v3780_v47 = vpop.f32.mrb[11].mxu1 }
 0x184   : > { %v2125_v8 = vpop.f32.mrb[0].mxu0 }
 0x185   : > { %v2687_v60 = vadd.f32 %v2125_v8, %v972_v38  ;;  %v2127_v51 = vpop.f32.mrb[1].mxu0 }
 0x186   : > { %v2688_v24 = vadd.f32 %v2127_v51, %v974_v30  ;;  %v2129_v56 = vpop.f32.mrb[2].mxu0 }
 0x187   : > { %v2206_v29 = vadd.f32 %v2687_v60, %v3785_v49  ;;  %v2689_v57 = vadd.f32 %v2129_v56, %v976_v53  ;;  %v2131_v12 = vpop.f32.mrb[3].mxu0 }
 0x188   : > { %v2207_v16 = vadd.f32 %v2688_v24, %v3787_v50  ;;  %v2690_v21 = vadd.f32 %v2131_v12, %v978_v55 }
 0x189   : > { %v2226_v32 = vmax.f32 %v2206_v29, 0.0  ;;  %v2208_v6 = vadd.f32 %v2689_v57, %v3785_v49 }
 0x18a   : > { %v2227_v59 = vmax.f32 %v2207_v16, 0.0  ;;  %v2209_v26 = vadd.f32 %v2690_v21, %v3787_v50 }
 0x18b   : > { %v2228_v61 = vmax.f32 %v2208_v6, 0.0 }
 0x18c   : > { %v2665_v62 = vpack.c.bf16 %v2227_v59, %v2226_v32  ;;  %v2229_v63 = vmax.f32 %v2209_v26, 0.0  ;;  %v2135_v0 = vpop.f32.mrb[4].mxu0 }
 0x18d   : > { %v2691_v54 = vadd.f32 %v2135_v0, %v982_v43  ;;  %v2137_v1 = vpop.f32.mrb[5].mxu0 }
 0x18e   : > { %2309 = vst.msk [vmem:[%s3797_s19] sm:$0xff] %vm3799_vm9, %v2665_v62  ;;  %v2666_v34 = vpack.c.bf16 %v2229_v63, %v2228_v61  ;;  %v2692_v5 = vadd.f32 %v2137_v1, %v984_v58  ;;  %v2139_v7 = vpop.f32.mrb[6].mxu0 }
 0x18f   : > { %v2210_v13 = vadd.f32 %v2691_v54, %v3785_v49  ;;  %v2693_v48 = vadd.f32 %v2139_v7, %v986_v44  ;;  %v2141_v14 = vpop.f32.mrb[7].mxu0 }
 0x190   : > { %2310 = vst.msk [vmem:[%s3797_s19 + $0x8] sm:$0xff] %vm3799_vm9, %v2666_v34  ;;  %v2211_v17 = vadd.f32 %v2692_v5, %v3787_v50  ;;  %v2694_v18 = vadd.f32 %v2141_v14, %v988_v15 }
 0x191   : > { %v2230_v22 = vmax.f32 %v2210_v13, 0.0  ;;  %v2212_v23 = vadd.f32 %v2693_v48, %v3785_v49 }
 0x192   : > { %v2231_v19 = vmax.f32 %v2211_v17, 0.0  ;;  %v2213_v28 = vadd.f32 %v2694_v18, %v3787_v50  ;;  %v1251_v31 = vpop.f32.mrb[12].mxu1 }
 0x193   : > { %v2232_v41 = vmax.f32 %v2212_v23, 0.0  ;;  %v1253_v33 = vpop.f32.mrb[13].mxu1 }
 0x194   : > { %v2667_v36 = vpack.c.bf16 %v2231_v19, %v2230_v22  ;;  %v2233_v3 = vmax.f32 %v2213_v28, 0.0  ;;  %v2145_v37 = vpop.f32.mrb[8].mxu0  ;;  %v1255_v39 = vpop.f32.mrb[14].mxu1 }
 0x195   : > { %v2695_v42 = vadd.f32 %v2145_v37, %v992_v40  ;;  %v2147_v11 = vpop.f32.mrb[9].mxu0  ;;  %v1257_v4 = vpop.f32.mrb[15].mxu1 }
 0x196   : > { %2311 = vst.msk [vmem:[%s3797_s19 + $0x10] sm:$0xff] %vm3799_vm9, %v2667_v36  ;;  %v2668_v27 = vpack.c.bf16 %v2233_v3, %v2232_v41  ;;  %v2696_v9 = vadd.f32 %v2147_v11, %v994_v2  ;;  %v2149_v38 = vpop.f32.mrb[10].mxu0 }
 0x197   : > { %v2214_v30 = vadd.f32 %v2695_v42, %v3785_v49  ;;  %v2697_v53 = vadd.f32 %v2149_v38, %v996_v46  ;;  %v2151_v55 = vpop.f32.mrb[11].mxu0 }
 0x198   : > { %2312 = vst.msk [vmem:[%s3797_s19 + $0x18] sm:$0xff] %vm3799_vm9, %v2668_v27  ;;  %v2215_v43 = vadd.f32 %v2696_v9, %v3787_v50  ;;  %v2698_v58 = vadd.f32 %v2151_v55, %v3780_v47 }
 0x199   : > { %v2234_v44 = vmax.f32 %v2214_v30, 0.0  ;;  %v2216_v15 = vadd.f32 %v2697_v53, %v3785_v49 }
 0x19a   : > { %v2235_v35 = vmax.f32 %v2215_v43, 0.0  ;;  %v2217_v40 = vadd.f32 %v2698_v58, %v3787_v50  ;;  %v1261_v2 = vpop.f32.mrb[16].mxu1 }
 0x19b   : > { %v2236_v45 = vmax.f32 %v2216_v15, 0.0  ;;  %v1263_v20 = vpop.f32.mrb[17].mxu1 }
 0x19c   : > { %v2669_v46 = vpack.c.bf16 %v2235_v35, %v2234_v44  ;;  %v2237_v52 = vmax.f32 %v2217_v40, 0.0  ;;  %v2155_v25 = vpop.f32.mrb[12].mxu0  ;;  %v1265_v8 = vpop.f32.mrb[18].mxu1 }
 0x19d   : > { %v2699_v60 = vadd.f32 %v2155_v25, %v1251_v31  ;;  %v2157_v51 = vpop.f32.mrb[13].mxu0  ;;  %v1267_v24 = vpop.f32.mrb[19].mxu1 }
 0x19e   : > { %2313 = vst.msk [vmem:[%s3797_s19 + $0x20] sm:$0xff] %vm3799_vm9, %v2669_v46  ;;  %v2670_v47 = vpack.c.bf16 %v2237_v52, %v2236_v45  ;;  %v2700_v56 = vadd.f32 %v2157_v51, %v1253_v33  ;;  %v2159_v29 = vpop.f32.mrb[14].mxu0 }
 0x19f   : > { %v2218_v57 = vadd.f32 %v2699_v60, %v3785_v49  ;;  %v2701_v12 = vadd.f32 %v2159_v29, %v1255_v39  ;;  %v2161_v16 = vpop.f32.mrb[15].mxu0 }
 0x1a0   : > { %2314 = vst.msk [vmem:[%s3797_s19 + $0x28] sm:$0xff] %vm3799_vm9, %v2670_v47  ;;  %v2219_v21 = vadd.f32 %v2700_v56, %v3787_v50  ;;  %v2702_v32 = vadd.f32 %v2161_v16, %v1257_v4 }
 0x1a1   : > { %v2238_v6 = vmax.f32 %v2218_v57, 0.0  ;;  %v2220_v59 = vadd.f32 %v2701_v12, %v3785_v49 }
 0x1a2   : > { %v2239_v26 = vmax.f32 %v2219_v21, 0.0  ;;  %v2221_v61 = vadd.f32 %v2702_v32, %v3787_v50 }
 0x1a3   : > { %v2240_v62 = vmax.f32 %v2220_v59, 0.0 }
 0x1a4   : > { %v2671_v63 = vpack.c.bf16 %v2239_v26, %v2238_v6  ;;  %v2241_v0 = vmax.f32 %v2221_v61, 0.0  ;;  %v2165_v54 = vpop.f32.mrb[16].mxu0 }
 0x1a5   : > { %v2703_v1 = vadd.f32 %v2165_v54, %v1261_v2  ;;  %v2167_v34 = vpop.f32.mrb[17].mxu0 }
 0x1a6   : > { %2315 = vst.msk [vmem:[%s3797_s19 + $0x30] sm:$0xff] %vm3799_vm9, %v2671_v63  ;;  %v2672_v5 = vpack.c.bf16 %v2241_v0, %v2240_v62  ;;  %v2704_v7 = vadd.f32 %v2167_v34, %v1263_v20  ;;  %v2169_v13 = vpop.f32.mrb[18].mxu0 }
 0x1a7   : > { %v2222_v48 = vadd.f32 %v2703_v1, %v3785_v49  ;;  %v2705_v14 = vadd.f32 %v2169_v13, %v1265_v8  ;;  %v2171_v17 = vpop.f32.mrb[19].mxu0 }
 0x1a8   : > { %2316 = vst.msk [vmem:[%s3797_s19 + $0x38] sm:$0xff] %vm3799_vm9, %v2672_v5  ;;  %v2223_v18 = vadd.f32 %v2704_v7, %v3787_v50  ;;  %v2706_v22 = vadd.f32 %v2171_v17, %v1267_v24 }
 0x1a9   : > { %v2242_v23 = vmax.f32 %v2222_v48, 0.0  ;;  %v2224_v19 = vadd.f32 %v2705_v14, %v3785_v49 }
 0x1aa   : > { %v2243_v28 = vmax.f32 %v2223_v18, 0.0  ;;  %v2225_v31 = vadd.f32 %v2706_v22, %v3787_v50 }
 0x1ab   : > { %v2244_v41 = vmax.f32 %v2224_v19, 0.0 }
 0x1ac   : > { %v2673_v33 = vpack.c.bf16 %v2243_v28, %v2242_v23  ;;  %v2245_v36 = vmax.f32 %v2225_v31, 0.0 }
 0x1ae   : > { %2317 = vst.msk [vmem:[%s3797_s19 + $0x40] sm:$0xff] %vm3799_vm9, %v2673_v33  ;;  %v2674_v3 = vpack.c.bf16 %v2245_v36, %v2244_v41 }
 0x1b0   : > { %2318 = vst.msk [vmem:[%s3797_s19 + $0x48] sm:$0xff] %vm3799_vm9, %v2674_v3 }
 0x1b1 PF: > { %s13_s12 = sadd.s32 1, %s3061_s12  }
 0x1b2   : > { %p10_p4 = scmp.ge.s32.totalorder %s13_s12, 4  }
 0x1b4   :  { %12 = sbr.rel (!%p10_p4) target bundleno = 1 (0x1), region = 70 }

// kernel: model_c_forward.13
= control target key start
LH: loop header
LB: loop body
LE: loop exit
PB: predicated region body
PF: predicated region fallthrough
CT: control target
= control target key end

     0   :  { %s4452_s12 = smov 0   ;;  %s5727_s0 = inlined_call_operand.vmem [shape: bf16[2,104,192], index: 0, kind: input, shape index: {}]   ;;  %s5728_s1 = inlined_call_operand.vmem [shape: bf16[9,192,192], index: 1, kind: input, shape index: {}]   ;;  %s5729_s2 = inlined_call_operand.vmem [shape: f32[1,192], index: 2, kind: input, shape index: {}]   ;;  %s5730_s3 = inlined_call_operand.vmem [shape: bf16[2,80,192], index: 3, kind: output, shape index: {}]  }
   0x1 LB: > { %s3333_s13 = sadd.s32 4294967295, %s4430_s12   ;;  %p3337_p0 = scmp.ge.s32.totalorder %s4430_s12, 1  ;;  %s4430_s12 = sphi %s4452_s12, %s13_s12  }
   0x2   : > { %p137_p1 = scmp.lt.s32.totalorder %s4430_s12, 3 }
   0x4   : > { %p138_p2 = pnand %p3337_p0, %p137_p1 }
   0x5   : > { %v4055_v0 = vld [vmem:[%s5728_s1 + $0xc4] ss:$8 sps:$4 sm:$0xff] (!%p138_p2)   ;;  %v4059_v2 = vld [vmem:[%s5728_s1 + $0xc0] ss:$8 sps:$4 sm:$0xff] (!%p138_p2)   ;;  %v4061_v4 = vld [vmem:[%s5728_s1 + $0xd4] ss:$8 sps:$4 sm:$0xff] (!%p138_p2)  }
   0x6   : > { %141 = sbr.rel (%p138_p2) target bundleno = 487 (0x1e7), region = 32  ;;  %v4057_v1 = vld [vmem:[%s5728_s1 + $0x304] ss:$8 sps:$4 sm:$0xff] (!%p138_p2)   ;;  %507 = vmatprep.subr.bf16.mxu1 (!%p138_p2), %v4055_v0  ;;  %v4060_v3 = vld [vmem:[%s5728_s1 + $0x300] ss:$8 sps:$4 sm:$0xff] (!%p138_p2)   ;;  %p161_p3 = scmp.lt.s32.totalorder (!%p138_p2), %s3333_s13, 1 }
   0x7   : > { %1729 = vmatprep.subr.bf16.mxu0 (!%p138_p2), %v4057_v1  ;;  %508 = vmatpush1.bf16.msra.mxu1 (!%p138_p2), %v4059_v2  ;;  %v4063_v5 = vld [vmem:[%s5728_s1 + $0x314] ss:$8 sps:$4 sm:$0xff] (!%p138_p2)   ;;  %v4065_v6 = vld [vmem:[%s5728_s1 + $0xd0] ss:$8 sps:$4 sm:$0xff] (!%p138_p2)   ;;  %v4067_v8 = vld [vmem:[%s5728_s1 + $0xe4] ss:$8 sps:$4 sm:$0xff] (!%p138_p2)  }
   0x8   : > { %1730 = vmatpush1.bf16.msra.mxu0 (!%p138_p2), %v4060_v3  ;;  %509 = vmatprep.subr.bf16.mxu1 (!%p138_p2), %v4061_v4  ;;  %v4066_v7 = vld [vmem:[%s5728_s1 + $0x310] ss:$8 sps:$4 sm:$0xff] (!%p138_p2)   ;;  %v4069_v9 = vld [vmem:[%s5728_s1 + $0x324] ss:$8 sps:$4 sm:$0xff] (!%p138_p2)   ;;  %v4071_v10 = vld [vmem:[%s5728_s1 + $0xe0] ss:$8 sps:$4 sm:$0xff] (!%p138_p2)  }
   0x9   : > { %1731 = vmatprep.subr.bf16.mxu0 (!%p138_p2), %v4063_v5  ;;  %v4072_v11 = vld [vmem:[%s5728_s1 + $0x320] ss:$8 sps:$4 sm:$0xff] (!%p138_p2)   ;;  %v4073_v12 = vld [vmem:[%s5728_s1 + $0xf4] ss:$8 sps:$4 sm:$0xff] (!%p138_p2)   ;;  %v4077_v14 = vld [vmem:[%s5728_s1 + $0xf0] ss:$8 sps:$4 sm:$0xff] (!%p138_p2)  }
   0xa   : > { %v4075_v13 = vld [vmem:[%s5728_s1 + $0x334] ss:$8 sps:$4 sm:$0xff] (!%p138_p2)   ;;  %v4078_v15 = vld [vmem:[%s5728_s1 + $0x330] ss:$8 sps:$4 sm:$0xff] (!%p138_p2)   ;;  %v4079_v16 = vld [vmem:[%s5728_s1 + $0x104] ss:$8 sps:$4 sm:$0xff] (!%p138_p2)  }
   0xb   : > { %510 = vmatpush1.bf16.msra.mxu1 (!%p138_p2), %v4065_v6  ;;  %v4081_v17 = vld [vmem:[%s5728_s1 + $0x344] ss:$8 sps:$4 sm:$0xff] (!%p138_p2)   ;;  %v4083_v18 = vld [vmem:[%s5728_s1 + $0x100] ss:$8 sps:$4 sm:$0xff] (!%p138_p2)   ;;  %v4085_v20 = vld [vmem:[%s5728_s1 + $0x114] ss:$8 sps:$4 sm:$0xff] (!%p138_p2)  }
   0xc   : > { %1732 = vmatpush1.bf16.msra.mxu0 (!%p138_p2), %v4066_v7  ;;  %511 = vmatprep.subr.bf16.mxu1 (!%p138_p2), %v4067_v8  ;;  %v4084_v19 = vld [vmem:[%s5728_s1 + $0x340] ss:$8 sps:$4 sm:$0xff] (!%p138_p2)   ;;  %v4087_v21 = vld [vmem:[%s5728_s1 + $0x354] ss:$8 sps:$4 sm:$0xff] (!%p138_p2)   ;;  %v4089_v22 = vld [vmem:[%s5728_s1 + $0x110] ss:$8 sps:$4 sm:$0xff] (!%p138_p2)  }
   0xd   : > { %1733 = vmatprep.subr.bf16.mxu0 %v4069_v9  ;;  %v4090_v23 = vld [vmem:[%s5728_s1 + $0x350] ss:$8 sps:$4 sm:$0xff]   ;;  %v4091_v24 = vld [vmem:[%s5728_s1 + $0x124] ss:$8 sps:$4 sm:$0xff]   ;;  %s5734_s13 = smov (!%p161_p3, %s3333_s13), 1  ;;  %vm491_vm2 = vcmask 523264  }
   0xe   : > { %v4093_v25 = vld [vmem:[%s5728_s1 + $0x364] ss:$8 sps:$4 sm:$0xff]   ;;  %v4095_v26 = vld [vmem:[%s5728_s1 + $0x120] ss:$8 sps:$4 sm:$0xff]   ;;  %v4097_v28 = vld [vmem:[%s5728_s1 + $0x134] ss:$8 sps:$4 sm:$0xff]  }
   0xf   : > { %512 = vmatpush1.bf16.msra.mxu1 %v4071_v10  ;;  %v4096_v27 = vld [vmem:[%s5728_s1 + $0x360] ss:$8 sps:$4 sm:$0xff]   ;;  %v4099_v29 = vld [vmem:[%s5728_s1 + $0x374] ss:$8 sps:$4 sm:$0xff]   ;;  %s4045_s24 = smul.u32 104, %s5734_s13  ;;  %vm1863_vm3 = vcmask 1045504  }
  0x10   : > { %1734 = vmatpush1.bf16.msra.mxu0 %v4072_v11  ;;  %513 = vmatprep.subr.bf16.mxu1 %v4073_v12  ;;  %v4101_v30 = vld [vmem:[%s5728_s1 + $0x130] ss:$8 sps:$4 sm:$0xff]   ;;  %v4103_v32 = vld [vmem:[%s5728_s1 + $0x144] ss:$8 sps:$4 sm:$0xff]   ;;  %v4107_v34 = vld [vmem:[%s5728_s1 + $0x140] ss:$8 sps:$4 sm:$0xff]  }
  0x11   : > { %1735 = vmatprep.subr.bf16.mxu0 %v4075_v13  ;;  %v4102_v31 = vld [vmem:[%s5728_s1 + $0x370] ss:$8 sps:$4 sm:$0xff]   ;;  %v4105_v33 = vld [vmem:[%s5728_s1 + $0x384] ss:$8 sps:$4 sm:$0xff]   ;;  %s4572_s8 = scalar_lea.vmem %s5727_s0, %s4045_s24  ;;  %v4108_v35 = vld [vmem:[%s5728_s1 + $0x380] ss:$8 sps:$4 sm:$0xff]  }
  0x12   : > { %v4109_v36 = vld [vmem:[%s5728_s1 + $0x154] ss:$8 sps:$4 sm:$0xff]   ;;  %v172_v38 = vld [vmem:[%s4572_s8] sm:$0xff]  ;;  %v173_v39 = vld [vmem:[%s4572_s8 + $0x8] sm:$0xff]  ;;  %vm277_vm0 = vsmask.f32 7424 }
  0x13   : > { %514 = vmatpush1.bf16.msra.mxu1 %v4077_v14  ;;  %v4111_v37 = vld [vmem:[%s5728_s1 + $0x394] ss:$8 sps:$4 sm:$0xff]   ;;  %v4592_v42 = vcombine.high %v172_v38, %v173_v39  ;;  %vm1482_vm1 = vsmask.f32 6400  ;;  %v4594_v43 = vcombine.low %v172_v38, %v173_v39  ;;  %v4113_v44 = vld [vmem:[%s5728_s1 + $0x150] ss:$8 sps:$4 sm:$0xff]  }
  0x14   : > { %1736 = vmatpush1.bf16.msra.mxu0 %v4078_v15  ;;  %515 = vmatprep.subr.bf16.mxu1 %v4079_v16  ;;  %v4589_v40 = vld [vmem:[%s4572_s8 + $0x10] sm:$0xff]  ;;  %v175_v41 = vld [vmem:[%s4572_s8 + $0x18] sm:$0xff]  ;;  %v1105_v47 = vld [vmem:[%s4572_s8 + $0x8] sm:$0xee]  ;;  %vm839_vm4 = vcmask 1046528   ;;  %vm2887_vm5 = vcmask 1044480  }
  0x15   : > { %1737 = vmatprep.subr.bf16.mxu0 %v4081_v17  ;;  %v4114_v45 = vld [vmem:[%s5728_s1 + $0x390] ss:$8 sps:$4 sm:$0xff]   ;;  %v4603_v46 = vcombine.high %v4589_v40, %v175_v41  ;;  %v4607_v48 = vcombine.low %v4589_v40, %v175_v41  ;;  %v291_v49 = vshrl.u32 %v4592_v42, 16  ;;  %v293_v50 = vshll.u32 %v4592_v42, 16  ;;  %v4612_v51 = vld [vmem:[%s4572_s8 + $0x20] sm:$0xff]  ;;  %s4046_s15 = smul.u32 80, %s5734_s13 }
  0x16   : > { %v4615_v52 = vcombine.high %v1105_v47, %v4589_v40  ;;  %v4115_v53 = vld [vmem:[%s5728_s1 + $0x164] ss:$8 sps:$4 sm:$0xff]   ;;  %v4625_v56 = vcombine.high %v175_v41, %v4612_v51  ;;  %v279_v57 = vshrl.u32 %v4594_v43, 16  ;;  %v4629_v58 = vcombine.low %v1105_v47, %v4589_v40  ;;  %v4119_v63 = vld [vmem:[%s5728_s1 + $0x160] ss:$8 sps:$4 sm:$0xff]  }
  0x17   : > { %516 = vmatpush1.bf16.msra.mxu1 %v4083_v18  ;;  %v4117_v54 = vld [vmem:[%s5728_s1 + $0x3a4] ss:$8 sps:$4 sm:$0xff]   ;;  %v298_v55 = vshll.u32 %v4603_v46, 16  ;;  %v295_v59 = vrot.slane %v293_v50, 1  ;;  %v281_v62 = vshll.u32 %v4594_v43, 16  ;;  %v286_v3 = vshll.u32 %v4607_v48, 16  ;;  %s5663_s17 = scalar_lea.vmem %s5730_s3, %s4046_s15 }
  0x18   : > { %1738 = vmatpush1.bf16.msra.mxu0 %v4084_v19  ;;  %517 = vmatprep.subr.bf16.mxu1 %v4085_v20  ;;  %v1501_v60 = vshrl.u32 %v4615_v52, 16  ;;  %v1504_v61 = vshll.u32 %v4615_v52, 16  ;;  %v1509_v1 = vshrl.u32 %v4625_v56, 16  ;;  %v1512_v2 = vshll.u32 %v4625_v56, 16  ;;  %v4120_v4 = vld [vmem:[%s5728_s1 + $0x3a0] ss:$8 sps:$4 sm:$0xff]  }
  0x19   : > { %1739 = vmatprep.subr.bf16.mxu0 %v4087_v21  ;;  %v300_v0 = vrot.slane %v298_v55, 1  ;;  %v296_v5 = vor.u32 %v295_v59, %v291_v49  ;;  %v283_v8 = vrot.slane %v281_v62, 1  ;;  %v4121_v9 = vld [vmem:[%s5728_s1 + $0x174] ss:$8 sps:$4 sm:$0xff]   ;;  %v1484_v15 = vshrl.u32 %v4629_v58, 16 }
  0x1a   : > { %v1503_v6 = vrot.slane %v1501_v60, 1  ;;  %v1506_v7 = vrot.slane %v1504_v61, 2  ;;  %v1511_v10 = vrot.slane %v1509_v1, 1  ;;  %v1514_v11 = vrot.slane %v1512_v2, 2  ;;  %v4123_v12 = vld [vmem:[%s5728_s1 + $0x3b4] ss:$8 sps:$4 sm:$0xff]  }
  0x1b   : > { %518 = vmatpush1.bf16.msra.mxu1 %v4089_v22  ;;  %v301_v13 = vsel %vm277_vm0, %v296_v5, %v300_v0  ;;  %v4125_v16 = vld [vmem:[%s5728_s1 + $0x170] ss:$8 sps:$4 sm:$0xff]   ;;  %v4658_v18 = vcombine.low %v175_v41, %v4612_v51  ;;  %v1487_v19 = vshll.u32 %v4629_v58, 16  ;;  %v284_v21 = vor.u32 %v283_v8, %v279_v57  ;;  %v4143_v39 = vld [vmem:[%s5728_s1 + $0x14] ss:$8 sps:$4 sm:$0xff]  }
  0x1c   : > { %1740 = vmatpush1.bf16.msra.mxu0 %v4090_v23  ;;  %519 = vmatprep.subr.bf16.mxu1 %v4091_v24  ;;  %v1507_v14 = vor.u32 %v1506_v7, %v1503_v6  ;;  %v4655_v17 = vor.u32 %v1514_v11, %v1511_v10  ;;  %v4126_v20 = vld [vmem:[%s5728_s1 + $0x3b0] ss:$8 sps:$4 sm:$0xff]   ;;  %v288_v22 = vrot.slane %v286_v3, 1  ;;  %v1486_v23 = vrot.slane %v1484_v15, 1  ;;  %v4146_v49 = vld [vmem:[%s5728_s1 + $0x3d4] ss:$8 sps:$4 sm:$0xff]  }
  0x1d   : > { %1741 = vmatprep.subr.bf16.mxu0 %v4093_v25  ;;  %3400 = vmatprep.mubr.msk.bf16.mxu1 %vm491_vm2, %v301_v13  ;;  %v1489_v25 = vrot.slane %v1487_v19, 2  ;;  %v302_v47 = vshrl.u32 %v4607_v48, 16  ;;  %v4144_v60 = vld [vmem:[%s5728_s1 + $0x3d0] ss:$8 sps:$4 sm:$0xff]   ;;  %v4149_v1 = vld [vmem:[%s5728_s1 + $0x24] ss:$8 sps:$4 sm:$0xff]  }
  0x1e   : > { %v1516_v24 = vsel %vm1482_vm1, %v1507_v14, %v4655_v17  ;;  %v4152_v5 = vld [vmem:[%s5728_s1 + $0x3e4] ss:$8 sps:$4 sm:$0xff]   ;;  %v179_v11 = vld [vmem:[%s4572_s8 + $0x38] sm:$0xff]  ;;  %v4147_v14 = vld [vmem:[%s5728_s1 + $0x20] ss:$8 sps:$4 sm:$0xff]   ;;  %vm3265_vm7 = vcmask 1043456  }
  0x1f   : > { %520 = vmatpush1.bf16.msra.mxu1 %v4095_v26  ;;  %v1492_v26 = vshrl.u32 %v4658_v18, 16  ;;  %3604 = vmatprep.mubr.msk.bf16.mxu0 %vm491_vm2, %v1516_v24  ;;  %v304_v3 = vor.u32 %v302_v47, %v288_v22  ;;  %v4150_v15 = vld [vmem:[%s5728_s1 + $0x3e0] ss:$8 sps:$4 sm:$0xff]   ;;  %vm2506_vm6 = vsmask.f32 5376  ;;  %vm3266_vm8 = vcmask 523268  }
  0x20   : > { %1742 = vmatpush1.bf16.msra.mxu0 %v4096_v27  ;;  %521 = vmatprep.subr.bf16.mxu1 %v4097_v28  ;;  %v1495_v27 = vshll.u32 %v4658_v18, 16  ;;  %v4131_v28 = vld [vmem:[%s5728_s1 + $0x4] ss:$8 sps:$4 sm:$0xff]   ;;  %vm5667_vm9 = vmor %vm3266_vm8, %vm3265_vm7 }
  0x21   : > { %1743 = vmatprep.subr.bf16.mxu0 %v4099_v29  ;;  %v4136_v29 = vld [vmem:[%s5728_s1 + $0x3c4] ss:$8 sps:$4 sm:$0xff]  }
  0x22   : > { %v1112_v24 = vld [vmem:[%s4572_s8 + $0x40] sm:$0xff] }
  0x23   : > { %522 = vmatpush1.bf16.msra.mxu1 %v4101_v30  ;;  %v310_v30 = vshrl.u32 %v4603_v46, 16 }
  0x24   : > { %1744 = vmatpush1.bf16.msra.mxu0 %v4102_v31  ;;  %523 = vmatprep.subr.bf16.mxu1 %v4103_v32  ;;  %v4129_v31 = vld [vmem:[%s5728_s1] ss:$8 sps:$4 sm:$0xff]   ;;  %v1490_v32 = vor.u32 %v1489_v25, %v1486_v23  ;;  %v4155_v25 = vld [vmem:[%s5728_s1 + $0x34] ss:$8 sps:$4 sm:$0xff]  }
  0x25   : > { %1745 = vmatprep.subr.bf16.mxu0 %v4105_v33  ;;  %v1494_v33 = vrot.slane %v1492_v26, 1  ;;  %v4158_v26 = vld [vmem:[%s5728_s1 + $0x3f4] ss:$8 sps:$4 sm:$0xff]  }
  0x27   : > { %524 = vmatpush1.bf16.msra.mxu1 %v4107_v34  ;;  %v1497_v34 = vrot.slane %v1495_v27, 2 }
  0x28   : > { %1746 = vmatpush1.bf16.msra.mxu0 %v4108_v35  ;;  %525 = vmatprep.subr.bf16.mxu1 %v4109_v36  ;;  %v289_v35 = vsel %vm277_vm0, %v284_v21, %v288_v22  ;;  %v4681_v36 = vld [vmem:[%s4572_s8 + $0x28] sm:$0xff] }
  0x29   : > { %1747 = vmatprep.subr.bf16.mxu0 %v4111_v37  ;;  %v4134_v37 = vld [vmem:[%s5728_s1 + $0x3c0] ss:$8 sps:$4 sm:$0xff]   ;;  %v1498_v38 = vor.u32 %v1497_v34, %v1494_v33  ;;  %v4691_v41 = vcombine.high %v4612_v51, %v4681_v36  ;;  %v4770_v34 = vcombine.low %v179_v11, %v1112_v24 }
  0x2b   : > { %526 = vmatpush1.bf16.msra.mxu1 %v4113_v44  ;;  %v1110_v44 = vld [vmem:[%s4572_s8 + $0x30] sm:$0xff]  ;;  %v1499_v55 = vsel %vm1482_vm1, %v1490_v32, %v1498_v38  ;;  %v314_v57 = vshll.u32 %v4691_v41, 16 }
  0x2c   : > { %1748 = vmatpush1.bf16.msra.mxu0 %v4114_v45  ;;  %527 = vmatprep.subr.bf16.mxu1 %v4115_v53  ;;  %v4696_v45 = vcombine.low %v4612_v51, %v4681_v36  ;;  %v4703_v50 = vcombine.high %v4681_v36, %v1110_v44  ;;  %v4706_v53 = vcombine.low %v4681_v36, %v1110_v44  ;;  %v4141_v51 = vld [vmem:[%s5728_s1 + $0x10] ss:$8 sps:$4 sm:$0xff]  }
  0x2d   : > { %1749 = vmatprep.subr.bf16.mxu0 %v4117_v54  ;;  %v312_v54 = vor.u32 %v310_v30, %v300_v0  ;;  %v316_v2 = vrot.slane %v314_v57, 1  ;;  %v4744_v21 = vcombine.low %v1110_v44, %v179_v11  ;;  %v4760_v30 = vcombine.high %v179_v11, %v1112_v24  ;;  %v4156_v32 = vld [vmem:[%s5728_s1 + $0x3f0] ss:$8 sps:$4 sm:$0xff]  }
  0x2e   : > { %v306_v59 = vshll.u32 %v4696_v45, 16  ;;  %v1527_v61 = vshrl.u32 %v4703_v50, 16  ;;  %v1530_v62 = vshll.u32 %v4703_v50, 16  ;;  %v1521_v0 = vshll.u32 %v4706_v53, 16 }
  0x2f   : > { %528 = vmatpush1.bf16.msra.mxu1 %v4119_v63  ;;  %v1518_v63 = vshrl.u32 %v4706_v53, 16  ;;  %v317_v10 = vsel %vm277_vm0, %v312_v54, %v316_v2  ;;  %v318_v13 = vshrl.u32 %v4696_v45, 16  ;;  %v1539_v54 = vshll.u32 %v4770_v34, 16 }
  0x30   : > { %1750 = vmatpush1.bf16.msra.mxu0 %v4120_v4  ;;  %529 = vmatprep.subr.bf16.mxu1 %v4121_v9  ;;  %v308_v4 = vrot.slane %v306_v59, 1  ;;  %v1529_v6 = vrot.slane %v1527_v61, 1  ;;  %v1532_v7 = vrot.slane %v1530_v62, 2  ;;  %v1523_v9 = vrot.slane %v1521_v0, 2  ;;  %v4160_v62 = vld [vmem:[%s5728_s1 + $0x40] ss:$8 sps:$4 sm:$0xff]  }
  0x31   : > { %1751 = vmatprep.subr.bf16.mxu0 %v4123_v12  ;;  %v1520_v8 = vrot.slane %v1518_v63, 1  ;;  %v326_v12 = vshrl.u32 %v4691_v41, 16 }
  0x32   : > { %v309_v22 = vsel %vm277_vm0, %v304_v3, %v308_v4  ;;  %v320_v33 = vor.u32 %v318_v13, %v308_v4  ;;  %v4798_v3 = vld [vmem:[%s4572_s8 + $0x50] sm:$0xff]  ;;  %v4164_v4 = vld [vmem:[%s5728_s1 + $0x400] ss:$8 sps:$4 sm:$0xff]   ;;  %v334_v13 = vshrl.u32 %v4744_v21, 16 }
  0x33   : > { %530 = vmatpush1.bf16.msra.mxu1 %v4125_v16  ;;  %v4738_v16 = vor.u32 %v1532_v7, %v1529_v6  ;;  %v4740_v19 = vor.u32 %v1523_v9, %v1520_v8  ;;  %v328_v23 = vor.u32 %v326_v12, %v316_v2  ;;  %v4171_v9 = vld [vmem:[%s5728_s1 + $0x54] ss:$8 sps:$4 sm:$0xff]  }
  0x34   : > { %1752 = vmatpush1.bf16.msra.mxu0 %v4126_v20  ;;  %725 = vmatprep.subr.bf16.mxu1 %v4131_v28  ;;  %v4742_v20 = vcombine.high %v1110_v44, %v179_v11  ;;  %v4162_v44 = vld [vmem:[%s5728_s1 + $0x44] ss:$8 sps:$4 sm:$0xff]  }
  0x35   : > { %2026 = vmatprep.subr.bf16.mxu0 %v4136_v29  ;;  %v1534_v27 = vsel %vm1482_vm1, %v4655_v17, %v4738_v16  ;;  %v1525_v28 = vsel %vm1482_vm1, %v1498_v38, %v4740_v19  ;;  %v322_v17 = vshll.u32 %v4744_v21, 16  ;;  %v1548_v38 = vshll.u32 %v4760_v30, 16 }
  0x36   : > { %540 = vmatmul.mubr.bf16.vlgmr.msra.gmra.mrb[0].mxu1 %v289_v35  ;;  %v330_v29 = vshll.u32 %v4742_v20, 16  ;;  %v342_v61 = vshrl.u32 %v4742_v20, 16 }
  0x37   : > { %1762 = vmatmul.mubr.bf16.vlgmr.msra.gmra.mrb[0].mxu0 %v1499_v55  ;;  %726 = vmatpush1.bf16.msra.mxu1 %v4129_v31  ;;  %v4153_v31 = vld [vmem:[%s5728_s1 + $0x30] ss:$8 sps:$4 sm:$0xff]   ;;  %v324_v47 = vrot.slane %v322_v17, 1 }
  0x38   : > { %2027 = vmatpush1.bf16.msra.mxu0 %v4134_v37  ;;  %727 = vmatprep.subr.bf16.mxu1 %v4143_v39  ;;  %v332_v35 = vrot.slane %v330_v29, 1  ;;  %v1545_v37 = vshrl.u32 %v4760_v30, 16  ;;  %v181_v39 = vld [vmem:[%s4572_s8 + $0x48] sm:$0xff] }
  0x39   : > { %2028 = vmatprep.subr.bf16.mxu0 %v4146_v49  ;;  %3401 = vmatprep.mubr.msk.bf16.mxu1 %vm491_vm2, %v317_v10  ;;  %v1536_v49 = vshrl.u32 %v4770_v34, 16  ;;  %v4784_v55 = vcombine.high %v1112_v24, %v181_v39  ;;  %v325_v63 = vsel %vm277_vm0, %v320_v33, %v324_v47  ;;  %v4806_v7 = vcombine.high %v181_v39, %v4798_v3  ;;  %v4174_v10 = vld [vmem:[%s5728_s1 + $0x414] ss:$8 sps:$4 sm:$0xff]  }
  0x3a   : > { %3605 = vmatprep.mubr.msk.bf16.mxu0 %vm491_vm2, %v1534_v27  ;;  %v333_v57 = vsel %vm277_vm0, %v328_v23, %v332_v35  ;;  %v1547_v59 = vrot.slane %v1545_v37, 1  ;;  %v344_v6 = vor.u32 %v342_v61, %v332_v35  ;;  %v4808_v8 = vcombine.low %v1112_v24, %v181_v39 }
  0x3b   : > { %728 = vmatpush1.bf16.msra.mxu1 %v4141_v51  ;;  %v4166_v51 = vld [vmem:[%s5728_s1 + $0x404] ss:$8 sps:$4 sm:$0xff]   ;;  %v1538_v0 = vrot.slane %v1536_v49, 1  ;;  %v346_v2 = vshll.u32 %v4784_v55, 16  ;;  %v1566_v23 = vshll.u32 %v4806_v7, 16 }
  0x3c   : > { %2029 = vmatpush1.bf16.msra.mxu0 %v4144_v60  ;;  %729 = vmatprep.subr.bf16.mxu1 %v4149_v1  ;;  %v1550_v60 = vrot.slane %v1548_v38, 2  ;;  %v1541_v1 = vrot.slane %v1539_v54, 2  ;;  %v338_v24 = vshll.u32 %v4808_v8, 16  ;;  %v4182_v49 = vld [vmem:[%s5728_s1 + $0x424] ss:$8 sps:$4 sm:$0xff]  }
  0x3d   : > { %2030 = vmatprep.subr.bf16.mxu0 %v4152_v5  ;;  %v348_v12 = vrot.slane %v346_v2, 1  ;;  %v1568_v33 = vrot.slane %v1566_v23, 2 }
  0x3e   : > { %550 = vmatmul.mubr.bf16.gmra.mrb[4].mxu1 %v309_v22  ;;  %v1551_v5 = vor.u32 %v1550_v60, %v1547_v59  ;;  %v1542_v11 = vor.u32 %v1541_v1, %v1538_v0  ;;  %v1563_v22 = vshrl.u32 %v4806_v7, 16  ;;  %v340_v37 = vrot.slane %v338_v24, 1  ;;  %v1451_v59 = vld [vmem:[%s4572_s8 + $0x58] sm:$0x33] }
  0x3f   : > { %1772 = vmatmul.mubr.bf16.gmra.mrb[4].mxu0 %v1525_v28  ;;  %730 = vmatpush1.bf16.msra.mxu1 %v4147_v14  ;;  %v4820_v14 = vcombine.low %v181_v39, %v4798_v3  ;;  %v4178_v28 = vld [vmem:[%s5728_s1 + $0x64] ss:$8 sps:$4 sm:$0xff]   ;;  %v206_v39 = vld [vmem:[%s4572_s8 + $0x50] sm:$0x11] }
  0x40   : > { %2031 = vmatpush1.bf16.msra.mxu0 %v4150_v15  ;;  %731 = vmatprep.subr.bf16.mxu1 %v4155_v25  ;;  %v1552_v15 = vsel %vm1482_vm1, %v4738_v16, %v1551_v5  ;;  %v4169_v25 = vld [vmem:[%s5728_s1 + $0x50] ss:$8 sps:$4 sm:$0xff]   ;;  %v1543_v16 = vsel %vm1482_vm1, %v4740_v19, %v1542_v11  ;;  %v336_v19 = vor.u32 %v334_v13, %v324_v47 }
  0x41   : > { %2032 = vmatprep.subr.bf16.mxu0 %v4158_v26  ;;  %3402 = vmatprep.mubr.msk.bf16.mxu1 %vm491_vm2, %v333_v57  ;;  %v4172_v26 = vld [vmem:[%s5728_s1 + $0x410] ss:$8 sps:$4 sm:$0xff]   ;;  %v1554_v27 = vshrl.u32 %v4820_v14, 16  ;;  %v1557_v35 = vshll.u32 %v4820_v14, 16  ;;  %v4851_v57 = vcombine.high %v206_v39, %v206_v39  ;;  %v4857_v60 = vcombine.low %v206_v39, %v206_v39 }
  0x42   : > { %3606 = vmatprep.mubr.msk.bf16.mxu0 %vm491_vm2, %v1552_v15 }
  0x43   : > { %732 = vmatpush1.bf16.msra.mxu1 %v4153_v31  ;;  %v349_v31 = vsel %vm277_vm0, %v344_v6, %v348_v12  ;;  %v1556_v38 = vrot.slane %v1554_v27, 1  ;;  %v4867_v6 = vcombine.high %v1451_v59, %v1451_v59  ;;  %v354_v15 = vshll.u32 %v4857_v60, 16  ;;  %v4185_v27 = vld [vmem:[%s5728_s1 + $0x70] ss:$8 sps:$4 sm:$0xff]  }
  0x44   : > { %2033 = vmatpush1.bf16.msra.mxu0 %v4156_v32  ;;  %733 = vmatprep.subr.bf16.mxu1 %v4162_v44  ;;  %v1565_v32 = vrot.slane %v1563_v22, 1  ;;  %v358_v44 = vshrl.u32 %v4784_v55, 16  ;;  %v4875_v22 = vcombine.low %v1451_v59, %v1451_v59 }
  0x45   : > { %2034 = vmatprep.subr.bf16.mxu0 %v4166_v51  ;;  %v1559_v51 = vrot.slane %v1557_v35, 2 }
  0x46   : > { %560 = vmatmul.mubr.bf16.gmra.mrb[8].mxu1 %v325_v63  ;;  %v1569_v54 = vor.u32 %v1568_v33, %v1565_v32  ;;  %v360_v47 = vor.u32 %v358_v44, %v348_v12  ;;  %v4180_v63 = vld [vmem:[%s5728_s1 + $0x420] ss:$8 sps:$4 sm:$0xff]   ;;  %v350_v12 = vshrl.u32 %v4808_v8, 16  ;;  %v1575_v32 = vshll.u32 %v4875_v22, 16 }
  0x47   : > { %1782 = vmatmul.mubr.bf16.gmra.mrb[8].mxu0 %v1543_v16  ;;  %734 = vmatpush1.bf16.msra.mxu1 %v4160_v62  ;;  %v4176_v62 = vld [vmem:[%s5728_s1 + $0x60] ss:$8 sps:$4 sm:$0xff]   ;;  %v1560_v1 = vor.u32 %v1559_v51, %v1556_v38  ;;  %v1584_v16 = vshll.u32 %v4867_v6, 16  ;;  %v4198_v38 = vld [vmem:[%s5728_s1 + $0x444] ss:$8 sps:$4 sm:$0xff]  }
  0x48   : > { %2035 = vmatpush1.bf16.msra.mxu0 %v4164_v4  ;;  %735 = vmatprep.subr.bf16.mxu1 %v4171_v9  ;;  %v1570_v0 = vsel %vm1482_vm1, %v1551_v5, %v1569_v54  ;;  %v362_v4 = vshll.u32 %v4851_v57, 16  ;;  %v4187_v9 = vld [vmem:[%s5728_s1 + $0x74] ss:$8 sps:$4 sm:$0xff]   ;;  %v352_v39 = vor.u32 %v350_v12, %v340_v37  ;;  %v1577_v59 = vrot.slane %v1575_v32, 2  ;;  %v4212_v32 = vld [vmem:[%s5728_s1 + $0x460] ss:$8 sps:$4 sm:$0xff]  }
  0x49   : > { %2036 = vmatprep.subr.bf16.mxu0 %v4174_v10  ;;  %3403 = vmatprep.mubr.msk.bf16.mxu1 %vm491_vm2, %v349_v31  ;;  %v341_v10 = vsel %vm277_vm0, %v336_v19, %v340_v37  ;;  %v4190_v5 = vld [vmem:[%s5728_s1 + $0x434] ss:$8 sps:$4 sm:$0xff]   ;;  %v1561_v23 = vsel %vm1482_vm1, %v1542_v11, %v1560_v1  ;;  %v1572_v31 = vshrl.u32 %v4875_v22, 16  ;;  %v4194_v11 = vld [vmem:[%s5728_s1 + $0x84] ss:$8 sps:$4 sm:$0xff]   ;;  %v1586_v19 = vrot.slane %v1584_v16, 2 }
  0x4a   : > { %3607 = vmatprep.mubr.msk.bf16.mxu0 %vm491_vm2, %v1570_v0  ;;  %v4196_v37 = vld [vmem:[%s5728_s1 + $0x440] ss:$8 sps:$4 sm:$0xff]   ;;  %v4204_v16 = vld [vmem:[%s5728_s1 + $0x450] ss:$8 sps:$4 sm:$0xff]  }
  0x4b   : > { %736 = vmatpush1.bf16.msra.mxu1 %v4169_v25  ;;  %v364_v25 = vrot.slane %v362_v4, 1  ;;  %v1574_v51 = vrot.slane %v1572_v31, 1  ;;  %v1832_v4 = vld [vmem:[%s4572_s8 + $0x8] sm:$0xcc] }
  0x4c   : > { %2037 = vmatpush1.bf16.msra.mxu0 %v4172_v26  ;;  %737 = vmatprep.subr.bf16.mxu1 %v4178_v28  ;;  %v1581_v26 = vshrl.u32 %v4867_v6, 16  ;;  %v4188_v28 = vld [vmem:[%s5728_s1 + $0x430] ss:$8 sps:$4 sm:$0xff]   ;;  %v4208_v31 = vld [vmem:[%s5728_s1 + $0xa0] ss:$8 sps:$4 sm:$0xff]  }
  0x4d   : > { %2038 = vmatprep.subr.bf16.mxu0 %v4182_v49  ;;  %v365_v33 = vsel %vm277_vm0, %v360_v47, %v364_v25  ;;  %v356_v49 = vrot.slane %v354_v15, 1  ;;  %v1578_v47 = vor.u32 %v1577_v59, %v1574_v51  ;;  %v4203_v15 = vld [vmem:[%s5728_s1 + $0x94] ss:$8 sps:$4 sm:$0xff]   ;;  %v1186_v51 = vrot.slane %v4629_v58, 1 }
  0x4e   : > { %570 = vmatmul.mubr.bf16.gmra.mrb[12].mxu1 %v341_v10  ;;  %v1583_v35 = vrot.slane %v1581_v26, 1  ;;  %v4201_v26 = vld [vmem:[%s5728_s1 + $0x90] ss:$8 sps:$4 sm:$0xff]   ;;  %v1187_v58 = vrot.slane %v4658_v18, 1 }
  0x4f   : > { %1792 = vmatmul.mubr.bf16.gmra.mrb[12].mxu0 %v1561_v23  ;;  %738 = vmatpush1.bf16.msra.mxu1 %v4176_v62  ;;  %v3634_v62 = vcombine.high %v1832_v4, %v4589_v40  ;;  %v1579_v23 = vsel %vm1482_vm1, %v1560_v1, %v1578_v47  ;;  %v4230_v47 = vld [vmem:[%s5728_s1 + $0x484] ss:$8 sps:$4 sm:$0xff]  }
  0x50   : > { %2039 = vmatpush1.bf16.msra.mxu0 %v4180_v63  ;;  %739 = vmatprep.subr.bf16.mxu1 %v4187_v9  ;;  %v1587_v0 = vor.u32 %v1586_v19, %v1583_v35  ;;  %v4192_v63 = vld [vmem:[%s5728_s1 + $0x80] ss:$8 sps:$4 sm:$0xff]   ;;  %v1868_v9 = vrot.slane %v4625_v56, 2  ;;  %v860_v35 = vrot.slane %v4851_v57, 1  ;;  %v4222_v19 = vld [vmem:[%s5728_s1 + $0x474] ss:$8 sps:$4 sm:$0xff]  }
  0x51   : > { %2040 = vmatprep.subr.bf16.mxu0 %v4190_v5  ;;  %3404 = vmatprep.mubr.msk.bf16.mxu1 %vm491_vm2, %v365_v33  ;;  %v357_v5 = vsel %vm277_vm0, %v352_v39, %v356_v49  ;;  %v1867_v25 = vrot.slane %v3634_v62, 2  ;;  %v3633_v33 = vcombine.low %v1832_v4, %v4589_v40  ;;  %v1190_v40 = vrot.slane %v4625_v56, 1  ;;  %v4217_v57 = vld [vmem:[%s5728_s1 + $0xb0] ss:$8 sps:$4 sm:$0xff]  }
  0x52   : > { %v1588_v10 = vsel %vm1482_vm1, %v1569_v54, %v1587_v0  ;;  %v4206_v54 = vld [vmem:[%s5728_s1 + $0x454] ss:$8 sps:$4 sm:$0xff]   ;;  %v4220_v49 = vld [vmem:[%s5728_s1 + $0x470] ss:$8 sps:$4 sm:$0xff]   ;;  %v1865_v0 = vrot.slane %v4658_v18, 2  ;;  %v1194_v62 = vrot.slane %v4703_v50, 1 }
  0x53   : > { %740 = vmatpush1.bf16.msra.mxu1 %v4185_v27  ;;  %3608 = vmatprep.mubr.msk.bf16.mxu0 %vm491_vm2, %v1588_v10  ;;  %v1869_v1 = vsel %vm1863_vm3, %v1867_v25, %v1868_v9  ;;  %v4210_v27 = vld [vmem:[%s5728_s1 + $0xa4] ss:$8 sps:$4 sm:$0xff]   ;;  %v1864_v59 = vrot.slane %v3633_v33, 2  ;;  %v1872_v10 = vrot.slane %v4703_v50, 2  ;;  %v1192_v25 = vrot.slane %v4706_v53, 1 }
  0x54   : > { %2041 = vmatpush1.bf16.msra.mxu0 %v4188_v28  ;;  %741 = vmatprep.subr.bf16.mxu1 %v4194_v11  ;;  %v4214_v28 = vld [vmem:[%s5728_s1 + $0x464] ss:$8 sps:$4 sm:$0xff]   ;;  %v4219_v11 = vld [vmem:[%s5728_s1 + $0xb4] ss:$8 sps:$4 sm:$0xff]  }
  0x55   : > { %2042 = vmatprep.subr.bf16.mxu0 %v4198_v38  ;;  %v1189_v38 = vrot.slane %v4615_v52, 1  ;;  %v4225_v52 = vld [vmem:[%s5728_s1 + $0x184] ss:$8 sps:$4 sm:$0xff]   ;;  %v1866_v18 = vsel %vm1863_vm3, %v1864_v59, %v1865_v0  ;;  %v4236_v50 = vld [vmem:[%s5728_s1 + $0x494] ss:$8 sps:$4 sm:$0xff]   ;;  %v1200_v59 = vrot.slane %v4820_v14, 1 }
  0x56   : > { %580 = vmatmul.mubr.bf16.gmra.mrb[16].mxu1 %v357_v5  ;;  %v4991_v5 = vsel %vm839_vm4, %v1190_v40, %v1194_v62  ;;  %v4245_v33 = vld [vmem:[%s5728_s1 + $0x1b4] ss:$8 sps:$4 sm:$0xff]  }
  0x57   : > { %1802 = vmatmul.mubr.bf16.gmra.mrb[16].mxu0 %v1579_v23  ;;  %742 = vmatpush1.bf16.msra.mxu1 %v4192_v63  ;;  %v4973_v4 = vsel %vm839_vm4, %v1189_v38, %v1190_v40  ;;  %v4223_v63 = vld [vmem:[%s5728_s1 + $0x180] ss:$8 sps:$4 sm:$0xff]   ;;  %v4233_v23 = vld [vmem:[%s5728_s1 + $0x194] ss:$8 sps:$4 sm:$0xff]   ;;  %v1202_v40 = vrot.slane %v4806_v7, 1 }
  0x58   : > { %2043 = vmatpush1.bf16.msra.mxu0 %v4196_v37  ;;  %743 = vmatprep.subr.bf16.mxu1 %v4203_v15  ;;  %v4228_v37 = vld [vmem:[%s5728_s1 + $0x480] ss:$8 sps:$4 sm:$0xff]   ;;  %v4988_v15 = vsel %vm839_vm4, %v1186_v51, %v1187_v58  ;;  %v4248_v38 = vld [vmem:[%s5728_s1 + $0x4b4] ss:$8 sps:$4 sm:$0xff]   ;;  %v4246_v51 = vld [vmem:[%s5728_s1 + $0x4b0] ss:$8 sps:$4 sm:$0xff]  }
  0x59   : > { %2044 = vmatprep.subr.bf16.mxu0 %v4206_v54  ;;  %3429 = vmatprep.mubr.msk.bf16.mxu1 %vm491_vm2, %v4592_v42  ;;  %v856_v42 = vrot.slane %v4784_v55, 1  ;;  %v5002_v54 = vsel %vm839_vm4, %v1187_v58, %v1192_v25  ;;  %v4249_v58 = vld [vmem:[%s5728_s1 + $0x1c0] ss:$8 sps:$4 sm:$0xff]  }
  0x5a   : > { %3659 = vmatprep.mubr.msk.bf16.mxu0 %vm491_vm2, %v1869_v1  ;;  %v1873_v1 = vsel %vm1863_vm3, %v1868_v9, %v1872_v10  ;;  %v1196_v9 = vrot.slane %v4770_v34, 1 }
  0x5b   : > { %744 = vmatpush1.bf16.msra.mxu1 %v4201_v26  ;;  %v4958_v39 = vsel %vm839_vm4, %v856_v42, %v860_v35  ;;  %v4231_v26 = vld [vmem:[%s5728_s1 + $0x190] ss:$8 sps:$4 sm:$0xff]  }
  0x5c   : > { %2045 = vmatpush1.bf16.msra.mxu0 %v4204_v16  ;;  %745 = vmatprep.subr.bf16.mxu1 %v4210_v27  ;;  %v4234_v16 = vld [vmem:[%s5728_s1 + $0x490] ss:$8 sps:$4 sm:$0xff]   ;;  %v4239_v27 = vld [vmem:[%s5728_s1 + $0x1a4] ss:$8 sps:$4 sm:$0xff]  }
  0x5d   : > { %2046 = vmatprep.subr.bf16.mxu0 %v4214_v28  ;;  %v1198_v28 = vrot.slane %v4760_v30, 1 }
  0x5f   : > { %746 = vmatpush1.bf16.msra.mxu1 %v4208_v31  ;;  %v4242_v31 = vld [vmem:[%s5728_s1 + $0x4a4] ss:$8 sps:$4 sm:$0xff]   ;;  %v5026_v56 = vsel %vm839_vm4, %v1194_v62, %v1198_v28  ;;  %v1880_v62 = vrot.slane %v4806_v7, 2 }
  0x60   : > { %2047 = vmatpush1.bf16.msra.mxu0 %v4212_v32  ;;  %747 = vmatprep.subr.bf16.mxu1 %v4219_v11  ;;  %v4240_v32 = vld [vmem:[%s5728_s1 + $0x4a0] ss:$8 sps:$4 sm:$0xff]   ;;  %v1876_v11 = vrot.slane %v4760_v30, 2  ;;  %v4243_v30 = vld [vmem:[%s5728_s1 + $0x1b0] ss:$8 sps:$4 sm:$0xff]  }
  0x61   : > { %2048 = vmatprep.subr.bf16.mxu0 %v4222_v19  ;;  %v5041_v19 = vsel %vm839_vm4, %v1192_v25, %v1196_v9 }
  0x62   : > { %v1881_v25 = vsel %vm1863_vm3, %v1876_v11, %v1880_v62 }
  0x63   : > { %748 = vmatpush1.bf16.msra.mxu1 %v4217_v57  ;;  %v1877_v57 = vsel %vm1863_vm3, %v1872_v10, %v1876_v11  ;;  %v4257_v10 = vld [vmem:[%s5728_s1 + $0x1d4] ss:$8 sps:$4 sm:$0xff]   ;;  %v2131_v11 = vld [vmem:[%s4572_s8 + $0x20] sm:$0xff] }
  0x64   : > { %2049 = vmatpush1.bf16.msra.mxu0 %v4220_v49  ;;  %1002 = vmatprep.subr.bf16.mxu1 %v4225_v52  ;;  %v5055_v49 = vsel %vm839_vm4, %v1198_v28, %v1202_v40  ;;  %v1874_v52 = vrot.slane %v4770_v34, 2  ;;  %v5074_v34 = vsel %vm839_vm4, %v1196_v9, %v1200_v59  ;;  %v1884_v28 = vrot.slane %v4867_v6, 2  ;;  %v2129_v9 = vld [vmem:[%s4572_s8 + $0x10] sm:$0xcc] }
  0x65   : > { %2372 = vmatprep.subr.bf16.mxu0 %v4230_v47  ;;  %v4254_v47 = vld [vmem:[%s5728_s1 + $0x4c4] ss:$8 sps:$4 sm:$0xff]   ;;  %v4272_v6 = vld [vmem:[%s5728_s1 + $0x4f4] ss:$8 sps:$4 sm:$0xff]  }
  0x66   : > { %758 = vmatmul.mubr.bf16.vlgmr.msra.gmra.mrb[0].mxu1 %v4594_v43  ;;  %v1870_v43 = vrot.slane %v4706_v53, 2  ;;  %v4237_v53 = vld [vmem:[%s5728_s1 + $0x1a0] ss:$8 sps:$4 sm:$0xff]  }
  0x67   : > { %2059 = vmatmul.mubr.bf16.vlgmr.msra.gmra.mrb[0].mxu0 %v1866_v18  ;;  %1003 = vmatpush1.bf16.msra.mxu1 %v4223_v63  ;;  %v4252_v63 = vld [vmem:[%s5728_s1 + $0x4c0] ss:$8 sps:$4 sm:$0xff]   ;;  %v4260_v18 = vld [vmem:[%s5728_s1 + $0x4d4] ss:$8 sps:$4 sm:$0xff]  }
  0x68   : > { %2373 = vmatpush1.bf16.msra.mxu0 %v4228_v37  ;;  %1004 = vmatprep.subr.bf16.mxu1 %v4233_v23  ;;  %v1871_v35 = vsel %vm1863_vm3, %v1865_v0, %v1870_v43  ;;  %v4251_v0 = vld [vmem:[%s5728_s1 + $0x1c4] ss:$8 sps:$4 sm:$0xff]   ;;  %v1875_v37 = vsel %vm1863_vm3, %v1870_v43, %v1874_v52  ;;  %v4255_v23 = vld [vmem:[%s5728_s1 + $0x1d0] ss:$8 sps:$4 sm:$0xff]   ;;  %v4264_v43 = vld [vmem:[%s5728_s1 + $0x4e0] ss:$8 sps:$4 sm:$0xff]  }
  0x69   : > { %2374 = vmatprep.subr.bf16.mxu0 %v4236_v50  ;;  %3430 = vmatprep.mubr.msk.bf16.mxu1 %vm491_vm2, %v4603_v46  ;;  %v4258_v50 = vld [vmem:[%s5728_s1 + $0x4d0] ss:$8 sps:$4 sm:$0xff]  }
  0x6a   : > { %3660 = vmatprep.mubr.msk.bf16.mxu0 %vm491_vm2, %v1873_v1  ;;  %v4266_v1 = vld [vmem:[%s5728_s1 + $0x4e4] ss:$8 sps:$4 sm:$0xff]  }
  0x6b   : > { %1005 = vmatpush1.bf16.msra.mxu1 %v4231_v26  ;;  %v1878_v26 = vrot.slane %v4820_v14, 2  ;;  %v4410_v14 = vld [vmem:[%s5728_s1 + $0x690] ss:$8 sps:$4 sm:$0xff]  }
  0x6c   : > { %2375 = vmatpush1.bf16.msra.mxu0 %v4234_v16  ;;  %1006 = vmatprep.subr.bf16.mxu1 %v4239_v27  ;;  %v4263_v16 = vld [vmem:[%s5728_s1 + $0x1e4] ss:$8 sps:$4 sm:$0xff]   ;;  %v4261_v27 = vld [vmem:[%s5728_s1 + $0x1e0] ss:$8 sps:$4 sm:$0xff]  }
  0x6d   : > { %2376 = vmatprep.subr.bf16.mxu0 %v4242_v31  ;;  %v5116_v31 = vld [vmem:[%s4572_s8] sm:$0xee] }
  0x6e   : > { %768 = vmatmul.mubr.bf16.gmra.mrb[4].mxu1 %v4607_v48 }
  0x6f   : > { %2069 = vmatmul.mubr.bf16.gmra.mrb[4].mxu0 %v1871_v35  ;;  %1007 = vmatpush1.bf16.msra.mxu1 %v4237_v53  ;;  %v5120_v53 = vld [vmem:[%s4572_s8 + $0x18] sm:$0xff]  ;;  %v1885_v35 = vsel %vm1863_vm3, %v1880_v62, %v1884_v28  ;;  %v4278_v62 = vld [vmem:[%s5728_s1 + $0x504] ss:$8 sps:$4 sm:$0xff]  }
  0x70   : > { %2377 = vmatpush1.bf16.msra.mxu0 %v4240_v32  ;;  %1008 = vmatprep.subr.bf16.mxu1 %v4245_v33  ;;  %v1879_v32 = vsel %vm1863_vm3, %v1874_v52, %v1878_v26  ;;  %v4269_v33 = vld [vmem:[%s5728_s1 + $0x1f4] ss:$8 sps:$4 sm:$0xff]   ;;  %v5141_v52 = vcombine.high %v2131_v11, %v4681_v36  ;;  %v4273_v36 = vld [vmem:[%s5728_s1 + $0x200] ss:$8 sps:$4 sm:$0xff]   ;;  %v4290_v28 = vld [vmem:[%s5728_s1 + $0x524] ss:$8 sps:$4 sm:$0xff]  }
  0x71   : > { %2378 = vmatprep.subr.bf16.mxu0 %v4248_v38  ;;  %3431 = vmatprep.mubr.msk.bf16.mxu1 %vm491_vm2, %v4691_v41  ;;  %v4267_v38 = vld [vmem:[%s5728_s1 + $0x1f0] ss:$8 sps:$4 sm:$0xff]  }
  0x72   : > { %3661 = vmatprep.mubr.msk.bf16.mxu0 %vm491_vm2, %v1877_v57 }
  0x73   : > { %1009 = vmatpush1.bf16.msra.mxu1 %v4243_v30  ;;  %v4421_v30 = vld [vmem:[%s4572_s8 + $0x8] sm:$0xff] }
  0x74   : > { %2379 = vmatpush1.bf16.msra.mxu0 %v4246_v51  ;;  %1010 = vmatprep.subr.bf16.mxu1 %v4251_v0  ;;  %v3459_v57 = vcombine.high %v5116_v31, %v4421_v30  ;;  %v5138_v51 = vcombine.high %v2129_v9, %v5120_v53  ;;  %v4270_v0 = vld [vmem:[%s5728_s1 + $0x4f0] ss:$8 sps:$4 sm:$0xff]  }
  0x75   : > { %2380 = vmatprep.subr.bf16.mxu0 %v4254_v47  ;;  %v1882_v47 = vrot.slane %v4875_v22, 2 }
  0x76   : > { %778 = vmatmul.mubr.bf16.gmra.mrb[8].mxu1 %v4696_v45  ;;  %v843_v22 = vrot.slane %v3459_v57, 1  ;;  %v4422_v57 = vld [vmem:[%s4572_s8 + $0x28] sm:$0xff] }
  0x77   : > { %2079 = vmatmul.mubr.bf16.gmra.mrb[8].mxu0 %v1875_v37  ;;  %1011 = vmatpush1.bf16.msra.mxu1 %v4249_v58  ;;  %v4275_v58 = vld [vmem:[%s5728_s1 + $0x204] ss:$8 sps:$4 sm:$0xff]   ;;  %v2213_v37 = vrot.slane %v5138_v51, 2 }
  0x78   : > { %2381 = vmatpush1.bf16.msra.mxu0 %v4252_v63  ;;  %1012 = vmatprep.subr.bf16.mxu1 %v4257_v10  ;;  %v844_v63 = vrot.slane %v4603_v46, 1  ;;  %v2214_v10 = vrot.slane %v5141_v52, 2  ;;  %v4320_v46 = vld [vmem:[%s5728_s1 + $0x564] ss:$8 sps:$4 sm:$0xff]  }
  0x79   : > { %2382 = vmatprep.subr.bf16.mxu0 %v4260_v18  ;;  %3432 = vmatprep.mubr.msk.bf16.mxu1 %vm491_vm2, %v4742_v20  ;;  %v4276_v18 = vld [vmem:[%s5728_s1 + $0x500] ss:$8 sps:$4 sm:$0xff]  }
  0x7a   : > { %3662 = vmatprep.mubr.msk.bf16.mxu0 %vm491_vm2, %v1881_v25  ;;  %v4281_v25 = vld [vmem:[%s5728_s1 + $0x214] ss:$8 sps:$4 sm:$0xff]  }
  0x7b   : > { %1013 = vmatpush1.bf16.msra.mxu1 %v4255_v23  ;;  %v1883_v23 = vsel %vm1863_vm3, %v1878_v26, %v1882_v47  ;;  %v2215_v26 = vsel %vm1863_vm3, %v2213_v37, %v2214_v10  ;;  %v5210_v47 = vld [vmem:[%s4572_s8 + $0x58] sm:$0xff] }
  0x7c   : > { %2383 = vmatpush1.bf16.msra.mxu0 %v4258_v50  ;;  %1014 = vmatprep.subr.bf16.mxu1 %v4263_v16  ;;  %v4284_v50 = vld [vmem:[%s5728_s1 + $0x514] ss:$8 sps:$4 sm:$0xff]   ;;  %v845_v16 = vsel %vm839_vm4, %v843_v22, %v844_v63 }
  0x7d   : > { %2384 = vmatprep.subr.bf16.mxu0 %v4266_v1  ;;  %v4279_v1 = vld [vmem:[%s5728_s1 + $0x210] ss:$8 sps:$4 sm:$0xff]  }
  0x7e   : > { %788 = vmatmul.mubr.bf16.gmra.mrb[12].mxu1 %v4744_v21 }
  0x7f   : > { %2089 = vmatmul.mubr.bf16.gmra.mrb[12].mxu0 %v1879_v32  ;;  %1015 = vmatpush1.bf16.msra.mxu1 %v4261_v27  ;;  %v4282_v27 = vld [vmem:[%s5728_s1 + $0x510] ss:$8 sps:$4 sm:$0xff]   ;;  %v4285_v32 = vld [vmem:[%s5728_s1 + $0x220] ss:$8 sps:$4 sm:$0xff]  }
  0x80   : > { %2385 = vmatpush1.bf16.msra.mxu0 %v4264_v43  ;;  %1016 = vmatprep.subr.bf16.mxu1 %v4269_v33  ;;  %v4287_v43 = vld [vmem:[%s5728_s1 + $0x224] ss:$8 sps:$4 sm:$0xff]   ;;  %v4288_v33 = vld [vmem:[%s5728_s1 + $0x520] ss:$8 sps:$4 sm:$0xff]  }
  0x81   : > { %2386 = vmatprep.subr.bf16.mxu0 %v4272_v6  ;;  %3433 = vmatprep.mubr.msk.bf16.mxu1 %vm491_vm2, %v4784_v55  ;;  %v4293_v6 = vld [vmem:[%s5728_s1 + $0x234] ss:$8 sps:$4 sm:$0xff]  }
  0x82   : > { %3663 = vmatprep.mubr.msk.bf16.mxu0 %vm491_vm2, %v1885_v35  ;;  %v3458_v35 = vcombine.low %v5116_v31, %v4421_v30  ;;  %v4294_v31 = vld [vmem:[%s5728_s1 + $0x530] ss:$8 sps:$4 sm:$0xff]   ;;  %v5227_v30 = vcombine.high %v4798_v3, %v5210_v47  ;;  %v848_v3 = vrot.slane %v4691_v41, 1 }
  0x83   : > { %1017 = vmatpush1.bf16.msra.mxu1 %v4267_v38  ;;  %v5204_v38 = vcombine.low %v2129_v9, %v5120_v53  ;;  %v4301_v9 = vld [vmem:[%s5728_s1 + $0x244] ss:$8 sps:$4 sm:$0xff]  }
  0x84   : > { %2387 = vmatpush1.bf16.msra.mxu0 %v4270_v0  ;;  %1018 = vmatprep.subr.bf16.mxu1 %v4275_v58  ;;  %v5207_v0 = vcombine.low %v2131_v11, %v4422_v57  ;;  %v4296_v58 = vld [vmem:[%s5728_s1 + $0x534] ss:$8 sps:$4 sm:$0xff]   ;;  %v841_v11 = vrot.slane %v4607_v48, 1  ;;  %v840_v22 = vrot.slane %v3458_v35, 1  ;;  %v4308_v48 = vld [vmem:[%s5728_s1 + $0x544] ss:$8 sps:$4 sm:$0xff]  }
  0x85   : > { %2388 = vmatprep.subr.bf16.mxu0 %v4278_v62  ;;  %v4291_v62 = vld [vmem:[%s5728_s1 + $0x230] ss:$8 sps:$4 sm:$0xff]   ;;  %v2210_v37 = vrot.slane %v5204_v38, 2  ;;  %v4317_v35 = vld [vmem:[%s5728_s1 + $0x264] ss:$8 sps:$4 sm:$0xff]   ;;  %v846_v57 = vrot.slane %v4696_v45, 1 }
  0x86   : > { %798 = vmatmul.mubr.bf16.gmra.mrb[16].mxu1 %v4808_v8  ;;  %v842_v41 = vsel %vm839_vm4, %v840_v22, %v841_v11  ;;  %v2222_v45 = vrot.slane %v4784_v55, 2  ;;  %v4323_v22 = vld [vmem:[%s5728_s1 + $0x274] ss:$8 sps:$4 sm:$0xff]  }
  0x87   : > { %2099 = vmatmul.mubr.bf16.gmra.mrb[16].mxu0 %v1883_v23  ;;  %1019 = vmatpush1.bf16.msra.mxu1 %v4273_v36  ;;  %v2900_v36 = vrot.slane %v4784_v55, 3  ;;  %v2904_v23 = vrot.slane %v5227_v30, 3 }
  0x88   : > { %2389 = vmatpush1.bf16.msra.mxu0 %v4276_v18  ;;  %1020 = vmatprep.subr.bf16.mxu1 %v4281_v25  ;;  %v2211_v18 = vrot.slane %v5207_v0, 2  ;;  %v4299_v25 = vld [vmem:[%s5728_s1 + $0x240] ss:$8 sps:$4 sm:$0xff]  }
  0x89   : > { %2390 = vmatprep.subr.bf16.mxu0 %v4284_v50  ;;  %3484 = vmatprep.mubr.msk.bf16.mxu1 %vm491_vm2, %v845_v16  ;;  %v4306_v50 = vld [vmem:[%s5728_s1 + $0x540] ss:$8 sps:$4 sm:$0xff]   ;;  %v2218_v16 = vrot.slane %v4742_v20, 2 }
  0x8a   : > { %3724 = vmatprep.mubr.msk.bf16.mxu0 %vm491_vm2, %v2215_v26  ;;  %v5249_v26 = vsel %vm2887_vm5, %v2900_v36, %v2904_v23 }
  0x8b   : > { %1021 = vmatpush1.bf16.msra.mxu1 %v4279_v1  ;;  %v2212_v1 = vsel %vm1863_vm3, %v2210_v37, %v2211_v18  ;;  %v4326_v37 = vld [vmem:[%s5728_s1 + $0x574] ss:$8 sps:$4 sm:$0xff]  }
  0x8c   : > { %2391 = vmatpush1.bf16.msra.mxu0 %v4282_v27  ;;  %1022 = vmatprep.subr.bf16.mxu1 %v4287_v43  ;;  %v4311_v27 = vld [vmem:[%s5728_s1 + $0x254] ss:$8 sps:$4 sm:$0xff]  }
  0x8d   : > { %2392 = vmatprep.subr.bf16.mxu0 %v4290_v28  ;;  %v4314_v43 = vld [vmem:[%s5728_s1 + $0x554] ss:$8 sps:$4 sm:$0xff]   ;;  %v4309_v28 = vld [vmem:[%s5728_s1 + $0x250] ss:$8 sps:$4 sm:$0xff]  }
  0x8f   : > { %1023 = vmatpush1.bf16.msra.mxu1 %v4285_v32  ;;  %v4312_v32 = vld [vmem:[%s5728_s1 + $0x550] ss:$8 sps:$4 sm:$0xff]  }
  0x90   : > { %2393 = vmatpush1.bf16.msra.mxu0 %v4288_v33  ;;  %1024 = vmatprep.subr.bf16.mxu1 %v4293_v6  ;;  %v849_v33 = vsel %vm839_vm4, %v844_v63, %v848_v3  ;;  %v2219_v6 = vsel %vm1863_vm3, %v2214_v10, %v2218_v16  ;;  %v4315_v63 = vld [vmem:[%s5728_s1 + $0x260] ss:$8 sps:$4 sm:$0xff]   ;;  %v852_v10 = vrot.slane %v4742_v20, 1 }
  0x91   : > { %2394 = vmatprep.subr.bf16.mxu0 %v4296_v58  ;;  %v2216_v58 = vrot.slane %v4744_v21, 2 }
  0x93   : > { %1025 = vmatpush1.bf16.msra.mxu1 %v4291_v62  ;;  %v4318_v62 = vld [vmem:[%s5728_s1 + $0x560] ss:$8 sps:$4 sm:$0xff]  }
  0x94   : > { %2395 = vmatpush1.bf16.msra.mxu0 %v4294_v31  ;;  %1348 = vmatprep.subr.bf16.mxu1 %v4301_v9  ;;  %v847_v31 = vsel %vm839_vm4, %v841_v11, %v846_v57  ;;  %v2217_v9 = vsel %vm1863_vm3, %v2211_v18, %v2216_v58  ;;  %v850_v11 = vrot.slane %v4744_v21, 1  ;;  %v2220_v18 = vrot.slane %v4808_v8, 2 }
  0x95   : > { %2753 = vmatprep.subr.bf16.mxu0 %v4308_v48  ;;  %v853_v48 = vsel %vm839_vm4, %v848_v3, %v852_v10  ;;  %v4329_v3 = vld [vmem:[%s5728_s1 + $0x284] ss:$8 sps:$4 sm:$0xff]  }
  0x96   : > { %1035 = vmatmul.mubr.bf16.vlgmr.msra.gmra.mrb[0].mxu1 %v842_v41  ;;  %v4324_v41 = vld [vmem:[%s5728_s1 + $0x570] ss:$8 sps:$4 sm:$0xff]  }
  0x97   : > { %2405 = vmatmul.mubr.bf16.vlgmr.msra.gmra.mrb[0].mxu0 %v2212_v1  ;;  %1349 = vmatpush1.bf16.msra.mxu1 %v4299_v25  ;;  %v2223_v25 = vsel %vm1863_vm3, %v2218_v16, %v2222_v45  ;;  %v4332_v16 = vld [vmem:[%s5728_s1 + $0x584] ss:$8 sps:$4 sm:$0xff]   ;;  %v4327_v1 = vld [vmem:[%s5728_s1 + $0x280] ss:$8 sps:$4 sm:$0xff]  }
  0x98   : > { %2754 = vmatpush1.bf16.msra.mxu0 %v4306_v50  ;;  %1350 = vmatprep.subr.bf16.mxu1 %v4311_v27  ;;  %v4321_v50 = vld [vmem:[%s5728_s1 + $0x270] ss:$8 sps:$4 sm:$0xff]   ;;  %v2226_v27 = vrot.slane %v5227_v30, 2 }
  0x99   : > { %2755 = vmatprep.subr.bf16.mxu0 %v4314_v43  ;;  %3485 = vmatprep.mubr.msk.bf16.mxu1 %vm491_vm2, %v849_v33  ;;  %v4330_v43 = vld [vmem:[%s5728_s1 + $0x580] ss:$8 sps:$4 sm:$0xff]   ;;  %v4423_v33 = vld [vmem:[%s4572_s8 + $0x50] sm:$0xff] }
  0x9a   : > { %3725 = vmatprep.mubr.msk.bf16.mxu0 %vm491_vm2, %v2219_v6  ;;  %v5326_v6 = vcombine.low %v4423_v33, %v5210_v47  ;;  %v2889_v47 = vrot.slane %v5207_v0, 3  ;;  %v2536_v33 = vshll.u32 %v5141_v52, 16 }
  0x9b   : > { %1351 = vmatpush1.bf16.msra.mxu1 %v4309_v28  ;;  %v851_v28 = vsel %vm839_vm4, %v846_v57, %v850_v11 }
  0x9c   : > { %2756 = vmatpush1.bf16.msra.mxu0 %v4312_v32  ;;  %1352 = vmatprep.subr.bf16.mxu1 %v4317_v35  ;;  %v2221_v32 = vsel %vm1863_vm3, %v2216_v58, %v2220_v18  ;;  %v2139_v35 = vld [vmem:[%s4572_s8 + $0x60] sm:$0x33] }
  0x9d   : > { %2757 = vmatprep.subr.bf16.mxu0 %v4320_v46  ;;  %v2856_v46 = vld [vmem:[%s4572_s8 + $0x10] sm:$0x88] }
  0x9e   : > { %1045 = vmatmul.mubr.bf16.gmra.mrb[4].mxu1 %v847_v31  ;;  %v3808_v57 = vcombine.low %v2856_v46, %v5120_v53  ;;  %v3809_v58 = vcombine.high %v2856_v46, %v5120_v53  ;;  %v2892_v31 = vrot.slane %v5141_v52, 3  ;;  %v4333_v53 = vld [vmem:[%s5728_s1 + $0x290] ss:$8 sps:$4 sm:$0xff]   ;;  %v4339_v46 = vld [vmem:[%s5728_s1 + $0x2a0] ss:$8 sps:$4 sm:$0xff]  }
  0x9f   : > { %2415 = vmatmul.mubr.bf16.gmra.mrb[4].mxu0 %v2217_v9  ;;  %1353 = vmatpush1.bf16.msra.mxu1 %v4315_v63  ;;  %v4335_v63 = vld [vmem:[%s5728_s1 + $0x294] ss:$8 sps:$4 sm:$0xff]   ;;  %v857_v9 = vsel %vm839_vm4, %v852_v10, %v856_v42  ;;  %v2224_v42 = vrot.slane %v5326_v6, 2  ;;  %v4341_v10 = vld [vmem:[%s5728_s1 + $0x2a4] ss:$8 sps:$4 sm:$0xff]  }
  0xa0   : > { %2758 = vmatpush1.bf16.msra.mxu0 %v4318_v62  ;;  %1354 = vmatprep.subr.bf16.mxu1 %v4323_v22  ;;  %v4338_v62 = vld [vmem:[%s5728_s1 + $0x594] ss:$8 sps:$4 sm:$0xff]   ;;  %v2227_v22 = vsel %vm1863_vm3, %v2222_v45, %v2226_v27  ;;  %v4344_v45 = vld [vmem:[%s5728_s1 + $0x5a4] ss:$8 sps:$4 sm:$0xff]  }
  0xa1   : > { %2759 = vmatprep.subr.bf16.mxu0 %v4326_v37  ;;  %3486 = vmatprep.mubr.msk.bf16.mxu1 %vm491_vm2, %v853_v48  ;;  %v3699_v37 = vcombine.high %v2139_v35, %v2139_v35  ;;  %v2891_v48 = vrot.slane %v3809_v58, 3  ;;  %v3698_v58 = vcombine.low %v2139_v35, %v2139_v35  ;;  %v4348_v35 = vld [vmem:[%s5728_s1 + $0x5b0] ss:$8 sps:$4 sm:$0xff]  }
  0xa2   : > { %3726 = vmatprep.mubr.msk.bf16.mxu0 %vm491_vm2, %v2223_v25  ;;  %v2888_v25 = vrot.slane %v3808_v57, 3  ;;  %v2225_v57 = vsel %vm1863_vm3, %v2220_v18, %v2224_v42  ;;  %v4345_v18 = vld [vmem:[%s5728_s1 + $0x2b0] ss:$8 sps:$4 sm:$0xff]  }
  0xa3   : > { %1355 = vmatpush1.bf16.msra.mxu1 %v4321_v50  ;;  %v4336_v50 = vld [vmem:[%s5728_s1 + $0x590] ss:$8 sps:$4 sm:$0xff]  }
  0xa4   : > { %2760 = vmatpush1.bf16.msra.mxu0 %v4324_v41  ;;  %1356 = vmatprep.subr.bf16.mxu1 %v4329_v3  ;;  %v854_v41 = vrot.slane %v4808_v8, 1  ;;  %v5361_v3 = vsel %vm2887_vm5, %v2891_v48, %v2892_v31 }
  0xa5   : > { %2761 = vmatprep.subr.bf16.mxu0 %v4332_v16  ;;  %v5366_v16 = vsel %vm2887_vm5, %v2888_v25, %v2889_v47  ;;  %v2538_v25 = vrot.slane %v2536_v33, 3  ;;  %v4364_v33 = vld [vmem:[%s5728_s1 + $0x5d4] ss:$8 sps:$4 sm:$0xff]  }
  0xa6   : > { %1055 = vmatmul.mubr.bf16.gmra.mrb[8].mxu1 %v851_v28  ;;  %v2528_v28 = vshll.u32 %v5138_v51, 16 }
  0xa7   : > { %2425 = vmatmul.mubr.bf16.gmra.mrb[8].mxu0 %v2221_v32  ;;  %1357 = vmatpush1.bf16.msra.mxu1 %v4327_v1  ;;  %v2525_v1 = vshrl.u32 %v5138_v51, 16  ;;  %v2533_v32 = vshrl.u32 %v5141_v52, 16  ;;  %v4347_v51 = vld [vmem:[%s5728_s1 + $0x2b4] ss:$8 sps:$4 sm:$0xff]  }
  0xa8   : > { %2762 = vmatpush1.bf16.msra.mxu0 %v4330_v43  ;;  %1358 = vmatprep.subr.bf16.mxu1 %v4335_v63  ;;  %v2230_v43 = vrot.slane %v3699_v37, 2  ;;  %v4342_v63 = vld [vmem:[%s5728_s1 + $0x5a0] ss:$8 sps:$4 sm:$0xff]   ;;  %v2530_v48 = vrot.slane %v2528_v28, 3 }
  0xa9   : > { %2763 = vmatprep.subr.bf16.mxu0 %v4338_v62  ;;  %3487 = vmatprep.mubr.msk.bf16.mxu1 %vm491_vm2, %v857_v9  ;;  %v855_v62 = vsel %vm839_vm4, %v850_v11, %v854_v41  ;;  %v4350_v9 = vld [vmem:[%s5728_s1 + $0x5b4] ss:$8 sps:$4 sm:$0xff]   ;;  %v2535_v11 = vrot.slane %v2533_v32, 2 }
  0xaa   : > { %3727 = vmatprep.mubr.msk.bf16.mxu0 %vm491_vm2, %v2227_v22  ;;  %v2527_v22 = vrot.slane %v2525_v1, 2  ;;  %v2231_v37 = vsel %vm1863_vm3, %v2226_v27, %v2230_v43  ;;  %v4354_v27 = vld [vmem:[%s5728_s1 + $0x2c4] ss:$8 sps:$4 sm:$0xff]   ;;  %v4356_v43 = vld [vmem:[%s5728_s1 + $0x5c0] ss:$8 sps:$4 sm:$0xff]  }
  0xab   : > { %1359 = vmatpush1.bf16.msra.mxu1 %v4333_v53  ;;  %v858_v53 = vrot.slane %v4857_v60, 1  ;;  %v5405_v1 = vor.u32 %v2538_v25, %v2535_v11  ;;  %v4352_v60 = vld [vmem:[%s5728_s1 + $0x2c0] ss:$8 sps:$4 sm:$0xff]  }
  0xac   : > { %2764 = vmatpush1.bf16.msra.mxu0 %v4336_v50  ;;  %1360 = vmatprep.subr.bf16.mxu1 %v4341_v10  ;;  %v2228_v50 = vrot.slane %v3698_v58, 2  ;;  %v4358_v10 = vld [vmem:[%s5728_s1 + $0x5c4] ss:$8 sps:$4 sm:$0xff]   ;;  %v2519_v58 = vshll.u32 %v5207_v0, 16 }
  0xad   : > { %2765 = vmatprep.subr.bf16.mxu0 %v4344_v45  ;;  %v2531_v45 = vor.u32 %v2530_v48, %v2527_v22  ;;  %v859_v28 = vsel %vm839_vm4, %v854_v41, %v858_v53  ;;  %v2508_v41 = vshrl.u32 %v5204_v38, 16  ;;  %v4370_v48 = vld [vmem:[%s5728_s1 + $0x5e0] ss:$8 sps:$4 sm:$0xff]   ;;  %v2556_v53 = vrot.slane %v330_v29, 3 }
  0xae   : > { %1065 = vmatmul.mubr.bf16.gmra.mrb[12].mxu1 %v855_v62  ;;  %v2229_v32 = vsel %vm1863_vm3, %v2224_v42, %v2228_v50  ;;  %v2511_v42 = vshll.u32 %v5204_v38, 16  ;;  %v4362_v62 = vld [vmem:[%s5728_s1 + $0x5d0] ss:$8 sps:$4 sm:$0xff]   ;;  %v4368_v38 = vld [vmem:[%s5728_s1 + $0x2e4] ss:$8 sps:$4 sm:$0xff]   ;;  %v2521_v25 = vrot.slane %v2519_v58, 3 }
  0xaf   : > { %2435 = vmatmul.mubr.bf16.gmra.mrb[12].mxu0 %v2225_v57  ;;  %1361 = vmatpush1.bf16.msra.mxu1 %v4339_v46  ;;  %v2540_v46 = vsel %vm2506_vm6, %v2531_v45, %v5405_v1  ;;  %v2516_v57 = vshrl.u32 %v5207_v0, 16  ;;  %v4373_v50 = vld [vmem:[%s5728_s1 + $0x2f0] ss:$8 sps:$4 sm:$0xff]   ;;  %v4390_v58 = vld [vmem:[%s5728_s1 + $0x634] ss:$8 sps:$4 sm:$0xff]  }
  0xb0   : > { %2766 = vmatpush1.bf16.msra.mxu0 %v4342_v63  ;;  %1362 = vmatprep.subr.bf16.mxu1 %v4347_v51  ;;  %v4359_v63 = vld [vmem:[%s5728_s1 + $0x2d0] ss:$8 sps:$4 sm:$0xff]   ;;  %v4372_v51 = vld [vmem:[%s5728_s1 + $0x5e4] ss:$8 sps:$4 sm:$0xff]   ;;  %v2513_v22 = vrot.slane %v2511_v42, 3 }
  0xb1   : > { %2767 = vmatprep.subr.bf16.mxu0 %v4350_v9  ;;  %3488 = vmatprep.mubr.msk.bf16.mxu1 %vm491_vm2, %v4958_v39  ;;  %v4361_v39 = vld [vmem:[%s5728_s1 + $0x2d4] ss:$8 sps:$4 sm:$0xff]   ;;  %v2510_v9 = vrot.slane %v2508_v41, 2  ;;  %v2518_v11 = vrot.slane %v2516_v57, 2  ;;  %v2475_v57 = vld [vmem:[%s4572_s8 + $0x60] sm:$0x77] }
  0xb2   : > { %3728 = vmatprep.mubr.msk.bf16.mxu0 %vm491_vm2, %v2231_v37  ;;  %v4366_v37 = vld [vmem:[%s5728_s1 + $0x2e0] ss:$8 sps:$4 sm:$0xff]  }
  0xb3   : > { %1363 = vmatpush1.bf16.msra.mxu1 %v4345_v18  ;;  %v4378_v18 = vld [vmem:[%s5728_s1 + $0x5f4] ss:$8 sps:$4 sm:$0xff]   ;;  %v2522_v45 = vor.u32 %v2521_v25, %v2518_v11 }
  0xb4   : > { %2768 = vmatpush1.bf16.msra.mxu0 %v4348_v35  ;;  %1364 = vmatprep.subr.bf16.mxu1 %v4354_v27  ;;  %v2553_v35 = vrot.slane %v342_v61, 2  ;;  %v4376_v27 = vld [vmem:[%s5728_s1 + $0x5f0] ss:$8 sps:$4 sm:$0xff]   ;;  %v4381_v61 = vld [vmem:[%s5728_s1 + $0x604] ss:$8 sps:$4 sm:$0xff]  }
  0xb5   : > { %2769 = vmatprep.subr.bf16.mxu0 %v4358_v10  ;;  %v2514_v10 = vor.u32 %v2513_v22, %v2510_v9  ;;  %v5510_v22 = vcombine.high %v2475_v57, %v2475_v57 }
  0xb6   : > { %1075 = vmatmul.mubr.bf16.gmra.mrb[16].mxu1 %v859_v28  ;;  %v2544_v28 = vrot.slane %v334_v13, 2  ;;  %v2574_v13 = vrot.slane %v346_v2, 3 }
  0xb7   : > { %2445 = vmatmul.mubr.bf16.gmra.mrb[16].mxu0 %v2229_v32  ;;  %1365 = vmatpush1.bf16.msra.mxu1 %v4352_v60  ;;  %v2557_v60 = vor.u32 %v2556_v53, %v2553_v35  ;;  %v2523_v29 = vsel %vm2506_vm6, %v2514_v10, %v2522_v45  ;;  %v2547_v32 = vrot.slane %v322_v17, 3  ;;  %v4382_v17 = vld [vmem:[%s5728_s1 + $0x610] ss:$8 sps:$4 sm:$0xff]   ;;  %v2605_v25 = vshrl.u32 %v5510_v22, 16  ;;  %v4391_v35 = vld [vmem:[%s5728_s1 + $0x640] ss:$8 sps:$4 sm:$0xff]  }
  0xb8   : > { %2770 = vmatpush1.bf16.msra.mxu0 %v4356_v43  ;;  %1366 = vmatprep.subr.bf16.mxu1 %v4361_v39  ;;  %v4379_v43 = vld [vmem:[%s5728_s1 + $0x600] ss:$8 sps:$4 sm:$0xff]   ;;  %v4384_v39 = vld [vmem:[%s5728_s1 + $0x614] ss:$8 sps:$4 sm:$0xff]   ;;  %v5530_v10 = vcombine.low %v2475_v57, %v2475_v57 }
  0xb9   : > { %2771 = vmatprep.subr.bf16.mxu0 %v4364_v33  ;;  %3549 = vmatprep.mubr.msk.bf16.mxu1 %vm491_vm2, %v4973_v4  ;;  %v4375_v4 = vld [vmem:[%s5728_s1 + $0x2f4] ss:$8 sps:$4 sm:$0xff]   ;;  %v2558_v33 = vsel %vm2506_vm6, %v5405_v1, %v2557_v60  ;;  %v2548_v41 = vor.u32 %v2547_v32, %v2544_v28  ;;  %v2590_v1 = vshll.u32 %v5227_v30, 16 }
  0xba   : > { %3779 = vmatprep.mubr.msk.bf16.mxu0 %vm491_vm2, %v2540_v46  ;;  %v2571_v46 = vrot.slane %v358_v44, 2  ;;  %v2587_v44 = vshrl.u32 %v5227_v30, 16  ;;  %v2596_v32 = vshrl.u32 %v5530_v10, 16  ;;  %v4412_v57 = vld [vmem:[%s5728_s1 + $0x694] ss:$8 sps:$4 sm:$0xff]  }
  0xbb   : > { %1367 = vmatpush1.bf16.msra.mxu1 %v4359_v63  ;;  %v2549_v42 = vsel %vm2506_vm6, %v2522_v45, %v2548_v41  ;;  %v4385_v63 = vld [vmem:[%s5728_s1 + $0x620] ss:$8 sps:$4 sm:$0xff]   ;;  %v2592_v9 = vrot.slane %v2590_v1, 3 }
  0xbc   : > { %2772 = vmatpush1.bf16.msra.mxu0 %v4362_v62  ;;  %1368 = vmatprep.subr.bf16.mxu1 %v4368_v38  ;;  %v2575_v2 = vor.u32 %v2574_v13, %v2571_v46  ;;  %v2562_v62 = vrot.slane %v350_v12, 2 }
  0xbd   : > { %2773 = vmatprep.subr.bf16.mxu0 %v4372_v51  ;;  %v2589_v51 = vrot.slane %v2587_v44, 2 }
  0xbe   : > { %v2576_v38 = vsel %vm2506_vm6, %v2557_v60, %v2575_v2  ;;  %v2607_v60 = vrot.slane %v2605_v25, 2 }
  0xbf   : > { %1369 = vmatpush1.bf16.msra.mxu1 %v4366_v37  ;;  %v2578_v37 = vshrl.u32 %v5326_v6, 16  ;;  %v2593_v11 = vor.u32 %v2592_v9, %v2589_v51  ;;  %v2902_v51 = vrot.slane %v5326_v6, 3  ;;  %v2896_v9 = vrot.slane %v4742_v20, 3 }
  0xc0   : > { %2774 = vmatpush1.bf16.msra.mxu0 %v4370_v48  ;;  %1370 = vmatprep.subr.bf16.mxu1 %v4375_v4  ;;  %v2581_v48 = vshll.u32 %v5326_v6, 16  ;;  %v2608_v4 = vshll.u32 %v5510_v22, 16  ;;  %v2894_v20 = vrot.slane %v4744_v21, 3  ;;  %v2906_v6 = vrot.slane %v5530_v10, 3 }
  0xc1   : > { %2775 = vmatprep.subr.bf16.mxu0 %v4378_v18  ;;  %v2580_v53 = vrot.slane %v2578_v37, 2  ;;  %v2594_v45 = vsel %vm2506_vm6, %v2575_v2, %v2593_v11  ;;  %v2897_v37 = vsel %vm2887_vm5, %v2892_v31, %v2896_v9  ;;  %v2901_v30 = vsel %vm2887_vm5, %v2896_v9, %v2900_v36 }
  0xc2   : > { %v2895_v52 = vsel %vm2887_vm5, %v2889_v47, %v2894_v20  ;;  %v2907_v31 = vsel %vm2887_vm5, %v2902_v51, %v2906_v6 }
  0xc3   : > { %1371 = vmatpush1.bf16.msra.mxu1 %v4373_v50  ;;  %v2583_v50 = vrot.slane %v2581_v48, 3 }
  0xc4   : > { %2776 = vmatpush1.bf16.msra.mxu0 %v4376_v27  ;;  %3861 = vmatprep.subr.bf16.mxu1 %v4381_v61  ;;  %v1115_v27 = vld [vmem:[%s4572_s8 + $0x58] sm:$0x11] }
  0xc5   : > { %3050 = vmatprep.subr.bf16.mxu0 %v4381_v61  ;;  %v3524_v61 = vcombine.high %v1115_v27, %v1115_v27  ;;  %v2584_v28 = vor.u32 %v2583_v50, %v2580_v53 }
  0xc6   : > { %1381 = vmatmul.mubr.bf16.vlgmr.msra.gmra.mrb[0].mxu1 %v4988_v15  ;;  %v4387_v15 = vld [vmem:[%s5728_s1 + $0x624] ss:$8 sps:$4 sm:$0xff]  }
  0xc7   : > { %2786 = vmatmul.mubr.bf16.vlgmr.msra.gmra.mrb[0].mxu0 %v2523_v29  ;;  %3873 = vmatpush1.bf16.msra.mxu1 %v4379_v43  ;;  %v2610_v29 = vrot.slane %v2608_v4, 3 }
  0xc8   : > { %3051 = vmatpush1.bf16.msra.mxu0 %v4379_v43  ;;  %3862 = vmatprep.subr.bf16.mxu1 %v4384_v39  ;;  %v4394_v43 = vld [vmem:[%s5728_s1 + $0x650] ss:$8 sps:$4 sm:$0xff]  }
  0xc9   : > { %3052 = vmatprep.subr.bf16.mxu0 %v4384_v39  ;;  %3550 = vmatprep.mubr.msk.bf16.mxu1 %vm491_vm2, %v4991_v5  ;;  %v2565_v5 = vrot.slane %v338_v24, 3  ;;  %v4388_v24 = vld [vmem:[%s5728_s1 + $0x630] ss:$8 sps:$4 sm:$0xff]   ;;  %v2599_v39 = vshll.u32 %v5530_v10, 16  ;;  %v2611_v46 = vor.u32 %v2610_v29, %v2607_v60 }
  0xca   : > { %3780 = vmatprep.mubr.msk.bf16.mxu0 %vm491_vm2, %v2558_v33  ;;  %v1206_v33 = vrot.slane %v3524_v61, 1 }
  0xcb   : > { %3874 = vmatpush1.bf16.msra.mxu1 %v4382_v17  ;;  %v2566_v12 = vor.u32 %v2565_v5, %v2562_v62  ;;  %v2601_v2 = vrot.slane %v2599_v39, 3  ;;  %v2612_v1 = vsel %vm2506_vm6, %v2593_v11, %v2611_v46  ;;  %v4407_v5 = vld [vmem:[%s5728_s1 + $0x680] ss:$8 sps:$4 sm:$0xff]  }
  0xcc   : > { %3053 = vmatpush1.bf16.msra.mxu0 %v4382_v17  ;;  %3863 = vmatprep.subr.bf16.mxu1 %v4387_v15  ;;  %v4397_v17 = vld [vmem:[%s5728_s1 + $0x660] ss:$8 sps:$4 sm:$0xff]   ;;  %v1207_v44 = vsel %vm839_vm4, %v1202_v40, %v1206_v33 }
  0xcd   : > { %3054 = vmatprep.subr.bf16.mxu0 %v4387_v15  ;;  %v2567_v18 = vsel %vm2506_vm6, %v2548_v41, %v2566_v12  ;;  %v2585_v13 = vsel %vm2506_vm6, %v2566_v12, %v2584_v28  ;;  %v3523_v41 = vcombine.low %v1115_v27, %v1115_v27  ;;  %v2598_v15 = vrot.slane %v2596_v32, 2 }
  0xce   : > { %1391 = vmatmul.mubr.bf16.gmra.mrb[4].mxu1 %v5002_v54  ;;  %v4393_v54 = vld [vmem:[%s5728_s1 + $0x644] ss:$8 sps:$4 sm:$0xff]  }
  0xcf   : > { %2796 = vmatmul.mubr.bf16.gmra.mrb[4].mxu0 %v2549_v42  ;;  %3875 = vmatpush1.bf16.msra.mxu1 %v4385_v63  ;;  %v4400_v42 = vld [vmem:[%s5728_s1 + $0x670] ss:$8 sps:$4 sm:$0xff]   ;;  %v2602_v62 = vor.u32 %v2601_v2, %v2598_v15 }
  0xd0   : > { %3055 = vmatpush1.bf16.msra.mxu0 %v4385_v63  ;;  %3864 = vmatprep.subr.bf16.mxu1 %v4390_v58  ;;  %v1204_v63 = vrot.slane %v3523_v41, 1 }
  0xd1   : > { %3056 = vmatprep.subr.bf16.mxu0 %v4390_v58  ;;  %3551 = vmatprep.mubr.msk.bf16.mxu1 %vm491_vm2, %v5026_v56  ;;  %v4396_v56 = vld [vmem:[%s5728_s1 + $0x654] ss:$8 sps:$4 sm:$0xff]   ;;  %v2603_v40 = vsel %vm2506_vm6, %v2584_v28, %v2602_v62  ;;  %v4413_v58 = vld [vmem:[%s5728_s1 + $0x6a0] ss:$8 sps:$4 sm:$0xff]  }
  0xd2   : > { %3781 = vmatprep.mubr.msk.bf16.mxu0 %vm491_vm2, %v2576_v38  ;;  %v1205_v7 = vsel %vm839_vm4, %v1200_v59, %v1204_v63  ;;  %v4415_v59 = vld [vmem:[%s5728_s1 + $0x6a4] ss:$8 sps:$4 sm:$0xff]   ;;  %v4418_v38 = vld [vmem:[%s5728_s1 + $0x6b4] ss:$8 sps:$4 sm:$0xff]   ;;  %v3153_v63 = vld [vmem:[%s5729_s2] sm:$0x3] }
  0xd3   : > { %3876 = vmatpush1.bf16.msra.mxu1 %v4388_v24 }
  0xd4   : > { %3057 = vmatpush1.bf16.msra.mxu0 %v4388_v24  ;;  %3865 = vmatprep.subr.bf16.mxu1 %v4393_v54  ;;  %v2908_v24 = vrot.slane %v5510_v22, 3 }
  0xd5   : > { %3058 = vmatprep.subr.bf16.mxu0 %v4393_v54 }
  0xd6   : > { %1401 = vmatmul.mubr.bf16.gmra.mrb[8].mxu1 %v5041_v19  ;;  %v4399_v19 = vld [vmem:[%s5728_s1 + $0x664] ss:$8 sps:$4 sm:$0xff]  }
  0xd7   : > { %2806 = vmatmul.mubr.bf16.gmra.mrb[8].mxu0 %v2567_v18  ;;  %3877 = vmatpush1.bf16.msra.mxu1 %v4391_v35 }
  0xd8   : > { %3059 = vmatpush1.bf16.msra.mxu0 %v4391_v35  ;;  %3866 = vmatprep.subr.bf16.mxu1 %v4396_v56 }
  0xd9   : > { %3060 = vmatprep.subr.bf16.mxu0 %v4396_v56  ;;  %3552 = vmatprep.mubr.msk.bf16.mxu1 %vm491_vm2, %v5055_v49  ;;  %v4402_v49 = vld [vmem:[%s5728_s1 + $0x674] ss:$8 sps:$4 sm:$0xff]  }
  0xda   : > { %3782 = vmatprep.mubr.msk.bf16.mxu0 %vm491_vm2, %v2594_v45 }
  0xdb   : > { %3878 = vmatpush1.bf16.msra.mxu1 %v4394_v43 }
  0xdc   : > { %3061 = vmatpush1.bf16.msra.mxu0 %v4394_v43  ;;  %3867 = vmatprep.subr.bf16.mxu1 %v4399_v19 }
  0xdd   : > { %3062 = vmatprep.subr.bf16.mxu0 %v4399_v19 }
  0xde   : > { %1411 = vmatmul.mubr.bf16.gmra.mrb[12].mxu1 %v5074_v34  ;;  %v4409_v34 = vld [vmem:[%s5728_s1 + $0x684] ss:$8 sps:$4 sm:$0xff]  }
  0xdf   : > { %2816 = vmatmul.mubr.bf16.gmra.mrb[12].mxu0 %v2585_v13  ;;  %3879 = vmatpush1.bf16.msra.mxu1 %v4397_v17 }
  0xe0   : > { %3063 = vmatpush1.bf16.msra.mxu0 %v4397_v17  ;;  %3868 = vmatprep.subr.bf16.mxu1 %v4402_v49 }
  0xe1   : > { %3064 = vmatprep.subr.bf16.mxu0 %v4402_v49  ;;  %3553 = vmatprep.mubr.msk.bf16.mxu1 %vm491_vm2, %v1207_v44  ;;  %v3155_v49 = vlaneseq }
  0xe2   : > { %3783 = vmatprep.mubr.msk.bf16.mxu0 %vm491_vm2, %v2612_v1 }
  0xe3   : > { %3880 = vmatpush1.bf16.msra.mxu1 %v4400_v42  ;;  %v3156_v1 = vshrl.u32 %v3155_v49, 7 }
  0xe4   : > { %3065 = vmatpush1.bf16.msra.mxu0 %v4400_v42  ;;  %3869 = vmatprep.subr.bf16.mxu1 %v4409_v34 }
  0xe5   : > { %3066 = vmatprep.subr.bf16.mxu0 %v4409_v34  ;;  %v3157_v42 = vsub.s32 0, %v3156_v1  ;;  %v3161_v62 = vsub.s32 1, %v3156_v1 }
  0xe6   : > { %1421 = vmatmul.mubr.bf16.gmra.mrb[16].mxu1 %v1205_v7 }
  0xe7   : > { %2826 = vmatmul.mubr.bf16.gmra.mrb[16].mxu0 %v2603_v40  ;;  %3881 = vmatpush1.bf16.msra.mxu1 %v4407_v5  ;;  %v5647_v34 = vrot.slane %v3153_v63, %v3157_v42 }
  0xe8   : > { %3067 = vmatpush1.bf16.msra.mxu0 %v4407_v5  ;;  %3870 = vmatprep.subr.bf16.mxu1 %v4412_v57  ;;  %v5649_v5 = vrot.slane %v3153_v63, %v3161_v62 }
  0xe9   : > { %3068 = vmatprep.subr.bf16.mxu0 %v4412_v57  ;;  %3834 = vmatprep.mubr.msk.bf16.mxu0 %vm491_vm2, %v5361_v3  ;;  %v4416_v3 = vld [vmem:[%s5728_s1 + $0x6b0] ss:$8 sps:$4 sm:$0xff]  }
  0xea   : > { %3837 = vmatprep.mubr.msk.bf16.mxu1 %vm491_vm2, %v5249_v26  ;;  %v2898_v26 = vrot.slane %v4808_v8, 3  ;;  %v2909_v8 = vsel %vm2887_vm5, %v2904_v23, %v2908_v24 }
  0xeb   : > { %3882 = vmatpush1.bf16.msra.mxu1 %v4410_v14 }
  0xec   : > { %3069 = vmatpush1.bf16.msra.mxu0 %v4410_v14  ;;  %3871 = vmatprep.subr.bf16.mxu1 %v4415_v59  ;;  %v2903_v12 = vsel %vm2887_vm5, %v2898_v26, %v2902_v51  ;;  %v2899_v23 = vsel %vm2887_vm5, %v2894_v20, %v2898_v26 }
  0xed   : > { %3070 = vmatprep.subr.bf16.mxu0 %v4415_v59 }
  0xef   : > { %3883 = vmatpush1.bf16.msra.mxu1 %v4413_v58 }
  0xf0   : > { %3071 = vmatpush1.bf16.msra.mxu0 %v4413_v58  ;;  %3872 = vmatprep.subr.bf16.mxu1 %v4418_v38 }
  0xf1   : > { %3072 = vmatprep.subr.bf16.mxu0 %v4418_v38 }
  0xf3   : > { %3884 = vmatpush1.bf16.msra.mxu1 %v4416_v3 }
  0xf4   : > { %3073 = vmatpush1.bf16.msra.mxu0 %v4416_v3 }
  0xf6   : > { %3113 = vmatmul.mubr.bf16.vlgmr.msra.gmra.mrb[20].mxu1 %v2903_v12 }
  0xf7   : > { %3083 = vmatmul.mubr.bf16.vlgmr.msra.gmra.mrb[0].mxu0 %v5366_v16  ;;  %3838 = vmatprep.mubr.msk.bf16.mxu1 %vm491_vm2, %v2909_v8 }
  0xf8   : > { %3835 = vmatprep.mubr.msk.bf16.mxu0 %vm491_vm2, %v2897_v37 }
  0xfe   : > { %3123 = vmatmul.mubr.bf16.gmra.mrb[24].mxu1 %v2907_v31 }
  0xff   : > { %3093 = vmatmul.mubr.bf16.gmra.mrb[4].mxu0 %v2895_v52 }
 0x100   : > { %3836 = vmatprep.mubr.msk.bf16.mxu0 %vm491_vm2, %v2901_v30 }
 0x107   : > { %3103 = vmatmul.mubr.bf16.gmra.mrb[8].mxu0 %v2899_v23 }
 0x199   : > { %v1382_v21 = vpop.f32.mrb[0].mxu1 }
 0x19a   : > { %v1384_v16 = vpop.f32.mrb[1].mxu1 }
 0x19b   : > { %v1386_v22 = vpop.f32.mrb[2].mxu1 }
 0x19c   : > { %v1388_v48 = vpop.f32.mrb[3].mxu1 }
 0x1a1   : > { %v5622_v0 = vpop.f32.mrb[4].mxu1 }
 0x1a2   : > { %v5624_v47 = vpop.f32.mrb[5].mxu1 }
 0x1a3   : > { %v5626_v54 = vpop.f32.mrb[6].mxu1 }
 0x1a4   : > { %v5628_v55 = vpop.f32.mrb[7].mxu1 }
 0x1a9   : > { %v5630_v36 = vpop.f32.mrb[8].mxu1 }
 0x1aa   : > { %v5632_v11 = vpop.f32.mrb[9].mxu1 }
 0x1ab   : > { %v5634_v25 = vpop.f32.mrb[10].mxu1 }
 0x1ac   : > { %v5636_v4 = vpop.f32.mrb[11].mxu1 }
 0x1b1   : > { %v1412_v18 = vpop.f32.mrb[12].mxu1 }
 0x1b2   : > { %v2817_v35 = vpop.f32.mrb[12].mxu0  ;;  %v1414_v50 = vpop.f32.mrb[13].mxu1 }
 0x1b3   : > { %v3897_v53 = vadd.f32 %v2817_v35, %v1412_v18  ;;  %v2819_v27 = vpop.f32.mrb[13].mxu0  ;;  %v1416_v56 = vpop.f32.mrb[14].mxu1 }
 0x1b4   : > { %v3899_v10 = vadd.f32 %v2819_v27, %v1414_v50  ;;  %v2821_v45 = vpop.f32.mrb[14].mxu0  ;;  %v1418_v60 = vpop.f32.mrb[15].mxu1 }
 0x1b5   : > { %v3901_v61 = vadd.f32 %v2821_v45, %v1416_v56  ;;  %v2823_v29 = vpop.f32.mrb[15].mxu0 }
 0x1b6   : > { %v3903_v43 = vadd.f32 %v2823_v29, %v1418_v60 }
 0x1b9   : > { %v1422_v28 = vpop.f32.mrb[16].mxu1 }
 0x1ba   : > { %v2827_v32 = vpop.f32.mrb[16].mxu0  ;;  %v1424_v19 = vpop.f32.mrb[17].mxu1 }
 0x1bb   : > { %v3905_v39 = vadd.f32 %v2827_v32, %v1422_v28  ;;  %v2829_v33 = vpop.f32.mrb[17].mxu0  ;;  %v1426_v13 = vpop.f32.mrb[18].mxu1 }
 0x1bc   : > { %v5638_v46 = vadd.f32 %v2829_v33, %v1424_v19  ;;  %v2831_v17 = vpop.f32.mrb[18].mxu0  ;;  %v1428_v15 = vpop.f32.mrb[19].mxu1 }
 0x1bd   : > { %v5640_v41 = vadd.f32 %v2831_v17, %v1426_v13  ;;  %v2833_v2 = vpop.f32.mrb[19].mxu0 }
 0x1be   : > { %v5642_v44 = vadd.f32 %v2833_v2, %v1428_v15 }
 0x1c9   : > { %v3114_v40 = vpop.f32.mrb[20].mxu1 }
 0x1ca   : > { %v3084_v7 = vpop.f32.mrb[0].mxu0  ;;  %v3898_v14 = vadd.f32 %v3897_v53, %v3114_v40  ;;  %v3116_v58 = vpop.f32.mrb[21].mxu1 }
 0x1cb   : > { %v3885_v57 = vadd.f32 %v3084_v7, %v1382_v21  ;;  %v3086_v59 = vpop.f32.mrb[1].mxu0  ;;  %v3900_v3 = vadd.f32 %v3899_v10, %v3116_v58  ;;  %v3118_v51 = vpop.f32.mrb[22].mxu1 }
 0x1cc   : > { %v3886_v38 = vadd.f32 %v3086_v59, %v1384_v16  ;;  %v3088_v26 = vpop.f32.mrb[2].mxu0  ;;  %v3177_v24 = vadd.f32 %v3898_v14, %v5647_v34  ;;  %v3902_v37 = vadd.f32 %v3901_v61, %v3118_v51  ;;  %v3120_v20 = vpop.f32.mrb[23].mxu1 }
 0x1cd   : > { %v3165_v9 = vadd.f32 %v3885_v57, %v5647_v34  ;;  %v3887_v12 = vadd.f32 %v3088_v26, %v1386_v22  ;;  %v3090_v8 = vpop.f32.mrb[3].mxu0  ;;  %v3178_v52 = vadd.f32 %v3900_v3, %v5649_v5  ;;  %v3904_v30 = vadd.f32 %v3903_v43, %v3120_v20 }
 0x1ce   : > { %v3166_v6 = vadd.f32 %v3886_v38, %v5649_v5  ;;  %v3888_v31 = vadd.f32 %v3090_v8, %v1388_v48  ;;  %v3197_v21 = vmax.f32 %v3177_v24, 0.0  ;;  %v3179_v18 = vadd.f32 %v3902_v37, %v5647_v34 }
 0x1cf   : > { %v3185_v23 = vmax.f32 %v3165_v9, 0.0  ;;  %v3167_v16 = vadd.f32 %v3887_v12, %v5647_v34  ;;  %v3198_v53 = vmax.f32 %v3178_v52, 0.0  ;;  %v3180_v22 = vadd.f32 %v3904_v30, %v5649_v5 }
 0x1d0   : > { %v3186_v35 = vmax.f32 %v3166_v6, 0.0  ;;  %v3168_v50 = vadd.f32 %v3888_v31, %v5649_v5  ;;  %v3199_v10 = vmax.f32 %v3179_v18, 0.0 }
 0x1d1   : > { %v3187_v27 = vmax.f32 %v3167_v16, 0.0  ;;  %v3857_v45 = vpack.c.bf16 %v3198_v53, %v3197_v21  ;;  %v3200_v60 = vmax.f32 %v3180_v22, 0.0  ;;  %v3124_v43 = vpop.f32.mrb[24].mxu1 }
 0x1d2   : > { %v3851_v56 = vpack.c.bf16 %v3186_v35, %v3185_v23  ;;  %v3188_v61 = vmax.f32 %v3168_v50, 0.0  ;;  %v3094_v29 = vpop.f32.mrb[4].mxu0  ;;  %v3906_v32 = vadd.f32 %v3905_v39, %v3124_v43  ;;  %v3126_v33 = vpop.f32.mrb[25].mxu1 }
 0x1d3   : > { %v3889_v28 = vadd.f32 %v3094_v29, %v5622_v0  ;;  %v3096_v19 = vpop.f32.mrb[5].mxu0  ;;  %3274 = vst.msk [vmem:[%s5663_s17 + $0x30] sm:$0xff] %vm5667_vm9, %v3857_v45  ;;  %v3858_v17 = vpack.c.bf16 %v3200_v60, %v3199_v10  ;;  %v3908_v2 = vadd.f32 %v5638_v46, %v3126_v33  ;;  %v3128_v1 = vpop.f32.mrb[26].mxu1 }
 0x1d4   : > { %3268 = vst.msk [vmem:[%s5663_s17] sm:$0xff] %vm5667_vm9, %v3851_v56  ;;  %v3852_v13 = vpack.c.bf16 %v3188_v61, %v3187_v27  ;;  %v3890_v15 = vadd.f32 %v3096_v19, %v5624_v47  ;;  %v3098_v49 = vpop.f32.mrb[6].mxu0  ;;  %v3181_v39 = vadd.f32 %v3906_v32, %v5647_v34  ;;  %v3910_v63 = vadd.f32 %v5640_v41, %v3128_v1  ;;  %v3130_v7 = vpop.f32.mrb[27].mxu1 }
 0x1d5   : > { %v3169_v0 = vadd.f32 %v3889_v28, %v5647_v34  ;;  %v3891_v42 = vadd.f32 %v3098_v49, %v5626_v54  ;;  %v3100_v62 = vpop.f32.mrb[7].mxu0  ;;  %3275 = vst.msk [vmem:[%s5663_s17 + $0x38] sm:$0xff] %vm5667_vm9, %v3858_v17  ;;  %v3182_v46 = vadd.f32 %v3908_v2, %v5649_v5  ;;  %v3912_v57 = vadd.f32 %v5642_v44, %v3130_v7 }
 0x1d6   : > { %3269 = vst.msk [vmem:[%s5663_s17 + $0x8] sm:$0xff] %vm5667_vm9, %v3852_v13  ;;  %v3170_v47 = vadd.f32 %v3890_v15, %v5649_v5  ;;  %v3892_v40 = vadd.f32 %v3100_v62, %v5628_v55  ;;  %v3201_v54 = vmax.f32 %v3181_v39, 0.0  ;;  %v3183_v59 = vadd.f32 %v3910_v63, %v5647_v34 }
 0x1d7   : > { %v3189_v14 = vmax.f32 %v3169_v0, 0.0  ;;  %v3171_v41 = vadd.f32 %v3891_v42, %v5647_v34  ;;  %v3202_v38 = vmax.f32 %v3182_v46, 0.0  ;;  %v3184_v26 = vadd.f32 %v3912_v57, %v5649_v5 }
 0x1d8   : > { %v3190_v58 = vmax.f32 %v3170_v47, 0.0  ;;  %v3172_v3 = vadd.f32 %v3892_v40, %v5649_v5  ;;  %v3203_v9 = vmax.f32 %v3183_v59, 0.0 }
 0x1d9   : > { %v3191_v51 = vmax.f32 %v3171_v41, 0.0  ;;  %v3859_v55 = vpack.c.bf16 %v3202_v38, %v3201_v54  ;;  %v3204_v12 = vmax.f32 %v3184_v26, 0.0 }
 0x1da   : > { %v3853_v24 = vpack.c.bf16 %v3190_v58, %v3189_v14  ;;  %v3192_v44 = vmax.f32 %v3172_v3, 0.0  ;;  %v3104_v37 = vpop.f32.mrb[8].mxu0 }
 0x1db   : > { %v3893_v8 = vadd.f32 %v3104_v37, %v5630_v36  ;;  %v3106_v20 = vpop.f32.mrb[9].mxu0  ;;  %3276 = vst.msk [vmem:[%s5663_s17 + $0x40] sm:$0xff] %vm5667_vm9, %v3859_v55  ;;  %v3860_v52 = vpack.c.bf16 %v3204_v12, %v3203_v9 }
 0x1dc   : > { %3270 = vst.msk [vmem:[%s5663_s17 + $0x10] sm:$0xff] %vm5667_vm9, %v3853_v24  ;;  %v3854_v6 = vpack.c.bf16 %v3192_v44, %v3191_v51  ;;  %v3894_v31 = vadd.f32 %v3106_v20, %v5632_v11  ;;  %v3108_v30 = vpop.f32.mrb[10].mxu0 }
 0x1dd   : > { %v3173_v23 = vadd.f32 %v3893_v8, %v5647_v34  ;;  %v3895_v21 = vadd.f32 %v3108_v30, %v5634_v25  ;;  %v3110_v16 = vpop.f32.mrb[11].mxu0  ;;  %3277 = vst.msk [vmem:[%s5663_s17 + $0x48] sm:$0xff] %vm5667_vm9, %v3860_v52 }
 0x1de   : > { %3271 = vst.msk [vmem:[%s5663_s17 + $0x18] sm:$0xff] %vm5667_vm9, %v3854_v6  ;;  %v3174_v36 = vadd.f32 %v3894_v31, %v5649_v5  ;;  %v3896_v18 = vadd.f32 %v3110_v16, %v5636_v4 }
 0x1df   : > { %v3193_v35 = vmax.f32 %v3173_v23, 0.0  ;;  %v3175_v11 = vadd.f32 %v3895_v21, %v5647_v34 }
 0x1e0   : > { %v3194_v53 = vmax.f32 %v3174_v36, 0.0  ;;  %v3176_v50 = vadd.f32 %v3896_v18, %v5649_v5 }
 0x1e1   : > { %v3195_v22 = vmax.f32 %v3175_v11, 0.0 }
 0x1e2   : > { %v3855_v27 = vpack.c.bf16 %v3194_v53, %v3193_v35  ;;  %v3196_v25 = vmax.f32 %v3176_v50, 0.0 }
 0x1e4   : > { %3272 = vst.msk [vmem:[%s5663_s17 + $0x20] sm:$0xff] %vm5667_vm9, %v3855_v27  ;;  %v3856_v10 = vpack.c.bf16 %v3196_v25, %v3195_v22 }
 0x1e6   : > { %3273 = vst.msk [vmem:[%s5663_s17 + $0x28] sm:$0xff] %vm5667_vm9, %v3856_v10 }
 0x1e7 PF: > { %s13_s12 = sadd.s32 1, %s4430_s12  }
 0x1e8   : > { %p10_p4 = scmp.ge.s32.totalorder %s13_s12, 4  }
 0x1ea   :  { %12 = sbr.rel (!%p10_p4) target bundleno = 1 (0x1), region = 70 }

// kernel: model_c_forward.16
= control target key start
LH: loop header
LB: loop body
LE: loop exit
PB: predicated region body
PF: predicated region fallthrough
CT: control target
= control target key end

     0   :  { %s581_s12 = smov 0   ;;  %s684_s0 = inlined_call_operand.vmem [shape: bf16[2,16,192], index: 0, kind: input, shape index: {}]   ;;  %s685_s1 = inlined_call_operand.vmem [shape: bf16[1,192,192], index: 1, kind: input, shape index: {}]   ;;  %s686_s2 = inlined_call_operand.vmem [shape: f32[1,192], index: 2, kind: input, shape index: {}]   ;;  %s687_s3 = inlined_call_operand.vmem [shape: bf16[2,16,192], index: 3, kind: output, shape index: {}]  }
   0x1 LB: > { %s462_s13 = sadd.s32 4294967295, %s559_s12   ;;  %p466_p0 = scmp.ge.s32.totalorder %s559_s12, 1  ;;  %s559_s12 = sphi %s581_s12, %s13_s12  }
   0x2   : > { %p137_p1 = scmp.lt.s32.totalorder %s559_s12, 3 }
   0x4   : > { %p138_p2 = pnand %p466_p0, %p137_p1 }
   0x5   : > { %v514_v0 = vld [vmem:[%s685_s1 + $0x4] ss:$8 sps:$4 sm:$0xff] (!%p138_p2)   ;;  %v516_v1 = vld [vmem:[%s685_s1] ss:$8 sps:$4 sm:$0xff] (!%p138_p2)   ;;  %v517_v2 = vld [vmem:[%s685_s1 + $0x14] ss:$8 sps:$4 sm:$0xff] (!%p138_p2)   ;;  %v200_v26 = vlaneseq (!%p138_p2) }
   0x6   : > { %141 = sbr.rel (%p138_p2) target bundleno = 276 (0x114), region = 32  ;;  %343 = vmatprep.subr.bf16.mxu0 (!%p138_p2), %v514_v0  ;;  %v519_v3 = vld [vmem:[%s685_s1 + $0x10] ss:$8 sps:$4 sm:$0xff] (!%p138_p2)   ;;  %p161_p3 = scmp.lt.s32.totalorder (!%p138_p2), %s462_s13, 1  ;;  %v520_v4 = vld [vmem:[%s685_s1 + $0x24] ss:$8 sps:$4 sm:$0xff] (!%p138_p2)  }
   0x7   : > { %344 = vmatpush1.bf16.msra.mxu0 (!%p138_p2), %v516_v1  ;;  %v522_v5 = vld [vmem:[%s685_s1 + $0x20] ss:$8 sps:$4 sm:$0xff] (!%p138_p2)   ;;  %v523_v6 = vld [vmem:[%s685_s1 + $0x34] ss:$8 sps:$4 sm:$0xff] (!%p138_p2)   ;;  %v525_v7 = vld [vmem:[%s685_s1 + $0x30] ss:$8 sps:$4 sm:$0xff] (!%p138_p2)  }
   0x8   : > { %345 = vmatprep.subr.bf16.mxu0 (!%p138_p2), %v517_v2  ;;  %v526_v8 = vld [vmem:[%s685_s1 + $0x44] ss:$8 sps:$4 sm:$0xff] (!%p138_p2)   ;;  %v528_v9 = vld [vmem:[%s685_s1 + $0x40] ss:$8 sps:$4 sm:$0xff] (!%p138_p2)   ;;  %v529_v10 = vld [vmem:[%s685_s1 + $0x54] ss:$8 sps:$4 sm:$0xff] (!%p138_p2)  }
   0x9   : > { %vm339_vm0 = vcmask (!%p138_p2), 523264   ;;  %v531_v12 = vld [vmem:[%s685_s1 + $0x50] ss:$8 sps:$4 sm:$0xff] (!%p138_p2)   ;;  %v532_v13 = vld [vmem:[%s685_s1 + $0x64] ss:$8 sps:$4 sm:$0xff] (!%p138_p2)   ;;  %v201_v27 = vshrl.u32 (!%p138_p2), %v200_v26, 7 }
   0xa   : > { %v534_v14 = vld [vmem:[%s685_s1 + $0x60] ss:$8 sps:$4 sm:$0xff] (!%p138_p2)   ;;  %v535_v15 = vld [vmem:[%s685_s1 + $0x74] ss:$8 sps:$4 sm:$0xff] (!%p138_p2)   ;;  %v537_v16 = vld [vmem:[%s685_s1 + $0x70] ss:$8 sps:$4 sm:$0xff] (!%p138_p2)  }
   0xb   : > { %346 = vmatpush1.bf16.msra.mxu0 (!%p138_p2), %v519_v3  ;;  %v538_v17 = vld [vmem:[%s685_s1 + $0x84] ss:$8 sps:$4 sm:$0xff] (!%p138_p2)   ;;  %v540_v18 = vld [vmem:[%s685_s1 + $0x80] ss:$8 sps:$4 sm:$0xff] (!%p138_p2)   ;;  %v541_v19 = vld [vmem:[%s685_s1 + $0x94] ss:$8 sps:$4 sm:$0xff] (!%p138_p2)  }
   0xc   : > { %347 = vmatprep.subr.bf16.mxu0 (!%p138_p2), %v520_v4  ;;  %v543_v20 = vld [vmem:[%s685_s1 + $0x90] ss:$8 sps:$4 sm:$0xff] (!%p138_p2)   ;;  %v544_v21 = vld [vmem:[%s685_s1 + $0xa4] ss:$8 sps:$4 sm:$0xff] (!%p138_p2)   ;;  %v546_v22 = vld [vmem:[%s685_s1 + $0xa0] ss:$8 sps:$4 sm:$0xff] (!%p138_p2)  }
   0xd   : > { %s689_s13 = smov (!%p161_p3, %s462_s13), 1  ;;  %v547_v23 = vld [vmem:[%s685_s1 + $0xb4] ss:$8 sps:$4 sm:$0xff]   ;;  %v549_v24 = vld [vmem:[%s685_s1 + $0xb0] ss:$8 sps:$4 sm:$0xff]   ;;  %v202_v28 = vsub.s32 0, %v201_v27 }
   0xe   : > { %s502_s30 = sshll.u32 %s689_s13, 4  ;;  %v198_v29 = vld [vmem:[%s686_s2] sm:$0x3]  ;;  %v206_v30 = vsub.s32 1, %v201_v27  ;;  %vm402_vm1 = vcmask 1043456   ;;  %vm403_vm2 = vcmask 523268  }
   0xf   : > { %348 = vmatpush1.bf16.msra.mxu0 %v522_v5  ;;  %s624_s8 = scalar_lea.vmem %s684_s0, %s502_s30  ;;  %v203_v31 = vrot.slane %v198_v29, %v202_v28  ;;  %s170_s21 = scalar_lea.vmem %s687_s3, %s502_s30  ;;  %vm404_vm3 = vmor %vm403_vm2, %vm402_vm1 }
  0x10   : > { %349 = vmatprep.subr.bf16.mxu0 %v523_v6  ;;  %v552_v11 = vld [vmem:[%s624_s8 + $0x4] ss:$8 sps:$4 sm:$0xff]   ;;  %v550_v25 = vld [vmem:[%s624_s8] ss:$8 sps:$4 sm:$0xff]   ;;  %v207_v32 = vrot.slane %v198_v29, %v206_v30 }
  0x11   : > { %497 = vmatprep.mubr.msk.bf16.mxu0 %vm339_vm0, %v552_v11 }
  0x13   : > { %350 = vmatpush1.bf16.msra.mxu0 %v525_v7 }
  0x14   : > { %351 = vmatprep.subr.bf16.mxu0 %v526_v8 }
  0x17   : > { %352 = vmatpush1.bf16.msra.mxu0 %v528_v9 }
  0x18   : > { %353 = vmatprep.subr.bf16.mxu0 %v529_v10 }
  0x1b   : > { %354 = vmatpush1.bf16.msra.mxu0 %v531_v12 }
  0x1c   : > { %355 = vmatprep.subr.bf16.mxu0 %v532_v13 }
  0x1f   : > { %356 = vmatpush1.bf16.msra.mxu0 %v534_v14 }
  0x20   : > { %357 = vmatprep.subr.bf16.mxu0 %v535_v15 }
  0x23   : > { %358 = vmatpush1.bf16.msra.mxu0 %v537_v16 }
  0x24   : > { %359 = vmatprep.subr.bf16.mxu0 %v538_v17 }
  0x27   : > { %360 = vmatpush1.bf16.msra.mxu0 %v540_v18 }
  0x28   : > { %361 = vmatprep.subr.bf16.mxu0 %v541_v19 }
  0x2b   : > { %362 = vmatpush1.bf16.msra.mxu0 %v543_v20 }
  0x2c   : > { %363 = vmatprep.subr.bf16.mxu0 %v544_v21 }
  0x2f   : > { %364 = vmatpush1.bf16.msra.mxu0 %v546_v22 }
  0x30   : > { %365 = vmatprep.subr.bf16.mxu0 %v547_v23 }
  0x33   : > { %366 = vmatpush1.bf16.msra.mxu0 %v549_v24 }
  0x36   : > { %376 = vmatmul.mubr.bf16.vlgmr.msra.gmra.mrb[0].mxu0 %v550_v25 }
 0x109   : > { %v377_v33 = vpop.f32.mrb[0].mxu0 }
 0x10a   : > { %v378_v34 = vadd.f32 %v377_v33, %v203_v31  ;;  %v379_v35 = vpop.f32.mrb[1].mxu0 }
 0x10b   : > { %v380_v36 = vadd.f32 %v379_v35, %v207_v32  ;;  %v381_v37 = vpop.f32.mrb[2].mxu0 }
 0x10c   : > { %v386_v38 = vmax.f32 %v378_v34, 0.0  ;;  %v382_v39 = vadd.f32 %v381_v37, %v203_v31  ;;  %v383_v40 = vpop.f32.mrb[3].mxu0 }
 0x10d   : > { %v387_v41 = vmax.f32 %v380_v36, 0.0  ;;  %v384_v42 = vadd.f32 %v383_v40, %v207_v32 }
 0x10e   : > { %v388_v43 = vmax.f32 %v382_v39, 0.0 }
 0x10f   : > { %v504_v44 = vpack.c.bf16 %v387_v41, %v386_v38  ;;  %v389_v45 = vmax.f32 %v384_v42, 0.0 }
 0x111   : > { %405 = vst.msk [vmem:[%s170_s21] sm:$0xff] %vm404_vm3, %v504_v44  ;;  %v505_v46 = vpack.c.bf16 %v389_v45, %v388_v43 }
 0x113   : > { %406 = vst.msk [vmem:[%s170_s21 + $0x8] sm:$0xff] %vm404_vm3, %v505_v46 }
 0x114 PF: > { %s13_s12 = sadd.s32 1, %s559_s12  }
 0x115   : > { %p10_p4 = scmp.ge.s32.totalorder %s13_s12, 4  }
 0x117   :  { %12 = sbr.rel (!%p10_p4) target bundleno = 1 (0x1), region = 62 }

// kernel: model_c_forward.17
= control target key start
LH: loop header
LB: loop body
LE: loop exit
PB: predicated region body
PF: predicated region fallthrough
CT: control target
= control target key end

     0   :  { %8 = vsyncpa [#allocation3], 0  ;;  %s717_s0 = inlined_call_operand.vmem [shape: bf16[2,16,192], index: 0, kind: input, shape index: {}]   ;;  %s718_s1 = inlined_call_operand.vmem [shape: bf16[192,10], index: 1, kind: input, shape index: {}]   ;;  %s719_s2 = inlined_call_operand.vmem [shape: f32[1,10], index: 2, kind: input, shape index: {}]   ;;  %s720_s3 = inlined_call_operand.hbm [shape: f32[2,1,10], index: 3, kind: output, shape index: {}]  }
   0x1   :  { %10 = vsyncpa [#allocation3 + $0x1], 0  ;;  %s578_s12 = smov 0   ;;  %s580_s13 = smov 0  }
   0x2   :  { %s582_s14 = smov 0   ;;  %s584_s15 = smov 0  }
   0x3 LB: > { %s599_s16 = sadd.s32 4294967295, %s554_s15   ;;  %s411_s17 = sadd.s32 4294967294, %s554_s15   ;;  %s554_s15 = sphi %s584_s15, %s726_s15   ;;  %s550_s14 = sphi %s582_s14, %s725_s14   ;;  %s546_s13 = sphi %s580_s13, %s724_s13   ;;  %s542_s12 = sphi %s578_s12, %s723_s12  }
   0x4   : > { %s603_s18 = sadd.s32 1, %s554_s15   ;;  %s91_s19 = sadd.s32 1, %s550_s14 }
   0x5   : > { %s88_s20 = ssub.s32 %s554_s15, %s603_s18  ;;  %p101_p0 = scmp.ne.s32.totalorder %s550_s14, %s546_s13 }
   0x6   : > { %p89_p1 = scmp.eq.s32.totalorder %s88_s20, 0  ;;  %p102_p2 = scmp.eq.s32.totalorder %s599_s16, 1 }
   0x7   : > { %p107_p3 = scmp.ne.s32.totalorder %s546_s13, %s542_s12  ;;  %p108_p4 = scmp.eq.s32.totalorder %s411_s17, 1 }
   0x8   : > { %s614_s21 = scalar_select %p89_p1, %s550_s14, %s91_s19  }
   0x9   : > { %p616_p5 = por %p102_p2, %p101_p0  ;;  %p620_p6 = por %p108_p4, %p107_p3 }
   0xa   : > { %p414_p7 = scmp.ge.s32.totalorder %s554_s15, 1  ;;  %p140_p8 = scmp.lt.s32.totalorder %s554_s15, 3 }
   0xc   : > { %p141_p9 = pnand %p414_p7, %p140_p8 }
   0xd   : > { %v477_v0 = vld [vmem:[%s718_s1] sm:$0xff] (!%p141_p9)   ;;  %v556_v1 = vmov (!%p141_p9), 0   ;;  %p163_p10 = scmp.lt.s32.totalorder (!%p141_p9), %s599_s16, 1  ;;  %v478_v2 = vld [vmem:[%s718_s1 + $0x8] sm:$0xff] (!%p141_p9)   ;;  %v479_v3 = vld [vmem:[%s718_s1 + $0x10] sm:$0xff] (!%p141_p9)   ;;  %vm283_vm0 = vcmask (!%p141_p9), 523264  }
   0xe   : > { %144 = sbr.rel (%p141_p9) target bundleno = 311 (0x137), region = 32  ;;  %287 = vmatprep.subr.bf16.mxu0 (!%p141_p9), %v556_v1  ;;  %v480_v4 = vld [vmem:[%s718_s1 + $0x18] sm:$0xff] (!%p141_p9)   ;;  %v481_v6 = vld [vmem:[%s718_s1 + $0x20] sm:$0xff] (!%p141_p9)   ;;  %v482_v7 = vld [vmem:[%s718_s1 + $0x28] sm:$0xff] (!%p141_p9)   ;;  %vm330_vm1 = vcmask (!%p141_p9), 80896   ;;  %s433_s11 = sshll.u32 (!%p141_p9), %s599_s16, 4 }
   0xf   : > { %288 = vmatpush1.bf16.msra.mxu0 (!%p141_p9), %v477_v0  ;;  %v483_v8 = vld [vmem:[%s718_s1 + $0x30] sm:$0xff] (!%p141_p9)   ;;  %v484_v9 = vld [vmem:[%s718_s1 + $0x38] sm:$0xff] (!%p141_p9)   ;;  %v485_v10 = vld [vmem:[%s718_s1 + $0x40] sm:$0xff] (!%p141_p9)   ;;  %vm341_vm2 = vcmask (!%p141_p9), 73728   ;;  %s675_s25 = scalar_lea.hbm (!%p141_p9), %s720_s3, %s433_s11 }
  0x10   : > { %289 = vmatprep.subr.bf16.mxu0 (!%p141_p9), %v556_v1  ;;  %v486_v11 = vld [vmem:[%s718_s1 + $0x48] sm:$0xff] (!%p141_p9)   ;;  %v487_v12 = vld [vmem:[%s718_s1 + $0x50] sm:$0xff] (!%p141_p9)   ;;  %v488_v13 = vld [vmem:[%s718_s1 + $0x58] sm:$0xff] (!%p141_p9)  }
  0x11   : > { %v417_v15 = vld [vmem:[%s719_s2] ss:$0 sm:$0xff] (!%p141_p9) }
  0x13   : > { %290 = vmatpush1.bf16.msra.mxu0 (!%p141_p9), %v478_v2 }
  0x14   : > { %291 = vmatprep.subr.bf16.mxu0 (!%p141_p9), %v556_v1 }
  0x15   : > { %s164_s28 = scalar_select %p163_p10, %s599_s16, 1 }
  0x16   : > { %s557_s16 = smov [#allocation2]  }
  0x17   : > { %s436_s4 = sshll.u32 %s164_s28, 4  ;;  %292 = vmatpush1.bf16.msra.mxu0 %v479_v3  ;;  %s496_s28 = sshll.u32 %s557_s16, 4  ;;  %s497_s28 = int_to_ptr.vmem [resolvable:$false] %s496_s28 }
  0x18   : > { %s167_s9 = scalar_lea.vmem %s717_s0, %s436_s4  ;;  %293 = vmatprep.subr.bf16.mxu0 %v556_v1  ;;  %s498_s29 = scalar_lea.vmem %s497_s28, 32 }
  0x19   : > { %v491_v5 = vld [vmem:[%s167_s9 + $0x4] ss:$8 sps:$4 sm:$0xff]   ;;  %v489_v14 = vld [vmem:[%s167_s9] ss:$8 sps:$4 sm:$0xff]   ;;  %s161_s9 = sand.u32 1, %s546_s13  }
  0x1a   : > { %432 = vmatprep.mubr.msk.bf16.mxu0 %vm283_vm0, %v491_v5  ;;  %s162_s17 = scalar_lea.vmem [#allocation2], %s161_s9  ;;  %s344_s26 = scalar_lea.sflag [#allocation3], %s161_s9 }
  0x1b   : > { %294 = vmatpush1.bf16.msra.mxu0 %v480_v4  ;;  %s356_s19 = sshll.u32 %s162_s17, 4  ;;  %s677_s19 = int_to_ptr.vmem [resolvable:$true] %s356_s19 }
  0x1c   : > { %295 = vmatprep.subr.bf16.mxu0 %v556_v1  ;;  %s492_s27 = scalar_lea.vmem %s677_s19, 16  ;;  %p499_p0 = scmp.lt.s32.totalorder %s677_s19, %s497_s28 }
  0x1d   : > { %p493_p11 = scmp.ne.s32.totalorder %s677_s19, %s492_s27  ;;  %p500_p1 = scmp.lt.s32.totalorder %s498_s29, %s492_s27 }
  0x1f   : > { %296 = vmatpush1.bf16.msra.mxu0 %v481_v6  ;;  %p494_p12 = pnand %p493_p11, %p616_p5  ;;  %p501_p2 = por %p500_p1, %p499_p0 }
  0x20   : > { %297 = vmatprep.subr.bf16.mxu0 %v556_v1 }
  0x21   : > { %p495_p13 = pneg %p494_p12 }
  0x23   : > { %298 = vmatpush1.bf16.msra.mxu0 %v482_v7  ;;  %p502_p3 = pnand %p501_p2, %p495_p13 }
  0x24   : > { %299 = vmatprep.subr.bf16.mxu0 %v556_v1 }
  0x27   : > { %300 = vmatpush1.bf16.msra.mxu0 %v483_v8 }
  0x28   : > { %301 = vmatprep.subr.bf16.mxu0 %v556_v1 }
  0x2b   : > { %302 = vmatpush1.bf16.msra.mxu0 %v484_v9 }
  0x2c   : > { %303 = vmatprep.subr.bf16.mxu0 %v556_v1 }
  0x2f   : > { %304 = vmatpush1.bf16.msra.mxu0 %v485_v10 }
  0x30   : > { %305 = vmatprep.subr.bf16.mxu0 %v556_v1 }
  0x33   : > { %306 = vmatpush1.bf16.msra.mxu0 %v486_v11 }
  0x34   : > { %307 = vmatprep.subr.bf16.mxu0 %v556_v1 }
  0x37   : > { %308 = vmatpush1.bf16.msra.mxu0 %v487_v12 }
  0x38   : > { %309 = vmatprep.subr.bf16.mxu0 %v556_v1 }
  0x3b   : > { %310 = vmatpush1.bf16.msra.mxu0 %v488_v13 }
  0x3e   : > { %320 = vmatmul.mubr.bf16.vlgmr.msra.gmra.mrb[0].mxu0 %v489_v14 }
 0x111   : > { %v321_v16 = vpop.f32.mrb[0].mxu0 }
 0x112   : > { %v322_v17 = vadd.f32 %v417_v15, %v321_v16  ;;  %v323_v18 = vpop.f32.mrb[1].mxu0 }
 0x113   : > { %v324_v19 = vpop.f32.mrb[2].mxu0 }
 0x114   : > { %v328_v20 = vmax.f32 %v322_v17, 0.0  ;;  %v325_v21 = vadd.f32 %v417_v15, %v324_v19  ;;  %v326_v22 = vpop.f32.mrb[3].mxu0 }
 0x116   : > { %v329_v23 = vmax.f32 %v325_v21, 0.0  ;;  %v331_v24 = vsel %vm330_vm1, %v328_v20, 0.0 }
 0x118   : > { %v332_v25 = vsel %vm330_vm1, %v329_v23, 0.0 }
 0x119   : > { %v333_v26 = vadd.f32 %v332_v25, %v331_v24 }
 0x11b   : > { %v334_v27 = vrot.slane %v333_v26, 4 }
 0x11d   : > { %v335_v28 = vadd.f32 %v334_v27, %v333_v26 }
 0x11f   : > { %v336_v29 = vrot.slane %v335_v28, 2 }
 0x121   : > { %v337_v30 = vadd.f32 %v336_v29, %v335_v28 }
 0x123   : > { %v338_v31 = vrot.slane %v337_v30, 1 }
 0x125   : > { %v339_v32 = vadd.f32 %v338_v31, %v337_v30 }
 0x127   : > { %v340_v33 = vmul.f32 0.0625, %v339_v32 }
 0x129   : > { %342 = vst.msk [vmem:[%s162_s17] sm:$0x1] %vm341_vm2, %v340_v33 }
 0x12a   : > { %505 = shalt.err (!%p502_p3)
}
 0x12b   : > { %s506_s30 = scalar_lea.hbm %s675_s25, 16  ;;  %s510_s6 = scalar_lea.hbm %s720_s3, 32 }
 0x12c   : > { %p507_p4 = scmp.ne.s32.totalorder %s675_s25, %s506_s30  ;;  %p511_p9 = scmp.lt.u32.totalorder %s675_s25, %s720_s3 }
 0x12d   : > { %p512_p10 = scmp.lt.u32.totalorder %s510_s6, %s506_s30  ;;  %p514_p12 = scmp.lt.u32.totalorder %s506_s30, %s675_s25 }
 0x12e   : > { %p508_p7 = pnand %p507_p4, %p616_p5 }
 0x12f   : > { %p513_p11 = por %p512_p10, %p511_p9 }
 0x130   : > { %p509_p8 = pneg %p508_p7 }
 0x131   : > { %p515_p13 = por %p514_p12, %p513_p11 }
 0x133   : > { %p516_p0 = pnand %p515_p13, %p509_p8 }
 0x135   : > { %519 = shalt.err (!%p516_p0)
}
 0x136   : > { %437 = dma.vmem_to_hbm [thread:$0]  (%p616_p5), %s677_s19, 16, %s675_s25, %s344_s26  }
 0x137 PF: > { %p443_p1 = scmp.ge.s32.totalorder %s554_s15, 2  ;;  %s368_s10 = sand.u32 1, %s542_s12  }
 0x138   : > { %s369_s9 = scalar_lea.sflag [#allocation3], %s368_s10 }
 0x139   : > { %p440_p2 = pnand %p443_p1, %p620_p6 }
 0x13b   : > { %537 = dma.done.wait (!%p440_p2), %s369_s9, 16  }
 0x13c   : > { %539 = vsyncadd (!%p440_p2), %s369_s9, 4294967280  ;;  %p13_p3 = scmp.ge.s32.totalorder %s603_s18, 4   ;;  %s723_s12 = smov %s546_s13 }
 0x13d   : > { %s724_s13 = smov %s550_s14  ;;  %s725_s14 = smov %s614_s21 }
 0x13e   : > { %s726_s15 = smov %s603_s18  ;;  %15 = sbr.rel (!%p13_p3) target bundleno = 3 (0x3), region = 67 }
 0x145   :  { %373 = vsyncpa [#allocation3], 1 }
 0x146   :  { %375 = vsyncpa [#allocation3 + $0x1], 1 }

// kernel: model_c_forward.15
= control target key start
LH: loop header
LB: loop body
LE: loop exit
PB: predicated region body
PF: predicated region fallthrough
CT: control target
= control target key end

     0   :  { %s3277_s12 = smov 0   ;;  %s4133_s0 = inlined_call_operand.vmem [shape: bf16[2,40,192], index: 0, kind: input, shape index: {}]   ;;  %s4134_s1 = inlined_call_operand.vmem [shape: bf16[9,192,192], index: 1, kind: input, shape index: {}]   ;;  %s4135_s2 = inlined_call_operand.vmem [shape: f32[1,192], index: 2, kind: input, shape index: {}]   ;;  %s4136_s3 = inlined_call_operand.vmem [shape: bf16[2,24,192], index: 3, kind: output, shape index: {}]  }
   0x1 LB: > { %s2364_s13 = sadd.s32 4294967295, %s3255_s12   ;;  %p2368_p0 = scmp.ge.s32.totalorder %s3255_s12, 1  ;;  %s3255_s12 = sphi %s3277_s12, %s13_s12  }
   0x2   : > { %p137_p1 = scmp.lt.s32.totalorder %s3255_s12, 3 }
   0x4   : > { %p138_p2 = pnand %p2368_p0, %p137_p1 }
   0x5   : > { %v2897_v0 = vld [vmem:[%s4134_s1 + $0xc4] ss:$8 sps:$4 sm:$0xff] (!%p138_p2)   ;;  %v2901_v2 = vld [vmem:[%s4134_s1 + $0xc0] ss:$8 sps:$4 sm:$0xff] (!%p138_p2)   ;;  %v2903_v4 = vld [vmem:[%s4134_s1 + $0xd4] ss:$8 sps:$4 sm:$0xff] (!%p138_p2)  }
   0x6   : > { %141 = sbr.rel (%p138_p2) target bundleno = 471 (0x1d7), region = 32  ;;  %v2899_v1 = vld [vmem:[%s4134_s1 + $0x304] ss:$8 sps:$4 sm:$0xff] (!%p138_p2)   ;;  %401 = vmatprep.subr.bf16.mxu1 (!%p138_p2), %v2897_v0  ;;  %v2902_v3 = vld [vmem:[%s4134_s1 + $0x300] ss:$8 sps:$4 sm:$0xff] (!%p138_p2)   ;;  %p161_p3 = scmp.lt.s32.totalorder (!%p138_p2), %s2364_s13, 1 }
   0x7   : > { %1278 = vmatprep.subr.bf16.mxu0 (!%p138_p2), %v2899_v1  ;;  %402 = vmatpush1.bf16.msra.mxu1 (!%p138_p2), %v2901_v2  ;;  %v2905_v5 = vld [vmem:[%s4134_s1 + $0x314] ss:$8 sps:$4 sm:$0xff] (!%p138_p2)   ;;  %v2907_v6 = vld [vmem:[%s4134_s1 + $0xd0] ss:$8 sps:$4 sm:$0xff] (!%p138_p2)   ;;  %v2909_v8 = vld [vmem:[%s4134_s1 + $0xe4] ss:$8 sps:$4 sm:$0xff] (!%p138_p2)  }
   0x8   : > { %1279 = vmatpush1.bf16.msra.mxu0 (!%p138_p2), %v2902_v3  ;;  %403 = vmatprep.subr.bf16.mxu1 (!%p138_p2), %v2903_v4  ;;  %v2908_v7 = vld [vmem:[%s4134_s1 + $0x310] ss:$8 sps:$4 sm:$0xff] (!%p138_p2)   ;;  %v2911_v9 = vld [vmem:[%s4134_s1 + $0x324] ss:$8 sps:$4 sm:$0xff] (!%p138_p2)   ;;  %v2913_v10 = vld [vmem:[%s4134_s1 + $0xe0] ss:$8 sps:$4 sm:$0xff] (!%p138_p2)  }
   0x9   : > { %1280 = vmatprep.subr.bf16.mxu0 (!%p138_p2), %v2905_v5  ;;  %v2914_v11 = vld [vmem:[%s4134_s1 + $0x320] ss:$8 sps:$4 sm:$0xff] (!%p138_p2)   ;;  %v2915_v12 = vld [vmem:[%s4134_s1 + $0xf4] ss:$8 sps:$4 sm:$0xff] (!%p138_p2)   ;;  %v2919_v14 = vld [vmem:[%s4134_s1 + $0xf0] ss:$8 sps:$4 sm:$0xff] (!%p138_p2)  }
   0xa   : > { %v2917_v13 = vld [vmem:[%s4134_s1 + $0x334] ss:$8 sps:$4 sm:$0xff] (!%p138_p2)   ;;  %v2920_v15 = vld [vmem:[%s4134_s1 + $0x330] ss:$8 sps:$4 sm:$0xff] (!%p138_p2)   ;;  %v2921_v16 = vld [vmem:[%s4134_s1 + $0x104] ss:$8 sps:$4 sm:$0xff] (!%p138_p2)  }
   0xb   : > { %404 = vmatpush1.bf16.msra.mxu1 (!%p138_p2), %v2907_v6  ;;  %v2923_v17 = vld [vmem:[%s4134_s1 + $0x344] ss:$8 sps:$4 sm:$0xff] (!%p138_p2)   ;;  %v2925_v18 = vld [vmem:[%s4134_s1 + $0x100] ss:$8 sps:$4 sm:$0xff] (!%p138_p2)   ;;  %v2927_v20 = vld [vmem:[%s4134_s1 + $0x114] ss:$8 sps:$4 sm:$0xff] (!%p138_p2)  }
   0xc   : > { %1281 = vmatpush1.bf16.msra.mxu0 (!%p138_p2), %v2908_v7  ;;  %405 = vmatprep.subr.bf16.mxu1 (!%p138_p2), %v2909_v8  ;;  %v2926_v19 = vld [vmem:[%s4134_s1 + $0x340] ss:$8 sps:$4 sm:$0xff] (!%p138_p2)   ;;  %v2929_v21 = vld [vmem:[%s4134_s1 + $0x354] ss:$8 sps:$4 sm:$0xff] (!%p138_p2)   ;;  %v2931_v22 = vld [vmem:[%s4134_s1 + $0x110] ss:$8 sps:$4 sm:$0xff] (!%p138_p2)  }
   0xd   : > { %1282 = vmatprep.subr.bf16.mxu0 %v2911_v9  ;;  %v2932_v23 = vld [vmem:[%s4134_s1 + $0x350] ss:$8 sps:$4 sm:$0xff]   ;;  %v2933_v24 = vld [vmem:[%s4134_s1 + $0x124] ss:$8 sps:$4 sm:$0xff]   ;;  %s4138_s13 = smov (!%p161_p3, %s2364_s13), 1  ;;  %vm394_vm2 = vcmask 523264  }
   0xe   : > { %v2935_v25 = vld [vmem:[%s4134_s1 + $0x364] ss:$8 sps:$4 sm:$0xff]   ;;  %v2937_v26 = vld [vmem:[%s4134_s1 + $0x120] ss:$8 sps:$4 sm:$0xff]   ;;  %v2939_v28 = vld [vmem:[%s4134_s1 + $0x134] ss:$8 sps:$4 sm:$0xff]  }
   0xf   : > { %406 = vmatpush1.bf16.msra.mxu1 %v2913_v10  ;;  %v2938_v27 = vld [vmem:[%s4134_s1 + $0x360] ss:$8 sps:$4 sm:$0xff]   ;;  %v2941_v29 = vld [vmem:[%s4134_s1 + $0x374] ss:$8 sps:$4 sm:$0xff]   ;;  %s2887_s24 = smul.u32 40, %s4138_s13  ;;  %vm663_vm3 = vcmask 1046528  }
  0x10   : > { %1283 = vmatpush1.bf16.msra.mxu0 %v2914_v11  ;;  %407 = vmatprep.subr.bf16.mxu1 %v2915_v12  ;;  %v2943_v30 = vld [vmem:[%s4134_s1 + $0x130] ss:$8 sps:$4 sm:$0xff]   ;;  %v2945_v32 = vld [vmem:[%s4134_s1 + $0x144] ss:$8 sps:$4 sm:$0xff]   ;;  %v2949_v34 = vld [vmem:[%s4134_s1 + $0x140] ss:$8 sps:$4 sm:$0xff]  }
  0x11   : > { %1284 = vmatprep.subr.bf16.mxu0 %v2917_v13  ;;  %v2944_v31 = vld [vmem:[%s4134_s1 + $0x370] ss:$8 sps:$4 sm:$0xff]   ;;  %v2947_v33 = vld [vmem:[%s4134_s1 + $0x384] ss:$8 sps:$4 sm:$0xff]   ;;  %s3397_s8 = scalar_lea.vmem %s4133_s0, %s2887_s24  ;;  %v2950_v35 = vld [vmem:[%s4134_s1 + $0x380] ss:$8 sps:$4 sm:$0xff]  }
  0x12   : > { %v2951_v36 = vld [vmem:[%s4134_s1 + $0x154] ss:$8 sps:$4 sm:$0xff]   ;;  %v172_v38 = vld [vmem:[%s3397_s8] sm:$0xff]  ;;  %v3413_v39 = vld [vmem:[%s3397_s8 + $0x8] sm:$0xff]  ;;  %vm241_vm0 = vsmask.f32 7424 }
  0x13   : > { %408 = vmatpush1.bf16.msra.mxu1 %v2919_v14  ;;  %v2953_v37 = vld [vmem:[%s4134_s1 + $0x394] ss:$8 sps:$4 sm:$0xff]   ;;  %v3420_v42 = vcombine.high %v172_v38, %v3413_v39  ;;  %vm1115_vm1 = vsmask.f32 4352  ;;  %v3423_v43 = vcombine.low %v172_v38, %v3413_v39  ;;  %v2955_v44 = vld [vmem:[%s4134_s1 + $0x150] ss:$8 sps:$4 sm:$0xff]  }
  0x14   : > { %1285 = vmatpush1.bf16.msra.mxu0 %v2920_v15  ;;  %409 = vmatprep.subr.bf16.mxu1 %v2921_v16  ;;  %v3416_v40 = vld [vmem:[%s3397_s8 + $0x10] sm:$0xff]  ;;  %v199_v41 = vld [vmem:[%s3397_s8 + $0x18] sm:$0x11]  ;;  %v855_v47 = vld [vmem:[%s3397_s8] sm:$0x88]  ;;  %vm1594_vm4 = vcmask 1045504  }
  0x15   : > { %1286 = vmatprep.subr.bf16.mxu0 %v2923_v17  ;;  %v2956_v45 = vld [vmem:[%s4134_s1 + $0x390] ss:$8 sps:$4 sm:$0xff]   ;;  %v3432_v46 = vcombine.high %v3416_v40, %v199_v41  ;;  %v3436_v48 = vcombine.low %v3416_v40, %v199_v41  ;;  %v255_v49 = vshrl.u32 %v3420_v42, 16  ;;  %v257_v50 = vshll.u32 %v3420_v42, 16  ;;  %v2957_v53 = vld [vmem:[%s4134_s1 + $0x164] ss:$8 sps:$4 sm:$0xff]  }
  0x16   : > { %v3441_v51 = vcombine.high %v855_v47, %v3413_v39  ;;  %v3444_v52 = vld [vmem:[%s3397_s8 + $0x18] sm:$0xff]  ;;  %v2959_v54 = vld [vmem:[%s4134_s1 + $0x3a4] ss:$8 sps:$4 sm:$0xff]   ;;  %v243_v57 = vshrl.u32 %v3423_v43, 16  ;;  %v3457_v58 = vcombine.low %v855_v47, %v3413_v39  ;;  %v245_v62 = vshll.u32 %v3423_v43, 16  ;;  %s2888_s15 = smul.u32 24, %s4138_s13 }
  0x17   : > { %410 = vmatpush1.bf16.msra.mxu1 %v2925_v18  ;;  %v262_v55 = vshll.u32 %v3432_v46, 16  ;;  %v2584_v56 = vcombine.high %v3416_v40, %v3444_v52  ;;  %v259_v59 = vrot.slane %v257_v50, 1  ;;  %v2961_v63 = vld [vmem:[%s4134_s1 + $0x160] ss:$8 sps:$4 sm:$0xff]   ;;  %v250_v3 = vshll.u32 %v3436_v48, 16 }
  0x18   : > { %1287 = vmatpush1.bf16.msra.mxu0 %v2926_v19  ;;  %411 = vmatprep.subr.bf16.mxu1 %v2927_v20  ;;  %v1134_v60 = vshrl.u32 %v3441_v51, 16  ;;  %v1137_v61 = vshll.u32 %v3441_v51, 16  ;;  %v2962_v4 = vld [vmem:[%s4134_s1 + $0x3a0] ss:$8 sps:$4 sm:$0xff]   ;;  %v247_v8 = vrot.slane %v245_v62, 1  ;;  %v1117_v15 = vshrl.u32 %v3457_v58, 16  ;;  %s170_s18 = scalar_lea.vmem %s4136_s3, %s2888_s15 }
  0x19   : > { %1288 = vmatprep.subr.bf16.mxu0 %v2929_v21  ;;  %v264_v0 = vrot.slane %v262_v55, 1  ;;  %v1142_v1 = vshrl.u32 %v2584_v56, 16  ;;  %v1145_v2 = vshll.u32 %v2584_v56, 16  ;;  %v260_v5 = vor.u32 %v259_v59, %v255_v49  ;;  %v2963_v9 = vld [vmem:[%s4134_s1 + $0x174] ss:$8 sps:$4 sm:$0xff]  }
  0x1a   : > { %v1136_v6 = vrot.slane %v1134_v60, 3  ;;  %v1139_v7 = vrot.slane %v1137_v61, 4  ;;  %v2965_v12 = vld [vmem:[%s4134_s1 + $0x3b4] ss:$8 sps:$4 sm:$0xff]   ;;  %v2967_v16 = vld [vmem:[%s4134_s1 + $0x170] ss:$8 sps:$4 sm:$0xff]   ;;  %v2583_v18 = vcombine.low %v3416_v40, %v3444_v52  ;;  %v248_v21 = vor.u32 %v247_v8, %v243_v57 }
  0x1b   : > { %412 = vmatpush1.bf16.msra.mxu1 %v2931_v22  ;;  %v1144_v10 = vrot.slane %v1142_v1, 3  ;;  %v1147_v11 = vrot.slane %v1145_v2, 4  ;;  %v265_v13 = vsel %vm241_vm0, %v260_v5, %v264_v0  ;;  %v1120_v19 = vshll.u32 %v3457_v58, 16  ;;  %v2968_v20 = vld [vmem:[%s4134_s1 + $0x3b0] ss:$8 sps:$4 sm:$0xff]  }
  0x1c   : > { %1289 = vmatpush1.bf16.msra.mxu0 %v2932_v23  ;;  %413 = vmatprep.subr.bf16.mxu1 %v2933_v24  ;;  %v1140_v14 = vor.u32 %v1139_v7, %v1136_v6  ;;  %v252_v22 = vrot.slane %v250_v3, 1  ;;  %v1119_v23 = vrot.slane %v1117_v15, 3  ;;  %v2985_v38 = vld [vmem:[%s4134_s1 + $0x14] ss:$8 sps:$4 sm:$0xff]   ;;  %v2983_v47 = vld [vmem:[%s4134_s1 + $0x10] ss:$8 sps:$4 sm:$0xff]   ;;  %v2636_v61 = vcombine.high %v3413_v39, %v3416_v40 }
  0x1d   : > { %1290 = vmatprep.subr.bf16.mxu0 %v2935_v25  ;;  %2423 = vmatprep.mubr.msk.bf16.mxu1 %vm394_vm2, %v265_v13  ;;  %v1148_v17 = vor.u32 %v1147_v11, %v1144_v10  ;;  %v1122_v25 = vrot.slane %v1120_v19, 4  ;;  %v2988_v41 = vld [vmem:[%s4134_s1 + $0x3d4] ss:$8 sps:$4 sm:$0xff]   ;;  %v266_v49 = vshrl.u32 %v3436_v48, 16  ;;  %v2986_v50 = vld [vmem:[%s4134_s1 + $0x3d0] ss:$8 sps:$4 sm:$0xff]  }
  0x1e   : > { %v2989_v55 = vld [vmem:[%s4134_s1 + $0x20] ss:$8 sps:$4 sm:$0xff]   ;;  %v2997_v59 = vld [vmem:[%s4134_s1 + $0x34] ss:$8 sps:$4 sm:$0xff]   ;;  %v2995_v62 = vld [vmem:[%s4134_s1 + $0x30] ss:$8 sps:$4 sm:$0xff]  }
  0x1f   : > { %414 = vmatpush1.bf16.msra.mxu1 %v2937_v26  ;;  %v1149_v24 = vsel %vm1115_vm1, %v1140_v14, %v1148_v17  ;;  %v1125_v26 = vshrl.u32 %v2583_v18, 16  ;;  %v268_v56 = vor.u32 %v266_v49, %v252_v22  ;;  %v2992_v57 = vld [vmem:[%s4134_s1 + $0x3e0] ss:$8 sps:$4 sm:$0xff]   ;;  %v3000_v60 = vld [vmem:[%s4134_s1 + $0x3f4] ss:$8 sps:$4 sm:$0xff]   ;;  %vm892_vm5 = vcmask 1044480  }
  0x20   : > { %1291 = vmatpush1.bf16.msra.mxu0 %v2938_v27  ;;  %415 = vmatprep.subr.bf16.mxu1 %v2939_v28  ;;  %v1128_v27 = vshll.u32 %v2583_v18, 16  ;;  %v2973_v28 = vld [vmem:[%s4134_s1 + $0x4] ss:$8 sps:$4 sm:$0xff]   ;;  %v3001_v2 = vld [vmem:[%s4134_s1 + $0x40] ss:$8 sps:$4 sm:$0xff]   ;;  %vm2303_vm7 = vcmask 1043456  }
  0x21   : > { %1292 = vmatprep.subr.bf16.mxu0 %v2941_v29  ;;  %v2978_v29 = vld [vmem:[%s4134_s1 + $0x3c4] ss:$8 sps:$4 sm:$0xff]   ;;  %2609 = vmatprep.mubr.msk.bf16.mxu0 %vm394_vm2, %v1149_v24  ;;  %v3004_v3 = vld [vmem:[%s4134_s1 + $0x400] ss:$8 sps:$4 sm:$0xff]   ;;  %v3007_v5 = vld [vmem:[%s4134_s1 + $0x50] ss:$8 sps:$4 sm:$0xff]  }
  0x22   : > { %v3006_v1 = vld [vmem:[%s4134_s1 + $0x404] ss:$8 sps:$4 sm:$0xff]   ;;  %v3010_v6 = vld [vmem:[%s4134_s1 + $0x410] ss:$8 sps:$4 sm:$0xff]   ;;  %v3016_v10 = vld [vmem:[%s4134_s1 + $0x420] ss:$8 sps:$4 sm:$0xff]  }
  0x23   : > { %416 = vmatpush1.bf16.msra.mxu1 %v2943_v30  ;;  %v269_v30 = vshrl.u32 %v3432_v46, 16  ;;  %v3015_v7 = vld [vmem:[%s4134_s1 + $0x64] ss:$8 sps:$4 sm:$0xff]   ;;  %v3021_v11 = vld [vmem:[%s4134_s1 + $0x74] ss:$8 sps:$4 sm:$0xff]   ;;  %vm2304_vm8 = vcmask 523268  }
  0x24   : > { %1293 = vmatpush1.bf16.msra.mxu0 %v2944_v31  ;;  %417 = vmatprep.subr.bf16.mxu1 %v2945_v32  ;;  %v1123_v31 = vor.u32 %v1122_v25, %v1119_v23  ;;  %v1127_v32 = vrot.slane %v1125_v26, 3  ;;  %v3018_v8 = vld [vmem:[%s4134_s1 + $0x424] ss:$8 sps:$4 sm:$0xff]   ;;  %v3019_v13 = vld [vmem:[%s4134_s1 + $0x70] ss:$8 sps:$4 sm:$0xff]   ;;  %vm2305_vm9 = vmor %vm2304_vm8, %vm2303_vm7 }
  0x25   : > { %1294 = vmatprep.subr.bf16.mxu0 %v2947_v33  ;;  %v1130_v33 = vrot.slane %v1128_v27, 4  ;;  %v3022_v14 = vld [vmem:[%s4134_s1 + $0x430] ss:$8 sps:$4 sm:$0xff]   ;;  %v3027_v15 = vld [vmem:[%s4134_s1 + $0x84] ss:$8 sps:$4 sm:$0xff]  }
  0x26   : > { %v3028_v18 = vld [vmem:[%s4134_s1 + $0x440] ss:$8 sps:$4 sm:$0xff]   ;;  %v3033_v19 = vld [vmem:[%s4134_s1 + $0x94] ss:$8 sps:$4 sm:$0xff]   ;;  %v3039_v23 = vld [vmem:[%s4134_s1 + $0xa4] ss:$8 sps:$4 sm:$0xff]  }
  0x27   : > { %418 = vmatpush1.bf16.msra.mxu1 %v2949_v34  ;;  %v2971_v34 = vld [vmem:[%s4134_s1] ss:$8 sps:$4 sm:$0xff]   ;;  %v3042_v24 = vld [vmem:[%s4134_s1 + $0x464] ss:$8 sps:$4 sm:$0xff]   ;;  %v3045_v27 = vld [vmem:[%s4134_s1 + $0xb4] ss:$8 sps:$4 sm:$0xff]  }
  0x28   : > { %1295 = vmatpush1.bf16.msra.mxu0 %v2950_v35  ;;  %419 = vmatprep.subr.bf16.mxu1 %v2951_v36  ;;  %v2976_v35 = vld [vmem:[%s4134_s1 + $0x3c0] ss:$8 sps:$4 sm:$0xff]   ;;  %v253_v36 = vsel %vm241_vm0, %v248_v21, %v252_v22  ;;  %v3031_v21 = vld [vmem:[%s4134_s1 + $0x90] ss:$8 sps:$4 sm:$0xff]   ;;  %v3070_v49 = vld [vmem:[%s4134_s1 + $0x4a4] ss:$8 sps:$4 sm:$0xff]  }
  0x29   : > { %1296 = vmatprep.subr.bf16.mxu0 %v2953_v37  ;;  %v1131_v37 = vor.u32 %v1130_v33, %v1127_v32  ;;  %v3034_v22 = vld [vmem:[%s4134_s1 + $0x450] ss:$8 sps:$4 sm:$0xff]   ;;  %v3037_v25 = vld [vmem:[%s4134_s1 + $0xa0] ss:$8 sps:$4 sm:$0xff]   ;;  %v3055_v32 = vld [vmem:[%s4134_s1 + $0x484] ss:$8 sps:$4 sm:$0xff]  }
  0x2a   : > { %v3040_v26 = vld [vmem:[%s4134_s1 + $0x460] ss:$8 sps:$4 sm:$0xff]   ;;  %vm1817_vm6 = vsmask.f32 5376 }
  0x2b   : > { %420 = vmatpush1.bf16.msra.mxu1 %v2955_v44  ;;  %v271_v44 = vor.u32 %v269_v30, %v264_v0  ;;  %v3003_v0 = vld [vmem:[%s4134_s1 + $0x44] ss:$8 sps:$4 sm:$0xff]   ;;  %v3046_v30 = vld [vmem:[%s4134_s1 + $0x470] ss:$8 sps:$4 sm:$0xff]   ;;  %v3049_v33 = vld [vmem:[%s4134_s1 + $0x180] ss:$8 sps:$4 sm:$0xff]  }
  0x2c   : > { %1297 = vmatpush1.bf16.msra.mxu0 %v2956_v45  ;;  %421 = vmatprep.subr.bf16.mxu1 %v2957_v53  ;;  %v1132_v45 = vsel %vm1115_vm1, %v1123_v31, %v1131_v37  ;;  %v2991_v53 = vld [vmem:[%s4134_s1 + $0x24] ss:$8 sps:$4 sm:$0xff]  }
  0x2d   : > { %1298 = vmatprep.subr.bf16.mxu0 %v2959_v54  ;;  %v2994_v54 = vld [vmem:[%s4134_s1 + $0x3e4] ss:$8 sps:$4 sm:$0xff]  }
  0x2e   : > { %v3051_v31 = vld [vmem:[%s4134_s1 + $0x184] ss:$8 sps:$4 sm:$0xff]  }
  0x2f   : > { %422 = vmatpush1.bf16.msra.mxu1 %v2961_v63  ;;  %v2998_v63 = vld [vmem:[%s4134_s1 + $0x3f0] ss:$8 sps:$4 sm:$0xff]  }
  0x30   : > { %1299 = vmatpush1.bf16.msra.mxu0 %v2962_v4  ;;  %423 = vmatprep.subr.bf16.mxu1 %v2963_v9  ;;  %v3009_v4 = vld [vmem:[%s4134_s1 + $0x54] ss:$8 sps:$4 sm:$0xff]   ;;  %v3013_v9 = vld [vmem:[%s4134_s1 + $0x60] ss:$8 sps:$4 sm:$0xff]  }
  0x31   : > { %1300 = vmatprep.subr.bf16.mxu0 %v2965_v12  ;;  %v3024_v12 = vld [vmem:[%s4134_s1 + $0x434] ss:$8 sps:$4 sm:$0xff]  }
  0x33   : > { %424 = vmatpush1.bf16.msra.mxu1 %v2967_v16  ;;  %v3030_v16 = vld [vmem:[%s4134_s1 + $0x444] ss:$8 sps:$4 sm:$0xff]  }
  0x34   : > { %1301 = vmatpush1.bf16.msra.mxu0 %v2968_v20  ;;  %581 = vmatprep.subr.bf16.mxu1 %v2973_v28  ;;  %v3036_v20 = vld [vmem:[%s4134_s1 + $0x454] ss:$8 sps:$4 sm:$0xff]  }
  0x35   : > { %1492 = vmatprep.subr.bf16.mxu0 %v2978_v29  ;;  %v3048_v28 = vld [vmem:[%s4134_s1 + $0x474] ss:$8 sps:$4 sm:$0xff]   ;;  %v3043_v29 = vld [vmem:[%s4134_s1 + $0xb0] ss:$8 sps:$4 sm:$0xff]  }
  0x36   : > { %434 = vmatmul.mubr.bf16.vlgmr.msra.gmra.mrb[0].mxu1 %v253_v36  ;;  %v3059_v36 = vld [vmem:[%s4134_s1 + $0x194] ss:$8 sps:$4 sm:$0xff]  }
  0x37   : > { %1311 = vmatmul.mubr.bf16.vlgmr.msra.gmra.mrb[0].mxu0 %v1132_v45  ;;  %582 = vmatpush1.bf16.msra.mxu1 %v2971_v34  ;;  %v2635_v34 = vcombine.low %v3413_v39, %v3416_v40  ;;  %v3060_v45 = vld [vmem:[%s4134_s1 + $0x490] ss:$8 sps:$4 sm:$0xff]  }
  0x38   : > { %1493 = vmatpush1.bf16.msra.mxu0 %v2976_v35  ;;  %583 = vmatprep.subr.bf16.mxu1 %v2985_v38  ;;  %v3053_v35 = vld [vmem:[%s4134_s1 + $0x480] ss:$8 sps:$4 sm:$0xff]   ;;  %v2426_v38 = vcombine.high %v3416_v40, %v3416_v40 }
  0x39   : > { %1494 = vmatprep.subr.bf16.mxu0 %v2988_v41  ;;  %2610 = vmatprep.mubr.msk.bf16.mxu0 %vm394_vm2, %v1148_v17  ;;  %v3025_v17 = vld [vmem:[%s4134_s1 + $0x80] ss:$8 sps:$4 sm:$0xff]   ;;  %v2638_v41 = vcombine.high %v3444_v52, %v3444_v52 }
  0x3a   : > { %2424 = vmatprep.mubr.msk.bf16.mxu1 %vm394_vm2, %v271_v44  ;;  %v3057_v44 = vld [vmem:[%s4134_s1 + $0x190] ss:$8 sps:$4 sm:$0xff]  }
  0x3b   : > { %584 = vmatpush1.bf16.msra.mxu1 %v2983_v47  ;;  %v3676_v47 = vld [vmem:[%s3397_s8] sm:$0xee] }
  0x3c   : > { %1495 = vmatpush1.bf16.msra.mxu0 %v2986_v50  ;;  %585 = vmatprep.subr.bf16.mxu1 %v2991_v53  ;;  %v2478_v50 = vcombine.high %v3676_v47, %v3413_v39  ;;  %v2425_v53 = vcombine.low %v3416_v40, %v3416_v40 }
  0x3d   : > { %1496 = vmatprep.subr.bf16.mxu0 %v2994_v54  ;;  %v3691_v54 = vld [vmem:[%s3397_s8 + $0x8] sm:$0xcc] }
  0x3e   : > { %444 = vmatmul.mubr.bf16.gmra.mrb[4].mxu1 %v268_v56  ;;  %v3065_v56 = vld [vmem:[%s4134_s1 + $0x1a0] ss:$8 sps:$4 sm:$0xff]  }
  0x3f   : > { %1321 = vmatmul.mubr.bf16.gmra.mrb[4].mxu0 %v1131_v37  ;;  %586 = vmatpush1.bf16.msra.mxu1 %v2989_v55  ;;  %v3062_v37 = vld [vmem:[%s4134_s1 + $0x494] ss:$8 sps:$4 sm:$0xff]   ;;  %v3694_v55 = vld [vmem:[%s3397_s8 + $0x20] sm:$0x33] }
  0x40   : > { %1497 = vmatpush1.bf16.msra.mxu0 %v2992_v57  ;;  %587 = vmatprep.subr.bf16.mxu1 %v2997_v59  ;;  %v2637_v57 = vcombine.low %v3444_v52, %v3444_v52  ;;  %v667_v59 = vrot.slane %v2478_v50, 1 }
  0x41   : > { %1498 = vmatprep.subr.bf16.mxu0 %v3000_v60  ;;  %2451 = vmatprep.mubr.msk.bf16.mxu1 %vm394_vm2, %v3420_v42  ;;  %v3012_v42 = vld [vmem:[%s4134_s1 + $0x414] ss:$8 sps:$4 sm:$0xff]   ;;  %v668_v60 = vrot.slane %v3432_v46, 1  ;;  %v3148_v46 = vld [vmem:[%s4134_s1 + $0x560] ss:$8 sps:$4 sm:$0xff]  }
  0x42   : > { %2663 = vmatprep.mubr.msk.bf16.mxu0 %vm394_vm2, %v2636_v61  ;;  %v3704_v61 = vcombine.high %v3691_v54, %v3416_v40 }
  0x43   : > { %588 = vmatpush1.bf16.msra.mxu1 %v2995_v62  ;;  %v3068_v62 = vld [vmem:[%s4134_s1 + $0x4a0] ss:$8 sps:$4 sm:$0xff]  }
  0x44   : > { %1499 = vmatpush1.bf16.msra.mxu0 %v2998_v63  ;;  %589 = vmatprep.subr.bf16.mxu1 %v3003_v0  ;;  %v3073_v63 = vld [vmem:[%s4134_s1 + $0x1b4] ss:$8 sps:$4 sm:$0xff]   ;;  %v2692_v0 = vcombine.high %v3444_v52, %v3694_v55 }
  0x45   : > { %1500 = vmatprep.subr.bf16.mxu0 %v3006_v1  ;;  %v3076_v1 = vld [vmem:[%s4134_s1 + $0x4b4] ss:$8 sps:$4 sm:$0xff]  }
  0x47   : > { %590 = vmatpush1.bf16.msra.mxu1 %v3001_v2  ;;  %v1598_v2 = vrot.slane %v3704_v61, 2 }
  0x48   : > { %1501 = vmatpush1.bf16.msra.mxu0 %v3004_v3  ;;  %591 = vmatprep.subr.bf16.mxu1 %v3009_v4  ;;  %v3718_v3 = vrot.slane %v2692_v0, 2  ;;  %v3071_v4 = vld [vmem:[%s4134_s1 + $0x1b0] ss:$8 sps:$4 sm:$0xff]  }
  0x49   : > { %1502 = vmatprep.subr.bf16.mxu0 %v3012_v42  ;;  %v669_v42 = vsel %vm663_vm3, %v667_v59, %v668_v60 }
  0x4b   : > { %592 = vmatpush1.bf16.msra.mxu1 %v3007_v5  ;;  %v3074_v5 = vld [vmem:[%s4134_s1 + $0x4b0] ss:$8 sps:$4 sm:$0xff]  }
  0x4c   : > { %1503 = vmatpush1.bf16.msra.mxu0 %v3010_v6  ;;  %593 = vmatprep.subr.bf16.mxu1 %v3015_v7  ;;  %v1600_v6 = vsel %vm1594_vm4, %v1598_v2, %v3718_v3  ;;  %v3079_v7 = vld [vmem:[%s4134_s1 + $0x1c4] ss:$8 sps:$4 sm:$0xff]   ;;  %v3144_v2 = vld [vmem:[%s4134_s1 + $0x554] ss:$8 sps:$4 sm:$0xff]  }
  0x4d   : > { %1504 = vmatprep.subr.bf16.mxu0 %v3018_v8  ;;  %v3082_v8 = vld [vmem:[%s4134_s1 + $0x4c4] ss:$8 sps:$4 sm:$0xff]  }
  0x4f   : > { %594 = vmatpush1.bf16.msra.mxu1 %v3013_v9  ;;  %v3077_v9 = vld [vmem:[%s4134_s1 + $0x1c0] ss:$8 sps:$4 sm:$0xff]  }
  0x50   : > { %1505 = vmatpush1.bf16.msra.mxu0 %v3016_v10  ;;  %595 = vmatprep.subr.bf16.mxu1 %v3021_v11  ;;  %v3080_v10 = vld [vmem:[%s4134_s1 + $0x4c0] ss:$8 sps:$4 sm:$0xff]   ;;  %v3085_v11 = vld [vmem:[%s4134_s1 + $0x1d4] ss:$8 sps:$4 sm:$0xff]  }
  0x51   : > { %1506 = vmatprep.subr.bf16.mxu0 %v3024_v12  ;;  %v3088_v12 = vld [vmem:[%s4134_s1 + $0x4d4] ss:$8 sps:$4 sm:$0xff]  }
  0x53   : > { %596 = vmatpush1.bf16.msra.mxu1 %v3019_v13  ;;  %v3083_v13 = vld [vmem:[%s4134_s1 + $0x1d0] ss:$8 sps:$4 sm:$0xff]  }
  0x54   : > { %1507 = vmatpush1.bf16.msra.mxu0 %v3022_v14  ;;  %597 = vmatprep.subr.bf16.mxu1 %v3027_v15  ;;  %v3086_v14 = vld [vmem:[%s4134_s1 + $0x4d0] ss:$8 sps:$4 sm:$0xff]   ;;  %v3091_v15 = vld [vmem:[%s4134_s1 + $0x1e4] ss:$8 sps:$4 sm:$0xff]  }
  0x55   : > { %1508 = vmatprep.subr.bf16.mxu0 %v3030_v16  ;;  %v3094_v16 = vld [vmem:[%s4134_s1 + $0x4e4] ss:$8 sps:$4 sm:$0xff]  }
  0x57   : > { %598 = vmatpush1.bf16.msra.mxu1 %v3025_v17  ;;  %v3089_v17 = vld [vmem:[%s4134_s1 + $0x1e0] ss:$8 sps:$4 sm:$0xff]  }
  0x58   : > { %1509 = vmatpush1.bf16.msra.mxu0 %v3028_v18  ;;  %599 = vmatprep.subr.bf16.mxu1 %v3033_v19  ;;  %v3092_v18 = vld [vmem:[%s4134_s1 + $0x4e0] ss:$8 sps:$4 sm:$0xff]   ;;  %v3097_v19 = vld [vmem:[%s4134_s1 + $0x1f4] ss:$8 sps:$4 sm:$0xff]  }
  0x59   : > { %1510 = vmatprep.subr.bf16.mxu0 %v3036_v20  ;;  %v3100_v20 = vld [vmem:[%s4134_s1 + $0x4f4] ss:$8 sps:$4 sm:$0xff]  }
  0x5b   : > { %600 = vmatpush1.bf16.msra.mxu1 %v3031_v21  ;;  %v3095_v21 = vld [vmem:[%s4134_s1 + $0x1f0] ss:$8 sps:$4 sm:$0xff]  }
  0x5c   : > { %1511 = vmatpush1.bf16.msra.mxu0 %v3034_v22  ;;  %601 = vmatprep.subr.bf16.mxu1 %v3039_v23  ;;  %v3098_v22 = vld [vmem:[%s4134_s1 + $0x4f0] ss:$8 sps:$4 sm:$0xff]   ;;  %v3103_v23 = vld [vmem:[%s4134_s1 + $0x204] ss:$8 sps:$4 sm:$0xff]  }
  0x5d   : > { %1512 = vmatprep.subr.bf16.mxu0 %v3042_v24  ;;  %v3106_v24 = vld [vmem:[%s4134_s1 + $0x504] ss:$8 sps:$4 sm:$0xff]  }
  0x5f   : > { %602 = vmatpush1.bf16.msra.mxu1 %v3037_v25  ;;  %v3101_v25 = vld [vmem:[%s4134_s1 + $0x200] ss:$8 sps:$4 sm:$0xff]  }
  0x60   : > { %1513 = vmatpush1.bf16.msra.mxu0 %v3040_v26  ;;  %603 = vmatprep.subr.bf16.mxu1 %v3045_v27  ;;  %v3104_v26 = vld [vmem:[%s4134_s1 + $0x500] ss:$8 sps:$4 sm:$0xff]   ;;  %v3109_v27 = vld [vmem:[%s4134_s1 + $0x214] ss:$8 sps:$4 sm:$0xff]  }
  0x61   : > { %1514 = vmatprep.subr.bf16.mxu0 %v3048_v28  ;;  %v3112_v28 = vld [vmem:[%s4134_s1 + $0x514] ss:$8 sps:$4 sm:$0xff]  }
  0x63   : > { %604 = vmatpush1.bf16.msra.mxu1 %v3043_v29  ;;  %v3107_v29 = vld [vmem:[%s4134_s1 + $0x210] ss:$8 sps:$4 sm:$0xff]  }
  0x64   : > { %1515 = vmatpush1.bf16.msra.mxu0 %v3046_v30  ;;  %798 = vmatprep.subr.bf16.mxu1 %v3051_v31  ;;  %v3110_v30 = vld [vmem:[%s4134_s1 + $0x510] ss:$8 sps:$4 sm:$0xff]   ;;  %v3117_v31 = vld [vmem:[%s4134_s1 + $0x224] ss:$8 sps:$4 sm:$0xff]  }
  0x65   : > { %1729 = vmatprep.subr.bf16.mxu0 %v3055_v32  ;;  %v3120_v32 = vld [vmem:[%s4134_s1 + $0x524] ss:$8 sps:$4 sm:$0xff]  }
  0x66   : > { %614 = vmatmul.mubr.bf16.vlgmr.msra.gmra.mrb[0].mxu1 %v3423_v43  ;;  %v3067_v43 = vld [vmem:[%s4134_s1 + $0x1a4] ss:$8 sps:$4 sm:$0xff]  }
  0x67   : > { %1525 = vmatmul.mubr.bf16.vlgmr.msra.gmra.mrb[0].mxu0 %v2635_v34  ;;  %799 = vmatpush1.bf16.msra.mxu1 %v3049_v33  ;;  %v3115_v33 = vld [vmem:[%s4134_s1 + $0x220] ss:$8 sps:$4 sm:$0xff]  }
  0x68   : > { %1730 = vmatpush1.bf16.msra.mxu0 %v3053_v35  ;;  %800 = vmatprep.subr.bf16.mxu1 %v3059_v36  ;;  %v3118_v34 = vld [vmem:[%s4134_s1 + $0x520] ss:$8 sps:$4 sm:$0xff]   ;;  %v2477_v35 = vcombine.low %v3676_v47, %v3413_v39  ;;  %v3821_v36 = vcombine.low %v3691_v54, %v3416_v40  ;;  %v3121_v39 = vld [vmem:[%s4134_s1 + $0x230] ss:$8 sps:$4 sm:$0xff]  }
  0x69   : > { %1731 = vmatprep.subr.bf16.mxu0 %v3062_v37  ;;  %2452 = vmatprep.mubr.msk.bf16.mxu1 %vm394_vm2, %v2426_v38  ;;  %v2691_v37 = vcombine.low %v3444_v52, %v3694_v55  ;;  %v3826_v38 = vld [vmem:[%s3397_s8 + $0x20] sm:$0x77]  ;;  %v1836_v55 = vshrl.u32 %v3704_v61, 16 }
  0x6a   : > { %2664 = vmatprep.mubr.msk.bf16.mxu0 %vm394_vm2, %v2638_v41  ;;  %v3123_v41 = vld [vmem:[%s4134_s1 + $0x234] ss:$8 sps:$4 sm:$0xff]   ;;  %v3840_v47 = vcombine.high %v3444_v52, %v3826_v38  ;;  %v1595_v50 = vrot.slane %v3821_v36, 2  ;;  %v3138_v52 = vld [vmem:[%s4134_s1 + $0x544] ss:$8 sps:$4 sm:$0xff]  }
  0x6b   : > { %801 = vmatpush1.bf16.msra.mxu1 %v3057_v44  ;;  %v3126_v44 = vld [vmem:[%s4134_s1 + $0x534] ss:$8 sps:$4 sm:$0xff]   ;;  %v3129_v54 = vld [vmem:[%s4134_s1 + $0x240] ss:$8 sps:$4 sm:$0xff]  }
  0x6c   : > { %1732 = vmatpush1.bf16.msra.mxu0 %v3060_v45  ;;  %802 = vmatprep.subr.bf16.mxu1 %v3067_v43  ;;  %v665_v45 = vrot.slane %v3436_v48, 1  ;;  %v3124_v43 = vld [vmem:[%s4134_s1 + $0x530] ss:$8 sps:$4 sm:$0xff]   ;;  %v3131_v48 = vld [vmem:[%s4134_s1 + $0x244] ss:$8 sps:$4 sm:$0xff]   ;;  %v1847_v59 = vshll.u32 %v3840_v47, 16 }
  0x6d   : > { %1733 = vmatprep.subr.bf16.mxu0 %v3070_v49  ;;  %v664_v49 = vrot.slane %v2477_v35, 1  ;;  %v3183_v35 = vld [vmem:[%s4134_s1 + $0x2c4] ss:$8 sps:$4 sm:$0xff]  }
  0x6e   : > { %624 = vmatmul.mubr.bf16.gmra.mrb[8].mxu1 %v2425_v53  ;;  %v1596_v53 = vrot.slane %v2691_v37, 2  ;;  %v3186_v37 = vld [vmem:[%s4134_s1 + $0x5c4] ss:$8 sps:$4 sm:$0xff]  }
  0x6f   : > { %1535 = vmatmul.mubr.bf16.gmra.mrb[8].mxu0 %v2637_v57  ;;  %803 = vmatpush1.bf16.msra.mxu1 %v3065_v56  ;;  %v1839_v56 = vshll.u32 %v3704_v61, 16  ;;  %v1844_v57 = vshrl.u32 %v3840_v47, 16  ;;  %v3141_v61 = vld [vmem:[%s4134_s1 + $0x254] ss:$8 sps:$4 sm:$0xff]  }
  0x70   : > { %1734 = vmatpush1.bf16.msra.mxu0 %v3068_v62  ;;  %804 = vmatprep.subr.bf16.mxu1 %v3073_v63  ;;  %v666_v62 = vsel %vm663_vm3, %v664_v49, %v665_v45  ;;  %v3136_v63 = vld [vmem:[%s4134_s1 + $0x540] ss:$8 sps:$4 sm:$0xff]   ;;  %v1597_v0 = vsel %vm1594_vm4, %v1595_v50, %v1596_v53  ;;  %v3192_v49 = vld [vmem:[%s4134_s1 + $0x5d4] ss:$8 sps:$4 sm:$0xff]   ;;  %v1819_v50 = vshrl.u32 %v3821_v36, 16 }
  0x71   : > { %1735 = vmatprep.subr.bf16.mxu0 %v3076_v1  ;;  %2503 = vmatprep.mubr.msk.bf16.mxu1 %vm394_vm2, %v669_v42  ;;  %v3865_v1 = vld [vmem:[%s3397_s8 + $0x18] sm:$0x77] }
  0x72   : > { %2717 = vmatprep.mubr.msk.bf16.mxu0 %vm394_vm2, %v1600_v6  ;;  %v2532_v42 = vcombine.high %v3416_v40, %v3865_v1  ;;  %v1846_v6 = vrot.slane %v1844_v57, 2  ;;  %v3150_v40 = vld [vmem:[%s4134_s1 + $0x564] ss:$8 sps:$4 sm:$0xff]  }
  0x73   : > { %805 = vmatpush1.bf16.msra.mxu1 %v3071_v4  ;;  %v1838_v4 = vrot.slane %v1836_v55, 2  ;;  %v3198_v55 = vld [vmem:[%s4134_s1 + $0x5e4] ss:$8 sps:$4 sm:$0xff]  }
  0x74   : > { %1736 = vmatpush1.bf16.msra.mxu0 %v3074_v5  ;;  %806 = vmatprep.subr.bf16.mxu1 %v3079_v7  ;;  %v1841_v5 = vrot.slane %v1839_v56, 3  ;;  %v1849_v7 = vrot.slane %v1847_v59, 3  ;;  %v1821_v56 = vrot.slane %v1819_v50, 2  ;;  %v3193_v59 = vld [vmem:[%s4134_s1 + $0x2e0] ss:$8 sps:$4 sm:$0xff]  }
  0x75   : > { %1737 = vmatprep.subr.bf16.mxu0 %v3082_v8  ;;  %v3139_v8 = vld [vmem:[%s4134_s1 + $0x250] ss:$8 sps:$4 sm:$0xff]  }
  0x77   : > { %807 = vmatpush1.bf16.msra.mxu1 %v3077_v9  ;;  %v3142_v9 = vld [vmem:[%s4134_s1 + $0x550] ss:$8 sps:$4 sm:$0xff]  }
  0x78   : > { %1738 = vmatpush1.bf16.msra.mxu0 %v3080_v10  ;;  %808 = vmatprep.subr.bf16.mxu1 %v3085_v11  ;;  %v3147_v10 = vld [vmem:[%s4134_s1 + $0x264] ss:$8 sps:$4 sm:$0xff]   ;;  %v896_v11 = vrot.slane %v3441_v51, 3  ;;  %v3153_v51 = vld [vmem:[%s4134_s1 + $0x274] ss:$8 sps:$4 sm:$0xff]  }
  0x79   : > { %1739 = vmatprep.subr.bf16.mxu0 %v3088_v12  ;;  %v3893_v12 = vrot.slane %v2532_v42, 3  ;;  %v3204_v42 = vld [vmem:[%s4134_s1 + $0x5f4] ss:$8 sps:$4 sm:$0xff]  }
  0x7b   : > { %809 = vmatpush1.bf16.msra.mxu1 %v3083_v13  ;;  %v1842_v13 = vor.u32 %v1841_v5, %v1838_v4  ;;  %v3201_v4 = vld [vmem:[%s4134_s1 + $0x2f4] ss:$8 sps:$4 sm:$0xff]   ;;  %v3199_v5 = vld [vmem:[%s4134_s1 + $0x2f0] ss:$8 sps:$4 sm:$0xff]  }
  0x7c   : > { %1740 = vmatpush1.bf16.msra.mxu0 %v3086_v14  ;;  %810 = vmatprep.subr.bf16.mxu1 %v3091_v15  ;;  %v3895_v14 = vor.u32 %v1849_v7, %v1846_v6  ;;  %v3145_v15 = vld [vmem:[%s4134_s1 + $0x260] ss:$8 sps:$4 sm:$0xff]   ;;  %v893_v6 = vrot.slane %v3457_v58, 3 }
  0x7d   : > { %1741 = vmatprep.subr.bf16.mxu0 %v3094_v16  ;;  %v4040_v58 = vld [vmem:[%s3397_s8 + $0x8] sm:$0x88] }
  0x7e   : > { %v1851_v16 = vsel %vm1817_vm6, %v1842_v13, %v3895_v14 }
  0x7f   : > { %811 = vmatpush1.bf16.msra.mxu1 %v3089_v17  ;;  %v3151_v17 = vld [vmem:[%s4134_s1 + $0x270] ss:$8 sps:$4 sm:$0xff]  }
  0x80   : > { %1742 = vmatpush1.bf16.msra.mxu0 %v3092_v18  ;;  %812 = vmatprep.subr.bf16.mxu1 %v3097_v19  ;;  %v3154_v18 = vld [vmem:[%s4134_s1 + $0x570] ss:$8 sps:$4 sm:$0xff]   ;;  %v3159_v19 = vld [vmem:[%s4134_s1 + $0x284] ss:$8 sps:$4 sm:$0xff]  }
  0x81   : > { %1743 = vmatprep.subr.bf16.mxu0 %v3100_v20  ;;  %v3162_v20 = vld [vmem:[%s4134_s1 + $0x584] ss:$8 sps:$4 sm:$0xff]  }
  0x83   : > { %813 = vmatpush1.bf16.msra.mxu1 %v3095_v21  ;;  %v3157_v21 = vld [vmem:[%s4134_s1 + $0x280] ss:$8 sps:$4 sm:$0xff]  }
  0x84   : > { %1744 = vmatpush1.bf16.msra.mxu0 %v3098_v22  ;;  %814 = vmatprep.subr.bf16.mxu1 %v3103_v23  ;;  %v3160_v22 = vld [vmem:[%s4134_s1 + $0x580] ss:$8 sps:$4 sm:$0xff]   ;;  %v3165_v23 = vld [vmem:[%s4134_s1 + $0x294] ss:$8 sps:$4 sm:$0xff]  }
  0x85   : > { %1745 = vmatprep.subr.bf16.mxu0 %v3106_v24  ;;  %v3168_v24 = vld [vmem:[%s4134_s1 + $0x594] ss:$8 sps:$4 sm:$0xff]  }
  0x87   : > { %815 = vmatpush1.bf16.msra.mxu1 %v3101_v25  ;;  %v3163_v25 = vld [vmem:[%s4134_s1 + $0x290] ss:$8 sps:$4 sm:$0xff]  }
  0x88   : > { %1746 = vmatpush1.bf16.msra.mxu0 %v3104_v26  ;;  %816 = vmatprep.subr.bf16.mxu1 %v3109_v27  ;;  %v3166_v26 = vld [vmem:[%s4134_s1 + $0x590] ss:$8 sps:$4 sm:$0xff]   ;;  %v3171_v27 = vld [vmem:[%s4134_s1 + $0x2a4] ss:$8 sps:$4 sm:$0xff]  }
  0x89   : > { %1747 = vmatprep.subr.bf16.mxu0 %v3112_v28  ;;  %v3174_v28 = vld [vmem:[%s4134_s1 + $0x5a4] ss:$8 sps:$4 sm:$0xff]  }
  0x8b   : > { %817 = vmatpush1.bf16.msra.mxu1 %v3107_v29  ;;  %v3169_v29 = vld [vmem:[%s4134_s1 + $0x2a0] ss:$8 sps:$4 sm:$0xff]  }
  0x8c   : > { %1748 = vmatpush1.bf16.msra.mxu0 %v3110_v30  ;;  %818 = vmatprep.subr.bf16.mxu1 %v3117_v31  ;;  %v3172_v30 = vld [vmem:[%s4134_s1 + $0x5a0] ss:$8 sps:$4 sm:$0xff]   ;;  %v3177_v31 = vld [vmem:[%s4134_s1 + $0x2b4] ss:$8 sps:$4 sm:$0xff]  }
  0x8d   : > { %1749 = vmatprep.subr.bf16.mxu0 %v3120_v32  ;;  %v3180_v32 = vld [vmem:[%s4134_s1 + $0x5b4] ss:$8 sps:$4 sm:$0xff]  }
  0x8f   : > { %819 = vmatpush1.bf16.msra.mxu1 %v3115_v33  ;;  %v3175_v33 = vld [vmem:[%s4134_s1 + $0x2b0] ss:$8 sps:$4 sm:$0xff]  }
  0x90   : > { %1750 = vmatpush1.bf16.msra.mxu0 %v3118_v34  ;;  %820 = vmatprep.subr.bf16.mxu1 %v3123_v41  ;;  %v3178_v34 = vld [vmem:[%s4134_s1 + $0x5b0] ss:$8 sps:$4 sm:$0xff]   ;;  %v3181_v41 = vld [vmem:[%s4134_s1 + $0x2c0] ss:$8 sps:$4 sm:$0xff]  }
  0x91   : > { %1751 = vmatprep.subr.bf16.mxu0 %v3126_v44  ;;  %v3184_v44 = vld [vmem:[%s4134_s1 + $0x5c0] ss:$8 sps:$4 sm:$0xff]  }
  0x93   : > { %821 = vmatpush1.bf16.msra.mxu1 %v3121_v39  ;;  %v3247_v39 = vld [vmem:[%s3397_s8 + $0x18] sm:$0xff] }
  0x94   : > { %1752 = vmatpush1.bf16.msra.mxu0 %v3124_v43  ;;  %1027 = vmatprep.subr.bf16.mxu1 %v3131_v48  ;;  %v3189_v43 = vld [vmem:[%s4134_s1 + $0x2d4] ss:$8 sps:$4 sm:$0xff]   ;;  %v3190_v48 = vld [vmem:[%s4134_s1 + $0x5d0] ss:$8 sps:$4 sm:$0xff]  }
  0x95   : > { %1980 = vmatprep.subr.bf16.mxu0 %v3138_v52 }
  0x96   : > { %831 = vmatmul.mubr.bf16.vlgmr.msra.gmra.mrb[0].mxu1 %v666_v62  ;;  %v3196_v62 = vld [vmem:[%s4134_s1 + $0x5e0] ss:$8 sps:$4 sm:$0xff]  }
  0x97   : > { %1762 = vmatmul.mubr.bf16.vlgmr.msra.gmra.mrb[0].mxu0 %v1597_v0  ;;  %1028 = vmatpush1.bf16.msra.mxu1 %v3129_v54 }
  0x98   : > { %1981 = vmatpush1.bf16.msra.mxu0 %v3136_v63  ;;  %1029 = vmatprep.subr.bf16.mxu1 %v3141_v61  ;;  %v4014_v63 = vld [vmem:[%s3397_s8 + $0x10] sm:$0xff] }
  0x99   : > { %1982 = vmatprep.subr.bf16.mxu0 %v3144_v2  ;;  %2504 = vmatprep.mubr.msk.bf16.mxu1 %vm394_vm2, %v668_v60  ;;  %v3156_v60 = vld [vmem:[%s4134_s1 + $0x574] ss:$8 sps:$4 sm:$0xff]   ;;  %v2531_v0 = vcombine.low %v4014_v63, %v3865_v1  ;;  %v3202_v1 = vld [vmem:[%s4134_s1 + $0x5f0] ss:$8 sps:$4 sm:$0xff]  }
  0x9a   : > { %2718 = vmatprep.mubr.msk.bf16.mxu0 %vm394_vm2, %v3718_v3  ;;  %v898_v3 = vsel %vm892_vm5, %v896_v11, %v3893_v12  ;;  %v3209_v11 = vld [vmem:[%s4134_s1 + $0x600] ss:$8 sps:$4 sm:$0xff]  }
  0x9b   : > { %1030 = vmatpush1.bf16.msra.mxu1 %v3139_v8  ;;  %v894_v7 = vrot.slane %v2531_v0, 3 }
  0x9c   : > { %1983 = vmatpush1.bf16.msra.mxu0 %v3142_v9  ;;  %1031 = vmatprep.subr.bf16.mxu1 %v3147_v10  ;;  %v3211_v10 = vld [vmem:[%s4134_s1 + $0x604] ss:$8 sps:$4 sm:$0xff]  }
  0x9d   : > { %1984 = vmatprep.subr.bf16.mxu0 %v3150_v40  ;;  %v895_v40 = vsel %vm892_vm5, %v893_v6, %v894_v7 }
  0x9e   : > { %841 = vmatmul.mubr.bf16.gmra.mrb[12].mxu1 %v665_v45  ;;  %v3983_v45 = vcombine.low %v3247_v39, %v3826_v38  ;;  %v3187_v38 = vld [vmem:[%s4134_s1 + $0x2d0] ss:$8 sps:$4 sm:$0xff]  }
  0x9f   : > { %1772 = vmatmul.mubr.bf16.gmra.mrb[12].mxu0 %v1596_v53  ;;  %1032 = vmatpush1.bf16.msra.mxu1 %v3145_v15  ;;  %v1822_v53 = vshll.u32 %v3821_v36, 16  ;;  %v3195_v36 = vld [vmem:[%s4134_s1 + $0x2e4] ss:$8 sps:$4 sm:$0xff]   ;;  %v3214_v15 = vld [vmem:[%s4134_s1 + $0x614] ss:$8 sps:$4 sm:$0xff]  }
  0xa0   : > { %1985 = vmatpush1.bf16.msra.mxu0 %v3148_v46  ;;  %1033 = vmatprep.subr.bf16.mxu1 %v3153_v51  ;;  %v1827_v52 = vshrl.u32 %v3983_v45, 16  ;;  %v1830_v54 = vshll.u32 %v3983_v45, 16  ;;  %v2796_v46 = vcombine.high %v4040_v58, %v4014_v63  ;;  %v3212_v51 = vld [vmem:[%s4134_s1 + $0x610] ss:$8 sps:$4 sm:$0xff]  }
  0xa1   : > { %1986 = vmatprep.subr.bf16.mxu0 %v3156_v60  ;;  %2557 = vmatprep.mubr.msk.bf16.mxu1 %vm394_vm2, %v898_v3  ;;  %v1824_v57 = vrot.slane %v1822_v53, 3  ;;  %v3217_v60 = vld [vmem:[%s4134_s1 + $0x624] ss:$8 sps:$4 sm:$0xff]  }
  0xa2   : > { %2769 = vmatprep.mubr.msk.bf16.mxu0 %vm394_vm2, %v1851_v16  ;;  %v1829_v61 = vrot.slane %v1827_v52, 2  ;;  %v1832_v2 = vrot.slane %v1830_v54, 3  ;;  %v2071_v3 = vrot.slane %v2796_v46, 3  ;;  %v2072_v16 = vrot.slane %v3840_v47, 3  ;;  %v3218_v47 = vld [vmem:[%s4134_s1 + $0x630] ss:$8 sps:$4 sm:$0xff]  }
  0xa3   : > { %1034 = vmatpush1.bf16.msra.mxu1 %v3151_v17  ;;  %v1825_v8 = vor.u32 %v1824_v57, %v1821_v56  ;;  %v3215_v17 = vld [vmem:[%s4134_s1 + $0x620] ss:$8 sps:$4 sm:$0xff]  }
  0xa4   : > { %1987 = vmatpush1.bf16.msra.mxu0 %v3154_v18  ;;  %1035 = vmatprep.subr.bf16.mxu1 %v3159_v19  ;;  %v1833_v9 = vor.u32 %v1832_v2, %v1829_v61  ;;  %v3220_v18 = vld [vmem:[%s4134_s1 + $0x634] ss:$8 sps:$4 sm:$0xff]   ;;  %v3221_v19 = vld [vmem:[%s4134_s1 + $0x640] ss:$8 sps:$4 sm:$0xff]  }
  0xa5   : > { %1988 = vmatprep.subr.bf16.mxu0 %v3162_v20  ;;  %v3226_v20 = vld [vmem:[%s4134_s1 + $0x654] ss:$8 sps:$4 sm:$0xff]  }
  0xa6   : > { %v1834_v13 = vsel %vm1817_vm6, %v1825_v8, %v1833_v9 }
  0xa7   : > { %1036 = vmatpush1.bf16.msra.mxu1 %v3157_v21  ;;  %v3224_v21 = vld [vmem:[%s4134_s1 + $0x650] ss:$8 sps:$4 sm:$0xff]  }
  0xa8   : > { %1989 = vmatpush1.bf16.msra.mxu0 %v3160_v22  ;;  %1037 = vmatprep.subr.bf16.mxu1 %v3165_v23  ;;  %v3229_v22 = vld [vmem:[%s4134_s1 + $0x664] ss:$8 sps:$4 sm:$0xff]   ;;  %v3227_v23 = vld [vmem:[%s4134_s1 + $0x660] ss:$8 sps:$4 sm:$0xff]  }
  0xa9   : > { %1990 = vmatprep.subr.bf16.mxu0 %v3168_v24  ;;  %v3232_v24 = vld [vmem:[%s4134_s1 + $0x674] ss:$8 sps:$4 sm:$0xff]  }
  0xab   : > { %1038 = vmatpush1.bf16.msra.mxu1 %v3163_v25  ;;  %v3230_v25 = vld [vmem:[%s4134_s1 + $0x670] ss:$8 sps:$4 sm:$0xff]  }
  0xac   : > { %1991 = vmatpush1.bf16.msra.mxu0 %v3166_v26  ;;  %1039 = vmatprep.subr.bf16.mxu1 %v3171_v27  ;;  %v3235_v26 = vld [vmem:[%s4134_s1 + $0x684] ss:$8 sps:$4 sm:$0xff]   ;;  %v3233_v27 = vld [vmem:[%s4134_s1 + $0x680] ss:$8 sps:$4 sm:$0xff]  }
  0xad   : > { %1992 = vmatprep.subr.bf16.mxu0 %v3174_v28  ;;  %v3238_v28 = vld [vmem:[%s4134_s1 + $0x694] ss:$8 sps:$4 sm:$0xff]  }
  0xaf   : > { %1040 = vmatpush1.bf16.msra.mxu1 %v3169_v29  ;;  %v3236_v29 = vld [vmem:[%s4134_s1 + $0x690] ss:$8 sps:$4 sm:$0xff]  }
  0xb0   : > { %1993 = vmatpush1.bf16.msra.mxu0 %v3172_v30  ;;  %1041 = vmatprep.subr.bf16.mxu1 %v3177_v31  ;;  %v3241_v30 = vld [vmem:[%s4134_s1 + $0x6a4] ss:$8 sps:$4 sm:$0xff]   ;;  %v3239_v31 = vld [vmem:[%s4134_s1 + $0x6a0] ss:$8 sps:$4 sm:$0xff]  }
  0xb1   : > { %1994 = vmatprep.subr.bf16.mxu0 %v3180_v32  ;;  %v2795_v32 = vcombine.low %v4040_v58, %v4014_v63 }
  0xb3   : > { %1042 = vmatpush1.bf16.msra.mxu1 %v3175_v33  ;;  %v3244_v33 = vld [vmem:[%s4134_s1 + $0x6b4] ss:$8 sps:$4 sm:$0xff]  }
  0xb4   : > { %1995 = vmatpush1.bf16.msra.mxu0 %v3178_v34  ;;  %1043 = vmatprep.subr.bf16.mxu1 %v3183_v35  ;;  %v3242_v34 = vld [vmem:[%s4134_s1 + $0x6b0] ss:$8 sps:$4 sm:$0xff]   ;;  %v2068_v35 = vrot.slane %v2795_v32, 3 }
  0xb5   : > { %1996 = vmatprep.subr.bf16.mxu0 %v3186_v37  ;;  %v2069_v37 = vrot.slane %v3983_v45, 3 }
  0xb7   : > { %1044 = vmatpush1.bf16.msra.mxu1 %v3181_v41  ;;  %v2070_v41 = vsel %vm892_vm5, %v2068_v35, %v2069_v37 }
  0xb8   : > { %1997 = vmatpush1.bf16.msra.mxu0 %v3184_v44  ;;  %1045 = vmatprep.subr.bf16.mxu1 %v3189_v43 }
  0xb9   : > { %1998 = vmatprep.subr.bf16.mxu0 %v3192_v49 }
  0xbb   : > { %1046 = vmatpush1.bf16.msra.mxu1 %v3187_v38 }
  0xbc   : > { %1999 = vmatpush1.bf16.msra.mxu0 %v3190_v48  ;;  %1047 = vmatprep.subr.bf16.mxu1 %v3195_v36 }
  0xbd   : > { %2000 = vmatprep.subr.bf16.mxu0 %v3198_v55 }
  0xbf   : > { %1048 = vmatpush1.bf16.msra.mxu1 %v3193_v59 }
  0xc0   : > { %2001 = vmatpush1.bf16.msra.mxu0 %v3196_v62  ;;  %1049 = vmatprep.subr.bf16.mxu1 %v3201_v4 }
  0xc1   : > { %2002 = vmatprep.subr.bf16.mxu0 %v3204_v42 }
  0xc3   : > { %1050 = vmatpush1.bf16.msra.mxu1 %v3199_v5 }
  0xc4   : > { %2003 = vmatpush1.bf16.msra.mxu0 %v3202_v1  ;;  %2831 = vmatprep.subr.bf16.mxu1 %v3211_v10 }
  0xc5   : > { %2202 = vmatprep.subr.bf16.mxu0 %v3211_v10 }
  0xc6   : > { %1060 = vmatmul.mubr.bf16.vlgmr.msra.gmra.mrb[0].mxu1 %v895_v40 }
  0xc7   : > { %2013 = vmatmul.mubr.bf16.vlgmr.msra.gmra.mrb[0].mxu0 %v1834_v13  ;;  %2843 = vmatpush1.bf16.msra.mxu1 %v3209_v11 }
  0xc8   : > { %2203 = vmatpush1.bf16.msra.mxu0 %v3209_v11  ;;  %2832 = vmatprep.subr.bf16.mxu1 %v3214_v15 }
  0xc9   : > { %2204 = vmatprep.subr.bf16.mxu0 %v3214_v15  ;;  %2558 = vmatprep.mubr.msk.bf16.mxu1 %vm394_vm2, %v3893_v12  ;;  %v2073_v12 = vsel %vm892_vm5, %v2071_v3, %v2072_v16 }
  0xca   : > { %2770 = vmatprep.mubr.msk.bf16.mxu0 %vm394_vm2, %v3895_v14  ;;  %v3223_v14 = vld [vmem:[%s4134_s1 + $0x644] ss:$8 sps:$4 sm:$0xff]  }
  0xcb   : > { %2844 = vmatpush1.bf16.msra.mxu1 %v3212_v51 }
  0xcc   : > { %2205 = vmatpush1.bf16.msra.mxu0 %v3212_v51  ;;  %2833 = vmatprep.subr.bf16.mxu1 %v3217_v60 }
  0xcd   : > { %2206 = vmatprep.subr.bf16.mxu0 %v3217_v60 }
  0xce   : > { %1070 = vmatmul.mubr.bf16.gmra.mrb[16].mxu1 %v894_v7 }
  0xcf   : > { %2023 = vmatmul.mubr.bf16.gmra.mrb[16].mxu0 %v1833_v9  ;;  %2845 = vmatpush1.bf16.msra.mxu1 %v3215_v17 }
  0xd0   : > { %2207 = vmatpush1.bf16.msra.mxu0 %v3215_v17  ;;  %2834 = vmatprep.subr.bf16.mxu1 %v3220_v18 }
  0xd1   : > { %2208 = vmatprep.subr.bf16.mxu0 %v3220_v18  ;;  %2821 = vmatprep.mubr.msk.bf16.mxu0 %vm394_vm2, %v2073_v12 }
  0xd2   : > { %2822 = vmatprep.mubr.msk.bf16.mxu1 %vm394_vm2, %v2072_v16 }
  0xd3   : > { %2846 = vmatpush1.bf16.msra.mxu1 %v3218_v47 }
  0xd4   : > { %2209 = vmatpush1.bf16.msra.mxu0 %v3218_v47  ;;  %2835 = vmatprep.subr.bf16.mxu1 %v3223_v14 }
  0xd5   : > { %2210 = vmatprep.subr.bf16.mxu0 %v3223_v14 }
  0xd7   : > { %2847 = vmatpush1.bf16.msra.mxu1 %v3221_v19 }
  0xd8   : > { %2211 = vmatpush1.bf16.msra.mxu0 %v3221_v19  ;;  %2836 = vmatprep.subr.bf16.mxu1 %v3226_v20 }
  0xd9   : > { %2212 = vmatprep.subr.bf16.mxu0 %v3226_v20 }
  0xdb   : > { %2848 = vmatpush1.bf16.msra.mxu1 %v3224_v21 }
  0xdc   : > { %2213 = vmatpush1.bf16.msra.mxu0 %v3224_v21  ;;  %2837 = vmatprep.subr.bf16.mxu1 %v3229_v22 }
  0xdd   : > { %2214 = vmatprep.subr.bf16.mxu0 %v3229_v22 }
  0xdf   : > { %2849 = vmatpush1.bf16.msra.mxu1 %v3227_v23 }
  0xe0   : > { %2215 = vmatpush1.bf16.msra.mxu0 %v3227_v23  ;;  %2838 = vmatprep.subr.bf16.mxu1 %v3232_v24 }
  0xe1   : > { %2216 = vmatprep.subr.bf16.mxu0 %v3232_v24  ;;  %v2261_v24 = vlaneseq }
  0xe3   : > { %2850 = vmatpush1.bf16.msra.mxu1 %v3230_v25 }
  0xe4   : > { %2217 = vmatpush1.bf16.msra.mxu0 %v3230_v25  ;;  %2839 = vmatprep.subr.bf16.mxu1 %v3235_v26  ;;  %v2262_v25 = vshrl.u32 %v2261_v24, 7 }
  0xe5   : > { %2218 = vmatprep.subr.bf16.mxu0 %v3235_v26 }
  0xe6   : > { %v2263_v26 = vsub.s32 0, %v2262_v25 }
  0xe7   : > { %2851 = vmatpush1.bf16.msra.mxu1 %v3233_v27 }
  0xe8   : > { %2219 = vmatpush1.bf16.msra.mxu0 %v3233_v27  ;;  %2840 = vmatprep.subr.bf16.mxu1 %v3238_v28  ;;  %v2259_v27 = vld [vmem:[%s4135_s2] sm:$0x3] }
  0xe9   : > { %2220 = vmatprep.subr.bf16.mxu0 %v3238_v28  ;;  %v2267_v28 = vsub.s32 1, %v2262_v25 }
  0xeb   : > { %2852 = vmatpush1.bf16.msra.mxu1 %v3236_v29  ;;  %v2268_v32 = vrot.slane %v2259_v27, %v2267_v28 }
  0xec   : > { %2221 = vmatpush1.bf16.msra.mxu0 %v3236_v29  ;;  %2841 = vmatprep.subr.bf16.mxu1 %v3241_v30  ;;  %v2264_v29 = vrot.slane %v2259_v27, %v2263_v26 }
  0xed   : > { %2222 = vmatprep.subr.bf16.mxu0 %v3241_v30 }
  0xef   : > { %2853 = vmatpush1.bf16.msra.mxu1 %v3239_v31 }
  0xf0   : > { %2223 = vmatpush1.bf16.msra.mxu0 %v3239_v31  ;;  %2842 = vmatprep.subr.bf16.mxu1 %v3244_v33 }
  0xf1   : > { %2224 = vmatprep.subr.bf16.mxu0 %v3244_v33 }
  0xf3   : > { %2854 = vmatpush1.bf16.msra.mxu1 %v3242_v34 }
  0xf4   : > { %2225 = vmatpush1.bf16.msra.mxu0 %v3242_v34 }
  0xf6   : > { %2245 = vmatmul.mubr.bf16.vlgmr.msra.gmra.mrb[20].mxu1 %v2069_v37 }
  0xf7   : > { %2235 = vmatmul.mubr.bf16.vlgmr.msra.gmra.mrb[0].mxu0 %v2070_v41 }
 0x111   : > { %v445_v39 = vpop.f32.mrb[4].mxu1 }
 0x112   : > { %v1322_v44 = vpop.f32.mrb[4].mxu0  ;;  %v447_v49 = vpop.f32.mrb[5].mxu1 }
 0x113   : > { %v1324_v43 = vpop.f32.mrb[5].mxu0  ;;  %v449_v53 = vpop.f32.mrb[6].mxu1 }
 0x114   : > { %v1326_v50 = vpop.f32.mrb[6].mxu0  ;;  %v450_v48 = vpop.f32.mrb[7].mxu1 }
 0x115   : > { %v1327_v38 = vpop.f32.mrb[7].mxu0 }
 0x141   : > { %v625_v52 = vpop.f32.mrb[8].mxu1 }
 0x142   : > { %v1536_v54 = vpop.f32.mrb[8].mxu0  ;;  %v626_v36 = vadd.f32 %v625_v52, %v445_v39  ;;  %v627_v45 = vpop.f32.mrb[9].mxu1 }
 0x143   : > { %v1538_v55 = vpop.f32.mrb[9].mxu0  ;;  %v628_v56 = vadd.f32 %v627_v45, %v447_v49  ;;  %v629_v59 = vpop.f32.mrb[10].mxu1 }
 0x144   : > { %v1540_v57 = vpop.f32.mrb[10].mxu0  ;;  %v630_v63 = vpop.f32.mrb[11].mxu1 }
 0x145   : > { %v1541_v62 = vpop.f32.mrb[11].mxu0 }
 0x171   : > { %v842_v0 = vpop.f32.mrb[12].mxu1 }
 0x172   : > { %v1773_v61 = vpop.f32.mrb[12].mxu0  ;;  %v853_v2 = vadd.f32 %v842_v0, %v626_v36  ;;  %v844_v4 = vpop.f32.mrb[13].mxu1 }
 0x173   : > { %v1775_v42 = vpop.f32.mrb[13].mxu0  ;;  %v854_v5 = vadd.f32 %v844_v4, %v628_v56  ;;  %v846_v6 = vpop.f32.mrb[14].mxu1 }
 0x174   : > { %v1777_v1 = vpop.f32.mrb[14].mxu0  ;;  %v847_v8 = vpop.f32.mrb[15].mxu1 }
 0x175   : > { %v1778_v7 = vpop.f32.mrb[15].mxu0 }
 0x199   : > { %v1061_v9 = vpop.f32.mrb[0].mxu1 }
 0x19a   : > { %v1063_v10 = vpop.f32.mrb[1].mxu1 }
 0x19b   : > { %v1065_v40 = vpop.f32.mrb[2].mxu1 }
 0x19c   : > { %v1067_v11 = vpop.f32.mrb[3].mxu1 }
 0x1a1   : > { %v1071_v13 = vpop.f32.mrb[16].mxu1 }
 0x1a2   : > { %v2024_v58 = vpop.f32.mrb[16].mxu0  ;;  %v1082_v15 = vadd.f32 %v1071_v13, %v853_v2  ;;  %v1073_v46 = vpop.f32.mrb[17].mxu1 }
 0x1a3   : > { %v2026_v51 = vpop.f32.mrb[17].mxu0  ;;  %v1083_v60 = vadd.f32 %v1073_v46, %v854_v5  ;;  %v1075_v3 = vpop.f32.mrb[18].mxu1 }
 0x1a4   : > { %v2028_v16 = vpop.f32.mrb[18].mxu0  ;;  %v1333_v17 = vadd.f32 %v1322_v44, %v1082_v15  ;;  %v1076_v18 = vpop.f32.mrb[19].mxu1 }
 0x1a5   : > { %v2029_v12 = vpop.f32.mrb[19].mxu0  ;;  %v1334_v47 = vadd.f32 %v1324_v43, %v1083_v60 }
 0x1a6   : > { %v1547_v14 = vadd.f32 %v1536_v54, %v1333_v17 }
 0x1a7   : > { %v1548_v19 = vadd.f32 %v1538_v55, %v1334_v47 }
 0x1a8   : > { %v1784_v20 = vadd.f32 %v1773_v61, %v1547_v14 }
 0x1a9   : > { %v1785_v21 = vadd.f32 %v1775_v42, %v1548_v19 }
 0x1aa   : > { %v2035_v22 = vadd.f32 %v2024_v58, %v1784_v20 }
 0x1ab   : > { %v2036_v23 = vadd.f32 %v2026_v51, %v1785_v21 }
 0x1c9   : > { %v2246_v31 = vpop.f32.mrb[20].mxu1 }
 0x1ca   : > { %v2236_v30 = vpop.f32.mrb[0].mxu0  ;;  %v2257_v34 = vadd.f32 %v2246_v31, %v2035_v22  ;;  %v2248_v37 = vpop.f32.mrb[21].mxu1 }
 0x1cb   : > { %v2855_v33 = vadd.f32 %v2236_v30, %v1061_v9  ;;  %v2238_v35 = vpop.f32.mrb[1].mxu0  ;;  %v2258_v44 = vadd.f32 %v2248_v37, %v2036_v23  ;;  %v2250_v43 = vpop.f32.mrb[22].mxu1 }
 0x1cc   : > { %v2856_v41 = vadd.f32 %v2238_v35, %v1063_v10  ;;  %v2240_v39 = vpop.f32.mrb[2].mxu0  ;;  %v2275_v50 = vadd.f32 %v2264_v29, %v2257_v34  ;;  %v2251_v48 = vpop.f32.mrb[23].mxu1 }
 0x1cd   : > { %v2271_v49 = vadd.f32 %v2855_v33, %v2264_v29  ;;  %v2857_v53 = vadd.f32 %v2240_v39, %v1065_v40  ;;  %v2242_v38 = vpop.f32.mrb[3].mxu0  ;;  %v2276_v54 = vadd.f32 %v2268_v32, %v2258_v44 }
 0x1ce   : > { %v2272_v52 = vadd.f32 %v2856_v41, %v2268_v32  ;;  %v2858_v36 = vadd.f32 %v2242_v38, %v1067_v11  ;;  %v2281_v55 = vmax.f32 %v2275_v50, 0.0 }
 0x1cf   : > { %v2277_v45 = vmax.f32 %v2271_v49, 0.0  ;;  %v2273_v56 = vadd.f32 %v2857_v53, %v2264_v29  ;;  %v2282_v59 = vmax.f32 %v2276_v54, 0.0 }
 0x1d0   : > { %v2278_v57 = vmax.f32 %v2272_v52, 0.0  ;;  %v2274_v62 = vadd.f32 %v2858_v36, %v2268_v32 }
 0x1d1   : > { %v2279_v63 = vmax.f32 %v2273_v56, 0.0  ;;  %v2830_v61 = vpack.c.bf16 %v2282_v59, %v2281_v55 }
 0x1d2   : > { %v2828_v0 = vpack.c.bf16 %v2278_v57, %v2277_v45  ;;  %v2280_v2 = vmax.f32 %v2274_v62, 0.0 }
 0x1d3   : > { %2308 = vst.msk [vmem:[%s170_s18 + $0x10] sm:$0xff] %vm2305_vm9, %v2830_v61 }
 0x1d4   : > { %2306 = vst.msk [vmem:[%s170_s18] sm:$0xff] %vm2305_vm9, %v2828_v0  ;;  %v2829_v4 = vpack.c.bf16 %v2280_v2, %v2279_v63 }
 0x1d6   : > { %2307 = vst.msk [vmem:[%s170_s18 + $0x8] sm:$0xff] %vm2305_vm9, %v2829_v4 }
 0x1d7 PF: > { %s13_s12 = sadd.s32 1, %s3255_s12  }
 0x1d8   : > { %p10_p4 = scmp.ge.s32.totalorder %s13_s12, 4  }
 0x1da   :  { %12 = sbr.rel (!%p10_p4) target bundleno = 1 (0x1), region = 70 }

// kernel: model_c_forward.14
= control target key start
LH: loop header
LB: loop body
LE: loop exit
PB: predicated region body
PF: predicated region fallthrough
CT: control target
= control target key end

     0   :  { %s5044_s12 = smov 0   ;;  %s6479_s0 = inlined_call_operand.vmem [shape: bf16[2,32,768], index: 0, kind: input, shape index: {}]   ;;  %s6480_s1 = inlined_call_operand.vmem [shape: bf16[4,768,192], index: 1, kind: input, shape index: {}]   ;;  %s6481_s2 = inlined_call_operand.vmem [shape: f32[1,192], index: 2, kind: input, shape index: {}]   ;;  %s6482_s3 = inlined_call_operand.vmem [shape: bf16[2,20,192], index: 3, kind: output, shape index: {}]  }
   0x1 LB: > { %s3615_s13 = sadd.s32 4294967295, %s5022_s12   ;;  %p3619_p0 = scmp.ge.s32.totalorder %s5022_s12, 1  ;;  %s5022_s12 = sphi %s5044_s12, %s13_s12  }
   0x2   : > { %p137_p1 = scmp.lt.s32.totalorder %s5022_s12, 3 }
   0x4   : > { %p138_p2 = pnand %p3619_p0, %p137_p1 }
   0x5   : > { %v4392_v0 = vld [vmem:[%s6480_s1 + $0x304] ss:$8 sps:$4 sm:$0xff] (!%p138_p2)   ;;  %v4396_v2 = vld [vmem:[%s6480_s1 + $0x300] ss:$8 sps:$4 sm:$0xff] (!%p138_p2)   ;;  %v4398_v4 = vld [vmem:[%s6480_s1 + $0x314] ss:$8 sps:$4 sm:$0xff] (!%p138_p2)  }
   0x6   : > { %141 = sbr.rel (%p138_p2) target bundleno = 624 (0x270), region = 32  ;;  %v4394_v1 = vld [vmem:[%s6480_s1 + $0x604] ss:$8 sps:$4 sm:$0xff] (!%p138_p2)   ;;  %998 = vmatprep.subr.bf16.mxu1 (!%p138_p2), %v4392_v0  ;;  %v4397_v3 = vld [vmem:[%s6480_s1 + $0x600] ss:$8 sps:$4 sm:$0xff] (!%p138_p2)   ;;  %p161_p3 = scmp.lt.s32.totalorder (!%p138_p2), %s3615_s13, 1 }
   0x7   : > { %2563 = vmatprep.subr.bf16.mxu0 (!%p138_p2), %v4394_v1  ;;  %999 = vmatpush1.bf16.msra.mxu1 (!%p138_p2), %v4396_v2  ;;  %v4400_v5 = vld [vmem:[%s6480_s1 + $0x614] ss:$8 sps:$4 sm:$0xff] (!%p138_p2)   ;;  %v4402_v6 = vld [vmem:[%s6480_s1 + $0x310] ss:$8 sps:$4 sm:$0xff] (!%p138_p2)   ;;  %v4404_v8 = vld [vmem:[%s6480_s1 + $0x324] ss:$8 sps:$4 sm:$0xff] (!%p138_p2)  }
   0x8   : > { %2564 = vmatpush1.bf16.msra.mxu0 (!%p138_p2), %v4397_v3  ;;  %1000 = vmatprep.subr.bf16.mxu1 (!%p138_p2), %v4398_v4  ;;  %v4403_v7 = vld [vmem:[%s6480_s1 + $0x610] ss:$8 sps:$4 sm:$0xff] (!%p138_p2)   ;;  %v4406_v9 = vld [vmem:[%s6480_s1 + $0x624] ss:$8 sps:$4 sm:$0xff] (!%p138_p2)   ;;  %v4408_v10 = vld [vmem:[%s6480_s1 + $0x320] ss:$8 sps:$4 sm:$0xff] (!%p138_p2)  }
   0x9   : > { %2565 = vmatprep.subr.bf16.mxu0 (!%p138_p2), %v4400_v5  ;;  %v4409_v11 = vld [vmem:[%s6480_s1 + $0x620] ss:$8 sps:$4 sm:$0xff] (!%p138_p2)   ;;  %v4410_v12 = vld [vmem:[%s6480_s1 + $0x334] ss:$8 sps:$4 sm:$0xff] (!%p138_p2)   ;;  %v4414_v14 = vld [vmem:[%s6480_s1 + $0x330] ss:$8 sps:$4 sm:$0xff] (!%p138_p2)  }
   0xa   : > { %v4412_v13 = vld [vmem:[%s6480_s1 + $0x634] ss:$8 sps:$4 sm:$0xff] (!%p138_p2)   ;;  %v4415_v15 = vld [vmem:[%s6480_s1 + $0x630] ss:$8 sps:$4 sm:$0xff] (!%p138_p2)   ;;  %v4416_v16 = vld [vmem:[%s6480_s1 + $0x344] ss:$8 sps:$4 sm:$0xff] (!%p138_p2)  }
   0xb   : > { %1001 = vmatpush1.bf16.msra.mxu1 (!%p138_p2), %v4402_v6  ;;  %v4418_v17 = vld [vmem:[%s6480_s1 + $0x644] ss:$8 sps:$4 sm:$0xff] (!%p138_p2)   ;;  %v4420_v18 = vld [vmem:[%s6480_s1 + $0x340] ss:$8 sps:$4 sm:$0xff] (!%p138_p2)   ;;  %v4422_v20 = vld [vmem:[%s6480_s1 + $0x354] ss:$8 sps:$4 sm:$0xff] (!%p138_p2)  }
   0xc   : > { %2566 = vmatpush1.bf16.msra.mxu0 (!%p138_p2), %v4403_v7  ;;  %1002 = vmatprep.subr.bf16.mxu1 (!%p138_p2), %v4404_v8  ;;  %v4421_v19 = vld [vmem:[%s6480_s1 + $0x640] ss:$8 sps:$4 sm:$0xff] (!%p138_p2)   ;;  %v4424_v21 = vld [vmem:[%s6480_s1 + $0x654] ss:$8 sps:$4 sm:$0xff] (!%p138_p2)   ;;  %v4426_v22 = vld [vmem:[%s6480_s1 + $0x350] ss:$8 sps:$4 sm:$0xff] (!%p138_p2)  }
   0xd   : > { %2567 = vmatprep.subr.bf16.mxu0 %v4406_v9  ;;  %v4427_v23 = vld [vmem:[%s6480_s1 + $0x650] ss:$8 sps:$4 sm:$0xff]   ;;  %v4428_v24 = vld [vmem:[%s6480_s1 + $0x364] ss:$8 sps:$4 sm:$0xff]   ;;  %v4432_v26 = vld [vmem:[%s6480_s1 + $0x360] ss:$8 sps:$4 sm:$0xff]  }
   0xe   : > { %v4430_v25 = vld [vmem:[%s6480_s1 + $0x664] ss:$8 sps:$4 sm:$0xff]   ;;  %v4433_v27 = vld [vmem:[%s6480_s1 + $0x660] ss:$8 sps:$4 sm:$0xff]   ;;  %v4434_v28 = vld [vmem:[%s6480_s1 + $0x374] ss:$8 sps:$4 sm:$0xff]  }
   0xf   : > { %1003 = vmatpush1.bf16.msra.mxu1 %v4408_v10  ;;  %v4436_v29 = vld [vmem:[%s6480_s1 + $0x674] ss:$8 sps:$4 sm:$0xff]   ;;  %v4438_v30 = vld [vmem:[%s6480_s1 + $0x370] ss:$8 sps:$4 sm:$0xff]   ;;  %v4440_v32 = vld [vmem:[%s6480_s1 + $0x384] ss:$8 sps:$4 sm:$0xff]  }
  0x10   : > { %2568 = vmatpush1.bf16.msra.mxu0 %v4409_v11  ;;  %1004 = vmatprep.subr.bf16.mxu1 %v4410_v12  ;;  %v4439_v31 = vld [vmem:[%s6480_s1 + $0x670] ss:$8 sps:$4 sm:$0xff]   ;;  %v4442_v33 = vld [vmem:[%s6480_s1 + $0x684] ss:$8 sps:$4 sm:$0xff]   ;;  %v4444_v34 = vld [vmem:[%s6480_s1 + $0x380] ss:$8 sps:$4 sm:$0xff]  }
  0x11   : > { %2569 = vmatprep.subr.bf16.mxu0 %v4412_v13  ;;  %v4445_v35 = vld [vmem:[%s6480_s1 + $0x680] ss:$8 sps:$4 sm:$0xff]   ;;  %s6486_s13 = smov (!%p161_p3, %s3615_s13), 1  ;;  %v4446_v36 = vld [vmem:[%s6480_s1 + $0x394] ss:$8 sps:$4 sm:$0xff]   ;;  %vm2837_vm2 = vcmask 1044480  }
  0x12   : > { %v4448_v37 = vld [vmem:[%s6480_s1 + $0x694] ss:$8 sps:$4 sm:$0xff]   ;;  %v4450_v38 = vld [vmem:[%s6480_s1 + $0x390] ss:$8 sps:$4 sm:$0xff]   ;;  %s4382_s17 = smul.u32 96, %s6486_s13  ;;  %vm3551_vm3 = vcmask 1043456  }
  0x13   : > { %1005 = vmatpush1.bf16.msra.mxu1 %v4414_v14  ;;  %v4451_v39 = vld [vmem:[%s6480_s1 + $0x690] ss:$8 sps:$4 sm:$0xff]   ;;  %v4452_v40 = vld [vmem:[%s6480_s1 + $0x3a4] ss:$8 sps:$4 sm:$0xff]   ;;  %v4456_v42 = vld [vmem:[%s6480_s1 + $0x3a0] ss:$8 sps:$4 sm:$0xff]  }
  0x14   : > { %2570 = vmatpush1.bf16.msra.mxu0 %v4415_v15  ;;  %1006 = vmatprep.subr.bf16.mxu1 %v4416_v16  ;;  %v4454_v41 = vld [vmem:[%s6480_s1 + $0x6a4] ss:$8 sps:$4 sm:$0xff]   ;;  %v4457_v43 = vld [vmem:[%s6480_s1 + $0x6a0] ss:$8 sps:$4 sm:$0xff]   ;;  %s5194_s30 = scalar_lea.vmem %s6479_s0, %s4382_s17  ;;  %v4458_v44 = vld [vmem:[%s6480_s1 + $0x3b4] ss:$8 sps:$4 sm:$0xff]  }
  0x15   : > { %2571 = vmatprep.subr.bf16.mxu0 %v4418_v17  ;;  %v4460_v45 = vld [vmem:[%s6480_s1 + $0x6b4] ss:$8 sps:$4 sm:$0xff]   ;;  %v4462_v46 = vld [vmem:[%s6480_s1 + $0x3b0] ss:$8 sps:$4 sm:$0xff]   ;;  %v171_v48 = vld [vmem:[%s5194_s30] sm:$0xff]  ;;  %s4383_s15 = smul.u32 24, %s6486_s13 }
  0x16   : > { %v4463_v47 = vld [vmem:[%s6480_s1 + $0x6b0] ss:$8 sps:$4 sm:$0xff]   ;;  %vm415_vm0 = vsmask.f32 7424  ;;  %v4464_v51 = vld [vmem:[%s6480_s1 + $0x3c4] ss:$8 sps:$4 sm:$0xff]  }
  0x17   : > { %1007 = vmatpush1.bf16.msra.mxu1 %v4420_v18  ;;  %v174_v49 = vld [vmem:[%s5194_s30 + $0x18] sm:$0xff]  ;;  %v276_v50 = vld [vmem:[%s5194_s30 + $0x30] sm:$0x77]  ;;  %v4466_v52 = vld [vmem:[%s6480_s1 + $0x6c4] ss:$8 sps:$4 sm:$0xff]   ;;  %vm3552_vm4 = vcmask 523268   ;;  %s6461_s18 = scalar_lea.vmem %s6482_s3, %s4383_s15 }
  0x18   : > { %2572 = vmatpush1.bf16.msra.mxu0 %v4421_v19  ;;  %1008 = vmatprep.subr.bf16.mxu1 %v4422_v20  ;;  %v5217_v53 = vcombine.high %v171_v48, %v174_v49  ;;  %v5219_v54 = vcombine.high %v276_v50, %v276_v50  ;;  %v1811_v55 = vld [vmem:[%s5194_s30] sm:$0xcc]  ;;  %v4494_v61 = vld [vmem:[%s5194_s30 + $0x34] ss:$24 sps:$4 sm:$0x1f]   ;;  %v5232_v63 = vcombine.low %v171_v48, %v174_v49  ;;  %vm6463_vm5 = vmor %vm3552_vm4, %vm3551_vm3  ;;  %vm3556_vm6 = vcmask 1041408  }
  0x19   : > { %2573 = vmatprep.subr.bf16.mxu0 %v4424_v21  ;;  %v4468_v56 = vld [vmem:[%s6480_s1 + $0x3c0] ss:$8 sps:$4 sm:$0xff]   ;;  %v4025_v60 = vcombine.high %v1811_v55, %v174_v49  ;;  %vm1968_vm1 = vsmask.f32 5376  ;;  %v4024_v0 = vcombine.low %v1811_v55, %v174_v49  ;;  %v4470_v1 = vld [vmem:[%s6480_s1 + $0x3d4] ss:$8 sps:$4 sm:$0xff]   ;;  %v5246_v16 = vcombine.low %v276_v50, %v276_v50 }
  0x1a   : > { %v429_v57 = vshrl.u32 %v5217_v53, 16  ;;  %v431_v58 = vshll.u32 %v5217_v53, 16  ;;  %v436_v59 = vshll.u32 %v5219_v54, 16  ;;  %v4469_v62 = vld [vmem:[%s6480_s1 + $0x6c0] ss:$8 sps:$4 sm:$0xff]   ;;  %v1995_v7 = vshrl.u32 %v4494_v61, 16 }
  0x1b   : > { %1009 = vmatpush1.bf16.msra.mxu1 %v4426_v22  ;;  %v1987_v4 = vshrl.u32 %v4025_v60, 16  ;;  %v1990_v5 = vshll.u32 %v4025_v60, 16  ;;  %v4472_v6 = vld [vmem:[%s6480_s1 + $0x6d4] ss:$8 sps:$4 sm:$0xff]   ;;  %v1998_v8 = vshll.u32 %v4494_v61, 16  ;;  %v419_v17 = vshll.u32 %v5232_v63, 16 }
  0x1c   : > { %2574 = vmatpush1.bf16.msra.mxu0 %v4427_v23  ;;  %1010 = vmatprep.subr.bf16.mxu1 %v4428_v24  ;;  %v433_v2 = vrot.slane %v431_v58, 1  ;;  %v5237_v3 = vrot.slane %v436_v59, 1  ;;  %v4502_v12 = vld [vmem:[%s5194_s30 + $0x30] ss:$24 sps:$4 sm:$0x1f]   ;;  %v1997_v14 = vrot.slane %v1995_v7, 2 }
  0x1d   : > { %2575 = vmatprep.subr.bf16.mxu0 %v4430_v25  ;;  %v1989_v10 = vrot.slane %v1987_v4, 2  ;;  %v1992_v11 = vrot.slane %v1990_v5, 3  ;;  %v4474_v13 = vld [vmem:[%s6480_s1 + $0x3d0] ss:$8 sps:$4 sm:$0xff]   ;;  %v2000_v15 = vrot.slane %v1998_v8, 3  ;;  %v1970_v21 = vshrl.u32 %v4024_v0, 16 }
  0x1e   : > { %v434_v9 = vor.u32 %v433_v2, %v429_v57  ;;  %v4475_v18 = vld [vmem:[%s6480_s1 + $0x6d0] ss:$8 sps:$4 sm:$0xff]   ;;  %v1973_v22 = vshll.u32 %v4024_v0, 16  ;;  %v4476_v23 = vld [vmem:[%s6480_s1 + $0x3e4] ss:$8 sps:$4 sm:$0xff]   ;;  %v491_v48 = vshrl.u32 %v5219_v54, 16 }
  0x1f   : > { %1011 = vmatpush1.bf16.msra.mxu1 %v4432_v26  ;;  %v1993_v20 = vor.u32 %v1992_v11, %v1989_v10  ;;  %v4478_v24 = vld [vmem:[%s6480_s1 + $0x6e4] ss:$8 sps:$4 sm:$0xff]   ;;  %v2001_v25 = vor.u32 %v2000_v15, %v1997_v14  ;;  %v1978_v26 = vshrl.u32 %v4502_v12, 16  ;;  %v4490_v49 = vld [vmem:[%s6480_s1 + $0x400] ss:$8 sps:$4 sm:$0xff]   ;;  %v488_v58 = vshrl.u32 %v5246_v16, 16 }
  0x20   : > { %2576 = vmatpush1.bf16.msra.mxu0 %v4433_v27  ;;  %1012 = vmatprep.subr.bf16.mxu1 %v4434_v28  ;;  %v439_v19 = vsel %vm415_vm0, %v434_v9, %v5237_v3  ;;  %v1981_v27 = vshll.u32 %v4502_v12, 16  ;;  %v4480_v28 = vld [vmem:[%s6480_s1 + $0x3e0] ss:$8 sps:$4 sm:$0xff]   ;;  %v4505_v54 = vld [vmem:[%s6480_s1 + $0x414] ss:$8 sps:$4 sm:$0xff]   ;;  %vm3557_vm7 = vcmask 521220  }
  0x21   : > { %2577 = vmatprep.subr.bf16.mxu0 %v4436_v29  ;;  %v4481_v29 = vld [vmem:[%s6480_s1 + $0x6e0] ss:$8 sps:$4 sm:$0xff]   ;;  %1030 = vmatprep.mubr.bf16.mxu1 %v439_v19  ;;  %v4508_v55 = vld [vmem:[%s6480_s1 + $0x714] ss:$8 sps:$4 sm:$0xff]   ;;  %v4503_v57 = vld [vmem:[%s6480_s1 + $0x410] ss:$8 sps:$4 sm:$0xff]  }
  0x22   : > { %v4496_v50 = vld [vmem:[%s6480_s1 + $0x700] ss:$8 sps:$4 sm:$0xff]   ;;  %v4506_v59 = vld [vmem:[%s6480_s1 + $0x710] ss:$8 sps:$4 sm:$0xff]   ;;  %v4511_v60 = vld [vmem:[%s6480_s1 + $0x424] ss:$8 sps:$4 sm:$0xff]  }
  0x23   : > { %1013 = vmatpush1.bf16.msra.mxu1 %v4438_v30  ;;  %v2002_v30 = vsel %vm1968_vm1, %v1993_v20, %v2001_v25  ;;  %v4514_v61 = vld [vmem:[%s6480_s1 + $0x724] ss:$8 sps:$4 sm:$0xff]   ;;  %v4517_v2 = vld [vmem:[%s6480_s1 + $0x434] ss:$8 sps:$4 sm:$0xff]   ;;  %v4515_v4 = vld [vmem:[%s6480_s1 + $0x430] ss:$8 sps:$4 sm:$0xff]  }
  0x24   : > { %2578 = vmatpush1.bf16.msra.mxu0 %v4439_v31  ;;  %1014 = vmatprep.subr.bf16.mxu1 %v4440_v32  ;;  %v417_v31 = vshrl.u32 %v5232_v63, 16  ;;  %v421_v32 = vrot.slane %v419_v17, 1  ;;  %v4518_v5 = vld [vmem:[%s6480_s1 + $0x730] ss:$8 sps:$4 sm:$0xff]   ;;  %v4526_v7 = vld [vmem:[%s6480_s1 + $0x744] ss:$8 sps:$4 sm:$0xff]   ;;  %vm3558_vm8 = vmor %vm3557_vm7, %vm3556_vm6 }
  0x25   : > { %2579 = vmatprep.subr.bf16.mxu0 %v4442_v33  ;;  %v424_v33 = vshll.u32 %v5246_v16, 16  ;;  %2595 = vmatprep.mubr.bf16.mxu0 %v2002_v30  ;;  %v4521_v8 = vld [vmem:[%s6480_s1 + $0x440] ss:$8 sps:$4 sm:$0xff]   ;;  %v4529_v10 = vld [vmem:[%s6480_s1 + $0x454] ss:$8 sps:$4 sm:$0xff]  }
  0x26   : > { %v4524_v9 = vld [vmem:[%s6480_s1 + $0x740] ss:$8 sps:$4 sm:$0xff]   ;;  %v4532_v11 = vld [vmem:[%s6480_s1 + $0x754] ss:$8 sps:$4 sm:$0xff]   ;;  %v4527_v12 = vld [vmem:[%s6480_s1 + $0x450] ss:$8 sps:$4 sm:$0xff]  }
  0x27   : > { %1015 = vmatpush1.bf16.msra.mxu1 %v4444_v34  ;;  %v1972_v34 = vrot.slane %v1970_v21, 2  ;;  %v4535_v14 = vld [vmem:[%s6480_s1 + $0x464] ss:$8 sps:$4 sm:$0xff]   ;;  %v4533_v16 = vld [vmem:[%s6480_s1 + $0x460] ss:$8 sps:$4 sm:$0xff]  }
  0x28   : > { %2580 = vmatpush1.bf16.msra.mxu0 %v4445_v35  ;;  %1016 = vmatprep.subr.bf16.mxu1 %v4446_v36  ;;  %v1975_v35 = vrot.slane %v1973_v22, 3  ;;  %v1980_v36 = vrot.slane %v1978_v26, 2  ;;  %v4538_v15 = vld [vmem:[%s6480_s1 + $0x764] ss:$8 sps:$4 sm:$0xff]   ;;  %v4536_v17 = vld [vmem:[%s6480_s1 + $0x760] ss:$8 sps:$4 sm:$0xff]  }
  0x29   : > { %2581 = vmatprep.subr.bf16.mxu0 %v4448_v37  ;;  %v1983_v37 = vrot.slane %v1981_v27, 3  ;;  %v4544_v19 = vld [vmem:[%s6480_s1 + $0x774] ss:$8 sps:$4 sm:$0xff]   ;;  %v4539_v20 = vld [vmem:[%s6480_s1 + $0x470] ss:$8 sps:$4 sm:$0xff]  }
  0x2a   : > { %v4542_v21 = vld [vmem:[%s6480_s1 + $0x770] ss:$8 sps:$4 sm:$0xff]   ;;  %v4547_v22 = vld [vmem:[%s6480_s1 + $0x484] ss:$8 sps:$4 sm:$0xff]  }
  0x2b   : > { %1017 = vmatpush1.bf16.msra.mxu1 %v4450_v38  ;;  %v4482_v38 = vld [vmem:[%s6480_s1 + $0x3f4] ss:$8 sps:$4 sm:$0xff]   ;;  %v5399_v27 = vld [vmem:[%s5194_s30 + $0x8] sm:$0xcc] }
  0x2c   : > { %2582 = vmatpush1.bf16.msra.mxu0 %v4451_v39  ;;  %1018 = vmatprep.subr.bf16.mxu1 %v4452_v40  ;;  %v4484_v39 = vld [vmem:[%s6480_s1 + $0x6f4] ss:$8 sps:$4 sm:$0xff]   ;;  %v4486_v40 = vld [vmem:[%s6480_s1 + $0x3f0] ss:$8 sps:$4 sm:$0xff]  }
  0x2d   : > { %2583 = vmatprep.subr.bf16.mxu0 %v4454_v41  ;;  %v4487_v41 = vld [vmem:[%s6480_s1 + $0x6f0] ss:$8 sps:$4 sm:$0xff]  }
  0x2f   : > { %1019 = vmatpush1.bf16.msra.mxu1 %v4456_v42  ;;  %v422_v42 = vor.u32 %v421_v32, %v417_v31  ;;  %v4601_v31 = vld [vmem:[%s5194_s30 + $0x3c] ss:$24 sps:$4 sm:$0x1f]   ;;  %v4545_v32 = vld [vmem:[%s6480_s1 + $0x480] ss:$8 sps:$4 sm:$0xff]  }
  0x30   : > { %2584 = vmatpush1.bf16.msra.mxu0 %v4457_v43  ;;  %1020 = vmatprep.subr.bf16.mxu1 %v4458_v44  ;;  %v426_v43 = vrot.slane %v424_v33, 1  ;;  %v1976_v44 = vor.u32 %v1975_v35, %v1972_v34  ;;  %v4548_v35 = vld [vmem:[%s6480_s1 + $0x780] ss:$8 sps:$4 sm:$0xff]  }
  0x31   : > { %2585 = vmatprep.subr.bf16.mxu0 %v4460_v45  ;;  %v1984_v45 = vor.u32 %v1983_v37, %v1980_v36 }
  0x32   : > { %v490_v0 = vor.u32 %v488_v58, %v426_v43 }
  0x33   : > { %1021 = vmatpush1.bf16.msra.mxu1 %v4462_v46  ;;  %v4492_v46 = vld [vmem:[%s6480_s1 + $0x404] ss:$8 sps:$4 sm:$0xff]  }
  0x34   : > { %2586 = vmatpush1.bf16.msra.mxu0 %v4463_v47  ;;  %1022 = vmatprep.subr.bf16.mxu1 %v4464_v51  ;;  %v4498_v47 = vld [vmem:[%s6480_s1 + $0x704] ss:$8 sps:$4 sm:$0xff]   ;;  %v427_v51 = vsel %vm415_vm0, %v422_v42, %v426_v43  ;;  %v2032_v43 = vshll.u32 %v4601_v31, 16 }
  0x35   : > { %2587 = vmatprep.subr.bf16.mxu0 %v4466_v52  ;;  %v1985_v52 = vsel %vm1968_vm1, %v1976_v44, %v1984_v45 }
  0x37   : > { %1023 = vmatpush1.bf16.msra.mxu1 %v4468_v56  ;;  %v493_v56 = vor.u32 %v491_v48, %v5237_v3  ;;  %v4520_v3 = vld [vmem:[%s6480_s1 + $0x734] ss:$8 sps:$4 sm:$0xff]  }
  0x38   : > { %2588 = vmatpush1.bf16.msra.mxu0 %v4469_v62  ;;  %1024 = vmatprep.subr.bf16.mxu1 %v4470_v1  ;;  %v4509_v62 = vld [vmem:[%s6480_s1 + $0x420] ss:$8 sps:$4 sm:$0xff]  }
  0x39   : > { %2589 = vmatprep.subr.bf16.mxu0 %v4472_v6  ;;  %v4512_v1 = vld [vmem:[%s6480_s1 + $0x720] ss:$8 sps:$4 sm:$0xff]   ;;  %v4523_v6 = vld [vmem:[%s6480_s1 + $0x444] ss:$8 sps:$4 sm:$0xff]  }
  0x3b   : > { %1025 = vmatpush1.bf16.msra.mxu1 %v4474_v13  ;;  %v4530_v13 = vld [vmem:[%s6480_s1 + $0x750] ss:$8 sps:$4 sm:$0xff]  }
  0x3c   : > { %2590 = vmatpush1.bf16.msra.mxu0 %v4475_v18  ;;  %1026 = vmatprep.subr.bf16.mxu1 %v4476_v23  ;;  %v4541_v18 = vld [vmem:[%s6480_s1 + $0x474] ss:$8 sps:$4 sm:$0xff]   ;;  %v5386_v23 = vld [vmem:[%s5194_s30 + $0x8] sm:$0xff] }
  0x3d   : > { %2591 = vmatprep.subr.bf16.mxu0 %v4478_v24  ;;  %v5389_v24 = vld [vmem:[%s5194_s30 + $0x20] sm:$0xff] }
  0x3e   : > { %v5396_v26 = vcombine.high %v5386_v23, %v5389_v24  ;;  %v4027_v30 = vcombine.high %v5399_v27, %v5389_v24 }
  0x3f   : > { %1027 = vmatpush1.bf16.msra.mxu1 %v4480_v28  ;;  %v4550_v28 = vld [vmem:[%s6480_s1 + $0x784] ss:$8 sps:$4 sm:$0xff]  }
  0x40   : > { %2592 = vmatpush1.bf16.msra.mxu0 %v4481_v29  ;;  %1028 = vmatprep.subr.bf16.mxu1 %v4482_v38  ;;  %v453_v33 = vshrl.u32 %v5396_v26, 16  ;;  %v455_v34 = vshll.u32 %v5396_v26, 16  ;;  %v2021_v37 = vshrl.u32 %v4027_v30, 16  ;;  %v2024_v38 = vshll.u32 %v4027_v30, 16 }
  0x41   : > { %2593 = vmatprep.subr.bf16.mxu0 %v4484_v39  ;;  %v2029_v39 = vshrl.u32 %v4601_v31, 16 }
  0x42   : > { %v457_v42 = vrot.slane %v455_v34, 1  ;;  %v4587_v34 = vld [vmem:[%s6480_s1 + $0x4f0] ss:$8 sps:$4 sm:$0xff]  }
  0x43   : > { %1029 = vmatpush1.bf16.msra.mxu1 %v4486_v40  ;;  %v4553_v40 = vld [vmem:[%s6480_s1 + $0x494] ss:$8 sps:$4 sm:$0xff]  }
  0x44   : > { %2594 = vmatpush1.bf16.msra.mxu0 %v4487_v41  ;;  %1049 = vmatprep.subr.bf16.mxu1 %v4492_v46  ;;  %v4556_v41 = vld [vmem:[%s6480_s1 + $0x794] ss:$8 sps:$4 sm:$0xff]   ;;  %v2026_v46 = vrot.slane %v2024_v38, 3  ;;  %v458_v48 = vor.u32 %v457_v42, %v453_v33  ;;  %v4604_v38 = vld [vmem:[%s6480_s1 + $0x504] ss:$8 sps:$4 sm:$0xff]  }
  0x45   : > { %2614 = vmatprep.subr.bf16.mxu0 %v4498_v47  ;;  %v2031_v47 = vrot.slane %v2029_v39, 2  ;;  %v4592_v33 = vld [vmem:[%s6480_s1 + $0x7f4] ss:$8 sps:$4 sm:$0xff]  }
  0x46   : > { %1031 = vmatmul.mubr.bf16.vlgmr.msra.gmra.mrb[0].mxu1 %v427_v51  ;;  %v4551_v51 = vld [vmem:[%s6480_s1 + $0x490] ss:$8 sps:$4 sm:$0xff]  }
  0x47   : > { %2596 = vmatmul.mubr.bf16.vlgmr.msra.gmra.mrb[0].mxu0 %v1985_v52  ;;  %1050 = vmatpush1.bf16.msra.mxu1 %v4490_v49  ;;  %v2034_v49 = vrot.slane %v2032_v43, 3  ;;  %v4554_v52 = vld [vmem:[%s6480_s1 + $0x790] ss:$8 sps:$4 sm:$0xff]   ;;  %v4602_v43 = vld [vmem:[%s6480_s1 + $0x500] ss:$8 sps:$4 sm:$0xff]  }
  0x48   : > { %2615 = vmatpush1.bf16.msra.mxu0 %v4496_v50  ;;  %1051 = vmatprep.subr.bf16.mxu1 %v4505_v54 }
  0x49   : > { %2616 = vmatprep.subr.bf16.mxu0 %v4508_v55  ;;  %1040 = vmatprep.mubr.bf16.mxu1 %v493_v56  ;;  %v5436_v55 = vor.u32 %v2034_v49, %v2031_v47  ;;  %v4559_v56 = vld [vmem:[%s6480_s1 + $0x4a4] ss:$8 sps:$4 sm:$0xff]   ;;  %v4605_v47 = vld [vmem:[%s6480_s1 + $0x800] ss:$8 sps:$4 sm:$0xff]  }
  0x4a   : > { %2605 = vmatprep.mubr.bf16.mxu0 %v2001_v25  ;;  %v5392_v25 = vld [vmem:[%s5194_s30 + $0x38] sm:$0x77] }
  0x4b   : > { %1052 = vmatpush1.bf16.msra.mxu1 %v4503_v57  ;;  %v5406_v29 = vcombine.high %v5392_v25, %v5392_v25  ;;  %v4562_v57 = vld [vmem:[%s6480_s1 + $0x7a4] ss:$8 sps:$4 sm:$0xff]  }
  0x4c   : > { %2617 = vmatpush1.bf16.msra.mxu0 %v4506_v59  ;;  %1053 = vmatprep.subr.bf16.mxu1 %v4511_v60  ;;  %v4557_v59 = vld [vmem:[%s6480_s1 + $0x4a0] ss:$8 sps:$4 sm:$0xff]  }
  0x4d   : > { %2618 = vmatprep.subr.bf16.mxu0 %v4514_v61  ;;  %v460_v36 = vshll.u32 %v5406_v29, 16  ;;  %v4560_v60 = vld [vmem:[%s6480_s1 + $0x7a0] ss:$8 sps:$4 sm:$0xff]   ;;  %v4565_v61 = vld [vmem:[%s6480_s1 + $0x4b4] ss:$8 sps:$4 sm:$0xff]   ;;  %v497_v42 = vshrl.u32 %v5406_v29, 16 }
  0x4e   : > { %1041 = vmatmul.mubr.bf16.gmra.mrb[4].mxu1 %v490_v0  ;;  %v4563_v0 = vld [vmem:[%s6480_s1 + $0x4b0] ss:$8 sps:$4 sm:$0xff]   ;;  %v4613_v29 = vld [vmem:[%s6480_s1 + $0x814] ss:$8 sps:$4 sm:$0xff]  }
  0x4f   : > { %2606 = vmatmul.mubr.bf16.gmra.mrb[4].mxu0 %v1984_v45  ;;  %1054 = vmatpush1.bf16.msra.mxu1 %v4509_v62  ;;  %v5426_v44 = vrot.slane %v460_v36, 1  ;;  %v2023_v45 = vrot.slane %v2021_v37, 2  ;;  %v4568_v62 = vld [vmem:[%s6480_s1 + $0x7b4] ss:$8 sps:$4 sm:$0xff]  }
  0x50   : > { %2619 = vmatpush1.bf16.msra.mxu0 %v4512_v1  ;;  %1055 = vmatprep.subr.bf16.mxu1 %v4517_v2  ;;  %v4566_v1 = vld [vmem:[%s6480_s1 + $0x7b0] ss:$8 sps:$4 sm:$0xff]   ;;  %v4571_v2 = vld [vmem:[%s6480_s1 + $0x4c4] ss:$8 sps:$4 sm:$0xff]  }
  0x51   : > { %2620 = vmatprep.subr.bf16.mxu0 %v4520_v3  ;;  %v2027_v50 = vor.u32 %v2026_v46, %v2023_v45  ;;  %v463_v54 = vsel %vm415_vm0, %v458_v48, %v5426_v44  ;;  %v4574_v3 = vld [vmem:[%s6480_s1 + $0x7c4] ss:$8 sps:$4 sm:$0xff]   ;;  %v4610_v48 = vld [vmem:[%s6480_s1 + $0x514] ss:$8 sps:$4 sm:$0xff]   ;;  %v499_v49 = vor.u32 %v497_v42, %v5426_v44  ;;  %v4644_v42 = vld [vmem:[%s6480_s1 + $0x570] ss:$8 sps:$4 sm:$0xff]  }
  0x52   : > { %1081 = vmatprep.mubr.bf16.mxu1 %v463_v54  ;;  %v4616_v54 = vld [vmem:[%s6480_s1 + $0x524] ss:$8 sps:$4 sm:$0xff]  }
  0x53   : > { %1056 = vmatpush1.bf16.msra.mxu1 %v4515_v4  ;;  %v2036_v58 = vsel %vm1968_vm1, %v2027_v50, %v5436_v55  ;;  %v4569_v4 = vld [vmem:[%s6480_s1 + $0x4c0] ss:$8 sps:$4 sm:$0xff]   ;;  %v4608_v50 = vld [vmem:[%s6480_s1 + $0x510] ss:$8 sps:$4 sm:$0xff]   ;;  %v4619_v44 = vld [vmem:[%s6480_s1 + $0x824] ss:$8 sps:$4 sm:$0xff]  }
  0x54   : > { %2621 = vmatpush1.bf16.msra.mxu0 %v4518_v5  ;;  %1057 = vmatprep.subr.bf16.mxu1 %v4523_v6  ;;  %v4572_v5 = vld [vmem:[%s6480_s1 + $0x7c0] ss:$8 sps:$4 sm:$0xff]   ;;  %v5478_v6 = vcombine.low %v5386_v23, %v5389_v24  ;;  %v4589_v23 = vld [vmem:[%s6480_s1 + $0x4f4] ss:$8 sps:$4 sm:$0xff]  }
  0x55   : > { %2622 = vmatprep.subr.bf16.mxu0 %v4526_v7  ;;  %2646 = vmatprep.mubr.bf16.mxu0 %v2036_v58  ;;  %v4577_v7 = vld [vmem:[%s6480_s1 + $0x4d4] ss:$8 sps:$4 sm:$0xff]   ;;  %v4617_v58 = vld [vmem:[%s6480_s1 + $0x820] ss:$8 sps:$4 sm:$0xff]  }
  0x57   : > { %1058 = vmatpush1.bf16.msra.mxu1 %v4521_v8  ;;  %v4026_v8 = vcombine.low %v5399_v27, %v5389_v24  ;;  %v441_v24 = vshrl.u32 %v5478_v6, 16 }
  0x58   : > { %2623 = vmatpush1.bf16.msra.mxu0 %v4524_v9  ;;  %1059 = vmatprep.subr.bf16.mxu1 %v4529_v10  ;;  %v4599_v9 = vld [vmem:[%s5194_s30 + $0x38] ss:$24 sps:$4 sm:$0x1f]   ;;  %v4580_v10 = vld [vmem:[%s6480_s1 + $0x7d4] ss:$8 sps:$4 sm:$0xff]  }
  0x59   : > { %2624 = vmatprep.subr.bf16.mxu0 %v4532_v11  ;;  %v4575_v11 = vld [vmem:[%s6480_s1 + $0x4d0] ss:$8 sps:$4 sm:$0xff]  }
  0x5b   : > { %1060 = vmatpush1.bf16.msra.mxu1 %v4527_v12  ;;  %v4578_v12 = vld [vmem:[%s6480_s1 + $0x7d0] ss:$8 sps:$4 sm:$0xff]  }
  0x5c   : > { %2625 = vmatpush1.bf16.msra.mxu0 %v4530_v13  ;;  %1061 = vmatprep.subr.bf16.mxu1 %v4535_v14  ;;  %v4583_v13 = vld [vmem:[%s6480_s1 + $0x4e4] ss:$8 sps:$4 sm:$0xff]   ;;  %v5500_v14 = vcombine.low %v5392_v25, %v5392_v25 }
  0x5d   : > { %2626 = vmatprep.subr.bf16.mxu0 %v4538_v15  ;;  %v443_v15 = vshll.u32 %v5478_v6, 16 }
  0x5e   : > { %v448_v27 = vshll.u32 %v5500_v14, 16 }
  0x5f   : > { %1062 = vmatpush1.bf16.msra.mxu1 %v4533_v16  ;;  %v2004_v16 = vshrl.u32 %v4026_v8, 16  ;;  %v445_v25 = vrot.slane %v443_v15, 1 }
  0x60   : > { %2627 = vmatpush1.bf16.msra.mxu0 %v4536_v17  ;;  %1063 = vmatprep.subr.bf16.mxu1 %v4541_v18  ;;  %v2007_v17 = vshll.u32 %v4026_v8, 16  ;;  %v2012_v18 = vshrl.u32 %v4599_v9, 16  ;;  %v450_v37 = vrot.slane %v448_v27, 1 }
  0x61   : > { %2628 = vmatprep.subr.bf16.mxu0 %v4544_v19  ;;  %v2015_v19 = vshll.u32 %v4599_v9, 16  ;;  %v446_v36 = vor.u32 %v445_v25, %v441_v24  ;;  %v4706_v9 = vld [vmem:[%s5194_s30 + $0x44] ss:$24 sps:$4 sm:$0x1f]  }
  0x62   : > { %v2009_v30 = vrot.slane %v2007_v17, 3  ;;  %v2014_v31 = vrot.slane %v2012_v18, 2  ;;  %v2063_v18 = vshrl.u32 %v4706_v9, 16 }
  0x63   : > { %1064 = vmatpush1.bf16.msra.mxu1 %v4539_v20  ;;  %v4586_v20 = vld [vmem:[%s6480_s1 + $0x7e4] ss:$8 sps:$4 sm:$0xff]   ;;  %v451_v45 = vsel %vm415_vm0, %v446_v36, %v450_v37 }
  0x64   : > { %2629 = vmatpush1.bf16.msra.mxu0 %v4542_v21  ;;  %1065 = vmatprep.subr.bf16.mxu1 %v4547_v22  ;;  %v4581_v21 = vld [vmem:[%s6480_s1 + $0x4e0] ss:$8 sps:$4 sm:$0xff]   ;;  %v2065_v25 = vrot.slane %v2063_v18, 2  ;;  %v4688_v18 = vld [vmem:[%s6480_s1 + $0x5e4] ss:$8 sps:$4 sm:$0xff]  }
  0x65   : > { %2630 = vmatprep.subr.bf16.mxu0 %v4550_v28  ;;  %v4584_v22 = vld [vmem:[%s6480_s1 + $0x7e0] ss:$8 sps:$4 sm:$0xff]   ;;  %v2006_v28 = vrot.slane %v2004_v16, 2 }
  0x67   : > { %1066 = vmatpush1.bf16.msra.mxu1 %v4545_v32  ;;  %v2017_v32 = vrot.slane %v2015_v19, 3  ;;  %v2010_v39 = vor.u32 %v2009_v30, %v2006_v28  ;;  %v4637_v19 = vld [vmem:[%s6480_s1 + $0x854] ss:$8 sps:$4 sm:$0xff]   ;;  %v4632_v30 = vld [vmem:[%s6480_s1 + $0x550] ss:$8 sps:$4 sm:$0xff]  }
  0x68   : > { %2631 = vmatpush1.bf16.msra.mxu0 %v4548_v35  ;;  %1067 = vmatprep.subr.bf16.mxu1 %v4553_v40  ;;  %v4590_v35 = vld [vmem:[%s6480_s1 + $0x7f0] ss:$8 sps:$4 sm:$0xff]  }
  0x69   : > { %2632 = vmatprep.subr.bf16.mxu0 %v4556_v41  ;;  %v2018_v40 = vor.u32 %v2017_v32, %v2014_v31  ;;  %v4607_v41 = vld [vmem:[%s6480_s1 + $0x804] ss:$8 sps:$4 sm:$0xff]   ;;  %v4635_v31 = vld [vmem:[%s6480_s1 + $0x850] ss:$8 sps:$4 sm:$0xff]  }
  0x6b   : > { %1068 = vmatpush1.bf16.msra.mxu1 %v4551_v51  ;;  %v2019_v46 = vsel %vm1968_vm1, %v2010_v39, %v2018_v40  ;;  %v494_v51 = vshrl.u32 %v5500_v14, 16  ;;  %v4634_v14 = vld [vmem:[%s6480_s1 + $0x554] ss:$8 sps:$4 sm:$0xff]   ;;  %v4641_v39 = vld [vmem:[%s6480_s1 + $0x860] ss:$8 sps:$4 sm:$0xff]  }
  0x6c   : > { %2633 = vmatpush1.bf16.msra.mxu0 %v4554_v52  ;;  %1069 = vmatprep.subr.bf16.mxu1 %v4559_v56  ;;  %v4611_v52 = vld [vmem:[%s6480_s1 + $0x810] ss:$8 sps:$4 sm:$0xff]  }
  0x6d   : > { %2634 = vmatprep.subr.bf16.mxu0 %v4562_v57  ;;  %v496_v56 = vor.u32 %v494_v51, %v450_v37  ;;  %v4614_v57 = vld [vmem:[%s6480_s1 + $0x520] ss:$8 sps:$4 sm:$0xff]   ;;  %v4659_v51 = vld [vmem:[%s6480_s1 + $0x890] ss:$8 sps:$4 sm:$0xff]  }
  0x6e   : > { %v4638_v37 = vld [vmem:[%s6480_s1 + $0x560] ss:$8 sps:$4 sm:$0xff]  }
  0x6f   : > { %1070 = vmatpush1.bf16.msra.mxu1 %v4557_v59  ;;  %v4622_v59 = vld [vmem:[%s6480_s1 + $0x534] ss:$8 sps:$4 sm:$0xff]  }
  0x70   : > { %2635 = vmatpush1.bf16.msra.mxu0 %v4560_v60  ;;  %1071 = vmatprep.subr.bf16.mxu1 %v4565_v61  ;;  %v4620_v60 = vld [vmem:[%s6480_s1 + $0x530] ss:$8 sps:$4 sm:$0xff]  }
  0x71   : > { %2636 = vmatprep.subr.bf16.mxu0 %v4568_v62  ;;  %v4623_v61 = vld [vmem:[%s6480_s1 + $0x830] ss:$8 sps:$4 sm:$0xff]   ;;  %v4628_v62 = vld [vmem:[%s6480_s1 + $0x544] ss:$8 sps:$4 sm:$0xff]  }
  0x73   : > { %1072 = vmatpush1.bf16.msra.mxu1 %v4563_v0  ;;  %v5584_v0 = vld [vmem:[%s5194_s30 + $0x10] sm:$0xff] }
  0x74   : > { %2637 = vmatpush1.bf16.msra.mxu0 %v4566_v1  ;;  %1073 = vmatprep.subr.bf16.mxu1 %v4571_v2  ;;  %v5587_v1 = vld [vmem:[%s5194_s30 + $0x28] sm:$0xff]  ;;  %v5590_v2 = vld [vmem:[%s5194_s30 + $0x40] sm:$0x77] }
  0x75   : > { %2638 = vmatprep.subr.bf16.mxu0 %v4574_v3  ;;  %v5593_v3 = vld [vmem:[%s5194_s30 + $0x10] sm:$0xcc] }
  0x76   : > { %v4029_v8 = vcombine.high %v5593_v3, %v5587_v1 }
  0x77   : > { %1074 = vmatpush1.bf16.msra.mxu1 %v4569_v4  ;;  %v4631_v4 = vld [vmem:[%s6480_s1 + $0x844] ss:$8 sps:$4 sm:$0xff]  }
  0x78   : > { %2639 = vmatpush1.bf16.msra.mxu0 %v4572_v5  ;;  %1075 = vmatprep.subr.bf16.mxu1 %v4577_v7  ;;  %v5600_v5 = vcombine.high %v5584_v0, %v5587_v1  ;;  %v5604_v7 = vcombine.high %v5590_v2, %v5590_v2  ;;  %v2055_v16 = vshrl.u32 %v4029_v8, 16  ;;  %v2058_v17 = vshll.u32 %v4029_v8, 16 }
  0x79   : > { %2640 = vmatprep.subr.bf16.mxu0 %v4580_v10  ;;  %v4626_v10 = vld [vmem:[%s6480_s1 + $0x540] ss:$8 sps:$4 sm:$0xff]   ;;  %v5724_v8 = vcombine.low %v5584_v0, %v5587_v1  ;;  %v4680_v0 = vld [vmem:[%s6480_s1 + $0x5d0] ss:$8 sps:$4 sm:$0xff]  }
  0x7a   : > { %v484_v15 = vshll.u32 %v5604_v7, 16  ;;  %v2060_v24 = vrot.slane %v2058_v17, 3 }
  0x7b   : > { %1076 = vmatpush1.bf16.msra.mxu1 %v4575_v11  ;;  %v4629_v11 = vld [vmem:[%s6480_s1 + $0x840] ss:$8 sps:$4 sm:$0xff]  }
  0x7c   : > { %2641 = vmatpush1.bf16.msra.mxu0 %v4578_v12  ;;  %1077 = vmatprep.subr.bf16.mxu1 %v4583_v13  ;;  %v477_v12 = vshrl.u32 %v5600_v5, 16  ;;  %v479_v13 = vshll.u32 %v5600_v5, 16 }
  0x7d   : > { %2642 = vmatprep.subr.bf16.mxu0 %v4586_v20 }
  0x7e   : > { %v481_v20 = vrot.slane %v479_v13, 1  ;;  %v4683_v13 = vld [vmem:[%s6480_s1 + $0x8d0] ss:$8 sps:$4 sm:$0xff]  }
  0x7f   : > { %1078 = vmatpush1.bf16.msra.mxu1 %v4581_v21  ;;  %v2066_v21 = vshll.u32 %v4706_v9, 16  ;;  %v4028_v9 = vcombine.low %v5593_v3, %v5587_v1  ;;  %v5743_v1 = vcombine.low %v5590_v2, %v5590_v2  ;;  %v467_v3 = vshll.u32 %v5724_v8, 16  ;;  %v4686_v2 = vld [vmem:[%s6480_s1 + $0x5e0] ss:$8 sps:$4 sm:$0xff]  }
  0x80   : > { %2643 = vmatpush1.bf16.msra.mxu0 %v4584_v22  ;;  %1079 = vmatprep.subr.bf16.mxu1 %v4589_v23  ;;  %v5624_v22 = vrot.slane %v484_v15, 1  ;;  %v2057_v23 = vrot.slane %v2055_v16, 2  ;;  %v482_v27 = vor.u32 %v481_v20, %v477_v12  ;;  %v4685_v12 = vld [vmem:[%s6480_s1 + $0x8d4] ss:$8 sps:$4 sm:$0xff]   ;;  %v4689_v20 = vld [vmem:[%s6480_s1 + $0x8e0] ss:$8 sps:$4 sm:$0xff]  }
  0x81   : > { %2644 = vmatprep.subr.bf16.mxu0 %v4592_v33  ;;  %v2068_v28 = vrot.slane %v2066_v21, 3  ;;  %v4640_v33 = vld [vmem:[%s6480_s1 + $0x564] ss:$8 sps:$4 sm:$0xff]   ;;  %v2041_v15 = vshll.u32 %v4028_v9, 16  ;;  %v465_v21 = vshrl.u32 %v5724_v8, 16 }
  0x82   : > { %v2061_v32 = vor.u32 %v2060_v24, %v2057_v23  ;;  %v469_v23 = vrot.slane %v467_v3, 1  ;;  %v472_v24 = vshll.u32 %v5743_v1, 16  ;;  %v4737_v3 = vld [vmem:[%s6480_s1 + $0x50] ss:$8 sps:$4 sm:$0xff]  }
  0x83   : > { %1080 = vmatpush1.bf16.msra.mxu1 %v4587_v34  ;;  %v4643_v34 = vld [vmem:[%s6480_s1 + $0x864] ss:$8 sps:$4 sm:$0xff]   ;;  %v5640_v36 = vor.u32 %v2068_v28, %v2065_v25 }
  0x84   : > { %2645 = vmatpush1.bf16.msra.mxu0 %v4590_v35  ;;  %1100 = vmatprep.subr.bf16.mxu1 %v4604_v38  ;;  %v487_v35 = vsel %vm415_vm0, %v482_v27, %v5624_v22  ;;  %v2043_v27 = vrot.slane %v2041_v15, 3  ;;  %v4745_v15 = vld [vmem:[%s6480_s1 + $0x64] ss:$8 sps:$4 sm:$0xff]  }
  0x85   : > { %2665 = vmatprep.subr.bf16.mxu0 %v4607_v41  ;;  %v2070_v38 = vsel %vm1968_vm1, %v2061_v32, %v5640_v36  ;;  %v4649_v41 = vld [vmem:[%s6480_s1 + $0x874] ss:$8 sps:$4 sm:$0xff]  }
  0x86   : > { %1082 = vmatmul.mubr.bf16.vlgmr.msra.gmra.mrb[0].mxu1 %v451_v45  ;;  %v4652_v45 = vld [vmem:[%s6480_s1 + $0x584] ss:$8 sps:$4 sm:$0xff]   ;;  %v4697_v32 = vld [vmem:[%s6480_s1 + $0x8f4] ss:$8 sps:$4 sm:$0xff]  }
  0x87   : > { %2647 = vmatmul.mubr.bf16.vlgmr.msra.gmra.mrb[0].mxu0 %v2019_v46  ;;  %1101 = vmatpush1.bf16.msra.mxu1 %v4602_v43  ;;  %v4647_v43 = vld [vmem:[%s6480_s1 + $0x870] ss:$8 sps:$4 sm:$0xff]   ;;  %v4655_v46 = vld [vmem:[%s6480_s1 + $0x884] ss:$8 sps:$4 sm:$0xff]  }
  0x88   : > { %2666 = vmatpush1.bf16.msra.mxu0 %v4605_v47  ;;  %1102 = vmatprep.subr.bf16.mxu1 %v4610_v48  ;;  %v4650_v47 = vld [vmem:[%s6480_s1 + $0x580] ss:$8 sps:$4 sm:$0xff]  }
  0x89   : > { %2667 = vmatprep.subr.bf16.mxu0 %v4613_v29  ;;  %1091 = vmatprep.mubr.bf16.mxu1 %v499_v49  ;;  %v4653_v48 = vld [vmem:[%s6480_s1 + $0x880] ss:$8 sps:$4 sm:$0xff]   ;;  %v4658_v29 = vld [vmem:[%s6480_s1 + $0x594] ss:$8 sps:$4 sm:$0xff]  }
  0x8a   : > { %2656 = vmatprep.mubr.bf16.mxu0 %v5436_v55  ;;  %v4625_v55 = vld [vmem:[%s6480_s1 + $0x834] ss:$8 sps:$4 sm:$0xff]  }
  0x8b   : > { %1103 = vmatpush1.bf16.msra.mxu1 %v4608_v50  ;;  %v4661_v49 = vld [vmem:[%s6480_s1 + $0x894] ss:$8 sps:$4 sm:$0xff]   ;;  %v4656_v50 = vld [vmem:[%s6480_s1 + $0x590] ss:$8 sps:$4 sm:$0xff]  }
  0x8c   : > { %2668 = vmatpush1.bf16.msra.mxu0 %v4611_v52  ;;  %1104 = vmatprep.subr.bf16.mxu1 %v4616_v54  ;;  %v4664_v52 = vld [vmem:[%s6480_s1 + $0x5a4] ss:$8 sps:$4 sm:$0xff]  }
  0x8d   : > { %2669 = vmatprep.subr.bf16.mxu0 %v4619_v44  ;;  %v4667_v54 = vld [vmem:[%s6480_s1 + $0x8a4] ss:$8 sps:$4 sm:$0xff]   ;;  %v4662_v44 = vld [vmem:[%s6480_s1 + $0x5a0] ss:$8 sps:$4 sm:$0xff]  }
  0x8e   : > { %1092 = vmatmul.mubr.bf16.gmra.mrb[8].mxu1 %v496_v56  ;;  %v4665_v56 = vld [vmem:[%s6480_s1 + $0x8a0] ss:$8 sps:$4 sm:$0xff]  }
  0x8f   : > { %2657 = vmatmul.mubr.bf16.gmra.mrb[8].mxu0 %v2018_v40  ;;  %1105 = vmatpush1.bf16.msra.mxu1 %v4614_v57  ;;  %v4646_v40 = vld [vmem:[%s6480_s1 + $0x574] ss:$8 sps:$4 sm:$0xff]  }
  0x90   : > { %2670 = vmatpush1.bf16.msra.mxu0 %v4617_v58  ;;  %1106 = vmatprep.subr.bf16.mxu1 %v4622_v59  ;;  %v4670_v57 = vld [vmem:[%s6480_s1 + $0x5b4] ss:$8 sps:$4 sm:$0xff]   ;;  %v4668_v59 = vld [vmem:[%s6480_s1 + $0x5b0] ss:$8 sps:$4 sm:$0xff]  }
  0x91   : > { %2671 = vmatprep.subr.bf16.mxu0 %v4625_v55  ;;  %1132 = vmatprep.mubr.bf16.mxu1 %v487_v35  ;;  %v4673_v58 = vld [vmem:[%s6480_s1 + $0x8b4] ss:$8 sps:$4 sm:$0xff]   ;;  %v4671_v55 = vld [vmem:[%s6480_s1 + $0x8b0] ss:$8 sps:$4 sm:$0xff]   ;;  %v470_v35 = vor.u32 %v469_v23, %v465_v21  ;;  %v4757_v23 = vld [vmem:[%s6480_s1 + $0x84] ss:$8 sps:$4 sm:$0xff]  }
  0x92   : > { %2697 = vmatprep.mubr.bf16.mxu0 %v2070_v38  ;;  %v4752_v21 = vld [vmem:[%s6480_s1 + $0x970] ss:$8 sps:$4 sm:$0xff]  }
  0x93   : > { %1107 = vmatpush1.bf16.msra.mxu1 %v4620_v60  ;;  %v4676_v60 = vld [vmem:[%s6480_s1 + $0x5c4] ss:$8 sps:$4 sm:$0xff]  }
  0x94   : > { %2672 = vmatpush1.bf16.msra.mxu0 %v4623_v61  ;;  %1108 = vmatprep.subr.bf16.mxu1 %v4628_v62  ;;  %v4679_v61 = vld [vmem:[%s6480_s1 + $0x8c4] ss:$8 sps:$4 sm:$0xff]   ;;  %v4674_v62 = vld [vmem:[%s6480_s1 + $0x5c0] ss:$8 sps:$4 sm:$0xff]  }
  0x95   : > { %2673 = vmatprep.subr.bf16.mxu0 %v4631_v4  ;;  %v4677_v4 = vld [vmem:[%s6480_s1 + $0x8c0] ss:$8 sps:$4 sm:$0xff]  }
  0x97   : > { %1109 = vmatpush1.bf16.msra.mxu1 %v4626_v10  ;;  %v4704_v10 = vld [vmem:[%s5194_s30 + $0x40] ss:$24 sps:$4 sm:$0x1f]  }
  0x98   : > { %2674 = vmatpush1.bf16.msra.mxu0 %v4629_v11  ;;  %1110 = vmatprep.subr.bf16.mxu1 %v4634_v14  ;;  %v4682_v11 = vld [vmem:[%s6480_s1 + $0x5d4] ss:$8 sps:$4 sm:$0xff]   ;;  %v2038_v14 = vshrl.u32 %v4028_v9, 16  ;;  %v2046_v16 = vshrl.u32 %v4704_v10, 16  ;;  %v2049_v17 = vshll.u32 %v4704_v10, 16 }
  0x99   : > { %2675 = vmatprep.subr.bf16.mxu0 %v4637_v19  ;;  %v4691_v19 = vld [vmem:[%s6480_s1 + $0x8e4] ss:$8 sps:$4 sm:$0xff]   ;;  %v4728_v9 = vld [vmem:[%s6480_s1 + $0x930] ss:$8 sps:$4 sm:$0xff]  }
  0x9a   : > { %v2040_v25 = vrot.slane %v2038_v14, 2  ;;  %v2048_v28 = vrot.slane %v2046_v16, 2  ;;  %v4740_v14 = vld [vmem:[%s6480_s1 + $0x950] ss:$8 sps:$4 sm:$0xff]   ;;  %v4748_v16 = vld [vmem:[%s6480_s1 + $0x964] ss:$8 sps:$4 sm:$0xff]  }
  0x9b   : > { %1111 = vmatpush1.bf16.msra.mxu1 %v4632_v30  ;;  %v2051_v30 = vrot.slane %v2049_v17, 3  ;;  %v4743_v17 = vld [vmem:[%s6480_s1 + $0x60] ss:$8 sps:$4 sm:$0xff]  }
  0x9c   : > { %2676 = vmatpush1.bf16.msra.mxu0 %v4635_v31  ;;  %1112 = vmatprep.subr.bf16.mxu1 %v4640_v33  ;;  %v4694_v31 = vld [vmem:[%s6480_s1 + $0x5f4] ss:$8 sps:$4 sm:$0xff]   ;;  %v4692_v33 = vld [vmem:[%s6480_s1 + $0x5f0] ss:$8 sps:$4 sm:$0xff]   ;;  %v2044_v38 = vor.u32 %v2043_v27, %v2040_v25  ;;  %v4755_v25 = vld [vmem:[%s6480_s1 + $0x80] ss:$8 sps:$4 sm:$0xff]  }
  0x9d   : > { %2677 = vmatprep.subr.bf16.mxu0 %v4643_v34  ;;  %v4695_v34 = vld [vmem:[%s6480_s1 + $0x8f0] ss:$8 sps:$4 sm:$0xff]   ;;  %v4758_v27 = vld [vmem:[%s6480_s1 + $0x980] ss:$8 sps:$4 sm:$0xff]  }
  0x9f   : > { %1113 = vmatpush1.bf16.msra.mxu1 %v4638_v37  ;;  %v474_v37 = vrot.slane %v472_v24, 1  ;;  %v4760_v24 = vld [vmem:[%s6480_s1 + $0x984] ss:$8 sps:$4 sm:$0xff]  }
  0xa0   : > { %2678 = vmatpush1.bf16.msra.mxu0 %v4641_v39  ;;  %1114 = vmatprep.subr.bf16.mxu1 %v4646_v40  ;;  %v2052_v39 = vor.u32 %v2051_v30, %v2048_v28  ;;  %v4709_v40 = vld [vmem:[%s6480_s1 + $0x4] ss:$8 sps:$4 sm:$0xff]   ;;  %v4763_v28 = vld [vmem:[%s6480_s1 + $0x94] ss:$8 sps:$4 sm:$0xff]  }
  0xa1   : > { %2679 = vmatprep.subr.bf16.mxu0 %v4649_v41  ;;  %v4712_v41 = vld [vmem:[%s6480_s1 + $0x904] ss:$8 sps:$4 sm:$0xff]   ;;  %v4766_v30 = vld [vmem:[%s6480_s1 + $0x994] ss:$8 sps:$4 sm:$0xff]  }
  0xa3   : > { %1115 = vmatpush1.bf16.msra.mxu1 %v4644_v42  ;;  %v503_v42 = vshrl.u32 %v5604_v7, 16  ;;  %v5791_v7 = vld [vmem:[%s5194_s30] sm:$0x88] }
  0xa4   : > { %2680 = vmatpush1.bf16.msra.mxu0 %v4647_v43  ;;  %1116 = vmatprep.subr.bf16.mxu1 %v4652_v45  ;;  %v4707_v43 = vld [vmem:[%s6480_s1] ss:$8 sps:$4 sm:$0xff]   ;;  %v475_v45 = vsel %vm415_vm0, %v470_v35, %v474_v37 }
  0xa5   : > { %2681 = vmatprep.subr.bf16.mxu0 %v4655_v46  ;;  %v2053_v46 = vsel %vm1968_vm1, %v2044_v38, %v2052_v39  ;;  %v4767_v35 = vld [vmem:[%s6480_s1 + $0xa0] ss:$8 sps:$4 sm:$0xff]   ;;  %v4775_v38 = vld [vmem:[%s6480_s1 + $0xb4] ss:$8 sps:$4 sm:$0xff]  }
  0xa7   : > { %1117 = vmatpush1.bf16.msra.mxu1 %v4650_v47  ;;  %v4710_v47 = vld [vmem:[%s6480_s1 + $0x900] ss:$8 sps:$4 sm:$0xff]  }
  0xa8   : > { %2682 = vmatpush1.bf16.msra.mxu0 %v4653_v48  ;;  %1118 = vmatprep.subr.bf16.mxu1 %v4658_v29  ;;  %v4715_v48 = vld [vmem:[%s6480_s1 + $0x14] ss:$8 sps:$4 sm:$0xff]  }
  0xa9   : > { %2683 = vmatprep.subr.bf16.mxu0 %v4661_v49  ;;  %v4718_v29 = vld [vmem:[%s6480_s1 + $0x914] ss:$8 sps:$4 sm:$0xff]   ;;  %v505_v49 = vor.u32 %v503_v42, %v5624_v22  ;;  %v4721_v22 = vld [vmem:[%s6480_s1 + $0x24] ss:$8 sps:$4 sm:$0xff]  }
  0xaa   : > { %v4781_v42 = vld [vmem:[%s6480_s1 + $0xc4] ss:$8 sps:$4 sm:$0xff]  }
  0xab   : > { %1119 = vmatpush1.bf16.msra.mxu1 %v4656_v50  ;;  %v4713_v50 = vld [vmem:[%s6480_s1 + $0x10] ss:$8 sps:$4 sm:$0xff]  }
  0xac   : > { %2684 = vmatpush1.bf16.msra.mxu0 %v4659_v51  ;;  %1120 = vmatprep.subr.bf16.mxu1 %v4664_v52  ;;  %v4716_v51 = vld [vmem:[%s6480_s1 + $0x910] ss:$8 sps:$4 sm:$0xff]   ;;  %v500_v52 = vshrl.u32 %v5743_v1, 16  ;;  %v4739_v1 = vld [vmem:[%s6480_s1 + $0x54] ss:$8 sps:$4 sm:$0xff]  }
  0xad   : > { %2685 = vmatprep.subr.bf16.mxu0 %v4667_v54  ;;  %v5805_v54 = vld [vmem:[%s5194_s30 + $0x18] sm:$0xff] }
  0xaf   : > { %1121 = vmatpush1.bf16.msra.mxu1 %v4662_v44  ;;  %v4229_v44 = vcombine.high %v5791_v7, %v5805_v54 }
  0xb0   : > { %2686 = vmatpush1.bf16.msra.mxu0 %v4665_v56  ;;  %1122 = vmatprep.subr.bf16.mxu1 %v4670_v57  ;;  %v4724_v56 = vld [vmem:[%s6480_s1 + $0x924] ss:$8 sps:$4 sm:$0xff]  }
  0xb1   : > { %2687 = vmatprep.subr.bf16.mxu0 %v4673_v58  ;;  %v5817_v57 = vld [vmem:[%s5194_s30 + $0x34] ss:$24 sps:$4 sm:$0x1f]  }
  0xb2   : > { %v2842_v58 = vrot.slane %v5817_v57, 3  ;;  %v4827_v57 = vld [vmem:[%s6480_s1 + $0x134] ss:$8 sps:$4 sm:$0xff]  }
  0xb3   : > { %1123 = vmatpush1.bf16.msra.mxu1 %v4668_v59  ;;  %v502_v59 = vor.u32 %v500_v52, %v474_v37  ;;  %v4770_v37 = vld [vmem:[%s6480_s1 + $0x9a0] ss:$8 sps:$4 sm:$0xff]  }
  0xb4   : > { %2688 = vmatpush1.bf16.msra.mxu0 %v4671_v55  ;;  %1124 = vmatprep.subr.bf16.mxu1 %v4676_v60  ;;  %v4719_v55 = vld [vmem:[%s6480_s1 + $0x20] ss:$8 sps:$4 sm:$0xff]  }
  0xb5   : > { %2689 = vmatprep.subr.bf16.mxu0 %v4679_v61  ;;  %v4722_v60 = vld [vmem:[%s6480_s1 + $0x920] ss:$8 sps:$4 sm:$0xff]   ;;  %v2841_v61 = vrot.slane %v4229_v44, 3 }
  0xb6   : > { %v4791_v52 = vld [vmem:[%s6480_s1 + $0xe0] ss:$8 sps:$4 sm:$0xff]  }
  0xb7   : > { %1125 = vmatpush1.bf16.msra.mxu1 %v4674_v62  ;;  %v4730_v62 = vld [vmem:[%s6480_s1 + $0x934] ss:$8 sps:$4 sm:$0xff]   ;;  %v2843_v10 = vsel %vm2837_vm2, %v2841_v61, %v2842_v58  ;;  %v4794_v44 = vld [vmem:[%s6480_s1 + $0x9e0] ss:$8 sps:$4 sm:$0xff]  }
  0xb8   : > { %2690 = vmatpush1.bf16.msra.mxu0 %v4677_v4  ;;  %1126 = vmatprep.subr.bf16.mxu1 %v4682_v11  ;;  %v4725_v4 = vld [vmem:[%s6480_s1 + $0x30] ss:$8 sps:$4 sm:$0xff]   ;;  %v4733_v11 = vld [vmem:[%s6480_s1 + $0x44] ss:$8 sps:$4 sm:$0xff]  }
  0xb9   : > { %2691 = vmatprep.subr.bf16.mxu0 %v4685_v12  ;;  %v4736_v12 = vld [vmem:[%s6480_s1 + $0x944] ss:$8 sps:$4 sm:$0xff]  }
  0xbb   : > { %1127 = vmatpush1.bf16.msra.mxu1 %v4680_v0  ;;  %v4731_v0 = vld [vmem:[%s6480_s1 + $0x40] ss:$8 sps:$4 sm:$0xff]  }
  0xbc   : > { %2692 = vmatpush1.bf16.msra.mxu0 %v4683_v13  ;;  %1128 = vmatprep.subr.bf16.mxu1 %v4688_v18  ;;  %v4734_v13 = vld [vmem:[%s6480_s1 + $0x940] ss:$8 sps:$4 sm:$0xff]  }
  0xbd   : > { %2693 = vmatprep.subr.bf16.mxu0 %v4691_v19  ;;  %v4746_v18 = vld [vmem:[%s6480_s1 + $0x960] ss:$8 sps:$4 sm:$0xff]   ;;  %v4751_v19 = vld [vmem:[%s6480_s1 + $0x74] ss:$8 sps:$4 sm:$0xff]  }
  0xbf   : > { %1129 = vmatpush1.bf16.msra.mxu1 %v4686_v2  ;;  %v4754_v2 = vld [vmem:[%s6480_s1 + $0x974] ss:$8 sps:$4 sm:$0xff]  }
  0xc0   : > { %2694 = vmatpush1.bf16.msra.mxu0 %v4689_v20  ;;  %1130 = vmatprep.subr.bf16.mxu1 %v4694_v31  ;;  %v4749_v20 = vld [vmem:[%s6480_s1 + $0x70] ss:$8 sps:$4 sm:$0xff]  }
  0xc1   : > { %2695 = vmatprep.subr.bf16.mxu0 %v4697_v32  ;;  %v4761_v31 = vld [vmem:[%s6480_s1 + $0x90] ss:$8 sps:$4 sm:$0xff]  }
  0xc2   : > { %v4764_v32 = vld [vmem:[%s6480_s1 + $0x990] ss:$8 sps:$4 sm:$0xff]  }
  0xc3   : > { %1131 = vmatpush1.bf16.msra.mxu1 %v4692_v33  ;;  %v4769_v33 = vld [vmem:[%s6480_s1 + $0xa4] ss:$8 sps:$4 sm:$0xff]  }
  0xc4   : > { %2696 = vmatpush1.bf16.msra.mxu0 %v4695_v34  ;;  %1658 = vmatprep.subr.bf16.mxu1 %v4709_v40  ;;  %v4772_v34 = vld [vmem:[%s6480_s1 + $0x9a4] ss:$8 sps:$4 sm:$0xff]   ;;  %v4773_v40 = vld [vmem:[%s6480_s1 + $0xb0] ss:$8 sps:$4 sm:$0xff]  }
  0xc5   : > { %3348 = vmatprep.subr.bf16.mxu0 %v4712_v41  ;;  %v4776_v41 = vld [vmem:[%s6480_s1 + $0x9b0] ss:$8 sps:$4 sm:$0xff]  }
  0xc6   : > { %1133 = vmatmul.mubr.bf16.vlgmr.msra.gmra.mrb[0].mxu1 %v475_v45  ;;  %v4779_v45 = vld [vmem:[%s6480_s1 + $0xc0] ss:$8 sps:$4 sm:$0xff]  }
  0xc7   : > { %2698 = vmatmul.mubr.bf16.vlgmr.msra.gmra.mrb[0].mxu0 %v2053_v46  ;;  %1659 = vmatpush1.bf16.msra.mxu1 %v4707_v43  ;;  %v4784_v43 = vld [vmem:[%s6480_s1 + $0x9c4] ss:$8 sps:$4 sm:$0xff]   ;;  %v4782_v46 = vld [vmem:[%s6480_s1 + $0x9c0] ss:$8 sps:$4 sm:$0xff]  }
  0xc8   : > { %3349 = vmatpush1.bf16.msra.mxu0 %v4710_v47  ;;  %1660 = vmatprep.subr.bf16.mxu1 %v4715_v48  ;;  %v4787_v47 = vld [vmem:[%s6480_s1 + $0xd4] ss:$8 sps:$4 sm:$0xff]  }
  0xc9   : > { %3350 = vmatprep.subr.bf16.mxu0 %v4718_v29  ;;  %1142 = vmatprep.mubr.bf16.mxu1 %v505_v49  ;;  %v4790_v48 = vld [vmem:[%s6480_s1 + $0x9d4] ss:$8 sps:$4 sm:$0xff]   ;;  %v4785_v29 = vld [vmem:[%s6480_s1 + $0xd0] ss:$8 sps:$4 sm:$0xff]  }
  0xca   : > { %2707 = vmatprep.mubr.bf16.mxu0 %v5640_v36  ;;  %v4727_v36 = vld [vmem:[%s6480_s1 + $0x34] ss:$8 sps:$4 sm:$0xff]   ;;  %v4788_v49 = vld [vmem:[%s6480_s1 + $0x9d0] ss:$8 sps:$4 sm:$0xff]  }
  0xcb   : > { %1661 = vmatpush1.bf16.msra.mxu1 %v4713_v50  ;;  %v4793_v50 = vld [vmem:[%s6480_s1 + $0xe4] ss:$8 sps:$4 sm:$0xff]  }
  0xcc   : > { %3351 = vmatpush1.bf16.msra.mxu0 %v4716_v51  ;;  %1662 = vmatprep.subr.bf16.mxu1 %v4721_v22  ;;  %v4796_v51 = vld [vmem:[%s6480_s1 + $0x9e4] ss:$8 sps:$4 sm:$0xff]   ;;  %v4228_v22 = vcombine.low %v5791_v7, %v5805_v54  ;;  %v4797_v7 = vld [vmem:[%s6480_s1 + $0xf0] ss:$8 sps:$4 sm:$0xff]  }
  0xcd   : > { %3352 = vmatprep.subr.bf16.mxu0 %v4724_v56  ;;  %v4799_v56 = vld [vmem:[%s6480_s1 + $0xf4] ss:$8 sps:$4 sm:$0xff]   ;;  %v4800_v54 = vld [vmem:[%s6480_s1 + $0x9f0] ss:$8 sps:$4 sm:$0xff]  }
  0xce   : > { %1143 = vmatmul.mubr.bf16.gmra.mrb[12].mxu1 %v502_v59  ;;  %v4802_v59 = vld [vmem:[%s6480_s1 + $0x9f4] ss:$8 sps:$4 sm:$0xff]   ;;  %v2838_v61 = vrot.slane %v4228_v22, 3 }
  0xcf   : > { %2708 = vmatmul.mubr.bf16.gmra.mrb[12].mxu0 %v2052_v39  ;;  %1663 = vmatpush1.bf16.msra.mxu1 %v4719_v55  ;;  %v4778_v39 = vld [vmem:[%s6480_s1 + $0x9b4] ss:$8 sps:$4 sm:$0xff]   ;;  %v5009_v55 = vld [vmem:[%s5194_s30 + $0x30] ss:$24 sps:$4 sm:$0x1f]  }
  0xd0   : > { %3353 = vmatpush1.bf16.msra.mxu0 %v4722_v60  ;;  %1664 = vmatprep.subr.bf16.mxu1 %v4727_v36  ;;  %v2839_v60 = vrot.slane %v5009_v55, 3  ;;  %v4805_v36 = vld [vmem:[%s6480_s1 + $0x104] ss:$8 sps:$4 sm:$0xff]   ;;  %v4863_v22 = vld [vmem:[%s6480_s1 + $0x194] ss:$8 sps:$4 sm:$0xff]  }
  0xd1   : > { %3354 = vmatprep.subr.bf16.mxu0 %v4730_v62  ;;  %1690 = vmatprep.mubr.bf16.mxu1 %v5217_v53  ;;  %v4742_v53 = vld [vmem:[%s6480_s1 + $0x954] ss:$8 sps:$4 sm:$0xff]   ;;  %v4810_v62 = vld [vmem:[%s6480_s1 + $0xa04] ss:$8 sps:$4 sm:$0xff]  }
  0xd2   : > { %3380 = vmatprep.mubr.bf16.mxu0 %v2843_v10  ;;  %v4808_v10 = vld [vmem:[%s6480_s1 + $0xa00] ss:$8 sps:$4 sm:$0xff]  }
  0xd3   : > { %1665 = vmatpush1.bf16.msra.mxu1 %v4725_v4  ;;  %v4803_v4 = vld [vmem:[%s6480_s1 + $0x100] ss:$8 sps:$4 sm:$0xff]  }
  0xd4   : > { %3355 = vmatpush1.bf16.msra.mxu0 %v4728_v9  ;;  %1666 = vmatprep.subr.bf16.mxu1 %v4733_v11  ;;  %v177_v9 = vld [vmem:[%s5194_s30 + $0x30] sm:$0x33]  ;;  %v2840_v11 = vsel %vm2837_vm2, %v2838_v61, %v2839_v60  ;;  %v4872_v61 = vld [vmem:[%s6480_s1 + $0xaa4] ss:$8 sps:$4 sm:$0xff]  }
  0xd5   : > { %3356 = vmatprep.subr.bf16.mxu0 %v4736_v12  ;;  %v6004_v12 = vld [vmem:[%s5194_s30 + $0x8] sm:$0x88] }
  0xd7   : > { %1667 = vmatpush1.bf16.msra.mxu1 %v4731_v0  ;;  %v4813_v0 = vld [vmem:[%s6480_s1 + $0x114] ss:$8 sps:$4 sm:$0xff]  }
  0xd8   : > { %3357 = vmatpush1.bf16.msra.mxu0 %v4734_v13  ;;  %1668 = vmatprep.subr.bf16.mxu1 %v4739_v1  ;;  %v4816_v13 = vld [vmem:[%s6480_s1 + $0xa14] ss:$8 sps:$4 sm:$0xff]   ;;  %v3827_v1 = vcombine.high %v177_v9, %v177_v9 }
  0xd9   : > { %3358 = vmatprep.subr.bf16.mxu0 %v4742_v53  ;;  %v6014_v53 = vld [vmem:[%s5194_s30 + $0x20] sm:$0xff] }
  0xdb   : > { %1669 = vmatpush1.bf16.msra.mxu1 %v4737_v3  ;;  %v4231_v3 = vcombine.high %v6004_v12, %v6014_v53 }
  0xdc   : > { %3359 = vmatpush1.bf16.msra.mxu0 %v4740_v14  ;;  %1670 = vmatprep.subr.bf16.mxu1 %v4745_v15  ;;  %v4811_v14 = vld [vmem:[%s6480_s1 + $0x110] ss:$8 sps:$4 sm:$0xff]  }
  0xdd   : > { %3360 = vmatprep.subr.bf16.mxu0 %v4748_v16  ;;  %v4814_v15 = vld [vmem:[%s6480_s1 + $0xa10] ss:$8 sps:$4 sm:$0xff]   ;;  %v4824_v16 = vld [vmem:[%s6480_s1 + $0xa24] ss:$8 sps:$4 sm:$0xff]  }
  0xdf   : > { %1671 = vmatpush1.bf16.msra.mxu1 %v4743_v17  ;;  %v3826_v17 = vcombine.low %v177_v9, %v177_v9  ;;  %v4878_v9 = vld [vmem:[%s6480_s1 + $0xab4] ss:$8 sps:$4 sm:$0xff]  }
  0xe0   : > { %3361 = vmatpush1.bf16.msra.mxu0 %v4746_v18  ;;  %1672 = vmatprep.subr.bf16.mxu1 %v4751_v19  ;;  %v2847_v18 = vrot.slane %v4231_v3, 3  ;;  %v6033_v19 = vld [vmem:[%s5194_s30 + $0x3c] ss:$24 sps:$4 sm:$0x1f]   ;;  %v4882_v3 = vld [vmem:[%s6480_s1 + $0xac0] ss:$8 sps:$4 sm:$0xff]  }
  0xe1   : > { %3362 = vmatprep.subr.bf16.mxu0 %v4754_v2  ;;  %v2848_v2 = vrot.slane %v6033_v19, 3  ;;  %v4927_v19 = vld [vmem:[%s6480_s1 + $0x234] ss:$8 sps:$4 sm:$0xff]  }
  0xe3   : > { %1673 = vmatpush1.bf16.msra.mxu1 %v4749_v20  ;;  %v4819_v20 = vld [vmem:[%s6480_s1 + $0x120] ss:$8 sps:$4 sm:$0xff]  }
  0xe4   : > { %3363 = vmatpush1.bf16.msra.mxu0 %v4752_v21  ;;  %1674 = vmatprep.subr.bf16.mxu1 %v4757_v23  ;;  %v4822_v21 = vld [vmem:[%s6480_s1 + $0xa20] ss:$8 sps:$4 sm:$0xff]   ;;  %v2849_v23 = vsel %vm2837_vm2, %v2847_v18, %v2848_v2  ;;  %v4896_v18 = vld [vmem:[%s6480_s1 + $0xae4] ss:$8 sps:$4 sm:$0xff]  }
  0xe5   : > { %3364 = vmatprep.subr.bf16.mxu0 %v4760_v24  ;;  %v4825_v24 = vld [vmem:[%s6480_s1 + $0x130] ss:$8 sps:$4 sm:$0xff]  }
  0xe7   : > { %1675 = vmatpush1.bf16.msra.mxu1 %v4755_v25  ;;  %v4828_v25 = vld [vmem:[%s6480_s1 + $0xa30] ss:$8 sps:$4 sm:$0xff]  }
  0xe8   : > { %3365 = vmatpush1.bf16.msra.mxu0 %v4758_v27  ;;  %1676 = vmatprep.subr.bf16.mxu1 %v4763_v28  ;;  %v4833_v27 = vld [vmem:[%s6480_s1 + $0x144] ss:$8 sps:$4 sm:$0xff]  }
  0xe9   : > { %3366 = vmatprep.subr.bf16.mxu0 %v4766_v30  ;;  %v4836_v28 = vld [vmem:[%s6480_s1 + $0xa44] ss:$8 sps:$4 sm:$0xff]   ;;  %v4831_v30 = vld [vmem:[%s6480_s1 + $0x140] ss:$8 sps:$4 sm:$0xff]  }
  0xeb   : > { %1677 = vmatpush1.bf16.msra.mxu1 %v4761_v31  ;;  %v4834_v31 = vld [vmem:[%s6480_s1 + $0xa40] ss:$8 sps:$4 sm:$0xff]  }
  0xec   : > { %3367 = vmatpush1.bf16.msra.mxu0 %v4764_v32  ;;  %1678 = vmatprep.subr.bf16.mxu1 %v4769_v33  ;;  %v4839_v32 = vld [vmem:[%s6480_s1 + $0x154] ss:$8 sps:$4 sm:$0xff]   ;;  %v4837_v33 = vld [vmem:[%s6480_s1 + $0x150] ss:$8 sps:$4 sm:$0xff]  }
  0xed   : > { %3368 = vmatprep.subr.bf16.mxu0 %v4772_v34  ;;  %v4840_v34 = vld [vmem:[%s6480_s1 + $0xa50] ss:$8 sps:$4 sm:$0xff]  }
  0xef   : > { %1679 = vmatpush1.bf16.msra.mxu1 %v4767_v35  ;;  %v4845_v35 = vld [vmem:[%s6480_s1 + $0x164] ss:$8 sps:$4 sm:$0xff]  }
  0xf0   : > { %3369 = vmatpush1.bf16.msra.mxu0 %v4770_v37  ;;  %1680 = vmatprep.subr.bf16.mxu1 %v4775_v38  ;;  %v4848_v37 = vld [vmem:[%s6480_s1 + $0xa64] ss:$8 sps:$4 sm:$0xff]   ;;  %v4843_v38 = vld [vmem:[%s6480_s1 + $0x160] ss:$8 sps:$4 sm:$0xff]  }
  0xf1   : > { %3370 = vmatprep.subr.bf16.mxu0 %v4778_v39  ;;  %v4846_v39 = vld [vmem:[%s6480_s1 + $0xa60] ss:$8 sps:$4 sm:$0xff]  }
  0xf3   : > { %1681 = vmatpush1.bf16.msra.mxu1 %v4773_v40  ;;  %v4851_v40 = vld [vmem:[%s6480_s1 + $0x174] ss:$8 sps:$4 sm:$0xff]  }
  0xf4   : > { %3371 = vmatpush1.bf16.msra.mxu0 %v4776_v41  ;;  %1682 = vmatprep.subr.bf16.mxu1 %v4781_v42  ;;  %v4854_v41 = vld [vmem:[%s6480_s1 + $0xa74] ss:$8 sps:$4 sm:$0xff]   ;;  %v4849_v42 = vld [vmem:[%s6480_s1 + $0x170] ss:$8 sps:$4 sm:$0xff]  }
  0xf5   : > { %3372 = vmatprep.subr.bf16.mxu0 %v4784_v43  ;;  %v4852_v43 = vld [vmem:[%s6480_s1 + $0xa70] ss:$8 sps:$4 sm:$0xff]  }
  0xf7   : > { %1683 = vmatpush1.bf16.msra.mxu1 %v4779_v45  ;;  %v4857_v45 = vld [vmem:[%s6480_s1 + $0x184] ss:$8 sps:$4 sm:$0xff]  }
  0xf8   : > { %3373 = vmatpush1.bf16.msra.mxu0 %v4782_v46  ;;  %1684 = vmatprep.subr.bf16.mxu1 %v4787_v47  ;;  %v4860_v46 = vld [vmem:[%s6480_s1 + $0xa84] ss:$8 sps:$4 sm:$0xff]  }
  0xf9   : > { %3374 = vmatprep.subr.bf16.mxu0 %v4790_v48 }
  0xfb   : > { %1685 = vmatpush1.bf16.msra.mxu1 %v4785_v29 }
  0xfc   : > { %3375 = vmatpush1.bf16.msra.mxu0 %v4788_v49  ;;  %1686 = vmatprep.subr.bf16.mxu1 %v4793_v50  ;;  %v4855_v50 = vld [vmem:[%s6480_s1 + $0x180] ss:$8 sps:$4 sm:$0xff]  }
  0xfd   : > { %3376 = vmatprep.subr.bf16.mxu0 %v4796_v51  ;;  %v4858_v51 = vld [vmem:[%s6480_s1 + $0xa80] ss:$8 sps:$4 sm:$0xff]  }
  0xff   : > { %1687 = vmatpush1.bf16.msra.mxu1 %v4791_v52 }
 0x100   : > { %3377 = vmatpush1.bf16.msra.mxu0 %v4794_v44  ;;  %1688 = vmatprep.subr.bf16.mxu1 %v4799_v56  ;;  %v4866_v56 = vld [vmem:[%s6480_s1 + $0xa94] ss:$8 sps:$4 sm:$0xff]  }
 0x101   : > { %3378 = vmatprep.subr.bf16.mxu0 %v4802_v59 }
 0x103   : > { %1689 = vmatpush1.bf16.msra.mxu1 %v4797_v7  ;;  %v4864_v7 = vld [vmem:[%s6480_s1 + $0xa90] ss:$8 sps:$4 sm:$0xff]  }
 0x104   : > { %3379 = vmatpush1.bf16.msra.mxu0 %v4800_v54  ;;  %1709 = vmatprep.subr.bf16.mxu1 %v4805_v36  ;;  %v4869_v54 = vld [vmem:[%s6480_s1 + $0x1a4] ss:$8 sps:$4 sm:$0xff]   ;;  %v4867_v36 = vld [vmem:[%s6480_s1 + $0x1a0] ss:$8 sps:$4 sm:$0xff]  }
 0x105   : > { %3399 = vmatprep.subr.bf16.mxu0 %v4810_v62  ;;  %v4870_v62 = vld [vmem:[%s6480_s1 + $0xaa0] ss:$8 sps:$4 sm:$0xff]  }
 0x106   : > { %1691 = vmatmul.mubr.bf16.vlgmr.msra.gmra.mrb[0].mxu1 %v5232_v63  ;;  %v4821_v63 = vld [vmem:[%s6480_s1 + $0x124] ss:$8 sps:$4 sm:$0xff]  }
 0x107   : > { %3381 = vmatmul.mubr.bf16.vlgmr.msra.gmra.mrb[0].mxu0 %v2840_v11  ;;  %1710 = vmatpush1.bf16.msra.mxu1 %v4803_v4  ;;  %v4875_v4 = vld [vmem:[%s6480_s1 + $0x1b4] ss:$8 sps:$4 sm:$0xff]   ;;  %v4876_v11 = vld [vmem:[%s6480_s1 + $0xab0] ss:$8 sps:$4 sm:$0xff]  }
 0x108   : > { %3400 = vmatpush1.bf16.msra.mxu0 %v4808_v10  ;;  %1711 = vmatprep.subr.bf16.mxu1 %v4813_v0  ;;  %v4873_v10 = vld [vmem:[%s6480_s1 + $0x1b0] ss:$8 sps:$4 sm:$0xff]   ;;  %v4881_v0 = vld [vmem:[%s6480_s1 + $0x1c4] ss:$8 sps:$4 sm:$0xff]  }
 0x109   : > { %3401 = vmatprep.subr.bf16.mxu0 %v4816_v13  ;;  %1700 = vmatprep.mubr.bf16.mxu1 %v3827_v1  ;;  %v4884_v13 = vld [vmem:[%s6480_s1 + $0xac4] ss:$8 sps:$4 sm:$0xff]   ;;  %v4879_v1 = vld [vmem:[%s6480_s1 + $0x1c0] ss:$8 sps:$4 sm:$0xff]  }
 0x10a   : > { %3390 = vmatprep.mubr.bf16.mxu0 %v2842_v58  ;;  %v4830_v58 = vld [vmem:[%s6480_s1 + $0xa34] ss:$8 sps:$4 sm:$0xff]  }
 0x10b   : > { %1712 = vmatpush1.bf16.msra.mxu1 %v4811_v14  ;;  %v4887_v14 = vld [vmem:[%s6480_s1 + $0x1d4] ss:$8 sps:$4 sm:$0xff]  }
 0x10c   : > { %3402 = vmatpush1.bf16.msra.mxu0 %v4814_v15  ;;  %1713 = vmatprep.subr.bf16.mxu1 %v4821_v63  ;;  %v4890_v15 = vld [vmem:[%s6480_s1 + $0xad4] ss:$8 sps:$4 sm:$0xff]   ;;  %v4885_v63 = vld [vmem:[%s6480_s1 + $0x1d0] ss:$8 sps:$4 sm:$0xff]  }
 0x10d   : > { %3403 = vmatprep.subr.bf16.mxu0 %v4824_v16  ;;  %v4888_v16 = vld [vmem:[%s6480_s1 + $0xad0] ss:$8 sps:$4 sm:$0xff]  }
 0x10e   : > { %1701 = vmatmul.mubr.bf16.gmra.mrb[16].mxu1 %v3826_v17  ;;  %v4893_v17 = vld [vmem:[%s6480_s1 + $0x1e4] ss:$8 sps:$4 sm:$0xff]  }
 0x10f   : > { %3391 = vmatmul.mubr.bf16.gmra.mrb[16].mxu0 %v2839_v60  ;;  %1714 = vmatpush1.bf16.msra.mxu1 %v4819_v20  ;;  %v4861_v60 = vld [vmem:[%s6480_s1 + $0x190] ss:$8 sps:$4 sm:$0xff]   ;;  %v4891_v20 = vld [vmem:[%s6480_s1 + $0x1e0] ss:$8 sps:$4 sm:$0xff]  }
 0x110   : > { %3404 = vmatpush1.bf16.msra.mxu0 %v4822_v21  ;;  %1715 = vmatprep.subr.bf16.mxu1 %v4827_v57  ;;  %v4894_v21 = vld [vmem:[%s6480_s1 + $0xae0] ss:$8 sps:$4 sm:$0xff]   ;;  %v4230_v57 = vcombine.low %v6004_v12, %v6014_v53  ;;  %v4900_v12 = vld [vmem:[%s6480_s1 + $0xaf0] ss:$8 sps:$4 sm:$0xff]  }
 0x111   : > { %3405 = vmatprep.subr.bf16.mxu0 %v4830_v58  ;;  %1741 = vmatprep.mubr.bf16.mxu1 %v5396_v26  ;;  %v4842_v26 = vld [vmem:[%s6480_s1 + $0xa54] ss:$8 sps:$4 sm:$0xff]  }
 0x112   : > { %3431 = vmatprep.mubr.bf16.mxu0 %v2849_v23  ;;  %v4899_v58 = vld [vmem:[%s6480_s1 + $0x1f4] ss:$8 sps:$4 sm:$0xff]   ;;  %v2844_v53 = vrot.slane %v4230_v57, 3 }
 0x113   : > { %1716 = vmatpush1.bf16.msra.mxu1 %v4825_v24  ;;  %v4902_v23 = vld [vmem:[%s6480_s1 + $0xaf4] ss:$8 sps:$4 sm:$0xff]   ;;  %v4897_v24 = vld [vmem:[%s6480_s1 + $0x1f0] ss:$8 sps:$4 sm:$0xff]  }
 0x114   : > { %3406 = vmatpush1.bf16.msra.mxu0 %v4828_v25  ;;  %1717 = vmatprep.subr.bf16.mxu1 %v4833_v27  ;;  %v5012_v25 = vld [vmem:[%s5194_s30 + $0x38] ss:$24 sps:$4 sm:$0x1f]  }
 0x115   : > { %3407 = vmatprep.subr.bf16.mxu0 %v4836_v28  ;;  %v2845_v27 = vrot.slane %v5012_v25, 3  ;;  %v4907_v28 = vld [vmem:[%s6480_s1 + $0x204] ss:$8 sps:$4 sm:$0xff]   ;;  %v4961_v25 = vld [vmem:[%s6480_s1 + $0x290] ss:$8 sps:$4 sm:$0xff]  }
 0x117   : > { %1718 = vmatpush1.bf16.msra.mxu1 %v4831_v30  ;;  %v4910_v30 = vld [vmem:[%s6480_s1 + $0xb04] ss:$8 sps:$4 sm:$0xff]  }
 0x118   : > { %3408 = vmatpush1.bf16.msra.mxu0 %v4834_v31  ;;  %1719 = vmatprep.subr.bf16.mxu1 %v4839_v32  ;;  %v178_v31 = vld [vmem:[%s5194_s30 + $0x38] sm:$0x33]  ;;  %v4905_v32 = vld [vmem:[%s6480_s1 + $0x200] ss:$8 sps:$4 sm:$0xff]  }
 0x119   : > { %3409 = vmatprep.subr.bf16.mxu0 %v4842_v26  ;;  %v2846_v26 = vsel %vm2837_vm2, %v2844_v53, %v2845_v27 }
 0x11b   : > { %1720 = vmatpush1.bf16.msra.mxu1 %v4837_v33  ;;  %v4908_v33 = vld [vmem:[%s6480_s1 + $0xb00] ss:$8 sps:$4 sm:$0xff]  }
 0x11c   : > { %3410 = vmatpush1.bf16.msra.mxu0 %v4840_v34  ;;  %1721 = vmatprep.subr.bf16.mxu1 %v4845_v35  ;;  %v6228_v34 = vld [vmem:[%s5194_s30 + $0x10] sm:$0x88] }
 0x11d   : > { %3411 = vmatprep.subr.bf16.mxu0 %v4848_v37  ;;  %v4913_v35 = vld [vmem:[%s6480_s1 + $0x214] ss:$8 sps:$4 sm:$0xff]  }
 0x11e   : > { %v4916_v37 = vld [vmem:[%s6480_s1 + $0xb14] ss:$8 sps:$4 sm:$0xff]  }
 0x11f   : > { %1722 = vmatpush1.bf16.msra.mxu1 %v4843_v38  ;;  %v3829_v38 = vcombine.high %v178_v31, %v178_v31 }
 0x120   : > { %3412 = vmatpush1.bf16.msra.mxu0 %v4846_v39  ;;  %1723 = vmatprep.subr.bf16.mxu1 %v4851_v40  ;;  %v6238_v39 = vld [vmem:[%s5194_s30 + $0x28] sm:$0xff] }
 0x121   : > { %3413 = vmatprep.subr.bf16.mxu0 %v4854_v41  ;;  %v6112_v47 = vpop.f32.mrb[4].mxu1  ;;  %v4233_v40 = vcombine.high %v6228_v34, %v6238_v39  ;;  %v4911_v41 = vld [vmem:[%s6480_s1 + $0x210] ss:$8 sps:$4 sm:$0xff]  }
 0x122   : > { %v6114_v48 = vpop.f32.mrb[4].mxu0  ;;  %v6116_v29 = vpop.f32.mrb[5].mxu1 }
 0x123   : > { %v6118_v49 = vpop.f32.mrb[5].mxu0  ;;  %1724 = vmatpush1.bf16.msra.mxu1 %v4849_v42  ;;  %v1046_v52 = vpop.f32.mrb[6].mxu1  ;;  %v4914_v42 = vld [vmem:[%s6480_s1 + $0xb10] ss:$8 sps:$4 sm:$0xff]  }
 0x124   : > { %3414 = vmatpush1.bf16.msra.mxu0 %v4852_v43  ;;  %v2611_v44 = vpop.f32.mrb[6].mxu0  ;;  %1725 = vmatprep.subr.bf16.mxu1 %v4857_v45  ;;  %v1047_v59 = vpop.f32.mrb[7].mxu1  ;;  %v4924_v43 = vld [vmem:[%s6480_s1 + $0xb24] ss:$8 sps:$4 sm:$0xff]   ;;  %v3828_v45 = vcombine.low %v178_v31, %v178_v31  ;;  %v4919_v52 = vld [vmem:[%s6480_s1 + $0x220] ss:$8 sps:$4 sm:$0xff]  }
 0x125   : > { %3415 = vmatprep.subr.bf16.mxu0 %v4860_v46  ;;  %v2612_v55 = vpop.f32.mrb[7].mxu0  ;;  %v2853_v46 = vrot.slane %v4233_v40, 3  ;;  %v4922_v44 = vld [vmem:[%s6480_s1 + $0xb20] ss:$8 sps:$4 sm:$0xff]   ;;  %v4928_v59 = vld [vmem:[%s6480_s1 + $0xb30] ss:$8 sps:$4 sm:$0xff]  }
 0x126   : > { %v4933_v55 = vld [vmem:[%s6480_s1 + $0x244] ss:$8 sps:$4 sm:$0xff]   ;;  %v4967_v31 = vld [vmem:[%s6480_s1 + $0x2a0] ss:$8 sps:$4 sm:$0xff]  }
 0x127   : > { %1726 = vmatpush1.bf16.msra.mxu1 %v4855_v50  ;;  %v6257_v50 = vld [vmem:[%s5194_s30 + $0x44] ss:$24 sps:$4 sm:$0x1f]  }
 0x128   : > { %3416 = vmatpush1.bf16.msra.mxu0 %v4858_v51  ;;  %1727 = vmatprep.subr.bf16.mxu1 %v4863_v22  ;;  %v2854_v51 = vrot.slane %v6257_v50, 3  ;;  %v4984_v40 = vld [vmem:[%s6480_s1 + $0xbc4] ss:$8 sps:$4 sm:$0xff]  }
 0x129   : > { %3417 = vmatprep.subr.bf16.mxu0 %v4866_v56  ;;  %v4925_v56 = vld [vmem:[%s6480_s1 + $0x230] ss:$8 sps:$4 sm:$0xff]  }
 0x12a   : > { %v2855_v22 = vsel %vm2837_vm2, %v2853_v46, %v2854_v51  ;;  %v4988_v46 = vld [vmem:[%s6480_s1 + $0xbd0] ss:$8 sps:$4 sm:$0xff]  }
 0x12b   : > { %1728 = vmatpush1.bf16.msra.mxu1 %v4861_v60  ;;  %v4936_v60 = vld [vmem:[%s6480_s1 + $0xb44] ss:$8 sps:$4 sm:$0xff]  }
 0x12c   : > { %3418 = vmatpush1.bf16.msra.mxu0 %v4864_v7  ;;  %1729 = vmatprep.subr.bf16.mxu1 %v4869_v54  ;;  %v4931_v7 = vld [vmem:[%s6480_s1 + $0x240] ss:$8 sps:$4 sm:$0xff]  }
 0x12d   : > { %3419 = vmatprep.subr.bf16.mxu0 %v4872_v61  ;;  %v4934_v54 = vld [vmem:[%s6480_s1 + $0xb40] ss:$8 sps:$4 sm:$0xff]   ;;  %v4939_v61 = vld [vmem:[%s6480_s1 + $0x254] ss:$8 sps:$4 sm:$0xff]  }
 0x12f   : > { %1730 = vmatpush1.bf16.msra.mxu1 %v4867_v36  ;;  %v4937_v36 = vld [vmem:[%s6480_s1 + $0x250] ss:$8 sps:$4 sm:$0xff]  }
 0x130   : > { %3420 = vmatpush1.bf16.msra.mxu0 %v4870_v62  ;;  %1731 = vmatprep.subr.bf16.mxu1 %v4875_v4  ;;  %v4940_v62 = vld [vmem:[%s6480_s1 + $0xb50] ss:$8 sps:$4 sm:$0xff]   ;;  %v4945_v4 = vld [vmem:[%s6480_s1 + $0x264] ss:$8 sps:$4 sm:$0xff]  }
 0x131   : > { %3421 = vmatprep.subr.bf16.mxu0 %v4878_v9  ;;  %v4948_v9 = vld [vmem:[%s6480_s1 + $0xb64] ss:$8 sps:$4 sm:$0xff]  }
 0x133   : > { %1732 = vmatpush1.bf16.msra.mxu1 %v4873_v10  ;;  %v4943_v10 = vld [vmem:[%s6480_s1 + $0x260] ss:$8 sps:$4 sm:$0xff]  }
 0x134   : > { %3422 = vmatpush1.bf16.msra.mxu0 %v4876_v11  ;;  %1733 = vmatprep.subr.bf16.mxu1 %v4881_v0  ;;  %v4946_v11 = vld [vmem:[%s6480_s1 + $0xb60] ss:$8 sps:$4 sm:$0xff]   ;;  %v4951_v0 = vld [vmem:[%s6480_s1 + $0x274] ss:$8 sps:$4 sm:$0xff]  }
 0x135   : > { %3423 = vmatprep.subr.bf16.mxu0 %v4884_v13  ;;  %v4954_v13 = vld [vmem:[%s6480_s1 + $0xb74] ss:$8 sps:$4 sm:$0xff]  }
 0x137   : > { %1734 = vmatpush1.bf16.msra.mxu1 %v4879_v1  ;;  %v4949_v1 = vld [vmem:[%s6480_s1 + $0x270] ss:$8 sps:$4 sm:$0xff]  }
 0x138   : > { %3424 = vmatpush1.bf16.msra.mxu0 %v4882_v3  ;;  %1735 = vmatprep.subr.bf16.mxu1 %v4887_v14  ;;  %v4952_v3 = vld [vmem:[%s6480_s1 + $0xb70] ss:$8 sps:$4 sm:$0xff]   ;;  %v4957_v14 = vld [vmem:[%s6480_s1 + $0x284] ss:$8 sps:$4 sm:$0xff]  }
 0x139   : > { %3425 = vmatprep.subr.bf16.mxu0 %v4890_v15  ;;  %v4960_v15 = vld [vmem:[%s6480_s1 + $0xb84] ss:$8 sps:$4 sm:$0xff]  }
 0x13b   : > { %1736 = vmatpush1.bf16.msra.mxu1 %v4885_v63 }
 0x13c   : > { %3426 = vmatpush1.bf16.msra.mxu0 %v4888_v16  ;;  %1737 = vmatprep.subr.bf16.mxu1 %v4893_v17 }
 0x13d   : > { %3427 = vmatprep.subr.bf16.mxu0 %v4896_v18 }
 0x13f   : > { %1738 = vmatpush1.bf16.msra.mxu1 %v4891_v20 }
 0x140   : > { %3428 = vmatpush1.bf16.msra.mxu0 %v4894_v21  ;;  %1739 = vmatprep.subr.bf16.mxu1 %v4899_v58 }
 0x141   : > { %3429 = vmatprep.subr.bf16.mxu0 %v4902_v23  ;;  %v4955_v23 = vld [vmem:[%s6480_s1 + $0x280] ss:$8 sps:$4 sm:$0xff]  }
 0x143   : > { %1740 = vmatpush1.bf16.msra.mxu1 %v4897_v24 }
 0x144   : > { %3430 = vmatpush1.bf16.msra.mxu0 %v4900_v12  ;;  %1760 = vmatprep.subr.bf16.mxu1 %v4907_v28  ;;  %v4969_v28 = vld [vmem:[%s6480_s1 + $0x2a4] ss:$8 sps:$4 sm:$0xff]  }
 0x145   : > { %3450 = vmatprep.subr.bf16.mxu0 %v4910_v30  ;;  %v4972_v30 = vld [vmem:[%s6480_s1 + $0xba4] ss:$8 sps:$4 sm:$0xff]  }
 0x146   : > { %1742 = vmatmul.mubr.bf16.vlgmr.msra.gmra.mrb[0].mxu1 %v5478_v6  ;;  %v4921_v6 = vld [vmem:[%s6480_s1 + $0x224] ss:$8 sps:$4 sm:$0xff]  }
 0x147   : > { %3432 = vmatmul.mubr.bf16.vlgmr.msra.gmra.mrb[0].mxu0 %v2846_v26  ;;  %1761 = vmatpush1.bf16.msra.mxu1 %v4905_v32  ;;  %v4970_v32 = vld [vmem:[%s6480_s1 + $0xba0] ss:$8 sps:$4 sm:$0xff]   ;;  %v4975_v26 = vld [vmem:[%s6480_s1 + $0x2b4] ss:$8 sps:$4 sm:$0xff]  }
 0x148   : > { %3451 = vmatpush1.bf16.msra.mxu0 %v4908_v33  ;;  %1762 = vmatprep.subr.bf16.mxu1 %v4913_v35  ;;  %v4978_v33 = vld [vmem:[%s6480_s1 + $0xbb4] ss:$8 sps:$4 sm:$0xff]   ;;  %v4973_v35 = vld [vmem:[%s6480_s1 + $0x2b0] ss:$8 sps:$4 sm:$0xff]  }
 0x149   : > { %3452 = vmatprep.subr.bf16.mxu0 %v4916_v37  ;;  %1751 = vmatprep.mubr.bf16.mxu1 %v3829_v38  ;;  %v4976_v37 = vld [vmem:[%s6480_s1 + $0xbb0] ss:$8 sps:$4 sm:$0xff]   ;;  %v4981_v38 = vld [vmem:[%s6480_s1 + $0x2c4] ss:$8 sps:$4 sm:$0xff]  }
 0x14a   : > { %3441 = vmatprep.mubr.bf16.mxu0 %v2848_v2  ;;  %v4930_v2 = vld [vmem:[%s6480_s1 + $0xb34] ss:$8 sps:$4 sm:$0xff]  }
 0x14b   : > { %1763 = vmatpush1.bf16.msra.mxu1 %v4911_v41  ;;  %v4979_v41 = vld [vmem:[%s6480_s1 + $0x2c0] ss:$8 sps:$4 sm:$0xff]  }
 0x14c   : > { %3453 = vmatpush1.bf16.msra.mxu0 %v4914_v42  ;;  %1764 = vmatprep.subr.bf16.mxu1 %v4921_v6  ;;  %v4982_v42 = vld [vmem:[%s6480_s1 + $0xbc0] ss:$8 sps:$4 sm:$0xff]   ;;  %v4987_v6 = vld [vmem:[%s6480_s1 + $0x2d4] ss:$8 sps:$4 sm:$0xff]  }
 0x14d   : > { %3454 = vmatprep.subr.bf16.mxu0 %v4924_v43  ;;  %v4990_v43 = vld [vmem:[%s6480_s1 + $0xbd4] ss:$8 sps:$4 sm:$0xff]  }
 0x14e   : > { %1752 = vmatmul.mubr.bf16.gmra.mrb[20].mxu1 %v3828_v45  ;;  %v4985_v45 = vld [vmem:[%s6480_s1 + $0x2d0] ss:$8 sps:$4 sm:$0xff]  }
 0x14f   : > { %3442 = vmatmul.mubr.bf16.gmra.mrb[20].mxu0 %v2845_v27  ;;  %1765 = vmatpush1.bf16.msra.mxu1 %v4919_v52  ;;  %v4964_v27 = vld [vmem:[%s6480_s1 + $0xb90] ss:$8 sps:$4 sm:$0xff]   ;;  %v4993_v52 = vld [vmem:[%s6480_s1 + $0x2e4] ss:$8 sps:$4 sm:$0xff]  }
 0x150   : > { %3455 = vmatpush1.bf16.msra.mxu0 %v4922_v44  ;;  %1766 = vmatprep.subr.bf16.mxu1 %v4927_v19  ;;  %v4996_v44 = vld [vmem:[%s6480_s1 + $0xbe4] ss:$8 sps:$4 sm:$0xff]   ;;  %v4991_v19 = vld [vmem:[%s6480_s1 + $0x2e0] ss:$8 sps:$4 sm:$0xff]  }
 0x151   : > { %3456 = vmatprep.subr.bf16.mxu0 %v4930_v2  ;;  %1792 = vmatprep.mubr.bf16.mxu1 %v5600_v5  ;;  %v4942_v5 = vld [vmem:[%s6480_s1 + $0xb54] ss:$8 sps:$4 sm:$0xff]   ;;  %v4994_v2 = vld [vmem:[%s6480_s1 + $0xbe0] ss:$8 sps:$4 sm:$0xff]  }
 0x152   : > { %3482 = vmatprep.mubr.bf16.mxu0 %v2855_v22  ;;  %v4232_v22 = vcombine.low %v6228_v34, %v6238_v39  ;;  %v5000_v34 = vld [vmem:[%s6480_s1 + $0xbf0] ss:$8 sps:$4 sm:$0xff]  }
 0x153   : > { %1767 = vmatpush1.bf16.msra.mxu1 %v4925_v56  ;;  %v4999_v56 = vld [vmem:[%s6480_s1 + $0x2f4] ss:$8 sps:$4 sm:$0xff]  }
 0x154   : > { %3457 = vmatpush1.bf16.msra.mxu0 %v4928_v59  ;;  %1768 = vmatprep.subr.bf16.mxu1 %v4933_v55  ;;  %v5002_v59 = vld [vmem:[%s6480_s1 + $0xbf4] ss:$8 sps:$4 sm:$0xff]   ;;  %v4997_v55 = vld [vmem:[%s6480_s1 + $0x2f0] ss:$8 sps:$4 sm:$0xff]   ;;  %v2850_v39 = vrot.slane %v4232_v22, 3 }
 0x155   : > { %3458 = vmatprep.subr.bf16.mxu0 %v4936_v60  ;;  %v5015_v60 = vld [vmem:[%s5194_s30 + $0x40] ss:$24 sps:$4 sm:$0x1f]  }
 0x157   : > { %1769 = vmatpush1.bf16.msra.mxu1 %v4931_v7  ;;  %v2851_v7 = vrot.slane %v5015_v60, 3 }
 0x158   : > { %3459 = vmatpush1.bf16.msra.mxu0 %v4934_v54  ;;  %1770 = vmatprep.subr.bf16.mxu1 %v4939_v61  ;;  %v179_v54 = vld [vmem:[%s5194_s30 + $0x40] sm:$0x33] }
 0x159   : > { %3460 = vmatprep.subr.bf16.mxu0 %v4942_v5  ;;  %v2852_v61 = vsel %vm2837_vm2, %v2850_v39, %v2851_v7  ;;  %v3831_v5 = vcombine.high %v179_v54, %v179_v54 }
 0x15b   : > { %1771 = vmatpush1.bf16.msra.mxu1 %v4937_v36  ;;  %v3830_v36 = vcombine.low %v179_v54, %v179_v54 }
 0x15c   : > { %3461 = vmatpush1.bf16.msra.mxu0 %v4940_v62  ;;  %1772 = vmatprep.subr.bf16.mxu1 %v4945_v4 }
 0x15d   : > { %3462 = vmatprep.subr.bf16.mxu0 %v4948_v9 }
 0x15f   : > { %1773 = vmatpush1.bf16.msra.mxu1 %v4943_v10 }
 0x160   : > { %3463 = vmatpush1.bf16.msra.mxu0 %v4946_v11  ;;  %1774 = vmatprep.subr.bf16.mxu1 %v4951_v0 }
 0x161   : > { %3464 = vmatprep.subr.bf16.mxu0 %v4954_v13  ;;  %v1093_v63 = vpop.f32.mrb[8].mxu1 }
 0x162   : > { %v2658_v16 = vpop.f32.mrb[8].mxu0  ;;  %v6337_v17 = vadd.f32 %v1093_v63, %v6112_v47  ;;  %v1095_v20 = vpop.f32.mrb[9].mxu1  ;;  %v4958_v47 = vld [vmem:[%s6480_s1 + $0xb80] ss:$8 sps:$4 sm:$0xff]  }
 0x163   : > { %v6340_v18 = vadd.f32 %v2658_v16, %v6114_v48  ;;  %v2660_v21 = vpop.f32.mrb[9].mxu0  ;;  %v6343_v57 = vadd.f32 %v1095_v20, %v6116_v29  ;;  %1775 = vmatpush1.bf16.msra.mxu1 %v4949_v1  ;;  %v1097_v48 = vpop.f32.mrb[10].mxu1  ;;  %v4963_v29 = vld [vmem:[%s6480_s1 + $0x294] ss:$8 sps:$4 sm:$0xff]  }
 0x164   : > { %v6346_v58 = vadd.f32 %v2660_v21, %v6118_v49  ;;  %3465 = vmatpush1.bf16.msra.mxu0 %v4952_v3  ;;  %v2662_v24 = vpop.f32.mrb[10].mxu0  ;;  %1776 = vmatprep.subr.bf16.mxu1 %v4957_v14  ;;  %v4966_v49 = vld [vmem:[%s6480_s1 + $0xb94] ss:$8 sps:$4 sm:$0xff]   ;;  %v1098_v12 = vpop.f32.mrb[11].mxu1 }
 0x165   : > { %3466 = vmatprep.subr.bf16.mxu0 %v4960_v15  ;;  %v2663_v53 = vpop.f32.mrb[11].mxu0 }
 0x167   : > { %1777 = vmatpush1.bf16.msra.mxu1 %v4955_v23 }
 0x168   : > { %3467 = vmatpush1.bf16.msra.mxu0 %v4958_v47  ;;  %1778 = vmatprep.subr.bf16.mxu1 %v4963_v29 }
 0x169   : > { %3468 = vmatprep.subr.bf16.mxu0 %v4966_v49 }
 0x16b   : > { %1779 = vmatpush1.bf16.msra.mxu1 %v4961_v25 }
 0x16c   : > { %3469 = vmatpush1.bf16.msra.mxu0 %v4964_v27  ;;  %1780 = vmatprep.subr.bf16.mxu1 %v4969_v28 }
 0x16d   : > { %3470 = vmatprep.subr.bf16.mxu0 %v4972_v30 }
 0x16f   : > { %1781 = vmatpush1.bf16.msra.mxu1 %v4967_v31  ;;  %v3509_v31 = vlaneseq }
 0x170   : > { %3471 = vmatpush1.bf16.msra.mxu0 %v4970_v32  ;;  %1782 = vmatprep.subr.bf16.mxu1 %v4975_v26 }
 0x171   : > { %3472 = vmatprep.subr.bf16.mxu0 %v4978_v33  ;;  %v3510_v32 = vshrl.u32 %v3509_v31, 7  ;;  %v3507_v33 = vld [vmem:[%s6481_s2] sm:$0x3] }
 0x173   : > { %1783 = vmatpush1.bf16.msra.mxu1 %v4973_v35  ;;  %v3511_v26 = vsub.s32 0, %v3510_v32  ;;  %v3515_v35 = vsub.s32 1, %v3510_v32 }
 0x174   : > { %3473 = vmatpush1.bf16.msra.mxu0 %v4976_v37  ;;  %1784 = vmatprep.subr.bf16.mxu1 %v4981_v38 }
 0x175   : > { %3474 = vmatprep.subr.bf16.mxu0 %v4984_v40  ;;  %v3512_v37 = vrot.slane %v3507_v33, %v3511_v26 }
 0x177   : > { %1785 = vmatpush1.bf16.msra.mxu1 %v4979_v41  ;;  %v3516_v41 = vrot.slane %v3507_v33, %v3515_v35 }
 0x178   : > { %3475 = vmatpush1.bf16.msra.mxu0 %v4982_v42  ;;  %1786 = vmatprep.subr.bf16.mxu1 %v4987_v6 }
 0x179   : > { %3476 = vmatprep.subr.bf16.mxu0 %v4990_v43 }
 0x17b   : > { %1787 = vmatpush1.bf16.msra.mxu1 %v4985_v45 }
 0x17c   : > { %3477 = vmatpush1.bf16.msra.mxu0 %v4988_v46  ;;  %1788 = vmatprep.subr.bf16.mxu1 %v4993_v52 }
 0x17d   : > { %3478 = vmatprep.subr.bf16.mxu0 %v4996_v44 }
 0x17f   : > { %1789 = vmatpush1.bf16.msra.mxu1 %v4991_v19 }
 0x180   : > { %3479 = vmatpush1.bf16.msra.mxu0 %v4994_v2  ;;  %1790 = vmatprep.subr.bf16.mxu1 %v4999_v56 }
 0x181   : > { %3480 = vmatprep.subr.bf16.mxu0 %v5002_v59 }
 0x183   : > { %1791 = vmatpush1.bf16.msra.mxu1 %v4997_v55 }
 0x184   : > { %3481 = vmatpush1.bf16.msra.mxu0 %v5000_v34 }
 0x186   : > { %1793 = vmatmul.mubr.bf16.vlgmr.msra.gmra.mrb[0].mxu1 %v5724_v8 }
 0x187   : > { %3483 = vmatmul.mubr.bf16.vlgmr.msra.gmra.mrb[0].mxu0 %v2852_v61  ;;  %1802 = vmatprep.mubr.bf16.mxu1 %v3831_v5 }
 0x188   : > { %3492 = vmatprep.mubr.bf16.mxu0 %v2854_v51 }
 0x18e   : > { %1803 = vmatmul.mubr.bf16.gmra.mrb[24].mxu1 %v3830_v36 }
 0x18f   : > { %3493 = vmatmul.mubr.bf16.gmra.mrb[24].mxu0 %v2851_v7 }
 0x1a1   : > { %v1144_v62 = vpop.f32.mrb[12].mxu1 }
 0x1a2   : > { %v2709_v4 = vpop.f32.mrb[12].mxu0  ;;  %v1145_v9 = vadd.f32 %v1144_v62, %v6337_v17  ;;  %v1146_v11 = vpop.f32.mrb[13].mxu1 }
 0x1a3   : > { %v6448_v10 = vadd.f32 %v2709_v4, %v6340_v18  ;;  %v2711_v0 = vpop.f32.mrb[13].mxu0  ;;  %v1147_v13 = vadd.f32 %v1146_v11, %v6343_v57  ;;  %v1148_v1 = vpop.f32.mrb[14].mxu1 }
 0x1a4   : > { %v6452_v8 = vadd.f32 %v2711_v0, %v6346_v58  ;;  %v2713_v50 = vpop.f32.mrb[14].mxu0  ;;  %v1149_v51 = vpop.f32.mrb[15].mxu1 }
 0x1a5   : > { %v2714_v3 = vpop.f32.mrb[15].mxu0 }
 0x1e1   : > { %v1702_v14 = vpop.f32.mrb[16].mxu1 }
 0x1e2   : > { %v3392_v15 = vpop.f32.mrb[16].mxu0  ;;  %v1703_v63 = vadd.f32 %v1702_v14, %v1145_v9  ;;  %v1704_v16 = vpop.f32.mrb[17].mxu1 }
 0x1e3   : > { %v3394_v20 = vpop.f32.mrb[17].mxu0  ;;  %v1705_v17 = vadd.f32 %v1704_v16, %v1147_v13  ;;  %v1706_v21 = vpop.f32.mrb[18].mxu1 }
 0x1e4   : > { %v3396_v18 = vpop.f32.mrb[18].mxu0  ;;  %v1707_v23 = vpop.f32.mrb[19].mxu1 }
 0x1e5   : > { %v3397_v47 = vpop.f32.mrb[19].mxu0 }
 0x221   : > { %v1753_v48 = vpop.f32.mrb[20].mxu1 }
 0x222   : > { %v3443_v24 = vpop.f32.mrb[20].mxu0  ;;  %v1754_v57 = vadd.f32 %v1753_v48, %v1703_v63  ;;  %v1755_v58 = vpop.f32.mrb[21].mxu1 }
 0x223   : > { %v3444_v29 = vadd.f32 %v3443_v24, %v3392_v15  ;;  %v3445_v49 = vpop.f32.mrb[21].mxu0  ;;  %v1756_v12 = vadd.f32 %v1755_v58, %v1705_v17  ;;  %v1757_v25 = vpop.f32.mrb[22].mxu1 }
 0x224   : > { %v3446_v53 = vadd.f32 %v3445_v49, %v3394_v20  ;;  %v3447_v27 = vpop.f32.mrb[22].mxu0  ;;  %v1758_v28 = vpop.f32.mrb[23].mxu1 }
 0x225   : > { %v3448_v30 = vpop.f32.mrb[23].mxu0 }
 0x259   : > { %v1794_v38 = vpop.f32.mrb[0].mxu1 }
 0x25a   : > { %v3484_v40 = vpop.f32.mrb[0].mxu0  ;;  %v1796_v6 = vpop.f32.mrb[1].mxu1 }
 0x25b   : > { %v4338_v42 = vadd.f32 %v3484_v40, %v1794_v38  ;;  %v3486_v43 = vpop.f32.mrb[1].mxu0  ;;  %v1798_v46 = vpop.f32.mrb[2].mxu1 }
 0x25c   : > { %v4339_v45 = vadd.f32 %v3486_v43, %v1796_v6  ;;  %v3488_v52 = vpop.f32.mrb[2].mxu0  ;;  %v1800_v2 = vpop.f32.mrb[3].mxu1 }
 0x25d   : > { %v3519_v44 = vadd.f32 %v4338_v42, %v3512_v37  ;;  %v4340_v19 = vadd.f32 %v3488_v52, %v1798_v46  ;;  %v3490_v22 = vpop.f32.mrb[3].mxu0 }
 0x25e   : > { %v3520_v56 = vadd.f32 %v4339_v45, %v3516_v41  ;;  %v4341_v59 = vadd.f32 %v3490_v22, %v1800_v2 }
 0x25f   : > { %v3525_v55 = vmax.f32 %v3519_v44, 0.0  ;;  %v3521_v34 = vadd.f32 %v4340_v19, %v3512_v37 }
 0x260   : > { %v3526_v39 = vmax.f32 %v3520_v56, 0.0  ;;  %v3522_v60 = vadd.f32 %v4341_v59, %v3516_v41 }
 0x261   : > { %v3527_v54 = vmax.f32 %v3521_v34, 0.0  ;;  %v1804_v36 = vpop.f32.mrb[24].mxu1 }
 0x262   : > { %v4335_v61 = vpack.c.bf16 %v3526_v39, %v3525_v55  ;;  %v3528_v5 = vmax.f32 %v3522_v60, 0.0  ;;  %v3494_v62 = vpop.f32.mrb[24].mxu0  ;;  %v1805_v4 = vadd.f32 %v1804_v36, %v1754_v57  ;;  %v1806_v11 = vpop.f32.mrb[25].mxu1 }
 0x263   : > { %v3495_v9 = vadd.f32 %v3494_v62, %v3444_v29  ;;  %v3496_v0 = vpop.f32.mrb[25].mxu0  ;;  %v1807_v1 = vadd.f32 %v1806_v11, %v1756_v12  ;;  %v1808_v51 = vpop.f32.mrb[26].mxu1 }
 0x264   : > { %3554 = vst.msk [vmem:[%s6461_s18] sm:$0xff] %vm6463_vm5, %v4335_v61  ;;  %v4336_v13 = vpack.c.bf16 %v3528_v5, %v3527_v54  ;;  %v3497_v50 = vadd.f32 %v3496_v0, %v3446_v53  ;;  %v3498_v3 = vpop.f32.mrb[26].mxu0  ;;  %v2720_v14 = vadd.f32 %v6448_v10, %v1805_v4  ;;  %v1809_v15 = vpop.f32.mrb[27].mxu1 }
 0x265   : > { %v3499_v63 = vpop.f32.mrb[27].mxu0  ;;  %v2721_v16 = vadd.f32 %v6452_v8, %v1807_v1 }
 0x266   : > { %3555 = vst.msk [vmem:[%s6461_s18 + $0x8] sm:$0xff] %vm6463_vm5, %v4336_v13  ;;  %v3505_v20 = vadd.f32 %v3495_v9, %v2720_v14 }
 0x267   : > { %v3506_v17 = vadd.f32 %v3497_v50, %v2721_v16 }
 0x268   : > { %v3523_v21 = vadd.f32 %v3512_v37, %v3505_v20 }
 0x269   : > { %v3524_v18 = vadd.f32 %v3516_v41, %v3506_v17 }
 0x26a   : > { %v3529_v23 = vmax.f32 %v3523_v21, 0.0 }
 0x26b   : > { %v3530_v47 = vmax.f32 %v3524_v18, 0.0 }
 0x26d   : > { %v4337_v48 = vpack.c.bf16 %v3530_v47, %v3529_v23 }
 0x26f   : > { %3559 = vst.msk [vmem:[%s6461_s18 + $0x10] sm:$0x33] %vm3558_vm8, %v4337_v48 }
 0x270 PF: > { %s13_s12 = sadd.s32 1, %s5022_s12  }
 0x271   : > { %p10_p4 = scmp.ge.s32.totalorder %s13_s12, 4  }
 0x273   :  { %12 = sbr.rel (!%p10_p4) target bundleno = 1 (0x1), region = 65 }

</bundles_post_ra>
